<compile_context>
chip_gen: v6e
topology: v6e:2x2x1
jax: 0.10.0
libtpu: 0.0.40
codegen_flags: <defaults>
</compile_context>

<pallas_src>
import functools

import jax
import jax.numpy as jnp
from jax.experimental import pallas as pl
from jax.experimental.pallas import tpu as pltpu

F32 = jnp.float32
BF16 = jnp.bfloat16
BN_EPS = 1e-5
LAYER_CFG = [(64, 3, 1), (128, 4, 2), (256, 6, 2), (512, 3, 2)]  # resnet34 layers 1..4


def _round_up(x, m):
    return ((x + m - 1) // m) * m


# --------------------------- Pallas kernels ---------------------------------

def _bn_epilogue(acc, g, bt, r, relu, inv_m):
    """BatchNorm (train-mode batch stats) + optional residual + optional ReLU."""
    mean = jnp.sum(acc, axis=0, keepdims=True) * inv_m
    var = jnp.maximum(jnp.sum(acc * acc, axis=0, keepdims=True) * inv_m - mean * mean, 0.0)
    scale = g * jax.lax.rsqrt(var + BN_EPS)
    bias = bt - mean * scale
    y = acc * scale + bias
    if r is not None:
        y = y + r
    if relu:
        y = jnp.maximum(y, 0.0)
    return y


def _conv_bn_kernel(a_ref, b_ref, g_ref, bt_ref, o_ref, acc_ref, *, relu, inv_m):
    k = pl.program_id(1)

    @pl.when(k == 0)
    def _():
        acc_ref[...] = jnp.zeros_like(acc_ref)

    acc_ref[...] += jnp.dot(a_ref[...], b_ref[...], preferred_element_type=jnp.float32)

    @pl.when(k == pl.num_programs(1) - 1)
    def _():
        o_ref[...] = _bn_epilogue(acc_ref[...], g_ref[...], bt_ref[...], None, relu, inv_m)


def _conv_bn_res_kernel(a_ref, b_ref, g_ref, bt_ref, r_ref, o_ref, acc_ref, *, relu, inv_m):
    k = pl.program_id(1)

    @pl.when(k == 0)
    def _():
        acc_ref[...] = jnp.zeros_like(acc_ref)

    acc_ref[...] += jnp.dot(a_ref[...], b_ref[...], preferred_element_type=jnp.float32)

    @pl.when(k == pl.num_programs(1) - 1)
    def _():
        o_ref[...] = _bn_epilogue(acc_ref[...], g_ref[...], bt_ref[...], r_ref[...],
                                  relu, inv_m)


def _max_reduce_kernel(x_ref, o_ref, *, kk):
    m = x_ref[0]
    for t in range(1, kk):
        m = jnp.maximum(m, x_ref[t])
    o_ref[...] = m


def _head_kernel(f_ref, w_ref, b_ref, o_ref):
    # F.relu -> AdaptiveAvgPool2d((1,1)) -> flatten -> BN1d(batch stats) -> fused Linear
    f = jnp.maximum(f_ref[...], 0.0)                   # (N, H*W, C)
    pooled = jnp.mean(f, axis=1)                       # (N, C)
    mean = jnp.mean(pooled, axis=0, keepdims=True)     # BN1d batch stats (train mode)
    var = jnp.mean(jnp.square(pooled - mean), axis=0, keepdims=True)
    xhat = (pooled - mean) * jax.lax.rsqrt(var + BN_EPS)
    o_ref[...] = jnp.dot(xhat, w_ref[...], preferred_element_type=jnp.float32) + b_ref[...]


# --------------------------- layer wrappers -----------------------------------

def _im2col(x, kh, kw, stride, pad, pad_value=0.0):
    """x: NHWC -> (N*OH*OW, kh*kw*C), plus (OH, OW). Pure data movement (glue)."""
    # TODO(synk): implicit im2col inside the matmul K-reduction (no HBM patch tensor)
    # needs element-offset BlockSpecs for strided windows; kept as XLA glue here.
    N, H, W, C = x.shape
    OH = (H + 2 * pad - kh) // stride + 1
    OW = (W + 2 * pad - kw) // stride + 1
    xp = jnp.pad(x, ((0, 0), (pad, pad), (pad, pad), (0, 0)),
                 constant_values=pad_value)
    cols = []
    for i in range(kh):
        for j in range(kw):
            cols.append(xp[:, i:i + stride * (OH - 1) + 1:stride,
                            j:j + stride * (OW - 1) + 1:stride, :])
    patches = jnp.stack(cols, axis=3)                  # (N, OH, OW, kh*kw, C)
    return patches.reshape(N * OH * OW, kh * kw * C), OH, OW


def conv_bn(x, w, gamma, beta, stride, pad, residual=None, relu=True):
    """Fused conv (bf16 MXU) + BatchNorm2d (training stats) + residual + ReLU.

    x: NHWC f32, w: (KH, KW, IC, OC) f32.  Returns NHWC f32.
    """
    N, H, W, C = x.shape
    kh, kw, ic, oc = w.shape

    patches, OH, OW = _im2col(x.astype(BF16), kh, kw, stride, pad)
    M, K = patches.shape                               # M = N*OH*OW, K = kh*kw*ic

    # Tile selection: single M tile (M is small here), TN<=256 (fills the 256-wide
    # MXU on v6e/v7x; harmless on v5e), TK<=768 chosen to minimize K padding.
    # TODO(synk): for very large M this needs M tiling + a two-stage BN-stat reduce.
    Mp = _round_up(M, 16)
    Np = _round_up(oc, 128)
    TN = min(Np, 256)
    Kp0 = _round_up(K, 128)
    nk = -(-Kp0 // 768)
    TK = _round_up(-(-Kp0 // nk), 128)
    Kp = TK * nk

    a = jnp.pad(patches, ((0, Mp - M), (0, Kp - K)))                       # bf16
    b = jnp.pad(w.reshape(kh * kw * ic, oc).astype(BF16),
                ((0, Kp - K), (0, Np - oc)))                               # bf16
    g = jnp.pad(gamma.reshape(1, oc).astype(F32), ((0, 0), (0, Np - oc)))
    bt = jnp.pad(beta.reshape(1, oc).astype(F32), ((0, 0), (0, Np - oc)))

    grid = (Np // TN, nk)
    a_spec = pl.BlockSpec((Mp, TK), lambda j, k: (0, k))
    b_spec = pl.BlockSpec((TK, TN), lambda j, k: (k, j))
    vec_spec = pl.BlockSpec((1, TN), lambda j, k: (0, j))
    o_spec = pl.BlockSpec((Mp, TN), lambda j, k: (0, j))
    scratch = [pltpu.VMEM((Mp, TN), jnp.float32)]
    cparams = pltpu.CompilerParams(dimension_semantics=("parallel", "arbitrary"))

    if residual is None:
        out = pl.pallas_call(
            functools.partial(_conv_bn_kernel, relu=relu, inv_m=1.0 / M),
            out_shape=jax.ShapeDtypeStruct((Mp, Np), F32),
            grid=grid,
            in_specs=[a_spec, b_spec, vec_spec, vec_spec],
            out_specs=o_spec,
            scratch_shapes=scratch,
            compiler_params=cparams,
        )(a, b, g, bt)
    else:
        r = jnp.pad(residual.reshape(M, oc).astype(F32),
                    ((0, Mp - M), (0, Np - oc)))
        out = pl.pallas_call(
            functools.partial(_conv_bn_res_kernel, relu=relu, inv_m=1.0 / M),
            out_shape=jax.ShapeDtypeStruct((Mp, Np), F32),
            grid=grid,
            in_specs=[a_spec, b_spec, vec_spec, vec_spec, o_spec],
            out_specs=o_spec,
            scratch_shapes=scratch,
            compiler_params=cparams,
        )(a, b, g, bt, r)

    return out[:M, :oc].reshape(N, OH, OW, oc)


def pallas_max_reduce(stacked):
    """max over axis 0 of (KK, M, C)."""
    KK, M, C = stacked.shape
    Cp = _round_up(C, 128)
    Mp = _round_up(M, 8)
    if KK * Mp * Cp * 4 <= (6 << 20):      # whole-array block (fewer grid steps)
        TM, TC = Mp, Cp
    else:
        TM, TC = 512, min(Cp, 256)
        Mp = _round_up(Mp, TM)
        Cp = _round_up(Cp, TC)
    sp = jnp.pad(stacked, ((0, 0), (0, Mp - M), (0, Cp - C)))
    out = pl.pallas_call(
        functools.partial(_max_reduce_kernel, kk=KK),
        out_shape=jax.ShapeDtypeStruct((Mp, Cp), F32),
        grid=(Mp // TM, Cp // TC),
        in_specs=[pl.BlockSpec((KK, TM, TC), lambda i, j: (0, i, j))],
        out_specs=pl.BlockSpec((TM, TC), lambda i, j: (i, j)),
        compiler_params=pltpu.CompilerParams(
            dimension_semantics=("parallel", "parallel")),
    )(sp)
    return out[:M, :C]


def maxpool2d(x, k=3, stride=2, pad=1):
    N, H, W, C = x.shape
    OH = (H + 2 * pad - k) // stride + 1
    OW = (W + 2 * pad - k) // stride + 1
    xp = jnp.pad(x, ((0, 0), (pad, pad), (pad, pad), (0, 0)),
                 constant_values=-jnp.inf)
    cols = []
    for i in range(k):
        for j in range(k):
            cols.append(xp[:, i:i + stride * (OH - 1) + 1:stride,
                            j:j + stride * (OW - 1) + 1:stride, :])
    # TODO(synk): maxpool still materializes the (k*k, M, C) stack in HBM (tiny here).
    stacked = jnp.stack(cols, axis=0).reshape(k * k, N * OH * OW, C)
    out = pallas_max_reduce(stacked)
    return out.reshape(N, OH, OW, C)


def basic_block(x, blk, stride):
    out = conv_bn(x, blk['conv1'], blk['bn1_g'], blk['bn1_b'], stride, 1, relu=True)
    if 'ds_conv' in blk:
        identity = conv_bn(x, blk['ds_conv'], blk['ds_g'], blk['ds_b'],
                           stride, 0, relu=False)
    else:
        identity = x
    return conv_bn(out, blk['conv2'], blk['bn2_g'], blk['bn2_b'], 1, 1,
                   residual=identity, relu=True)


def heads(feat, hp):
    """Fused: relu + global avg pool + flatten + (BN1d+Linear) classifier & bb heads.

    BN gamma/beta are folded into the linear weights (param-only prep), so the
    kernel does one (C,6) matmul and one lane-contiguous store.
    """
    N, H, W, C = feat.shape
    f3 = feat.reshape(N, H * W, C)
    w_cat = jnp.concatenate([hp['bn_c_g'][:, None] * hp['w_c'],
                             hp['bn_b_g'][:, None] * hp['w_b']], axis=1)        # (C, 6)
    b_cat = jnp.concatenate([hp['bn_c_b'] @ hp['w_c'] + hp['b_c'],
                             hp['bn_b_b'] @ hp['w_b'] + hp['b_b']])[None, :]    # (1, 6)
    out = pl.pallas_call(
        _head_kernel,
        out_shape=jax.ShapeDtypeStruct((N, 6), F32),
        grid=(1,),
        in_specs=[pl.BlockSpec((N, H * W, C), lambda i: (0, 0, 0)),
                  pl.BlockSpec((C, 6), lambda i: (0, 0)),
                  pl.BlockSpec((1, 6), lambda i: (0, 0))],
        out_specs=pl.BlockSpec((N, 6), lambda i: (0, 0)),
    )(f3, w_cat, b_cat)
    return out[:, :2], out[:, 2:6]


# --------------------------- model -------------------------------------------

def init_params(key):
    keys = iter(jax.random.split(key, 128))

    def conv_w(kh, kw, ic, oc):
        std = (2.0 / (kh * kw * ic)) ** 0.5
        return std * jax.random.normal(next(keys), (kh, kw, ic, oc), F32)

    def bn(c):
        return jnp.ones((c,), F32), jnp.zeros((c,), F32)

    params = {'conv1': conv_w(7, 7, 3, 64)}
    params['bn1_g'], params['bn1_b'] = bn(64)

    in_ch = 64
    layers = []
    for out_ch, n_blocks, stride in LAYER_CFG:
        blocks = []
        for b in range(n_blocks):
            s = stride if b == 0 else 1
            blk = {'conv1': conv_w(3, 3, in_ch, out_ch),
                   'conv2': conv_w(3, 3, out_ch, out_ch)}
            blk['bn1_g'], blk['bn1_b'] = bn(out_ch)
            blk['bn2_g'], blk['bn2_b'] = bn(out_ch)
            if s != 1 or in_ch != out_ch:
                blk['ds_conv'] = conv_w(1, 1, in_ch, out_ch)
                blk['ds_g'], blk['ds_b'] = bn(out_ch)
            blocks.append(blk)
            in_ch = out_ch
        layers.append(blocks)
    params['layers'] = layers

    head = {}
    head['bn_c_g'], head['bn_c_b'] = bn(512)
    head['w_c'] = (1.0 / 512 ** 0.5) * jax.random.normal(next(keys), (512, 2), F32)
    head['b_c'] = 0.01 * jax.random.normal(next(keys), (2,), F32)
    head['bn_b_g'], head['bn_b_b'] = bn(512)
    head['w_b'] = (1.0 / 512 ** 0.5) * jax.random.normal(next(keys), (512, 4), F32)
    head['b_b'] = 0.01 * jax.random.normal(next(keys), (4,), F32)
    params['head'] = head
    return params


def combined_model_forward(params, x_nchw):
    x = jnp.transpose(x_nchw.astype(F32), (0, 2, 3, 1))        # NCHW -> NHWC
    # features1[:4]: conv1 / bn1 / relu / maxpool
    x = conv_bn(x, params['conv1'], params['bn1_g'], params['bn1_b'],
                stride=2, pad=3, relu=True)
    x = maxpool2d(x)
    # features1[4:6] = layer1, layer2 ; features2 = layer3, layer4
    for (out_ch, n_blocks, stride), blocks in zip(LAYER_CFG, params['layers']):
        for b, blk in enumerate(blocks):
            x = basic_block(x, blk, stride if b == 0 else 1)
    # relu + adaptive avg pool (1,1) + flatten + classifier / bb heads
    return heads(x, params['head'])


# --------------------------- main ---------------------------------------------

if __name__ == "__main__":
    key = jax.random.PRNGKey(0)
    params = init_params(key)
    x = jax.random.normal(jax.random.fold_in(key, 12345), (2, 3, 64, 64), F32)

    out_cls, out_bb = combined_model_forward(params, x)
    jax.block_until_ready((out_cls, out_bb))

    assert out_cls.shape == (2, 2) and out_bb.shape == (2, 4)
    assert bool(jnp.all(jnp.isfinite(out_cls))) and bool(jnp.all(jnp.isfinite(out_bb)))
    print("KERNEL_OK")
</pallas_src>

<mosaic_0001>
module attributes {stable_mosaic.version = 11 : i64} {
  func.func @_conv_bn_kernel(%arg0: i32, %arg1: i32, %arg2: memref<2048x256xbf16, #tpu.memory_space<vmem>>, %arg3: memref<256x128xbf16, #tpu.memory_space<vmem>>, %arg4: memref<1x128xf32, #tpu.memory_space<vmem>>, %arg5: memref<1x128xf32, #tpu.memory_space<vmem>>, %arg6: memref<2048x128xf32, #tpu.memory_space<vmem>>, %arg7: memref<2048x128xf32, #tpu.memory_space<vmem>>) attributes {dimension_semantics = [#tpu.dimension_semantics<parallel>, #tpu.dimension_semantics<arbitrary>], iteration_bounds = array<i64: 1, 1>, scalar_prefetch = 0 : i64, scratch_operands = 1 : i64, tpu.core_type = #tpu.core_type<tc>, window_params = [{transform_indices = @transform_0, window_bounds = array<i64: 2048, 256>}, {transform_indices = @transform_1, window_bounds = array<i64: 256, 128>}, {transform_indices = @transform_2, window_bounds = array<i64: 1, 128>}, {transform_indices = @transform_3, window_bounds = array<i64: 1, 128>}, {transform_indices = @transform_4, window_bounds = array<i64: 2048, 128>}]} {
    %c0_i32 = arith.constant 0 : i32
    %0 = arith.cmpi eq, %arg1, %c0_i32 : i32
    %1 = arith.extui %0 : i1 to i32
    %c0_i32_0 = arith.constant 0 : i32
    %2 = arith.cmpi ne, %1, %c0_i32_0 : i32
    scf.if %2 {
      %cst_10 = arith.constant 0.000000e+00 : f32
      %12 = vector.broadcast %cst_10 : f32 to vector<2048x128xf32>
      %c0_11 = arith.constant 0 : index
      %c0_12 = arith.constant 0 : index
      %13 = vector.load %arg7[%c0_11, %c0_12] : memref<2048x128xf32, #tpu.memory_space<vmem>>, vector<2048x128xf32>
      tpu.vector_store %arg7[%c0_11, %c0_12], %12 {strides = array<i32>} : memref<2048x128xf32, #tpu.memory_space<vmem>>, vector<2048x128xf32>,
    } else {
    }
    %c0 = arith.constant 0 : index
    %c0_1 = arith.constant 0 : index
    %3 = vector.load %arg7[%c0, %c0_1] : memref<2048x128xf32, #tpu.memory_space<vmem>>, vector<2048x128xf32>
    %c0_2 = arith.constant 0 : index
    %c0_3 = arith.constant 0 : index
    %4 = vector.load %arg2[%c0_2, %c0_3] : memref<2048x256xbf16, #tpu.memory_space<vmem>>, vector<2048x256xbf16>
    %c0_4 = arith.constant 0 : index
    %c0_5 = arith.constant 0 : index
    %5 = vector.load %arg3[%c0_4, %c0_5] : memref<256x128xbf16, #tpu.memory_space<vmem>>, vector<256x128xbf16>
    %cst = arith.constant dense<0.000000e+00> : vector<2048x128xf32>
    %6 = tpu.matmul %4, %5, %cst {dimension_numbers = #tpu.dot_dimension_numbers<[1], [0], [0], [1], [0, 0, 1, 1], [], []>} : vector<2048x256xbf16>, vector<256x128xbf16>, vector<2048x128xf32> -> vector<2048x128xf32>
    %7 = arith.addf %3, %6 : vector<2048x128xf32>
    %c0_6 = arith.constant 0 : index
    %c0_7 = arith.constant 0 : index
    %8 = vector.load %arg7[%c0_6, %c0_7] : memref<2048x128xf32, #tpu.memory_space<vmem>>, vector<2048x128xf32>
    tpu.vector_store %arg7[%c0_6, %c0_7], %7 {strides = array<i32>} : memref<2048x128xf32, #tpu.memory_space<vmem>>, vector<2048x128xf32>,
    %c0_i32_8 = arith.constant 0 : i32
    %9 = arith.cmpi eq, %arg1, %c0_i32_8 : i32
    %10 = arith.extui %9 : i1 to i32
    %c0_i32_9 = arith.constant 0 : i32
    %11 = arith.cmpi ne, %10, %c0_i32_9 : i32
    scf.if %11 {
      %c0_10 = arith.constant 0 : index
      %c0_11 = arith.constant 0 : index
      %12 = vector.load %arg7[%c0_10, %c0_11] : memref<2048x128xf32, #tpu.memory_space<vmem>>, vector<2048x128xf32>
      %c0_12 = arith.constant 0 : index
      %c0_13 = arith.constant 0 : index
      %13 = vector.load %arg4[%c0_12, %c0_13] : memref<1x128xf32, #tpu.memory_space<vmem>>, vector<1x128xf32>
      %c0_14 = arith.constant 0 : index
      %c0_15 = arith.constant 0 : index
      %14 = vector.load %arg5[%c0_14, %c0_15] : memref<1x128xf32, #tpu.memory_space<vmem>>, vector<1x128xf32>
      %cst_16 = arith.constant dense<0.000000e+00> : vector<128xf32>
      %15 = vector.multi_reduction <add>, %12, %cst_16 [0] : vector<2048x128xf32> to vector<128xf32>
      %16 = vector.shape_cast %15 : vector<128xf32> to vector<1x128xf32>
      %cst_17 = arith.constant 4.8828125E-4 : f32
      %17 = vector.broadcast %cst_17 : f32 to vector<1x128xf32>
      %18 = arith.mulf %16, %17 : vector<1x128xf32>
      %19 = arith.mulf %12, %12 : vector<2048x128xf32>
      %cst_18 = arith.constant dense<0.000000e+00> : vector<128xf32>
      %20 = vector.multi_reduction <add>, %19, %cst_18 [0] : vector<2048x128xf32> to vector<128xf32>
      %21 = vector.shape_cast %20 : vector<128xf32> to vector<1x128xf32>
      %cst_19 = arith.constant 4.8828125E-4 : f32
      %22 = vector.broadcast %cst_19 : f32 to vector<1x128xf32>
      %23 = arith.mulf %21, %22 : vector<1x128xf32>
      %24 = arith.mulf %18, %18 : vector<1x128xf32>
      %25 = arith.subf %23, %24 : vector<1x128xf32>
      %cst_20 = arith.constant 0.000000e+00 : f32
      %26 = vector.broadcast %cst_20 : f32 to vector<1x128xf32>
      %27 = arith.maximumf %25, %26 : vector<1x128xf32>
      %cst_21 = arith.constant 9.99999974E-6 : f32
      %28 = vector.broadcast %cst_21 : f32 to vector<1x128xf32>
      %29 = arith.addf %27, %28 : vector<1x128xf32>
      %30 = math.rsqrt %29 : vector<1x128xf32>
      %31 = arith.mulf %13, %30 : vector<1x128xf32>
      %32 = arith.mulf %18, %31 : vector<1x128xf32>
      %33 = arith.subf %14, %32 : vector<1x128xf32>
      %34 = vector.broadcast %31 : vector<1x128xf32> to vector<2048x128xf32>
      %35 = arith.mulf %12, %34 : vector<2048x128xf32>
      %36 = vector.broadcast %33 : vector<1x128xf32> to vector<2048x128xf32>
      %37 = arith.addf %35, %36 : vector<2048x128xf32>
      %cst_22 = arith.constant 0.000000e+00 : f32
      %38 = vector.broadcast %cst_22 : f32 to vector<2048x128xf32>
      %39 = arith.maximumf %37, %38 : vector<2048x128xf32>
      %c0_23 = arith.constant 0 : index
      %c0_24 = arith.constant 0 : index
      %40 = vector.load %arg6[%c0_23, %c0_24] : memref<2048x128xf32, #tpu.memory_space<vmem>>, vector<2048x128xf32>
      tpu.vector_store %arg6[%c0_23, %c0_24], %39 {strides = array<i32>} : memref<2048x128xf32, #tpu.memory_space<vmem>>, vector<2048x128xf32>,
    } else {
    }
    return
  }
  func.func @transform_0(%arg0: i32, %arg1: i32) -> (i32, i32) {
    %c0_i32 = arith.constant 0 : i32
    %c0_i32_0 = arith.constant 0 : i32
    return %c0_i32, %arg1 : i32, i32
  }
  func.func @transform_1(%arg0: i32, %arg1: i32) -> (i32, i32) {
    %c0_i32 = arith.constant 0 : i32
    return %arg1, %arg0 : i32, i32
  }
  func.func @transform_2(%arg0: i32, %arg1: i32) -> (i32, i32) {
    %c0_i32 = arith.constant 0 : i32
    %c0_i32_0 = arith.constant 0 : i32
    return %c0_i32, %arg0 : i32, i32
  }
  func.func @transform_3(%arg0: i32, %arg1: i32) -> (i32, i32) {
    %c0_i32 = arith.constant 0 : i32
    %c0_i32_0 = arith.constant 0 : i32
    return %c0_i32, %arg0 : i32, i32
  }
  func.func @transform_4(%arg0: i32, %arg1: i32) -> (i32, i32) {
    %c0_i32 = arith.constant 0 : i32
    %c0_i32_0 = arith.constant 0 : i32
    return %c0_i32, %arg0 : i32, i32
  }
}

</mosaic_0001>

<bundles_post_ra>
// kernel: tpu_custom_call.1
= control target key start
LH: loop header
LB: loop body
LE: loop exit
PB: predicated region body
PF: predicated region fallthrough
CT: control target
= control target key end

     0   :  { %9 = vsyncpa [#allocation4], 0  ;;  %s10347_s0 = inlined_call_operand.hbm [shape: bf16[2048,256], index: 0, kind: input, shape index: {}]   ;;  %s10348_s1 = inlined_call_operand.hbm [shape: bf16[256,128], index: 1, kind: input, shape index: {}]   ;;  %s10349_s2 = inlined_call_operand.vmem [shape: f32[1,128], index: 2, kind: input, shape index: {}]   ;;  %s10350_s3 = inlined_call_operand.vmem [shape: f32[1,128], index: 3, kind: input, shape index: {}]   ;;  %s10351_s4 = inlined_call_operand.hbm [shape: f32[2048,128], index: 4, kind: output, shape index: {}]  }
   0x1   :  { %10 = vsyncpa [#allocation7], 0 }
   0x2   :  { %11 = vsyncpa [#allocation5], 0  ;;  %s6679_s15 = smov [#allocation3]  }
   0x3   :  { %s17_s16 = sshll.u32 %s6679_s15, 4  ;;  %s18_s16 = int_to_ptr.vmem [resolvable:$true] %s17_s16 }
   0x4   :  { %s6621_s17 = scalar_lea.vmem %s18_s16, 32768  ;;  %p6626_p1 = scmp.lt.s32.totalorder %s18_s16, %s18_s16 }
   0x5   :  { %p6622_p0 = scmp.ne.s32.totalorder %s18_s16, %s6621_s17  ;;  %p6627_p2 = scmp.lt.s32.totalorder %s6621_s17, %s6621_s17 }
   0x7   :  { %p6628_p3 = por %p6627_p2, %p6626_p1 }
   0x9   :  { %p6629_p4 = pnand %p6628_p3, %p6622_p0 }
   0xb   :  { %6632 = shalt.err (!%p6629_p4)
}
   0xc   :  { %s6680_s18 = smov 128   ;;  %s6681_s19 = smov 8  }
   0xd   :  { %23 = dma.hbm_to_vmem [thread:$0]  %s10347_s0, 32768, %s18_s16, [#allocation4], %s6680_s18, %s6680_s18, %s6681_s19  }
   0xe   :  { %s6682_s22 = smov [#allocation6]  }
   0xf   :  { %s29_s23 = sshll.u32 %s6682_s22, 4  ;;  %s30_s23 = int_to_ptr.vmem [resolvable:$true] %s29_s23 }
  0x10   :  { %s6641_s24 = scalar_lea.vmem %s30_s23, 2048  ;;  %p6646_p6 = scmp.lt.s32.totalorder %s30_s23, %s30_s23 }
  0x11   :  { %p6642_p5 = scmp.ne.s32.totalorder %s30_s23, %s6641_s24  ;;  %p6647_p7 = scmp.lt.s32.totalorder %s6641_s24, %s6641_s24 }
  0x13   :  { %p6648_p8 = por %p6647_p7, %p6646_p6 }
  0x15   :  { %p6649_p9 = pnand %p6648_p8, %p6642_p5 }
  0x17   :  { %6652 = shalt.err (!%p6649_p9)
}
  0x18   :  { %s6683_s25 = smov 64   ;;  %s6684_s26 = smov 4  }
  0x19   :  { %35 = dma.hbm_to_vmem [thread:$0]  %s10348_s1, 2048, %s30_s23, [#allocation7], %s6683_s25, %s6683_s25, %s6684_s26  }
  0x1a   :  { %6673 = dma.done.wait [#allocation4], 32768  }
  0x1b   :  { %6674 = vsyncadd [#allocation4], 4294934528 }
  0x1c   :  { %6675 = dma.done.wait [#allocation7], 2048  }
  0x1d   :  { %6676 = vsyncadd [#allocation7], 4294965248  ;;  %v6685_v0 = vmov 0   ;;  %v6211_v1 = vld [vmem:[#allocation6 + $0x38] sm:$0xff]   ;;  %v6212_v2 = vld [vmem:[#allocation6 + $0x30] sm:$0xff]  }
  0x1e   :  { %2227 = vmatprep.subr.bf16.mxu0 %v6685_v0  ;;  %6171 = vmatprep.subr.bf16.mxu1 %v6685_v0  ;;  %v6213_v3 = vld [vmem:[#allocation6 + $0x28] sm:$0xff]   ;;  %v6214_v4 = vld [vmem:[#allocation6 + $0x20] sm:$0xff]   ;;  %v6215_v5 = vld [vmem:[#allocation6 + $0x18] sm:$0xff]  }
  0x1f   :  { %2228 = vmatpush1.bf16.msra.mxu0 %v6211_v1  ;;  %6187 = vmatpush1.bf16.msra.mxu1 %v6211_v1  ;;  %v6229_v6 = vld [vmem:[#allocation3 + $0x4] ss:$8 sps:$4 sm:$0xff]   ;;  %v6216_v7 = vld [vmem:[#allocation6 + $0x10] sm:$0xff]   ;;  %v6219_v10 = vld [vmem:[#allocation6 + $0x78] sm:$0xff]  }
  0x20   :  { %2229 = vmatprep.subr.bf16.mxu0 %v6685_v0  ;;  %6172 = vmatprep.subr.bf16.mxu1 %v6685_v0  ;;  %v6217_v8 = vld [vmem:[#allocation6 + $0x8] sm:$0xff]   ;;  %v6218_v9 = vld [vmem:[#allocation6] sm:$0xff]   ;;  %v6220_v11 = vld [vmem:[#allocation6 + $0x70] sm:$0xff]  }
  0x21   :  { %2259 = vmatprep.mubr.bf16.mxu0 %v6229_v6  ;;  %v6221_v12 = vld [vmem:[#allocation6 + $0x68] sm:$0xff]   ;;  %v6222_v13 = vld [vmem:[#allocation6 + $0x60] sm:$0xff]   ;;  %v6223_v14 = vld [vmem:[#allocation6 + $0x58] sm:$0xff]  }
  0x22   :  { %v6224_v15 = vld [vmem:[#allocation6 + $0x50] sm:$0xff]   ;;  %v6225_v16 = vld [vmem:[#allocation6 + $0x48] sm:$0xff]   ;;  %v6226_v17 = vld [vmem:[#allocation6 + $0x40] sm:$0xff]  }
  0x23   :  { %2230 = vmatpush1.bf16.msra.mxu0 %v6212_v2  ;;  %6188 = vmatpush1.bf16.msra.mxu1 %v6212_v2  ;;  %v6227_v18 = vld [vmem:[#allocation3] ss:$8 sps:$4 sm:$0xff]   ;;  %v6230_v19 = vld [vmem:[#allocation3 + $0x14] ss:$8 sps:$4 sm:$0xff]   ;;  %v6232_v20 = vld [vmem:[#allocation3 + $0x10] ss:$8 sps:$4 sm:$0xff]  }
  0x24   :  { %2231 = vmatprep.subr.bf16.mxu0 %v6685_v0  ;;  %6173 = vmatprep.subr.bf16.mxu1 %v6685_v0  ;;  %v6233_v21 = vld [vmem:[#allocation3 + $0x24] ss:$8 sps:$4 sm:$0xff]   ;;  %v6235_v22 = vld [vmem:[#allocation3 + $0x20] ss:$8 sps:$4 sm:$0xff]   ;;  %v6236_v23 = vld [vmem:[#allocation3 + $0x34] ss:$8 sps:$4 sm:$0xff]  }
  0x25   :  { %v6238_v24 = vld [vmem:[#allocation3 + $0x30] ss:$8 sps:$4 sm:$0xff]   ;;  %v6239_v25 = vld [vmem:[#allocation3 + $0x44] ss:$8 sps:$4 sm:$0xff]   ;;  %v6241_v26 = vld [vmem:[#allocation3 + $0x40] ss:$8 sps:$4 sm:$0xff]  }
  0x26   :  { %v6242_v27 = vld [vmem:[#allocation3 + $0x54] ss:$8 sps:$4 sm:$0xff]   ;;  %v6244_v28 = vld [vmem:[#allocation3 + $0x50] ss:$8 sps:$4 sm:$0xff]   ;;  %v6245_v29 = vld [vmem:[#allocation3 + $0x64] ss:$8 sps:$4 sm:$0xff]  }
  0x27   :  { %2232 = vmatpush1.bf16.msra.mxu0 %v6213_v3  ;;  %6189 = vmatpush1.bf16.msra.mxu1 %v6213_v3  ;;  %v6247_v30 = vld [vmem:[#allocation3 + $0x60] ss:$8 sps:$4 sm:$0xff]   ;;  %v6248_v31 = vld [vmem:[#allocation3 + $0x74] ss:$8 sps:$4 sm:$0xff]   ;;  %v6250_v32 = vld [vmem:[#allocation3 + $0x70] ss:$8 sps:$4 sm:$0xff]  }
  0x28   :  { %2233 = vmatprep.subr.bf16.mxu0 %v6685_v0  ;;  %6174 = vmatprep.subr.bf16.mxu1 %v6685_v0  ;;  %v6251_v33 = vld [vmem:[#allocation3 + $0x84] ss:$8 sps:$4 sm:$0xff]   ;;  %v6253_v34 = vld [vmem:[#allocation3 + $0x80] ss:$8 sps:$4 sm:$0xff]   ;;  %v6254_v35 = vld [vmem:[#allocation3 + $0x94] ss:$8 sps:$4 sm:$0xff]  }
  0x29   :  { %v6256_v36 = vld [vmem:[#allocation3 + $0x90] ss:$8 sps:$4 sm:$0xff]   ;;  %v6257_v37 = vld [vmem:[#allocation3 + $0xa4] ss:$8 sps:$4 sm:$0xff]   ;;  %v6259_v38 = vld [vmem:[#allocation3 + $0xa0] ss:$8 sps:$4 sm:$0xff]  }
  0x2a   :  { %v6260_v39 = vld [vmem:[#allocation3 + $0xb4] ss:$8 sps:$4 sm:$0xff]   ;;  %v6262_v40 = vld [vmem:[#allocation3 + $0xb0] ss:$8 sps:$4 sm:$0xff]   ;;  %v6263_v41 = vld [vmem:[#allocation3 + $0xc4] ss:$8 sps:$4 sm:$0xff]  }
  0x2b   :  { %2234 = vmatpush1.bf16.msra.mxu0 %v6214_v4  ;;  %6190 = vmatpush1.bf16.msra.mxu1 %v6214_v4  ;;  %v6265_v42 = vld [vmem:[#allocation3 + $0xc0] ss:$8 sps:$4 sm:$0xff]   ;;  %v6266_v43 = vld [vmem:[#allocation3 + $0xd4] ss:$8 sps:$4 sm:$0xff]   ;;  %v6268_v44 = vld [vmem:[#allocation3 + $0xd0] ss:$8 sps:$4 sm:$0xff]  }
  0x2c   :  { %2235 = vmatprep.subr.bf16.mxu0 %v6685_v0  ;;  %6175 = vmatprep.subr.bf16.mxu1 %v6685_v0  ;;  %v6269_v45 = vld [vmem:[#allocation3 + $0xe4] ss:$8 sps:$4 sm:$0xff]   ;;  %v6271_v46 = vld [vmem:[#allocation3 + $0xe0] ss:$8 sps:$4 sm:$0xff]   ;;  %v6272_v47 = vld [vmem:[#allocation3 + $0xf4] ss:$8 sps:$4 sm:$0xff]  }
  0x2d   :  { %v6274_v48 = vld [vmem:[#allocation3 + $0xf0] ss:$8 sps:$4 sm:$0xff]   ;;  %v6275_v49 = vld [vmem:[#allocation3 + $0x104] ss:$8 sps:$4 sm:$0xff]   ;;  %v6323_v51 = vld [vmem:[#allocation3 + $0x400] ss:$8 sps:$4 sm:$0xff]  }
  0x2e   :  { %v6325_v50 = vld [vmem:[#allocation3 + $0x404] ss:$8 sps:$4 sm:$0xff]   ;;  %v6277_v52 = vld [vmem:[#allocation3 + $0x100] ss:$8 sps:$4 sm:$0xff]   ;;  %v6278_v53 = vld [vmem:[#allocation3 + $0x114] ss:$8 sps:$4 sm:$0xff]  }
  0x2f   :  { %2236 = vmatpush1.bf16.msra.mxu0 %v6215_v5  ;;  %6191 = vmatpush1.bf16.msra.mxu1 %v6215_v5  ;;  %v6329_v54 = vld [vmem:[#allocation3 + $0x414] ss:$8 sps:$4 sm:$0xff]   ;;  %v6331_v55 = vld [vmem:[#allocation3 + $0x410] ss:$8 sps:$4 sm:$0xff]   ;;  %v6281_v57 = vld [vmem:[#allocation3 + $0x124] ss:$8 sps:$4 sm:$0xff]  }
  0x30   :  { %2237 = vmatprep.subr.bf16.mxu0 %v6685_v0  ;;  %6176 = vmatprep.subr.bf16.mxu1 %v6685_v0  ;;  %v6280_v56 = vld [vmem:[#allocation3 + $0x110] ss:$8 sps:$4 sm:$0xff]   ;;  %v6335_v58 = vld [vmem:[#allocation3 + $0x424] ss:$8 sps:$4 sm:$0xff]   ;;  %v6337_v59 = vld [vmem:[#allocation3 + $0x420] ss:$8 sps:$4 sm:$0xff]  }
  0x31   :  { %2771 = vmatprep.mubr.bf16.mxu1 %v6325_v50  ;;  %v6283_v60 = vld [vmem:[#allocation3 + $0x120] ss:$8 sps:$4 sm:$0xff]   ;;  %v6284_v61 = vld [vmem:[#allocation3 + $0x134] ss:$8 sps:$4 sm:$0xff]   ;;  %v6343_v63 = vld [vmem:[#allocation3 + $0x430] ss:$8 sps:$4 sm:$0xff]  }
  0x32   :  { %v6341_v62 = vld [vmem:[#allocation3 + $0x434] ss:$8 sps:$4 sm:$0xff]   ;;  %v6287_v1 = vld [vmem:[#allocation3 + $0x144] ss:$8 sps:$4 sm:$0xff]   ;;  %v6349_v3 = vld [vmem:[#allocation3 + $0x440] ss:$8 sps:$4 sm:$0xff]  }
  0x33   :  { %2238 = vmatpush1.bf16.msra.mxu0 %v6216_v7  ;;  %6192 = vmatpush1.bf16.msra.mxu1 %v6216_v7  ;;  %v6347_v2 = vld [vmem:[#allocation3 + $0x444] ss:$8 sps:$4 sm:$0xff]   ;;  %v6289_v4 = vld [vmem:[#allocation3 + $0x140] ss:$8 sps:$4 sm:$0xff]   ;;  %v6290_v5 = vld [vmem:[#allocation3 + $0x154] ss:$8 sps:$4 sm:$0xff]  }
  0x34   :  { %2239 = vmatprep.subr.bf16.mxu0 %v6685_v0  ;;  %6177 = vmatprep.subr.bf16.mxu1 %v6685_v0  ;;  %v6353_v6 = vld [vmem:[#allocation3 + $0x454] ss:$8 sps:$4 sm:$0xff]   ;;  %v6355_v7 = vld [vmem:[#allocation3 + $0x450] ss:$8 sps:$4 sm:$0xff]  }
  0x37   :  { %2240 = vmatpush1.bf16.msra.mxu0 %v6217_v8  ;;  %6193 = vmatpush1.bf16.msra.mxu1 %v6217_v8  ;;  %v6292_v8 = vld [vmem:[#allocation3 + $0x150] ss:$8 sps:$4 sm:$0xff]  }
  0x38   :  { %2241 = vmatprep.subr.bf16.mxu0 %v6685_v0  ;;  %6178 = vmatprep.subr.bf16.mxu1 %v6685_v0 }
  0x3b   :  { %2242 = vmatpush1.bf16.msra.mxu0 %v6218_v9  ;;  %6194 = vmatpush1.bf16.msra.mxu1 %v6218_v9  ;;  %v6293_v9 = vld [vmem:[#allocation3 + $0x164] ss:$8 sps:$4 sm:$0xff]  }
  0x3c   :  { %2243 = vmatprep.subr.bf16.mxu0 %v6685_v0  ;;  %6179 = vmatprep.subr.bf16.mxu1 %v6685_v0 }
  0x3f   :  { %2244 = vmatpush2.bf16.msra.mxu0 %v6219_v10  ;;  %6195 = vmatpush2.bf16.msra.mxu1 %v6219_v10  ;;  %v6359_v10 = vld [vmem:[#allocation3 + $0x464] ss:$8 sps:$4 sm:$0xff]  }
  0x40   :  { %2245 = vmatprep.subr.bf16.mxu0 %v6685_v0  ;;  %6180 = vmatprep.subr.bf16.mxu1 %v6685_v0 }
  0x43   :  { %2246 = vmatpush2.bf16.msra.mxu0 %v6220_v11  ;;  %6196 = vmatpush2.bf16.msra.mxu1 %v6220_v11  ;;  %v6361_v11 = vld [vmem:[#allocation3 + $0x460] ss:$8 sps:$4 sm:$0xff]  }
  0x44   :  { %2247 = vmatprep.subr.bf16.mxu0 %v6685_v0  ;;  %6181 = vmatprep.subr.bf16.mxu1 %v6685_v0 }
  0x47   :  { %2248 = vmatpush2.bf16.msra.mxu0 %v6221_v12  ;;  %6197 = vmatpush2.bf16.msra.mxu1 %v6221_v12  ;;  %v6295_v12 = vld [vmem:[#allocation3 + $0x160] ss:$8 sps:$4 sm:$0xff]  }
  0x48   :  { %2249 = vmatprep.subr.bf16.mxu0 %v6685_v0  ;;  %6182 = vmatprep.subr.bf16.mxu1 %v6685_v0 }
  0x4b   :  { %2250 = vmatpush2.bf16.msra.mxu0 %v6222_v13  ;;  %6198 = vmatpush2.bf16.msra.mxu1 %v6222_v13  ;;  %v6296_v13 = vld [vmem:[#allocation3 + $0x174] ss:$8 sps:$4 sm:$0xff]  }
  0x4c   :  { %2251 = vmatprep.subr.bf16.mxu0 %v6685_v0  ;;  %6183 = vmatprep.subr.bf16.mxu1 %v6685_v0 }
  0x4f   :  { %2252 = vmatpush2.bf16.msra.mxu0 %v6223_v14  ;;  %6199 = vmatpush2.bf16.msra.mxu1 %v6223_v14  ;;  %v6365_v14 = vld [vmem:[#allocation3 + $0x474] ss:$8 sps:$4 sm:$0xff]  }
  0x50   :  { %2253 = vmatprep.subr.bf16.mxu0 %v6685_v0  ;;  %6184 = vmatprep.subr.bf16.mxu1 %v6685_v0 }
  0x53   :  { %2254 = vmatpush2.bf16.msra.mxu0 %v6224_v15  ;;  %6200 = vmatpush2.bf16.msra.mxu1 %v6224_v15  ;;  %v6367_v15 = vld [vmem:[#allocation3 + $0x470] ss:$8 sps:$4 sm:$0xff]  }
  0x54   :  { %2255 = vmatprep.subr.bf16.mxu0 %v6685_v0  ;;  %6185 = vmatprep.subr.bf16.mxu1 %v6685_v0 }
  0x57   :  { %2256 = vmatpush2.bf16.msra.mxu0 %v6225_v16  ;;  %6201 = vmatpush2.bf16.msra.mxu1 %v6225_v16  ;;  %v6298_v16 = vld [vmem:[#allocation3 + $0x170] ss:$8 sps:$4 sm:$0xff]  }
  0x58   :  { %2257 = vmatprep.subr.bf16.mxu0 %v6685_v0  ;;  %6186 = vmatprep.subr.bf16.mxu1 %v6685_v0  ;;  %v6286_v0 = vld [vmem:[#allocation3 + $0x130] ss:$8 sps:$4 sm:$0xff]  }
  0x5b   :  { %2258 = vmatpush2.bf16.msra.mxu0 %v6226_v17  ;;  %6202 = vmatpush2.bf16.msra.mxu1 %v6226_v17  ;;  %v6299_v17 = vld [vmem:[#allocation3 + $0x184] ss:$8 sps:$4 sm:$0xff]  }
  0x5e   :  { %2260 = vmatmul.mubr.bf16.vlgmr.msra.gmra.mxu0 %v6227_v18  ;;  %2772 = vmatmul.mubr.bf16.vlgmr.msra.gmra.mxu1 %v6323_v51  ;;  %v6371_v18 = vld [vmem:[#allocation3 + $0x484] ss:$8 sps:$4 sm:$0xff]   ;;  %v6311_v51 = vld [vmem:[#allocation3 + $0x1c0] ss:$8 sps:$4 sm:$0xff]  }
  0x5f   :  { %2267 = vmatprep.mubr.bf16.mxu0 %v6230_v19  ;;  %2779 = vmatprep.mubr.bf16.mxu1 %v6329_v54  ;;  %v6373_v19 = vld [vmem:[#allocation3 + $0x480] ss:$8 sps:$4 sm:$0xff]   ;;  %v6401_v54 = vld [vmem:[#allocation3 + $0x4d4] ss:$8 sps:$4 sm:$0xff]  }
  0x66   :  { %2268 = vmatmul.mubr.bf16.gmra.mxu0 %v6232_v20  ;;  %2780 = vmatmul.mubr.bf16.gmra.mxu1 %v6331_v55  ;;  %v6301_v20 = vld [vmem:[#allocation3 + $0x180] ss:$8 sps:$4 sm:$0xff]  }
  0x67   :  { %2275 = vmatprep.mubr.bf16.mxu0 %v6233_v21  ;;  %2787 = vmatprep.mubr.bf16.mxu1 %v6335_v58  ;;  %v6302_v21 = vld [vmem:[#allocation3 + $0x194] ss:$8 sps:$4 sm:$0xff]  }
  0x6e   :  { %2276 = vmatmul.mubr.bf16.gmra.mxu0 %v6235_v22  ;;  %2788 = vmatmul.mubr.bf16.gmra.mxu1 %v6337_v59  ;;  %v6377_v22 = vld [vmem:[#allocation3 + $0x494] ss:$8 sps:$4 sm:$0xff]   ;;  %v6314_v59 = vld [vmem:[#allocation3 + $0x1d0] ss:$8 sps:$4 sm:$0xff]  }
  0x6f   :  { %2283 = vmatprep.mubr.bf16.mxu0 %v6236_v23  ;;  %2795 = vmatprep.mubr.bf16.mxu1 %v6341_v62  ;;  %v6407_v62 = vld [vmem:[#allocation3 + $0x4e4] ss:$8 sps:$4 sm:$0xff]  }
  0x76   :  { %2284 = vmatmul.mubr.bf16.gmra.mxu0 %v6238_v24  ;;  %2796 = vmatmul.mubr.bf16.gmra.mxu1 %v6343_v63  ;;  %v6379_v24 = vld [vmem:[#allocation3 + $0x490] ss:$8 sps:$4 sm:$0xff]  }
  0x77   :  { %2291 = vmatprep.mubr.bf16.mxu0 %v6239_v25  ;;  %2803 = vmatprep.mubr.bf16.mxu1 %v6347_v2 }
  0x7e   :  { %2292 = vmatmul.mubr.bf16.gmra.mxu0 %v6241_v26  ;;  %2804 = vmatmul.mubr.bf16.gmra.mxu1 %v6349_v3  ;;  %v6317_v3 = vld [vmem:[#allocation3 + $0x1e0] ss:$8 sps:$4 sm:$0xff]  }
  0x7f   :  { %2299 = vmatprep.mubr.bf16.mxu0 %v6242_v27  ;;  %2811 = vmatprep.mubr.bf16.mxu1 %v6353_v6  ;;  %v6304_v27 = vld [vmem:[#allocation3 + $0x190] ss:$8 sps:$4 sm:$0xff]   ;;  %v6413_v6 = vld [vmem:[#allocation3 + $0x4f4] ss:$8 sps:$4 sm:$0xff]  }
  0x86   :  { %2300 = vmatmul.mubr.bf16.gmra.mxu0 %v6244_v28  ;;  %2812 = vmatmul.mubr.bf16.gmra.mxu1 %v6355_v7  ;;  %v6305_v28 = vld [vmem:[#allocation3 + $0x1a4] ss:$8 sps:$4 sm:$0xff]  }
  0x87   :  { %2307 = vmatprep.mubr.bf16.mxu0 %v6245_v29  ;;  %2819 = vmatprep.mubr.bf16.mxu1 %v6359_v10 }
  0x8e   :  { %2308 = vmatmul.mubr.bf16.gmra.mxu0 %v6247_v30  ;;  %2820 = vmatmul.mubr.bf16.gmra.mxu1 %v6361_v11  ;;  %v6383_v30 = vld [vmem:[#allocation3 + $0x4a4] ss:$8 sps:$4 sm:$0xff]   ;;  %v6320_v11 = vld [vmem:[#allocation3 + $0x1f0] ss:$8 sps:$4 sm:$0xff]  }
  0x8f   :  { %2315 = vmatprep.mubr.bf16.mxu0 %v6248_v31  ;;  %2827 = vmatprep.mubr.bf16.mxu1 %v6365_v14  ;;  %v6419_v14 = vld [vmem:[#allocation3 + $0x504] ss:$8 sps:$4 sm:$0xff]  }
  0x96   :  { %2316 = vmatmul.mubr.bf16.gmra.mxu0 %v6250_v32  ;;  %2828 = vmatmul.mubr.bf16.gmra.mxu1 %v6367_v15  ;;  %v6385_v32 = vld [vmem:[#allocation3 + $0x4a0] ss:$8 sps:$4 sm:$0xff]  }
  0x97   :  { %2323 = vmatprep.mubr.bf16.mxu0 %v6251_v33  ;;  %2835 = vmatprep.mubr.bf16.mxu1 %v6371_v18 }
  0x9e   :  { %2324 = vmatmul.mubr.bf16.gmra.mxu0 %v6253_v34  ;;  %2836 = vmatmul.mubr.bf16.gmra.mxu1 %v6373_v19  ;;  %v6326_v19 = vld [vmem:[#allocation3 + $0x200] ss:$8 sps:$4 sm:$0xff]  }
  0x9f   :  { %2331 = vmatprep.mubr.bf16.mxu0 %v6254_v35  ;;  %2843 = vmatprep.mubr.bf16.mxu1 %v6377_v22  ;;  %v6307_v35 = vld [vmem:[#allocation3 + $0x1a0] ss:$8 sps:$4 sm:$0xff]   ;;  %v6425_v22 = vld [vmem:[#allocation3 + $0x514] ss:$8 sps:$4 sm:$0xff]  }
  0xa6   :  { %2332 = vmatmul.mubr.bf16.gmra.mxu0 %v6256_v36  ;;  %2844 = vmatmul.mubr.bf16.gmra.mxu1 %v6379_v24  ;;  %v6308_v36 = vld [vmem:[#allocation3 + $0x1b4] ss:$8 sps:$4 sm:$0xff]  }
  0xa7   :  { %2339 = vmatprep.mubr.bf16.mxu0 %v6257_v37  ;;  %2851 = vmatprep.mubr.bf16.mxu1 %v6383_v30  ;;  %v6340_v30 = vld [vmem:[#allocation3 + $0x224] ss:$8 sps:$4 sm:$0xff]  }
  0xae   :  { %2340 = vmatmul.mubr.bf16.gmra.mxu0 %v6259_v38  ;;  %2852 = vmatmul.mubr.bf16.gmra.mxu1 %v6385_v32  ;;  %v6389_v38 = vld [vmem:[#allocation3 + $0x4b4] ss:$8 sps:$4 sm:$0xff]  }
  0xaf   :  { %2347 = vmatprep.mubr.bf16.mxu0 %v6260_v39  ;;  %2859 = vmatprep.mubr.bf16.mxu1 %v6389_v38 }
  0xb6   :  { %2348 = vmatmul.mubr.bf16.gmra.mxu0 %v6262_v40  ;;  %v6391_v40 = vld [vmem:[#allocation3 + $0x4b0] ss:$8 sps:$4 sm:$0xff]  }
  0xb7   :  { %2355 = vmatprep.mubr.bf16.mxu0 %v6263_v41  ;;  %2860 = vmatmul.mubr.bf16.gmra.mxu1 %v6391_v40  ;;  %v6338_v40 = vld [vmem:[#allocation3 + $0x220] ss:$8 sps:$4 sm:$0xff]  }
  0xbe   :  { %2356 = vmatmul.mubr.bf16.gmra.mxu0 %v6265_v42 }
  0xbf   :  { %2363 = vmatprep.mubr.bf16.mxu0 %v6266_v43  ;;  %v6310_v43 = vld [vmem:[#allocation3 + $0x1b0] ss:$8 sps:$4 sm:$0xff]  }
  0xc6   :  { %2364 = vmatmul.mubr.bf16.gmra.mxu0 %v6268_v44  ;;  %v6313_v44 = vld [vmem:[#allocation3 + $0x1c4] ss:$8 sps:$4 sm:$0xff]  }
  0xc7   :  { %2371 = vmatprep.mubr.bf16.mxu0 %v6269_v45 }
  0xce   :  { %2372 = vmatmul.mubr.bf16.gmra.mxu0 %v6271_v46  ;;  %v6395_v46 = vld [vmem:[#allocation3 + $0x4c4] ss:$8 sps:$4 sm:$0xff]  }
  0xcf   :  { %2379 = vmatprep.mubr.bf16.mxu0 %v6272_v47  ;;  %2867 = vmatprep.mubr.bf16.mxu1 %v6395_v46  ;;  %v6439_v46 = vld [vmem:[#allocation3 + $0x530] ss:$8 sps:$4 sm:$0xff]  }
  0xd6   :  { %2380 = vmatmul.mubr.bf16.gmra.mxu0 %v6274_v48  ;;  %v6397_v48 = vld [vmem:[#allocation3 + $0x4c0] ss:$8 sps:$4 sm:$0xff]  }
  0xd7   :  { %2387 = vmatprep.mubr.bf16.mxu0 %v6275_v49  ;;  %2868 = vmatmul.mubr.bf16.gmra.mxu1 %v6397_v48 }
  0xd8   :  { %2875 = vmatprep.mubr.bf16.mxu1 %v6401_v54  ;;  %v6443_v54 = vld [vmem:[#allocation3 + $0x544] ss:$8 sps:$4 sm:$0xff]  }
  0xde   :  { %2388 = vmatmul.mubr.bf16.gmra.mxu0 %v6277_v52  ;;  %v6316_v52 = vld [vmem:[#allocation3 + $0x1d4] ss:$8 sps:$4 sm:$0xff]  }
  0xdf   :  { %2395 = vmatprep.mubr.bf16.mxu0 %v6278_v53 }
  0xe6   :  { %2396 = vmatmul.mubr.bf16.gmra.mxu0 %v6280_v56  ;;  %v6403_v56 = vld [vmem:[#allocation3 + $0x4d0] ss:$8 sps:$4 sm:$0xff]  }
  0xe7   :  { %2403 = vmatprep.mubr.bf16.mxu0 %v6281_v57  ;;  %2876 = vmatmul.mubr.bf16.gmra.mxu1 %v6403_v56 }
  0xe8   :  { %2883 = vmatprep.mubr.bf16.mxu1 %v6407_v62  ;;  %v6358_v62 = vld [vmem:[#allocation3 + $0x254] ss:$8 sps:$4 sm:$0xff]  }
  0xee   :  { %2404 = vmatmul.mubr.bf16.gmra.mxu0 %v6283_v60  ;;  %v6319_v60 = vld [vmem:[#allocation3 + $0x1e4] ss:$8 sps:$4 sm:$0xff]  }
  0xef   :  { %2411 = vmatprep.mubr.bf16.mxu0 %v6284_v61 }
  0xf6   :  { %2412 = vmatmul.mubr.bf16.gmra.mxu0 %v6286_v0  ;;  %v6409_v0 = vld [vmem:[#allocation3 + $0x4e0] ss:$8 sps:$4 sm:$0xff]  }
  0xf7   :  { %2419 = vmatprep.mubr.bf16.mxu0 %v6287_v1  ;;  %2884 = vmatmul.mubr.bf16.gmra.mxu1 %v6409_v0 }
  0xf8   :  { %2891 = vmatprep.mubr.bf16.mxu1 %v6413_v6 }
  0xfe   :  { %2420 = vmatmul.mubr.bf16.gmra.mxu0 %v6289_v4  ;;  %v6322_v4 = vld [vmem:[#allocation3 + $0x1f4] ss:$8 sps:$4 sm:$0xff]  }
  0xff   :  { %2427 = vmatprep.mubr.bf16.mxu0 %v6290_v5 }
 0x106   :  { %2428 = vmatmul.mubr.bf16.gmra.mxu0 %v6292_v8  ;;  %v6415_v8 = vld [vmem:[#allocation3 + $0x4f0] ss:$8 sps:$4 sm:$0xff]  }
 0x107   :  { %2435 = vmatprep.mubr.bf16.mxu0 %v6293_v9  ;;  %2892 = vmatmul.mubr.bf16.gmra.mxu1 %v6415_v8  ;;  %v6356_v8 = vld [vmem:[#allocation3 + $0x250] ss:$8 sps:$4 sm:$0xff]  }
 0x108   :  { %2899 = vmatprep.mubr.bf16.mxu1 %v6419_v14  ;;  %v6457_v14 = vld [vmem:[#allocation3 + $0x560] ss:$8 sps:$4 sm:$0xff]  }
 0x10e   :  { %2436 = vmatmul.mubr.bf16.gmra.mxu0 %v6295_v12  ;;  %v6328_v12 = vld [vmem:[#allocation3 + $0x204] ss:$8 sps:$4 sm:$0xff]  }
 0x10f   :  { %2443 = vmatprep.mubr.bf16.mxu0 %v6296_v13 }
 0x116   :  { %2444 = vmatmul.mubr.bf16.gmra.mxu0 %v6298_v16  ;;  %v6421_v16 = vld [vmem:[#allocation3 + $0x500] ss:$8 sps:$4 sm:$0xff]  }
 0x117   :  { %2451 = vmatprep.mubr.bf16.mxu0 %v6299_v17  ;;  %2900 = vmatmul.mubr.bf16.gmra.mxu1 %v6421_v16 }
 0x118   :  { %2907 = vmatprep.mubr.bf16.mxu1 %v6425_v22  ;;  %v6461_v22 = vld [vmem:[#allocation3 + $0x574] ss:$8 sps:$4 sm:$0xff]  }
 0x11e   :  { %v6753_v23 = vpop.f32.mrf.mxu0  ;;  %2452 = vmatmul.mubr.bf16.gmra.mxu0 %v6301_v20  ;;  %v6334_v20 = vld [vmem:[#allocation3 + $0x214] ss:$8 sps:$4 sm:$0xff]  }
 0x11f   :  { %10651 = vst [vmem:[#allocation12_spill] sm:$0xff] %v6753_v23  ;;  %2459 = vmatprep.mubr.bf16.mxu0 %v6302_v21 }
 0x120   :  { %v2263_v25 = vpop.f32.mrf.mxu0 }
 0x121   :  { %v6427_v25 = vld [vmem:[#allocation3 + $0x510] ss:$8 sps:$4 sm:$0xff]  }
 0x122   :  { %v6755_v26 = vpop.f32.mrf.mxu0  ;;  %2908 = vmatmul.mubr.bf16.gmra.mxu1 %v6427_v25 }
 0x123   :  { %10652 = vst [vmem:[#allocation13_spill] sm:$0xff] %v6755_v26 }
 0x124   :  { %v2266_v29 = vpop.f32.mrf.mxu0 }
 0x125   :  { %v6332_v29 = vld [vmem:[#allocation3 + $0x210] ss:$8 sps:$4 sm:$0xff]  }
 0x126   :  { %v6757_v31 = vpop.f32.mrf.mxu0  ;;  %2460 = vmatmul.mubr.bf16.gmra.mxu0 %v6304_v27 }
 0x127   :  { %10653 = vst [vmem:[#allocation14_spill] sm:$0xff] %v6757_v31  ;;  %2467 = vmatprep.mubr.bf16.mxu0 %v6305_v28 }
 0x128   :  { %v2271_v33 = vpop.f32.mrf.mxu0 }
 0x129   :  { %v6431_v33 = vld [vmem:[#allocation3 + $0x524] ss:$8 sps:$4 sm:$0xff]  }
 0x12a   :  { %v6759_v34 = vpop.f32.mrf.mxu0  ;;  %2915 = vmatprep.mubr.bf16.mxu1 %v6431_v33  ;;  %v6376_v33 = vld [vmem:[#allocation3 + $0x284] ss:$8 sps:$4 sm:$0xff]  }
 0x12b   :  { %10654 = vst [vmem:[#allocation15_spill] sm:$0xff] %v6759_v34 }
 0x12c   :  { %v2274_v37 = vpop.f32.mrf.mxu0 }
 0x12e   :  { %v6761_v39 = vpop.f32.mrf.mxu0  ;;  %2468 = vmatmul.mubr.bf16.gmra.mxu0 %v6307_v35 }
 0x12f   :  { %10655 = vst [vmem:[#allocation16_spill] sm:$0xff] %v6761_v39  ;;  %2475 = vmatprep.mubr.bf16.mxu0 %v6308_v36  ;;  %v6433_v36 = vld [vmem:[#allocation3 + $0x520] ss:$8 sps:$4 sm:$0xff]  }
 0x130   :  { %v2279_v41 = vpop.f32.mrf.mxu0  ;;  %2916 = vmatmul.mubr.bf16.gmra.mxu1 %v6433_v36 }
 0x131   :  { %v6346_v41 = vld [vmem:[#allocation3 + $0x234] ss:$8 sps:$4 sm:$0xff]  }
 0x132   :  { %v6763_v42 = vpop.f32.mrf.mxu0 }
 0x133   :  { %10656 = vst [vmem:[#allocation17_spill] sm:$0xff] %v6763_v42 }
 0x134   :  { %v2282_v45 = vpop.f32.mrf.mxu0 }
 0x136   :  { %v6765_v47 = vpop.f32.mrf.mxu0  ;;  %2476 = vmatmul.mubr.bf16.gmra.mxu0 %v6310_v43 }
 0x137   :  { %10657 = vst [vmem:[#allocation18_spill] sm:$0xff] %v6765_v47  ;;  %2483 = vmatprep.mubr.bf16.mxu0 %v6313_v44  ;;  %v6437_v44 = vld [vmem:[#allocation3 + $0x534] ss:$8 sps:$4 sm:$0xff]  }
 0x138   :  { %v2287_v49 = vpop.f32.mrf.mxu0  ;;  %2923 = vmatprep.mubr.bf16.mxu1 %v6437_v44  ;;  %v6815_v44 = vpop.f32.mrf.mxu1 }
 0x139   :  { %2924 = vmatmul.mubr.bf16.gmra.mxu1 %v6439_v46  ;;  %10682 = vst [vmem:[#allocation43_spill] sm:$0xff] %v6815_v44 }
 0x13a   :  { %v6767_v50 = vpop.f32.mrf.mxu0  ;;  %2931 = vmatprep.mubr.bf16.mxu1 %v6443_v54 }
 0x13b   :  { %10658 = vst [vmem:[#allocation19_spill] sm:$0xff] %v6767_v50 }
 0x13c   :  { %v2290_v53 = vpop.f32.mrf.mxu0 }
 0x13e   :  { %v6769_v55 = vpop.f32.mrf.mxu0  ;;  %2484 = vmatmul.mubr.bf16.gmra.mxu0 %v6311_v51  ;;  %v6344_v51 = vld [vmem:[#allocation3 + $0x230] ss:$8 sps:$4 sm:$0xff]  }
 0x13f   :  { %10659 = vst [vmem:[#allocation20_spill] sm:$0xff] %v6769_v55  ;;  %2491 = vmatprep.mubr.bf16.mxu0 %v6316_v52  ;;  %v6352_v52 = vld [vmem:[#allocation3 + $0x244] ss:$8 sps:$4 sm:$0xff]  }
 0x140   :  { %v2295_v57 = vpop.f32.mrf.mxu0 }
 0x141   :  { %v6445_v57 = vld [vmem:[#allocation3 + $0x540] ss:$8 sps:$4 sm:$0xff]  }
 0x142   :  { %v6771_v58 = vpop.f32.mrf.mxu0  ;;  %2932 = vmatmul.mubr.bf16.gmra.mxu1 %v6445_v57  ;;  %v6473_v57 = vld [vmem:[#allocation3 + $0x594] ss:$8 sps:$4 sm:$0xff]  }
 0x143   :  { %10660 = vst [vmem:[#allocation21_spill] sm:$0xff] %v6771_v58 }
 0x144   :  { %v2298_v61 = vpop.f32.mrf.mxu0 }
 0x145   :  { %v6350_v61 = vld [vmem:[#allocation3 + $0x240] ss:$8 sps:$4 sm:$0xff]  }
 0x146   :  { %v6773_v63 = vpop.f32.mrf.mxu0  ;;  %2492 = vmatmul.mubr.bf16.gmra.mxu0 %v6314_v59 }
 0x147   :  { %10661 = vst [vmem:[#allocation22_spill] sm:$0xff] %v6773_v63  ;;  %2499 = vmatprep.mubr.bf16.mxu0 %v6319_v60 }
 0x148   :  { %v2303_v1 = vpop.f32.mrf.mxu0 }
 0x149   :  { %v6449_v1 = vld [vmem:[#allocation3 + $0x554] ss:$8 sps:$4 sm:$0xff]  }
 0x14a   :  { %v6775_v2 = vpop.f32.mrf.mxu0  ;;  %2939 = vmatprep.mubr.bf16.mxu1 %v6449_v1 }
 0x14b   :  { %10662 = vst [vmem:[#allocation23_spill] sm:$0xff] %v6775_v2 }
 0x14c   :  { %v2306_v5 = vpop.f32.mrf.mxu0 }
 0x14e   :  { %v6777_v7 = vpop.f32.mrf.mxu0  ;;  %2500 = vmatmul.mubr.bf16.gmra.mxu0 %v6317_v3 }
 0x14f   :  { %10663 = vst [vmem:[#allocation24_spill] sm:$0xff] %v6777_v7  ;;  %2507 = vmatprep.mubr.bf16.mxu0 %v6322_v4  ;;  %v6451_v4 = vld [vmem:[#allocation3 + $0x550] ss:$8 sps:$4 sm:$0xff]  }
 0x150   :  { %v2311_v9 = vpop.f32.mrf.mxu0  ;;  %2940 = vmatmul.mubr.bf16.gmra.mxu1 %v6451_v4 }
 0x151   :  { %v6364_v9 = vld [vmem:[#allocation3 + $0x264] ss:$8 sps:$4 sm:$0xff]  }
 0x152   :  { %v6779_v10 = vpop.f32.mrf.mxu0 }
 0x153   :  { %10664 = vst [vmem:[#allocation25_spill] sm:$0xff] %v6779_v10 }
 0x154   :  { %v2314_v13 = vpop.f32.mrf.mxu0 }
 0x156   :  { %v6781_v15 = vpop.f32.mrf.mxu0  ;;  %2508 = vmatmul.mubr.bf16.gmra.mxu0 %v6320_v11 }
 0x157   :  { %10665 = vst [vmem:[#allocation26_spill] sm:$0xff] %v6781_v15  ;;  %2515 = vmatprep.mubr.bf16.mxu0 %v6328_v12  ;;  %v6455_v12 = vld [vmem:[#allocation3 + $0x564] ss:$8 sps:$4 sm:$0xff]  }
 0x158   :  { %v2319_v17 = vpop.f32.mrf.mxu0  ;;  %2947 = vmatprep.mubr.bf16.mxu1 %v6455_v12 }
 0x159   :  { %2948 = vmatmul.mubr.bf16.gmra.mxu1 %v6457_v14  ;;  %v6479_v14 = vld [vmem:[#allocation3 + $0x5a4] ss:$8 sps:$4 sm:$0xff]  }
 0x15a   :  { %v6783_v18 = vpop.f32.mrf.mxu0  ;;  %2955 = vmatprep.mubr.bf16.mxu1 %v6461_v22 }
 0x15b   :  { %10666 = vst [vmem:[#allocation27_spill] sm:$0xff] %v6783_v18 }
 0x15c   :  { %v2322_v21 = vpop.f32.mrf.mxu0 }
 0x15e   :  { %v6785_v24 = vpop.f32.mrf.mxu0  ;;  %2516 = vmatmul.mubr.bf16.gmra.mxu0 %v6326_v19  ;;  %v6362_v19 = vld [vmem:[#allocation3 + $0x260] ss:$8 sps:$4 sm:$0xff]  }
 0x15f   :  { %10667 = vst [vmem:[#allocation28_spill] sm:$0xff] %v6785_v24  ;;  %2523 = vmatprep.mubr.bf16.mxu0 %v6334_v20  ;;  %v6370_v20 = vld [vmem:[#allocation3 + $0x274] ss:$8 sps:$4 sm:$0xff]  }
 0x160   :  { %v2327_v27 = vpop.f32.mrf.mxu0 }
 0x161   :  { %v6463_v27 = vld [vmem:[#allocation3 + $0x570] ss:$8 sps:$4 sm:$0xff]  }
 0x162   :  { %v6787_v28 = vpop.f32.mrf.mxu0  ;;  %2956 = vmatmul.mubr.bf16.gmra.mxu1 %v6463_v27 }
 0x163   :  { %10668 = vst [vmem:[#allocation29_spill] sm:$0xff] %v6787_v28 }
 0x164   :  { %v2330_v32 = vpop.f32.mrf.mxu0 }
 0x165   :  { %v6368_v32 = vld [vmem:[#allocation3 + $0x270] ss:$8 sps:$4 sm:$0xff]  }
 0x166   :  { %v6789_v35 = vpop.f32.mrf.mxu0  ;;  %2524 = vmatmul.mubr.bf16.gmra.mxu0 %v6332_v29 }
 0x167   :  { %10669 = vst [vmem:[#allocation30_spill] sm:$0xff] %v6789_v35  ;;  %2531 = vmatprep.mubr.bf16.mxu0 %v6340_v30 }
 0x168   :  { %v2335_v37 = vpop.f32.mrf.mxu0 }
 0x169   :  { %v6467_v37 = vld [vmem:[#allocation3 + $0x584] ss:$8 sps:$4 sm:$0xff]  }
 0x16a   :  { %v6791_v38 = vpop.f32.mrf.mxu0  ;;  %2963 = vmatprep.mubr.bf16.mxu1 %v6467_v37 }
 0x16b   :  { %10670 = vst [vmem:[#allocation31_spill] sm:$0xff] %v6791_v38 }
 0x16c   :  { %v2338_v43 = vpop.f32.mrf.mxu0 }
 0x16e   :  { %v6793_v45 = vpop.f32.mrf.mxu0  ;;  %2532 = vmatmul.mubr.bf16.gmra.mxu0 %v6338_v40 }
 0x16f   :  { %10671 = vst [vmem:[#allocation32_spill] sm:$0xff] %v6793_v45  ;;  %2539 = vmatprep.mubr.bf16.mxu0 %v6346_v41  ;;  %v6469_v41 = vld [vmem:[#allocation3 + $0x580] ss:$8 sps:$4 sm:$0xff]  }
 0x170   :  { %v2343_v48 = vpop.f32.mrf.mxu0  ;;  %2964 = vmatmul.mubr.bf16.gmra.mxu1 %v6469_v41  ;;  %v6485_v41 = vld [vmem:[#allocation3 + $0x5b4] ss:$8 sps:$4 sm:$0xff]  }
 0x171   :  { %v6374_v48 = vld [vmem:[#allocation3 + $0x280] ss:$8 sps:$4 sm:$0xff]   ;;  %2971 = vmatprep.mubr.bf16.mxu1 %v6473_v57 }
 0x172   :  { %v6795_v49 = vpop.f32.mrf.mxu0 }
 0x173   :  { %10672 = vst [vmem:[#allocation33_spill] sm:$0xff] %v6795_v49 }
 0x174   :  { %v2346_v53 = vpop.f32.mrf.mxu0 }
 0x176   :  { %v6797_v56 = vpop.f32.mrf.mxu0  ;;  %2540 = vmatmul.mubr.bf16.gmra.mxu0 %v6344_v51  ;;  %v2775_v51 = vpop.f32.mrf.mxu1 }
 0x177   :  { %10673 = vst [vmem:[#allocation34_spill] sm:$0xff] %v6797_v56  ;;  %2547 = vmatprep.mubr.bf16.mxu0 %v6352_v52  ;;  %v6382_v52 = vld [vmem:[#allocation3 + $0x294] ss:$8 sps:$4 sm:$0xff]   ;;  %v6487_v51 = vld [vmem:[#allocation3 + $0x5b0] ss:$8 sps:$4 sm:$0xff]  }
 0x178   :  { %v2351_v59 = vpop.f32.mrf.mxu0  ;;  %v6819_v54 = vpop.f32.mrf.mxu1 }
 0x179   :  { %10684 = vst [vmem:[#allocation45_spill] sm:$0xff] %v6819_v54 }
 0x17a   :  { %v6799_v60 = vpop.f32.mrf.mxu0 }
 0x17b   :  { %10674 = vst [vmem:[#allocation35_spill] sm:$0xff] %v6799_v60 }
 0x17c   :  { %v2354_v0 = vpop.f32.mrf.mxu0 }
 0x17e   :  { %v6801_v3 = vpop.f32.mrf.mxu0  ;;  %2548 = vmatmul.mubr.bf16.gmra.mxu0 %v6350_v61  ;;  %v2778_v61 = vpop.f32.mrf.mxu1 }
 0x17f   :  { %10675 = vst [vmem:[#allocation36_spill] sm:$0xff] %v6801_v3  ;;  %2555 = vmatprep.mubr.bf16.mxu0 %v6358_v62  ;;  %v6475_v62 = vld [vmem:[#allocation3 + $0x590] ss:$8 sps:$4 sm:$0xff]  }
 0x180   :  { %v2359_v5 = vpop.f32.mrf.mxu0  ;;  %v6823_v1 = vpop.f32.mrf.mxu1  ;;  %2972 = vmatmul.mubr.bf16.gmra.mxu1 %v6475_v62  ;;  %v6392_v61 = vld [vmem:[#allocation3 + $0x2b0] ss:$8 sps:$4 sm:$0xff]  }
 0x181   :  { %10686 = vst [vmem:[#allocation47_spill] sm:$0xff] %v6823_v1  ;;  %v6380_v5 = vld [vmem:[#allocation3 + $0x290] ss:$8 sps:$4 sm:$0xff]   ;;  %2979 = vmatprep.mubr.bf16.mxu1 %v6479_v14 }
 0x182   :  { %v6803_v6 = vpop.f32.mrf.mxu0 }
 0x183   :  { %10676 = vst [vmem:[#allocation37_spill] sm:$0xff] %v6803_v6 }
 0x184   :  { %v2362_v11 = vpop.f32.mrf.mxu0 }
 0x186   :  { %v6805_v13 = vpop.f32.mrf.mxu0  ;;  %2556 = vmatmul.mubr.bf16.gmra.mxu0 %v6356_v8  ;;  %v2783_v8 = vpop.f32.mrf.mxu1 }
 0x187   :  { %10677 = vst [vmem:[#allocation38_spill] sm:$0xff] %v6805_v13  ;;  %2563 = vmatprep.mubr.bf16.mxu0 %v6364_v9  ;;  %v6388_v9 = vld [vmem:[#allocation3 + $0x2a4] ss:$8 sps:$4 sm:$0xff]  }
 0x188   :  { %v2367_v16 = vpop.f32.mrf.mxu0  ;;  %v6827_v12 = vpop.f32.mrf.mxu1 }
 0x189   :  { %10688 = vst [vmem:[#allocation49_spill] sm:$0xff] %v6827_v12 }
 0x18a   :  { %v6807_v17 = vpop.f32.mrf.mxu0 }
 0x18b   :  { %10678 = vst [vmem:[#allocation39_spill] sm:$0xff] %v6807_v17 }
 0x18c   :  { %v2370_v21 = vpop.f32.mrf.mxu0 }
 0x18e   :  { %v6809_v25 = vpop.f32.mrf.mxu0  ;;  %2564 = vmatmul.mubr.bf16.gmra.mxu0 %v6362_v19  ;;  %v2786_v19 = vpop.f32.mrf.mxu1 }
 0x18f   :  { %10679 = vst [vmem:[#allocation40_spill] sm:$0xff] %v6809_v25  ;;  %2571 = vmatprep.mubr.bf16.mxu0 %v6370_v20  ;;  %v6481_v20 = vld [vmem:[#allocation3 + $0x5a0] ss:$8 sps:$4 sm:$0xff]  }
 0x190   :  { %v2375_v29 = vpop.f32.mrf.mxu0  ;;  %v6831_v22 = vpop.f32.mrf.mxu1  ;;  %2980 = vmatmul.mubr.bf16.gmra.mxu1 %v6481_v20  ;;  %v6491_v19 = vld [vmem:[#allocation3 + $0x5c0] ss:$8 sps:$4 sm:$0xff]  }
 0x191   :  { %10690 = vst [vmem:[#allocation51_spill] sm:$0xff] %v6831_v22  ;;  %v6386_v29 = vld [vmem:[#allocation3 + $0x2a0] ss:$8 sps:$4 sm:$0xff]   ;;  %2987 = vmatprep.mubr.bf16.mxu1 %v6485_v41 }
 0x192   :  { %v6811_v30 = vpop.f32.mrf.mxu0 }
 0x193   :  { %10680 = vst [vmem:[#allocation41_spill] sm:$0xff] %v6811_v30 }
 0x194   :  { %v2378_v36 = vpop.f32.mrf.mxu0 }
 0x196   :  { %v6813_v40 = vpop.f32.mrf.mxu0  ;;  %2572 = vmatmul.mubr.bf16.gmra.mxu0 %v6368_v32  ;;  %v2791_v32 = vpop.f32.mrf.mxu1 }
 0x197   :  { %10681 = vst [vmem:[#allocation42_spill] sm:$0xff] %v6813_v40  ;;  %2579 = vmatprep.mubr.bf16.mxu0 %v6376_v33  ;;  %v6394_v33 = vld [vmem:[#allocation3 + $0x2b4] ss:$8 sps:$4 sm:$0xff]   ;;  %v6398_v32 = vld [vmem:[#allocation3 + $0x2c0] ss:$8 sps:$4 sm:$0xff]  }
 0x198   :  { %v2383_v43 = vpop.f32.mrf.mxu0  ;;  %v6835_v37 = vpop.f32.mrf.mxu1  ;;  %2988 = vmatmul.mubr.bf16.gmra.mxu1 %v6487_v51  ;;  %v6499_v51 = vld [vmem:[#allocation3 + $0x5d4] ss:$8 sps:$4 sm:$0xff]  }
 0x199   :  { %10692 = vst [vmem:[#allocation53_spill] sm:$0xff] %v6835_v37 }
 0x19a   :  { %v6817_v46 = vpop.f32.mrf.mxu0 }
 0x19b   :  { %10683 = vst [vmem:[#allocation44_spill] sm:$0xff] %v6817_v46 }
 0x19c   :  { %v2386_v53 = vpop.f32.mrf.mxu0 }
 0x19e   :  { %v6821_v59 = vpop.f32.mrf.mxu0  ;;  %2580 = vmatmul.mubr.bf16.gmra.mxu0 %v6374_v48  ;;  %v2794_v48 = vpop.f32.mrf.mxu1 }
 0x19f   :  { %10685 = vst [vmem:[#allocation46_spill] sm:$0xff] %v6821_v59  ;;  %2587 = vmatprep.mubr.bf16.mxu0 %v6382_v52 }
 0x1a0   :  { %v2391_v0 = vpop.f32.mrf.mxu0  ;;  %v6839_v53 = vpop.f32.mrf.mxu1 }
 0x1a1   :  { %10694 = vst [vmem:[#allocation55_spill] sm:$0xff] %v6839_v53  ;;  %v6400_v0 = vld [vmem:[#allocation3 + $0x2c4] ss:$8 sps:$4 sm:$0xff]  }
 0x1a2   :  { %v6825_v4 = vpop.f32.mrf.mxu0  ;;  %v2799_v62 = vpop.f32.mrf.mxu1 }
 0x1a3   :  { %10687 = vst [vmem:[#allocation48_spill] sm:$0xff] %v6825_v4  ;;  %v6497_v62 = vld [vmem:[#allocation3 + $0x5d0] ss:$8 sps:$4 sm:$0xff]  }
 0x1a4   :  { %v2394_v11 = vpop.f32.mrf.mxu0  ;;  %v6843_v8 = vpop.f32.mrf.mxu1 }
 0x1a5   :  { %10696 = vst [vmem:[#allocation57_spill] sm:$0xff] %v6843_v8 }
 0x1a6   :  { %v6829_v16 = vpop.f32.mrf.mxu0  ;;  %2588 = vmatmul.mubr.bf16.gmra.mxu0 %v6380_v5  ;;  %v2802_v14 = vpop.f32.mrf.mxu1 }
 0x1a7   :  { %10689 = vst [vmem:[#allocation50_spill] sm:$0xff] %v6829_v16  ;;  %2595 = vmatprep.mubr.bf16.mxu0 %v6388_v9  ;;  %v6493_v9 = vld [vmem:[#allocation3 + $0x5c4] ss:$8 sps:$4 sm:$0xff]   ;;  %v6404_v14 = vld [vmem:[#allocation3 + $0x2d0] ss:$8 sps:$4 sm:$0xff]  }
 0x1a8   :  { %v2399_v21 = vpop.f32.mrf.mxu0  ;;  %2995 = vmatprep.mubr.bf16.mxu1 %v6493_v9 }
 0x1a9   :  { %v6847_v21 = vpop.f32.mrf.mxu1  ;;  %2996 = vmatmul.mubr.bf16.gmra.mxu1 %v6491_v19 }
 0x1aa   :  { %v6833_v27 = vpop.f32.mrf.mxu0  ;;  %10698 = vst [vmem:[#allocation59_spill] sm:$0xff] %v6847_v21  ;;  %3003 = vmatprep.mubr.bf16.mxu1 %v6499_v51 }
 0x1ab   :  { %10691 = vst [vmem:[#allocation52_spill] sm:$0xff] %v6833_v27 }
 0x1ac   :  { %v2402_v36 = vpop.f32.mrf.mxu0 }
 0x1ad   :  { %v6406_v36 = vld [vmem:[#allocation3 + $0x2d4] ss:$8 sps:$4 sm:$0xff]  }
 0x1ae   :  { %v6837_v43 = vpop.f32.mrf.mxu0  ;;  %2596 = vmatmul.mubr.bf16.gmra.mxu0 %v6386_v29 }
 0x1af   :  { %10693 = vst [vmem:[#allocation54_spill] sm:$0xff] %v6837_v43  ;;  %2603 = vmatprep.mubr.bf16.mxu0 %v6394_v33  ;;  %v2807_v33 = vpop.f32.mrf.mxu1 }
 0x1b0   :  { %v2407_v52 = vpop.f32.mrf.mxu0 }
 0x1b1   :  { %v6851_v48 = vpop.f32.mrf.mxu1  ;;  %3004 = vmatmul.mubr.bf16.gmra.mxu1 %v6497_v62 }
 0x1b2   :  { %v6841_v57 = vpop.f32.mrf.mxu0  ;;  %10700 = vst [vmem:[#allocation61_spill] sm:$0xff] %v6851_v48  ;;  %v6505_v48 = vld [vmem:[#allocation3 + $0x5e4] ss:$8 sps:$4 sm:$0xff]  }
 0x1b3   :  { %10695 = vst [vmem:[#allocation56_spill] sm:$0xff] %v6841_v57  ;;  %3011 = vmatprep.mubr.bf16.mxu1 %v6505_v48 }
 0x1b4   :  { %v2410_v5 = vpop.f32.mrf.mxu0 }
 0x1b6   :  { %v6845_v11 = vpop.f32.mrf.mxu0  ;;  %2604 = vmatmul.mubr.bf16.gmra.mxu0 %v6392_v61  ;;  %v2810_v61 = vpop.f32.mrf.mxu1 }
 0x1b7   :  { %10697 = vst [vmem:[#allocation58_spill] sm:$0xff] %v6845_v11  ;;  %2611 = vmatprep.mubr.bf16.mxu0 %v6400_v0  ;;  %v6503_v61 = vld [vmem:[#allocation3 + $0x5e0] ss:$8 sps:$4 sm:$0xff]  }
 0x1b8   :  { %v2415_v20 = vpop.f32.mrf.mxu0  ;;  %v6855_v5 = vpop.f32.mrf.mxu1 }
 0x1b9   :  { %10702 = vst [vmem:[#allocation63_spill] sm:$0xff] %v6855_v5  ;;  %v6412_v20 = vld [vmem:[#allocation3 + $0x2e4] ss:$8 sps:$4 sm:$0xff]   ;;  %3012 = vmatmul.mubr.bf16.gmra.mxu1 %v6503_v61  ;;  %v6418_v5 = vld [vmem:[#allocation3 + $0x2f4] ss:$8 sps:$4 sm:$0xff]  }
 0x1ba   :  { %v6849_v29 = vpop.f32.mrf.mxu0  ;;  %v2815_v19 = vpop.f32.mrf.mxu1 }
 0x1bb   :  { %10699 = vst [vmem:[#allocation60_spill] sm:$0xff] %v6849_v29 }
 0x1bc   :  { %v2418_v41 = vpop.f32.mrf.mxu0 }
 0x1bd   :  { %v6859_v41 = vpop.f32.mrf.mxu1 }
 0x1be   :  { %v6853_v52 = vpop.f32.mrf.mxu0  ;;  %2612 = vmatmul.mubr.bf16.gmra.mxu0 %v6398_v32  ;;  %10704 = vst [vmem:[#allocation65_spill] sm:$0xff] %v6859_v41  ;;  %v6511_v41 = vld [vmem:[#allocation3 + $0x5f4] ss:$8 sps:$4 sm:$0xff]  }
 0x1bf   :  { %10701 = vst [vmem:[#allocation62_spill] sm:$0xff] %v6853_v52  ;;  %2619 = vmatprep.mubr.bf16.mxu0 %v6406_v36  ;;  %v2818_v32 = vpop.f32.mrf.mxu1  ;;  %3019 = vmatprep.mubr.bf16.mxu1 %v6511_v41 }
 0x1c0   :  { %v2423_v0 = vpop.f32.mrf.mxu0  ;;  %v6509_v32 = vld [vmem:[#allocation3 + $0x5f0] ss:$8 sps:$4 sm:$0xff]  }
 0x1c1   :  { %v6863_v51 = vpop.f32.mrf.mxu1  ;;  %v6410_v0 = vld [vmem:[#allocation3 + $0x2e0] ss:$8 sps:$4 sm:$0xff]   ;;  %3020 = vmatmul.mubr.bf16.gmra.mxu1 %v6509_v32 }
 0x1c2   :  { %v6857_v9 = vpop.f32.mrf.mxu0  ;;  %10706 = vst [vmem:[#allocation67_spill] sm:$0xff] %v6863_v51  ;;  %v6424_v51 = vld [vmem:[#allocation3 + $0x304] ss:$8 sps:$4 sm:$0xff]  }
 0x1c3   :  { %10703 = vst [vmem:[#allocation64_spill] sm:$0xff] %v6857_v9  ;;  %v2823_v19 = vpop.f32.mrf.mxu1 }
 0x1c4   :  { %v2426_v33 = vpop.f32.mrf.mxu0 }
 0x1c5   :  { %v6867_v8 = vpop.f32.mrf.mxu1 }
 0x1c6   :  { %v6861_v21 = vpop.f32.mrf.mxu0  ;;  %2620 = vmatmul.mubr.bf16.gmra.mxu0 %v6404_v14  ;;  %10708 = vst [vmem:[#allocation69_spill] sm:$0xff] %v6867_v8  ;;  %v6517_v8 = vld [vmem:[#allocation3 + $0x604] ss:$8 sps:$4 sm:$0xff]  }
 0x1c7   :  { %10705 = vst [vmem:[#allocation66_spill] sm:$0xff] %v6861_v21  ;;  %2627 = vmatprep.mubr.bf16.mxu0 %v6412_v20  ;;  %v2826_v14 = vpop.f32.mrf.mxu1  ;;  %3027 = vmatprep.mubr.bf16.mxu1 %v6517_v8 }
 0x1c8   :  { %v2431_v36 = vpop.f32.mrf.mxu0  ;;  %v6515_v14 = vld [vmem:[#allocation3 + $0x600] ss:$8 sps:$4 sm:$0xff]  }
 0x1c9   :  { %v6871_v20 = vpop.f32.mrf.mxu1  ;;  %v6416_v36 = vld [vmem:[#allocation3 + $0x2f0] ss:$8 sps:$4 sm:$0xff]   ;;  %3028 = vmatmul.mubr.bf16.gmra.mxu1 %v6515_v14 }
 0x1ca   :  { %v6865_v62 = vpop.f32.mrf.mxu0  ;;  %10710 = vst [vmem:[#allocation71_spill] sm:$0xff] %v6871_v20  ;;  %v6430_v20 = vld [vmem:[#allocation3 + $0x314] ss:$8 sps:$4 sm:$0xff]  }
 0x1cb   :  { %10707 = vst [vmem:[#allocation68_spill] sm:$0xff] %v6865_v62  ;;  %v2831_v19 = vpop.f32.mrf.mxu1 }
 0x1cc   :  { %v2434_v33 = vpop.f32.mrf.mxu0 }
 0x1cd   :  { %v6875_v37 = vpop.f32.mrf.mxu1 }
 0x1ce   :  { %v6869_v53 = vpop.f32.mrf.mxu0  ;;  %2628 = vmatmul.mubr.bf16.gmra.mxu0 %v6410_v0  ;;  %10712 = vst [vmem:[#allocation73_spill] sm:$0xff] %v6875_v37  ;;  %v6520_v37 = vld [vmem:[#allocation3 + $0x614] ss:$8 sps:$4 sm:$0xff]  }
 0x1cf   :  { %10709 = vst [vmem:[#allocation70_spill] sm:$0xff] %v6869_v53  ;;  %2635 = vmatprep.mubr.bf16.mxu0 %v6418_v5  ;;  %v2834_v0 = vpop.f32.mrf.mxu1  ;;  %3035 = vmatprep.mubr.bf16.mxu1 %v6520_v37 }
 0x1d0   :  { %v2439_v48 = vpop.f32.mrf.mxu0  ;;  %v6518_v0 = vld [vmem:[#allocation3 + $0x610] ss:$8 sps:$4 sm:$0xff]  }
 0x1d1   :  { %v6879_v41 = vpop.f32.mrf.mxu1  ;;  %v6422_v48 = vld [vmem:[#allocation3 + $0x300] ss:$8 sps:$4 sm:$0xff]   ;;  %3036 = vmatmul.mubr.bf16.gmra.mxu1 %v6518_v0 }
 0x1d2   :  { %v6873_v61 = vpop.f32.mrf.mxu0  ;;  %10714 = vst [vmem:[#allocation75_spill] sm:$0xff] %v6879_v41  ;;  %v6436_v41 = vld [vmem:[#allocation3 + $0x324] ss:$8 sps:$4 sm:$0xff]  }
 0x1d3   :  { %10711 = vst [vmem:[#allocation72_spill] sm:$0xff] %v6873_v61  ;;  %v2839_v19 = vpop.f32.mrf.mxu1 }
 0x1d4   :  { %v2442_v33 = vpop.f32.mrf.mxu0 }
 0x1d5   :  { %v6883_v12 = vpop.f32.mrf.mxu1 }
 0x1d6   :  { %v6877_v22 = vpop.f32.mrf.mxu0  ;;  %2636 = vmatmul.mubr.bf16.gmra.mxu0 %v6416_v36  ;;  %10716 = vst [vmem:[#allocation77_spill] sm:$0xff] %v6883_v12  ;;  %v6523_v12 = vld [vmem:[#allocation3 + $0x624] ss:$8 sps:$4 sm:$0xff]  }
 0x1d7   :  { %10713 = vst [vmem:[#allocation74_spill] sm:$0xff] %v6877_v22  ;;  %2643 = vmatprep.mubr.bf16.mxu0 %v6424_v51  ;;  %v2842_v36 = vpop.f32.mrf.mxu1  ;;  %3043 = vmatprep.mubr.bf16.mxu1 %v6523_v12 }
 0x1d8   :  { %v2447_v5 = vpop.f32.mrf.mxu0  ;;  %v6521_v36 = vld [vmem:[#allocation3 + $0x620] ss:$8 sps:$4 sm:$0xff]  }
 0x1d9   :  { %v6887_v51 = vpop.f32.mrf.mxu1  ;;  %v6428_v5 = vld [vmem:[#allocation3 + $0x310] ss:$8 sps:$4 sm:$0xff]   ;;  %3044 = vmatmul.mubr.bf16.gmra.mxu1 %v6521_v36 }
 0x1da   :  { %v6881_v32 = vpop.f32.mrf.mxu0  ;;  %10718 = vst [vmem:[#allocation79_spill] sm:$0xff] %v6887_v51  ;;  %v6442_v51 = vld [vmem:[#allocation3 + $0x334] ss:$8 sps:$4 sm:$0xff]  }
 0x1db   :  { %10715 = vst [vmem:[#allocation76_spill] sm:$0xff] %v6881_v32  ;;  %v2847_v19 = vpop.f32.mrf.mxu1 }
 0x1dc   :  { %v2450_v33 = vpop.f32.mrf.mxu0 }
 0x1dd   :  { %v6891_v54 = vpop.f32.mrf.mxu1 }
 0x1de   :  { %v6885_v1 = vpop.f32.mrf.mxu0  ;;  %2644 = vmatmul.mubr.bf16.gmra.mxu0 %v6422_v48  ;;  %10720 = vst [vmem:[#allocation81_spill] sm:$0xff] %v6891_v54  ;;  %v6526_v54 = vld [vmem:[#allocation3 + $0x634] ss:$8 sps:$4 sm:$0xff]  }
 0x1df   :  { %10717 = vst [vmem:[#allocation78_spill] sm:$0xff] %v6885_v1  ;;  %2651 = vmatprep.mubr.bf16.mxu0 %v6430_v20  ;;  %v2850_v48 = vpop.f32.mrf.mxu1  ;;  %3051 = vmatprep.mubr.bf16.mxu1 %v6526_v54 }
 0x1e0   :  { %v2455_v8 = vpop.f32.mrf.mxu0  ;;  %v6524_v48 = vld [vmem:[#allocation3 + $0x630] ss:$8 sps:$4 sm:$0xff]  }
 0x1e1   :  { %v6895_v20 = vpop.f32.mrf.mxu1  ;;  %v6434_v8 = vld [vmem:[#allocation3 + $0x320] ss:$8 sps:$4 sm:$0xff]   ;;  %3052 = vmatmul.mubr.bf16.gmra.mxu1 %v6524_v48 }
 0x1e2   :  { %v6889_v14 = vpop.f32.mrf.mxu0  ;;  %10722 = vst [vmem:[#allocation83_spill] sm:$0xff] %v6895_v20  ;;  %v6448_v20 = vld [vmem:[#allocation3 + $0x344] ss:$8 sps:$4 sm:$0xff]  }
 0x1e3   :  { %10719 = vst [vmem:[#allocation80_spill] sm:$0xff] %v6889_v14  ;;  %v2855_v19 = vpop.f32.mrf.mxu1 }
 0x1e4   :  { %v2458_v33 = vpop.f32.mrf.mxu0 }
 0x1e5   :  { %v6899_v14 = vpop.f32.mrf.mxu1 }
 0x1e6   :  { %v6893_v44 = vpop.f32.mrf.mxu0  ;;  %2652 = vmatmul.mubr.bf16.gmra.mxu0 %v6428_v5  ;;  %10724 = vst [vmem:[#allocation85_spill] sm:$0xff] %v6899_v14  ;;  %v6529_v14 = vld [vmem:[#allocation3 + $0x644] ss:$8 sps:$4 sm:$0xff]  }
 0x1e7   :  { %10721 = vst [vmem:[#allocation82_spill] sm:$0xff] %v6893_v44  ;;  %2659 = vmatprep.mubr.bf16.mxu0 %v6436_v41  ;;  %v2858_v5 = vpop.f32.mrf.mxu1  ;;  %3059 = vmatprep.mubr.bf16.mxu1 %v6529_v14 }
 0x1e8   :  { %v2463_v37 = vpop.f32.mrf.mxu0  ;;  %v6527_v5 = vld [vmem:[#allocation3 + $0x640] ss:$8 sps:$4 sm:$0xff]  }
 0x1e9   :  { %v6903_v41 = vpop.f32.mrf.mxu1  ;;  %v6440_v37 = vld [vmem:[#allocation3 + $0x330] ss:$8 sps:$4 sm:$0xff]   ;;  %3060 = vmatmul.mubr.bf16.gmra.mxu1 %v6527_v5 }
 0x1ea   :  { %v6897_v0 = vpop.f32.mrf.mxu0  ;;  %10726 = vst [vmem:[#allocation87_spill] sm:$0xff] %v6903_v41  ;;  %v6454_v41 = vld [vmem:[#allocation3 + $0x354] ss:$8 sps:$4 sm:$0xff]  }
 0x1eb   :  { %10723 = vst [vmem:[#allocation84_spill] sm:$0xff] %v6897_v0  ;;  %v2863_v19 = vpop.f32.mrf.mxu1 }
 0x1ec   :  { %v2466_v33 = vpop.f32.mrf.mxu0 }
 0x1ed   :  { %v6907_v0 = vpop.f32.mrf.mxu1 }
 0x1ee   :  { %v6901_v1 = vpop.f32.mrf.mxu0  ;;  %2660 = vmatmul.mubr.bf16.gmra.mxu0 %v6434_v8  ;;  %10728 = vst [vmem:[#allocation89_spill] sm:$0xff] %v6907_v0  ;;  %v6532_v0 = vld [vmem:[#allocation3 + $0x654] ss:$8 sps:$4 sm:$0xff]  }
 0x1ef   :  { %10725 = vst [vmem:[#allocation86_spill] sm:$0xff] %v6901_v1  ;;  %2667 = vmatprep.mubr.bf16.mxu0 %v6442_v51  ;;  %v2866_v8 = vpop.f32.mrf.mxu1  ;;  %3067 = vmatprep.mubr.bf16.mxu1 %v6532_v0 }
 0x1f0   :  { %v2471_v12 = vpop.f32.mrf.mxu0  ;;  %v6530_v8 = vld [vmem:[#allocation3 + $0x650] ss:$8 sps:$4 sm:$0xff]  }
 0x1f1   :  { %v6911_v51 = vpop.f32.mrf.mxu1  ;;  %v6446_v12 = vld [vmem:[#allocation3 + $0x340] ss:$8 sps:$4 sm:$0xff]   ;;  %3068 = vmatmul.mubr.bf16.gmra.mxu1 %v6530_v8 }
 0x1f2   :  { %v6905_v36 = vpop.f32.mrf.mxu0  ;;  %10730 = vst [vmem:[#allocation91_spill] sm:$0xff] %v6911_v51  ;;  %v6460_v51 = vld [vmem:[#allocation3 + $0x364] ss:$8 sps:$4 sm:$0xff]  }
 0x1f3   :  { %10727 = vst [vmem:[#allocation88_spill] sm:$0xff] %v6905_v36  ;;  %v2871_v19 = vpop.f32.mrf.mxu1 }
 0x1f4   :  { %v2474_v33 = vpop.f32.mrf.mxu0 }
 0x1f5   :  { %v6915_v36 = vpop.f32.mrf.mxu1 }
 0x1f6   :  { %v6909_v44 = vpop.f32.mrf.mxu0  ;;  %2668 = vmatmul.mubr.bf16.gmra.mxu0 %v6440_v37  ;;  %10732 = vst [vmem:[#allocation93_spill] sm:$0xff] %v6915_v36  ;;  %v6535_v36 = vld [vmem:[#allocation3 + $0x664] ss:$8 sps:$4 sm:$0xff]  }
 0x1f7   :  { %10729 = vst [vmem:[#allocation90_spill] sm:$0xff] %v6909_v44  ;;  %2675 = vmatprep.mubr.bf16.mxu0 %v6448_v20  ;;  %v2874_v37 = vpop.f32.mrf.mxu1  ;;  %3075 = vmatprep.mubr.bf16.mxu1 %v6535_v36 }
 0x1f8   :  { %v2479_v54 = vpop.f32.mrf.mxu0  ;;  %v6533_v37 = vld [vmem:[#allocation3 + $0x660] ss:$8 sps:$4 sm:$0xff]  }
 0x1f9   :  { %v6919_v20 = vpop.f32.mrf.mxu1  ;;  %v6452_v54 = vld [vmem:[#allocation3 + $0x350] ss:$8 sps:$4 sm:$0xff]   ;;  %3076 = vmatmul.mubr.bf16.gmra.mxu1 %v6533_v37 }
 0x1fa   :  { %v6913_v48 = vpop.f32.mrf.mxu0  ;;  %10734 = vst [vmem:[#allocation95_spill] sm:$0xff] %v6919_v20  ;;  %v6466_v20 = vld [vmem:[#allocation3 + $0x374] ss:$8 sps:$4 sm:$0xff]  }
 0x1fb   :  { %10731 = vst [vmem:[#allocation92_spill] sm:$0xff] %v6913_v48  ;;  %v2879_v19 = vpop.f32.mrf.mxu1 }
 0x1fc   :  { %v2482_v33 = vpop.f32.mrf.mxu0 }
 0x1fd   :  { %v6923_v48 = vpop.f32.mrf.mxu1 }
 0x1fe   :  { %v6917_v1 = vpop.f32.mrf.mxu0  ;;  %2676 = vmatmul.mubr.bf16.gmra.mxu0 %v6446_v12  ;;  %10736 = vst [vmem:[#allocation97_spill] sm:$0xff] %v6923_v48  ;;  %v6538_v48 = vld [vmem:[#allocation3 + $0x674] ss:$8 sps:$4 sm:$0xff]  }
 0x1ff   :  { %10733 = vst [vmem:[#allocation94_spill] sm:$0xff] %v6917_v1  ;;  %2683 = vmatprep.mubr.bf16.mxu0 %v6454_v41  ;;  %v2882_v12 = vpop.f32.mrf.mxu1  ;;  %3083 = vmatprep.mubr.bf16.mxu1 %v6538_v48 }
 0x200   :  { %v2487_v14 = vpop.f32.mrf.mxu0  ;;  %v6536_v12 = vld [vmem:[#allocation3 + $0x670] ss:$8 sps:$4 sm:$0xff]  }
 0x201   :  { %v6927_v41 = vpop.f32.mrf.mxu1  ;;  %v6458_v14 = vld [vmem:[#allocation3 + $0x360] ss:$8 sps:$4 sm:$0xff]   ;;  %3084 = vmatmul.mubr.bf16.gmra.mxu1 %v6536_v12 }
 0x202   :  { %v6921_v5 = vpop.f32.mrf.mxu0  ;;  %10738 = vst [vmem:[#allocation99_spill] sm:$0xff] %v6927_v41  ;;  %v6472_v41 = vld [vmem:[#allocation3 + $0x384] ss:$8 sps:$4 sm:$0xff]  }
 0x203   :  { %10735 = vst [vmem:[#allocation96_spill] sm:$0xff] %v6921_v5  ;;  %v2887_v19 = vpop.f32.mrf.mxu1 }
 0x204   :  { %v2490_v33 = vpop.f32.mrf.mxu0 }
 0x205   :  { %v6931_v5 = vpop.f32.mrf.mxu1 }
 0x206   :  { %v6925_v44 = vpop.f32.mrf.mxu0  ;;  %2684 = vmatmul.mubr.bf16.gmra.mxu0 %v6452_v54  ;;  %10740 = vst [vmem:[#allocation101_spill] sm:$0xff] %v6931_v5  ;;  %v6541_v5 = vld [vmem:[#allocation3 + $0x684] ss:$8 sps:$4 sm:$0xff]  }
 0x207   :  { %10737 = vst [vmem:[#allocation98_spill] sm:$0xff] %v6925_v44  ;;  %2691 = vmatprep.mubr.bf16.mxu0 %v6460_v51  ;;  %v2890_v54 = vpop.f32.mrf.mxu1  ;;  %3091 = vmatprep.mubr.bf16.mxu1 %v6541_v5 }
 0x208   :  { %v2495_v0 = vpop.f32.mrf.mxu0  ;;  %v6539_v54 = vld [vmem:[#allocation3 + $0x680] ss:$8 sps:$4 sm:$0xff]  }
 0x209   :  { %v6935_v51 = vpop.f32.mrf.mxu1  ;;  %v6464_v0 = vld [vmem:[#allocation3 + $0x370] ss:$8 sps:$4 sm:$0xff]   ;;  %3092 = vmatmul.mubr.bf16.gmra.mxu1 %v6539_v54  ;;  %v4319_v54 = vmul.f32 %v6753_v23, %v6753_v23 }
 0x20a   :  { %v6929_v8 = vpop.f32.mrf.mxu0  ;;  %10742 = vst [vmem:[#allocation103_spill] sm:$0xff] %v6935_v51  ;;  %v6478_v51 = vld [vmem:[#allocation3 + $0x394] ss:$8 sps:$4 sm:$0xff]  }
 0x20b   :  { %10739 = vst [vmem:[#allocation100_spill] sm:$0xff] %v6929_v8  ;;  %v2895_v19 = vpop.f32.mrf.mxu1 }
 0x20c   :  { %v2498_v33 = vpop.f32.mrf.mxu0 }
 0x20d   :  { %v6939_v8 = vpop.f32.mrf.mxu1 }
 0x20e   :  { %v6933_v1 = vpop.f32.mrf.mxu0  ;;  %2692 = vmatmul.mubr.bf16.gmra.mxu0 %v6458_v14  ;;  %10744 = vst [vmem:[#allocation105_spill] sm:$0xff] %v6939_v8  ;;  %v4320_v8 = vmul.f32 %v6755_v26, %v6755_v26 }
 0x20f   :  { %10741 = vst [vmem:[#allocation102_spill] sm:$0xff] %v6933_v1  ;;  %2699 = vmatprep.mubr.bf16.mxu0 %v6466_v20  ;;  %v2898_v14 = vpop.f32.mrf.mxu1 }
 0x210   :  { %v2503_v36 = vpop.f32.mrf.mxu0 }
 0x211   :  { %v6943_v20 = vpop.f32.mrf.mxu1  ;;  %v6470_v36 = vld [vmem:[#allocation3 + $0x380] ss:$8 sps:$4 sm:$0xff]  }
 0x212   :  { %v6937_v37 = vpop.f32.mrf.mxu0  ;;  %10746 = vst [vmem:[#allocation107_spill] sm:$0xff] %v6943_v20  ;;  %v4575_v20 = vadd.f32 %v4320_v8, %v4319_v54  ;;  %v4324_v54 = vmul.f32 %v6763_v42, %v6763_v42 }
 0x213   :  { %10743 = vst [vmem:[#allocation104_spill] sm:$0xff] %v6937_v37  ;;  %v2903_v19 = vpop.f32.mrf.mxu1 }
 0x214   :  { %v2506_v33 = vpop.f32.mrf.mxu0  ;;  %v4321_v19 = vmul.f32 %v6757_v31, %v6757_v31 }
 0x215   :  { %v6947_v37 = vpop.f32.mrf.mxu1 }
 0x216   :  { %v6941_v44 = vpop.f32.mrf.mxu0  ;;  %2700 = vmatmul.mubr.bf16.gmra.mxu0 %v6464_v0  ;;  %10748 = vst [vmem:[#allocation109_spill] sm:$0xff] %v6947_v37  ;;  %v6544_v0 = vld [vmem:[#allocation3 + $0x694] ss:$8 sps:$4 sm:$0xff]  }
 0x217   :  { %10745 = vst [vmem:[#allocation106_spill] sm:$0xff] %v6941_v44  ;;  %2707 = vmatprep.mubr.bf16.mxu0 %v6472_v41  ;;  %v2906_v5 = vpop.f32.mrf.mxu1  ;;  %v6542_v41 = vld [vmem:[#allocation3 + $0x690] ss:$8 sps:$4 sm:$0xff]   ;;  %3099 = vmatprep.mubr.bf16.mxu1 %v6544_v0  ;;  %v6484_v0 = vld [vmem:[#allocation3 + $0x3a4] ss:$8 sps:$4 sm:$0xff]  }
 0x218   :  { %v2511_v48 = vpop.f32.mrf.mxu0  ;;  %3100 = vmatmul.mubr.bf16.gmra.mxu1 %v6542_v41  ;;  %v4322_v5 = vmul.f32 %v6759_v34, %v6759_v34 }
 0x219   :  { %v4057_v48 = vadd.f32 %v6755_v26, %v6753_v23  ;;  %v6959_v37 = vpop.f32.mrf.mxu1  ;;  %v4576_v26 = vadd.f32 %v4575_v20, %v4321_v19  ;;  %v6545_v20 = vld [vmem:[#allocation3 + $0x6a0] ss:$8 sps:$4 sm:$0xff]  }
 0x21a   :  { %v6945_v12 = vpop.f32.mrf.mxu0  ;;  %10750 = vst [vmem:[#allocation111_spill] sm:$0xff] %v6959_v37 }
 0x21b   :  { %10747 = vst [vmem:[#allocation108_spill] sm:$0xff] %v6945_v12  ;;  %v6476_v12 = vld [vmem:[#allocation3 + $0x390] ss:$8 sps:$4 sm:$0xff]   ;;  %v2911_v44 = vpop.f32.mrf.mxu1  ;;  %v4577_v8 = vadd.f32 %v4576_v26, %v4322_v5 }
 0x21c   :  { %v2514_v33 = vpop.f32.mrf.mxu0 }
 0x21d   :  { %v6969_v37 = vpop.f32.mrf.mxu1 }
 0x21e   :  { %v6951_v14 = vpop.f32.mrf.mxu0  ;;  %2708 = vmatmul.mubr.bf16.gmra.mxu0 %v6470_v36  ;;  %v4058_v36 = vadd.f32 %v4057_v48, %v6757_v31  ;;  %10752 = vst [vmem:[#allocation113_spill] sm:$0xff] %v6969_v37  ;;  %v6547_v48 = vld [vmem:[#allocation3 + $0x6a4] ss:$8 sps:$4 sm:$0xff]  }
 0x21f   :  { %10749 = vst [vmem:[#allocation110_spill] sm:$0xff] %v6951_v14  ;;  %2715 = vmatprep.mubr.bf16.mxu0 %v6478_v51  ;;  %v4323_v51 = vmul.f32 %v6761_v39, %v6761_v39  ;;  %v2914_v44 = vpop.f32.mrf.mxu1  ;;  %3107 = vmatprep.mubr.bf16.mxu1 %v6547_v48  ;;  %v6490_v48 = vld [vmem:[#allocation3 + $0x3b4] ss:$8 sps:$4 sm:$0xff]  }
 0x220   :  { %v2519_v33 = vpop.f32.mrf.mxu0  ;;  %v4059_v23 = vadd.f32 %v4058_v36, %v6759_v34  ;;  %3108 = vmatmul.mubr.bf16.gmra.mxu1 %v6545_v20 }
 0x221   :  { %v4578_v19 = vadd.f32 %v4577_v8, %v4323_v51  ;;  %v6979_v5 = vpop.f32.mrf.mxu1  ;;  %v6482_v51 = vld [vmem:[#allocation3 + $0x3a0] ss:$8 sps:$4 sm:$0xff]  }
 0x222   :  { %v6964_v14 = vpop.f32.mrf.mxu0  ;;  %v4060_v41 = vadd.f32 %v4059_v23, %v6761_v39  ;;  %10754 = vst [vmem:[#allocation115_spill] sm:$0xff] %v6979_v5 }
 0x223   :  { %10751 = vst [vmem:[#allocation112_spill] sm:$0xff] %v6964_v14  ;;  %v4579_v23 = vadd.f32 %v4578_v19, %v4324_v54  ;;  %v2919_v8 = vpop.f32.mrf.mxu1  ;;  %v4328_v19 = vmul.f32 %v6771_v58, %v6771_v58 }
 0x224   :  { %v2522_v33 = vpop.f32.mrf.mxu0  ;;  %v4061_v36 = vadd.f32 %v4060_v41, %v6763_v42 }
 0x225   :  { %v4325_v33 = vmul.f32 %v6765_v47, %v6765_v47  ;;  %v6989_v34 = vpop.f32.mrf.mxu1 }
 0x226   :  { %v6974_v31 = vpop.f32.mrf.mxu0  ;;  %2716 = vmatmul.mubr.bf16.gmra.mxu0 %v6476_v12  ;;  %v4062_v39 = vadd.f32 %v4061_v36, %v6765_v47  ;;  %v4326_v12 = vmul.f32 %v6767_v50, %v6767_v50  ;;  %10756 = vst [vmem:[#allocation117_spill] sm:$0xff] %v6989_v34  ;;  %v6550_v36 = vld [vmem:[#allocation3 + $0x6b4] ss:$8 sps:$4 sm:$0xff]  }
 0x227   :  { %10753 = vst [vmem:[#allocation114_spill] sm:$0xff] %v6974_v31  ;;  %2723 = vmatprep.mubr.bf16.mxu0 %v6484_v0  ;;  %v4580_v41 = vadd.f32 %v4579_v23, %v4325_v33  ;;  %v4327_v0 = vmul.f32 %v6769_v55, %v6769_v55  ;;  %v2922_v33 = vpop.f32.mrf.mxu1  ;;  %v6548_v23 = vld [vmem:[#allocation3 + $0x6b0] ss:$8 sps:$4 sm:$0xff]   ;;  %3115 = vmatprep.mubr.bf16.mxu1 %v6550_v36  ;;  %v6496_v36 = vld [vmem:[#allocation3 + $0x3c4] ss:$8 sps:$4 sm:$0xff]  }
 0x228   :  { %v2527_v26 = vpop.f32.mrf.mxu0  ;;  %v4063_v42 = vadd.f32 %v4062_v39, %v6767_v50  ;;  %3116 = vmatmul.mubr.bf16.gmra.mxu1 %v6548_v23 }
 0x229   :  { %v4581_v54 = vadd.f32 %v4580_v41, %v4326_v12  ;;  %v6999_v41 = vpop.f32.mrf.mxu1 }
 0x22a   :  { %v6984_v44 = vpop.f32.mrf.mxu0  ;;  %v4064_v20 = vadd.f32 %v4063_v42, %v6769_v55  ;;  %10758 = vst [vmem:[#allocation119_spill] sm:$0xff] %v6999_v41 }
 0x22b   :  { %10755 = vst [vmem:[#allocation116_spill] sm:$0xff] %v6984_v44  ;;  %v4582_v39 = vadd.f32 %v4581_v54, %v4327_v0  ;;  %v6488_v0 = vld [vmem:[#allocation3 + $0x3b0] ss:$8 sps:$4 sm:$0xff]   ;;  %v2927_v54 = vpop.f32.mrf.mxu1 }
 0x22c   :  { %v2530_v26 = vpop.f32.mrf.mxu0  ;;  %v4065_v8 = vadd.f32 %v4064_v20, %v6771_v58 }
 0x22d   :  { %v4329_v26 = vmul.f32 %v6773_v63, %v6773_v63  ;;  %v4583_v42 = vadd.f32 %v4582_v39, %v4328_v19  ;;  %v7009_v50 = vpop.f32.mrf.mxu1  ;;  %v4332_v39 = vmul.f32 %v6779_v10, %v6779_v10 }
 0x22e   :  { %v6994_v47 = vpop.f32.mrf.mxu0  ;;  %2724 = vmatmul.mubr.bf16.gmra.mxu0 %v6482_v51  ;;  %v4066_v55 = vadd.f32 %v4065_v8, %v6773_v63  ;;  %v4330_v51 = vmul.f32 %v6775_v2, %v6775_v2  ;;  %10760 = vst [vmem:[#allocation121_spill] sm:$0xff] %v7009_v50  ;;  %v6553_v8 = vld [vmem:[#allocation3 + $0x6c4] ss:$8 sps:$4 sm:$0xff]  }
 0x22f   :  { %10757 = vst [vmem:[#allocation118_spill] sm:$0xff] %v6994_v47  ;;  %2731 = vmatprep.mubr.bf16.mxu0 %v6490_v48  ;;  %v4584_v20 = vadd.f32 %v4583_v42, %v4329_v26  ;;  %v4331_v48 = vmul.f32 %v6777_v7, %v6777_v7  ;;  %v2930_v26 = vpop.f32.mrf.mxu1  ;;  %v6551_v42 = vld [vmem:[#allocation3 + $0x6c0] ss:$8 sps:$4 sm:$0xff]   ;;  %3123 = vmatprep.mubr.bf16.mxu1 %v6553_v8  ;;  %v6502_v8 = vld [vmem:[#allocation3 + $0x3d4] ss:$8 sps:$4 sm:$0xff]  }
 0x230   :  { %v2535_v12 = vpop.f32.mrf.mxu0  ;;  %v4067_v58 = vadd.f32 %v4066_v55, %v6775_v2  ;;  %3124 = vmatmul.mubr.bf16.gmra.mxu1 %v6551_v42 }
 0x231   :  { %v4585_v19 = vadd.f32 %v4584_v20, %v4330_v51  ;;  %v7019_v20 = vpop.f32.mrf.mxu1 }
 0x232   :  { %v7004_v33 = vpop.f32.mrf.mxu0  ;;  %v4068_v23 = vadd.f32 %v4067_v58, %v6777_v7  ;;  %10762 = vst [vmem:[#allocation123_spill] sm:$0xff] %v7019_v20 }
 0x233   :  { %10759 = vst [vmem:[#allocation120_spill] sm:$0xff] %v7004_v33  ;;  %v4586_v55 = vadd.f32 %v4585_v19, %v4331_v48  ;;  %v6494_v48 = vld [vmem:[#allocation3 + $0x3c0] ss:$8 sps:$4 sm:$0xff]   ;;  %v2935_v19 = vpop.f32.mrf.mxu1 }
 0x234   :  { %v2538_v12 = vpop.f32.mrf.mxu0  ;;  %v4069_v54 = vadd.f32 %v4068_v23, %v6779_v10 }
 0x235   :  { %v4333_v12 = vmul.f32 %v6781_v15, %v6781_v15  ;;  %v4587_v58 = vadd.f32 %v4586_v55, %v4332_v39  ;;  %v7029_v2 = vpop.f32.mrf.mxu1  ;;  %v4336_v55 = vmul.f32 %v6787_v28, %v6787_v28 }
 0x236   :  { %v7014_v63 = vpop.f32.mrf.mxu0  ;;  %2732 = vmatmul.mubr.bf16.gmra.mxu0 %v6488_v0  ;;  %v4070_v7 = vadd.f32 %v4069_v54, %v6781_v15  ;;  %v4334_v0 = vmul.f32 %v6783_v18, %v6783_v18  ;;  %10764 = vst [vmem:[#allocation125_spill] sm:$0xff] %v7029_v2  ;;  %v6556_v54 = vld [vmem:[#allocation3 + $0x6d4] ss:$8 sps:$4 sm:$0xff]  }
 0x237   :  { %10761 = vst [vmem:[#allocation122_spill] sm:$0xff] %v7014_v63  ;;  %2739 = vmatprep.mubr.bf16.mxu0 %v6496_v36  ;;  %v4588_v23 = vadd.f32 %v4587_v58, %v4333_v12  ;;  %v4335_v36 = vmul.f32 %v6785_v24, %v6785_v24  ;;  %v2938_v12 = vpop.f32.mrf.mxu1  ;;  %v6554_v58 = vld [vmem:[#allocation3 + $0x6d0] ss:$8 sps:$4 sm:$0xff]   ;;  %3131 = vmatprep.mubr.bf16.mxu1 %v6556_v54  ;;  %v6508_v54 = vld [vmem:[#allocation3 + $0x3e4] ss:$8 sps:$4 sm:$0xff]  }
 0x238   :  { %v2543_v51 = vpop.f32.mrf.mxu0  ;;  %v4071_v10 = vadd.f32 %v4070_v7, %v6783_v18  ;;  %3132 = vmatmul.mubr.bf16.gmra.mxu1 %v6554_v58 }
 0x239   :  { %v4589_v39 = vadd.f32 %v4588_v23, %v4334_v0  ;;  %v7039_v23 = vpop.f32.mrf.mxu1 }
 0x23a   :  { %v7024_v26 = vpop.f32.mrf.mxu0  ;;  %v4072_v42 = vadd.f32 %v4071_v10, %v6785_v24  ;;  %10766 = vst [vmem:[#allocation127_spill] sm:$0xff] %v7039_v23 }
 0x23b   :  { %10763 = vst [vmem:[#allocation124_spill] sm:$0xff] %v7024_v26  ;;  %v4590_v7 = vadd.f32 %v4589_v39, %v4335_v36  ;;  %v6500_v36 = vld [vmem:[#allocation3 + $0x3d0] ss:$8 sps:$4 sm:$0xff]   ;;  %v2943_v39 = vpop.f32.mrf.mxu1 }
 0x23c   :  { %v2546_v51 = vpop.f32.mrf.mxu0  ;;  %v4073_v19 = vadd.f32 %v4072_v42, %v6787_v28 }
 0x23d   :  { %v4337_v51 = vmul.f32 %v6789_v35, %v6789_v35  ;;  %v4591_v10 = vadd.f32 %v4590_v7, %v4336_v55  ;;  %v7049_v18 = vpop.f32.mrf.mxu1  ;;  %v4340_v7 = vmul.f32 %v6795_v49, %v6795_v49 }
 0x23e   :  { %v7034_v15 = vpop.f32.mrf.mxu0  ;;  %2740 = vmatmul.mubr.bf16.gmra.mxu0 %v6494_v48  ;;  %v4074_v24 = vadd.f32 %v4073_v19, %v6789_v35  ;;  %v4338_v48 = vmul.f32 %v6791_v38, %v6791_v38  ;;  %10768 = vst [vmem:[#allocation129_spill] sm:$0xff] %v7049_v18  ;;  %v6559_v19 = vld [vmem:[#allocation3 + $0x6e4] ss:$8 sps:$4 sm:$0xff]  }
 0x23f   :  { %10765 = vst [vmem:[#allocation126_spill] sm:$0xff] %v7034_v15  ;;  %2747 = vmatprep.mubr.bf16.mxu0 %v6502_v8  ;;  %v4592_v42 = vadd.f32 %v4591_v10, %v4337_v51  ;;  %v4339_v8 = vmul.f32 %v6793_v45, %v6793_v45  ;;  %v2946_v51 = vpop.f32.mrf.mxu1  ;;  %v6557_v10 = vld [vmem:[#allocation3 + $0x6e0] ss:$8 sps:$4 sm:$0xff]   ;;  %3139 = vmatprep.mubr.bf16.mxu1 %v6559_v19  ;;  %v6514_v19 = vld [vmem:[#allocation3 + $0x3f4] ss:$8 sps:$4 sm:$0xff]  }
 0x240   :  { %v2551_v0 = vpop.f32.mrf.mxu0  ;;  %v4075_v28 = vadd.f32 %v4074_v24, %v6791_v38  ;;  %3140 = vmatmul.mubr.bf16.gmra.mxu1 %v6557_v10 }
 0x241   :  { %v4593_v55 = vadd.f32 %v4592_v42, %v4338_v48  ;;  %v7059_v42 = vpop.f32.mrf.mxu1 }
 0x242   :  { %v7044_v12 = vpop.f32.mrf.mxu0  ;;  %v4076_v58 = vadd.f32 %v4075_v28, %v6793_v45  ;;  %10770 = vst [vmem:[#allocation131_spill] sm:$0xff] %v7059_v42 }
 0x243   :  { %10767 = vst [vmem:[#allocation128_spill] sm:$0xff] %v7044_v12  ;;  %v4594_v24 = vadd.f32 %v4593_v55, %v4339_v8  ;;  %v6506_v8 = vld [vmem:[#allocation3 + $0x3e0] ss:$8 sps:$4 sm:$0xff]   ;;  %v2951_v55 = vpop.f32.mrf.mxu1 }
 0x244   :  { %v2554_v0 = vpop.f32.mrf.mxu0  ;;  %v4077_v39 = vadd.f32 %v4076_v58, %v6795_v49 }
 0x245   :  { %v4341_v0 = vmul.f32 %v6797_v56, %v6797_v56  ;;  %v4595_v28 = vadd.f32 %v4594_v24, %v4340_v7  ;;  %v7069_v38 = vpop.f32.mrf.mxu1  ;;  %v4344_v24 = vmul.f32 %v6803_v6, %v6803_v6 }
 0x246   :  { %v7054_v35 = vpop.f32.mrf.mxu0  ;;  %2748 = vmatmul.mubr.bf16.gmra.mxu0 %v6500_v36  ;;  %v4078_v45 = vadd.f32 %v4077_v39, %v6797_v56  ;;  %v4342_v36 = vmul.f32 %v6799_v60, %v6799_v60  ;;  %10772 = vst [vmem:[#allocation133_spill] sm:$0xff] %v7069_v38  ;;  %v6562_v39 = vld [vmem:[#allocation3 + $0x6f4] ss:$8 sps:$4 sm:$0xff]  }
 0x247   :  { %10769 = vst [vmem:[#allocation130_spill] sm:$0xff] %v7054_v35  ;;  %2755 = vmatprep.mubr.bf16.mxu0 %v6508_v54  ;;  %v4596_v58 = vadd.f32 %v4595_v28, %v4341_v0  ;;  %v4343_v54 = vmul.f32 %v6801_v3, %v6801_v3  ;;  %v2954_v0 = vpop.f32.mrf.mxu1  ;;  %v6560_v28 = vld [vmem:[#allocation3 + $0x6f0] ss:$8 sps:$4 sm:$0xff]   ;;  %3147 = vmatprep.mubr.bf16.mxu1 %v6562_v39 }
 0x248   :  { %v2559_v48 = vpop.f32.mrf.mxu0  ;;  %v4079_v49 = vadd.f32 %v4078_v45, %v6799_v60  ;;  %3148 = vmatmul.mubr.bf16.gmra.mxu1 %v6560_v28 }
 0x249   :  { %v4597_v7 = vadd.f32 %v4596_v58, %v4342_v36  ;;  %v7079_v58 = vpop.f32.mrf.mxu1 }
 0x24a   :  { %v7064_v51 = vpop.f32.mrf.mxu0  ;;  %v4080_v10 = vadd.f32 %v4079_v49, %v6801_v3  ;;  %10774 = vst [vmem:[#allocation135_spill] sm:$0xff] %v7079_v58 }
 0x24b   :  { %10771 = vst [vmem:[#allocation132_spill] sm:$0xff] %v7064_v51  ;;  %v4598_v45 = vadd.f32 %v4597_v7, %v4343_v54  ;;  %v6512_v54 = vld [vmem:[#allocation3 + $0x3f0] ss:$8 sps:$4 sm:$0xff]   ;;  %v2959_v7 = vpop.f32.mrf.mxu1 }
 0x24c   :  { %v2562_v48 = vpop.f32.mrf.mxu0  ;;  %v4081_v55 = vadd.f32 %v4080_v10, %v6803_v6 }
 0x24d   :  { %v4345_v48 = vmul.f32 %v6805_v13, %v6805_v13  ;;  %v4599_v49 = vadd.f32 %v4598_v45, %v4344_v24  ;;  %v4348_v45 = vmul.f32 %v6811_v30, %v6811_v30 }
 0x24e   :  { %v7074_v56 = vpop.f32.mrf.mxu0  ;;  %2756 = vmatmul.mubr.bf16.gmra.mxu0 %v6506_v8  ;;  %v4082_v3 = vadd.f32 %v4081_v55, %v6805_v13  ;;  %v4346_v8 = vmul.f32 %v6807_v17, %v6807_v17  ;;  %v6565_v55 = vld [vmem:[#allocation3 + $0x704] ss:$8 sps:$4 sm:$0xff]  }
 0x24f   :  { %10773 = vst [vmem:[#allocation134_spill] sm:$0xff] %v7074_v56  ;;  %2763 = vmatprep.mubr.bf16.mxu0 %v6514_v19  ;;  %v4600_v10 = vadd.f32 %v4599_v49, %v4345_v48  ;;  %v4347_v19 = vmul.f32 %v6809_v25, %v6809_v25  ;;  %v6563_v48 = vld [vmem:[#allocation3 + $0x700] ss:$8 sps:$4 sm:$0xff]   ;;  %3155 = vmatprep.mubr.bf16.mxu1 %v6565_v55 }
 0x250   :  { %v2567_v36 = vpop.f32.mrf.mxu0  ;;  %v4083_v6 = vadd.f32 %v4082_v3, %v6807_v17  ;;  %3156 = vmatmul.mubr.bf16.gmra.mxu1 %v6563_v48  ;;  %v4352_v48 = vmul.f32 %v6825_v4, %v6825_v4 }
 0x251   :  { %v7089_v36 = vpop.f32.mrf.mxu1  ;;  %v4601_v28 = vadd.f32 %v4600_v10, %v4346_v8 }
 0x252   :  { %v7084_v0 = vpop.f32.mrf.mxu0  ;;  %10776 = vst [vmem:[#allocation137_spill] sm:$0xff] %v7089_v36  ;;  %v4084_v24 = vadd.f32 %v4083_v6, %v6809_v25  ;;  %v4350_v25 = vmul.f32 %v6817_v46, %v6817_v46 }
 0x253   :  { %10775 = vst [vmem:[#allocation136_spill] sm:$0xff] %v7084_v0  ;;  %v2962_v7 = vpop.f32.mrf.mxu1  ;;  %v4602_v49 = vadd.f32 %v4601_v28, %v4347_v19 }
 0x254   :  { %v2570_v39 = vpop.f32.mrf.mxu0  ;;  %v4085_v3 = vadd.f32 %v4084_v24, %v6811_v30  ;;  %v4351_v24 = vmul.f32 %v6821_v59, %v6821_v59 }
 0x255   :  { %v4349_v39 = vmul.f32 %v6813_v40, %v6813_v40  ;;  %v7099_v8 = vpop.f32.mrf.mxu1  ;;  %v4603_v6 = vadd.f32 %v4602_v49, %v4348_v45  ;;  %v6568_v49 = vld [vmem:[#allocation3 + $0x714] ss:$8 sps:$4 sm:$0xff]  }
 0x256   :  { %v7094_v13 = vpop.f32.mrf.mxu0  ;;  %2764 = vmatmul.mubr.bf16.gmra.mxu0 %v6512_v54  ;;  %10778 = vst [vmem:[#allocation139_spill] sm:$0xff] %v7099_v8  ;;  %v4086_v10 = vadd.f32 %v4085_v3, %v6813_v40  ;;  %3163 = vmatprep.mubr.bf16.mxu1 %v6568_v49 }
 0x257   :  { %10777 = vst [vmem:[#allocation138_spill] sm:$0xff] %v7094_v13  ;;  %v2967_v7 = vpop.f32.mrf.mxu1  ;;  %v4604_v19 = vadd.f32 %v4603_v6, %v4349_v39 }
 0x258   :  { %v2575_v17 = vpop.f32.mrf.mxu0  ;;  %v4087_v28 = vadd.f32 %v4086_v10, %v6817_v46  ;;  %v6566_v7 = vld [vmem:[#allocation3 + $0x710] ss:$8 sps:$4 sm:$0xff]   ;;  %v4353_v10 = vmul.f32 %v6829_v16, %v6829_v16 }
 0x259   :  { %v7109_v17 = vpop.f32.mrf.mxu1  ;;  %v4605_v30 = vadd.f32 %v4604_v19, %v4350_v25  ;;  %3164 = vmatmul.mubr.bf16.gmra.mxu1 %v6566_v7  ;;  %v4356_v7 = vmul.f32 %v6841_v57, %v6841_v57 }
 0x25a   :  { %v7104_v54 = vpop.f32.mrf.mxu0  ;;  %10780 = vst [vmem:[#allocation141_spill] sm:$0xff] %v7109_v17  ;;  %v4088_v45 = vadd.f32 %v4087_v28, %v6821_v59  ;;  %v4354_v28 = vmul.f32 %v6833_v27, %v6833_v27 }
 0x25b   :  { %10779 = vst [vmem:[#allocation140_spill] sm:$0xff] %v7104_v54  ;;  %v2970_v40 = vpop.f32.mrf.mxu1  ;;  %v4606_v39 = vadd.f32 %v4605_v30, %v4351_v24 }
 0x25c   :  { %v2578_v55 = vpop.f32.mrf.mxu0  ;;  %v4089_v6 = vadd.f32 %v4088_v45, %v6825_v4  ;;  %v4355_v45 = vmul.f32 %v6837_v43, %v6837_v43 }
 0x25d   :  { %v7119_v46 = vpop.f32.mrf.mxu1  ;;  %v4607_v25 = vadd.f32 %v4606_v39, %v4352_v48  ;;  %v6571_v39 = vld [vmem:[#allocation3 + $0x724] ss:$8 sps:$4 sm:$0xff]  }
 0x25e   :  { %v7114_v3 = vpop.f32.mrf.mxu0  ;;  %10782 = vst [vmem:[#allocation143_spill] sm:$0xff] %v7119_v46  ;;  %v4090_v19 = vadd.f32 %v4089_v6, %v6829_v16  ;;  %3171 = vmatprep.mubr.bf16.mxu1 %v6571_v39 }
 0x25f   :  { %10781 = vst [vmem:[#allocation142_spill] sm:$0xff] %v7114_v3  ;;  %v2975_v40 = vpop.f32.mrf.mxu1  ;;  %v4608_v30 = vadd.f32 %v4607_v25, %v4353_v10 }
 0x260   :  { %v2583_v55 = vpop.f32.mrf.mxu0  ;;  %v4091_v24 = vadd.f32 %v4090_v19, %v6833_v27  ;;  %v6569_v40 = vld [vmem:[#allocation3 + $0x720] ss:$8 sps:$4 sm:$0xff]   ;;  %v4357_v19 = vmul.f32 %v6845_v11, %v6845_v11 }
 0x261   :  { %v7129_v55 = vpop.f32.mrf.mxu1  ;;  %v4609_v4 = vadd.f32 %v4608_v30, %v4354_v28  ;;  %3172 = vmatmul.mubr.bf16.gmra.mxu1 %v6569_v40  ;;  %v4360_v40 = vmul.f32 %v6857_v9, %v6857_v9 }
 0x262   :  { %v7124_v59 = vpop.f32.mrf.mxu0  ;;  %10784 = vst [vmem:[#allocation145_spill] sm:$0xff] %v7129_v55  ;;  %v4092_v48 = vadd.f32 %v4091_v24, %v6837_v43  ;;  %v4358_v24 = vmul.f32 %v6849_v29, %v6849_v29 }
 0x263   :  { %10783 = vst [vmem:[#allocation144_spill] sm:$0xff] %v7124_v59  ;;  %v2978_v16 = vpop.f32.mrf.mxu1  ;;  %v4610_v10 = vadd.f32 %v4609_v4, %v4355_v45 }
 0x264   :  { %v2586_v49 = vpop.f32.mrf.mxu0  ;;  %v4093_v25 = vadd.f32 %v4092_v48, %v6841_v57  ;;  %v4359_v48 = vmul.f32 %v6853_v52, %v6853_v52 }
 0x265   :  { %v7139_v27 = vpop.f32.mrf.mxu1  ;;  %v4611_v28 = vadd.f32 %v4610_v10, %v4356_v7  ;;  %v6574_v10 = vld [vmem:[#allocation3 + $0x734] ss:$8 sps:$4 sm:$0xff]  }
 0x266   :  { %v7134_v6 = vpop.f32.mrf.mxu0  ;;  %10786 = vst [vmem:[#allocation147_spill] sm:$0xff] %v7139_v27  ;;  %v4094_v30 = vadd.f32 %v4093_v25, %v6845_v11  ;;  %3179 = vmatprep.mubr.bf16.mxu1 %v6574_v10 }
 0x267   :  { %10785 = vst [vmem:[#allocation146_spill] sm:$0xff] %v7134_v6  ;;  %v2983_v16 = vpop.f32.mrf.mxu1  ;;  %v4612_v4 = vadd.f32 %v4611_v28, %v4357_v19 }
 0x268   :  { %v2591_v49 = vpop.f32.mrf.mxu0  ;;  %v4095_v45 = vadd.f32 %v4094_v30, %v6849_v29  ;;  %v6572_v16 = vld [vmem:[#allocation3 + $0x730] ss:$8 sps:$4 sm:$0xff]   ;;  %v4361_v30 = vmul.f32 %v6861_v21, %v6861_v21 }
 0x269   :  { %v7149_v49 = vpop.f32.mrf.mxu1  ;;  %v4613_v57 = vadd.f32 %v4612_v4, %v4358_v24  ;;  %3180 = vmatmul.mubr.bf16.gmra.mxu1 %v6572_v16  ;;  %v4364_v16 = vmul.f32 %v6873_v61, %v6873_v61 }
 0x26a   :  { %v7144_v43 = vpop.f32.mrf.mxu0  ;;  %10788 = vst [vmem:[#allocation149_spill] sm:$0xff] %v7149_v49  ;;  %v4096_v7 = vadd.f32 %v4095_v45, %v6853_v52  ;;  %v4362_v45 = vmul.f32 %v6865_v62, %v6865_v62 }
 0x26b   :  { %10787 = vst [vmem:[#allocation148_spill] sm:$0xff] %v7144_v43  ;;  %v2986_v11 = vpop.f32.mrf.mxu1  ;;  %v4614_v19 = vadd.f32 %v4613_v57, %v4359_v48 }
 0x26c   :  { %v2594_v39 = vpop.f32.mrf.mxu0  ;;  %v4097_v28 = vadd.f32 %v4096_v7, %v6857_v9  ;;  %v4363_v7 = vmul.f32 %v6869_v53, %v6869_v53 }
 0x26d   :  { %v7159_v29 = vpop.f32.mrf.mxu1  ;;  %v4615_v24 = vadd.f32 %v4614_v19, %v4360_v40  ;;  %v6577_v19 = vld [vmem:[#allocation3 + $0x744] ss:$8 sps:$4 sm:$0xff]  }
 0x26e   :  { %v7154_v25 = vpop.f32.mrf.mxu0  ;;  %10790 = vst [vmem:[#allocation151_spill] sm:$0xff] %v7159_v29  ;;  %v4098_v4 = vadd.f32 %v4097_v28, %v6861_v21  ;;  %3187 = vmatprep.mubr.bf16.mxu1 %v6577_v19 }
 0x26f   :  { %10789 = vst [vmem:[#allocation150_spill] sm:$0xff] %v7154_v25  ;;  %v2991_v11 = vpop.f32.mrf.mxu1  ;;  %v4616_v57 = vadd.f32 %v4615_v24, %v4361_v30 }
 0x270   :  { %v2599_v39 = vpop.f32.mrf.mxu0  ;;  %v4099_v48 = vadd.f32 %v4098_v4, %v6865_v62  ;;  %v6575_v11 = vld [vmem:[#allocation3 + $0x740] ss:$8 sps:$4 sm:$0xff]   ;;  %v4365_v4 = vmul.f32 %v6877_v22, %v6877_v22 }
 0x271   :  { %v7169_v39 = vpop.f32.mrf.mxu1  ;;  %v4617_v9 = vadd.f32 %v4616_v57, %v4362_v45  ;;  %3188 = vmatmul.mubr.bf16.gmra.mxu1 %v6575_v11  ;;  %v10798_v11 = vld [vmem:[#allocation80_spill] sm:$0xff] }
 0x272   :  { %v7164_v52 = vpop.f32.mrf.mxu0  ;;  %10792 = vst [vmem:[#allocation153_spill] sm:$0xff] %v7169_v39  ;;  %v4100_v40 = vadd.f32 %v4099_v48, %v6869_v53  ;;  %v4366_v48 = vmul.f32 %v6881_v32, %v6881_v32 }
 0x273   :  { %10791 = vst [vmem:[#allocation152_spill] sm:$0xff] %v7164_v52  ;;  %v2994_v21 = vpop.f32.mrf.mxu1  ;;  %v4618_v30 = vadd.f32 %v4617_v9, %v4363_v7 }
 0x274   :  { %v2602_v10 = vpop.f32.mrf.mxu0  ;;  %v4101_v24 = vadd.f32 %v4100_v40, %v6873_v61  ;;  %v10796_v40 = vld [vmem:[#allocation78_spill] sm:$0xff] }
 0x275   :  { %v7179_v62 = vpop.f32.mrf.mxu1  ;;  %v4619_v45 = vadd.f32 %v4618_v30, %v4364_v16  ;;  %v4367_v61 = vmul.f32 %v10796_v40, %v10796_v40  ;;  %v4368_v30 = vmul.f32 %v10798_v11, %v10798_v11 }
 0x276   :  { %v7174_v28 = vpop.f32.mrf.mxu0  ;;  %10794 = vst [vmem:[#allocation155_spill] sm:$0xff] %v7179_v62  ;;  %v4102_v57 = vadd.f32 %v4101_v24, %v6877_v22  ;;  %v6580_v24 = vld [vmem:[#allocation3 + $0x754] ss:$8 sps:$4 sm:$0xff]  }
 0x277   :  { %10793 = vst [vmem:[#allocation154_spill] sm:$0xff] %v7174_v28  ;;  %v2999_v21 = vpop.f32.mrf.mxu1  ;;  %v4620_v9 = vadd.f32 %v4619_v45, %v4365_v4  ;;  %3195 = vmatprep.mubr.bf16.mxu1 %v6580_v24 }
 0x278   :  { %v2607_v10 = vpop.f32.mrf.mxu0  ;;  %v4103_v7 = vadd.f32 %v4102_v57, %v6881_v32  ;;  %v6578_v21 = vld [vmem:[#allocation3 + $0x750] ss:$8 sps:$4 sm:$0xff]  }
 0x279   :  { %v7189_v10 = vpop.f32.mrf.mxu1  ;;  %v4621_v60 = vadd.f32 %v4620_v9, %v4366_v48  ;;  %v10800_v57 = vld [vmem:[#allocation82_spill] sm:$0xff]  ;;  %3196 = vmatmul.mubr.bf16.gmra.mxu1 %v6578_v21  ;;  %v10806_v21 = vld [vmem:[#allocation88_spill] sm:$0xff] }
 0x27a   :  { %v7184_v53 = vpop.f32.mrf.mxu0  ;;  %10797 = vst [vmem:[#allocation157_spill] sm:$0xff] %v7189_v10  ;;  %v4104_v16 = vadd.f32 %v4103_v7, %v10796_v40  ;;  %v4369_v32 = vmul.f32 %v10800_v57, %v10800_v57  ;;  %v10802_v7 = vld [vmem:[#allocation84_spill] sm:$0xff] }
 0x27b   :  { %10795 = vst [vmem:[#allocation156_spill] sm:$0xff] %v7184_v53  ;;  %v3002_v62 = vpop.f32.mrf.mxu1  ;;  %v4622_v4 = vadd.f32 %v4621_v60, %v4367_v61  ;;  %v4370_v40 = vmul.f32 %v10802_v7, %v10802_v7 }
 0x27c   :  { %v2610_v19 = vpop.f32.mrf.mxu0  ;;  %v4105_v45 = vadd.f32 %v4104_v16, %v10798_v11  ;;  %v10804_v16 = vld [vmem:[#allocation86_spill] sm:$0xff] }
 0x27d   :  { %v7199_v10 = vpop.f32.mrf.mxu1  ;;  %v4623_v48 = vadd.f32 %v4622_v4, %v4368_v30  ;;  %v4371_v11 = vmul.f32 %v10804_v16, %v10804_v16  ;;  %v4372_v4 = vmul.f32 %v10806_v21, %v10806_v21 }
 0x27e   :  { %v7194_v22 = vpop.f32.mrf.mxu0  ;;  %10801 = vst [vmem:[#allocation159_spill] sm:$0xff] %v7199_v10  ;;  %v4106_v9 = vadd.f32 %v4105_v45, %v10800_v57  ;;  %v6583_v45 = vld [vmem:[#allocation3 + $0x764] ss:$8 sps:$4 sm:$0xff]  }
 0x27f   :  { %10799 = vst [vmem:[#allocation158_spill] sm:$0xff] %v7194_v22  ;;  %v3007_v62 = vpop.f32.mrf.mxu1  ;;  %v4624_v60 = vadd.f32 %v4623_v48, %v4369_v32  ;;  %3203 = vmatprep.mubr.bf16.mxu1 %v6583_v45 }
 0x280   :  { %v2615_v19 = vpop.f32.mrf.mxu0  ;;  %v4107_v61 = vadd.f32 %v4106_v9, %v10802_v7  ;;  %v6581_v62 = vld [vmem:[#allocation3 + $0x760] ss:$8 sps:$4 sm:$0xff]   ;;  %v10808_v9 = vld [vmem:[#allocation90_spill] sm:$0xff] }
 0x281   :  { %v7209_v19 = vpop.f32.mrf.mxu1  ;;  %v4625_v10 = vadd.f32 %v4624_v60, %v4370_v40  ;;  %v4373_v7 = vmul.f32 %v10808_v9, %v10808_v9  ;;  %3204 = vmatmul.mubr.bf16.gmra.mxu1 %v6581_v62  ;;  %v10814_v62 = vld [vmem:[#allocation96_spill] sm:$0xff] }
 0x282   :  { %v7204_v39 = vpop.f32.mrf.mxu0  ;;  %10805 = vst [vmem:[#allocation161_spill] sm:$0xff] %v7209_v19  ;;  %v4108_v30 = vadd.f32 %v4107_v61, %v10804_v16  ;;  %v10810_v61 = vld [vmem:[#allocation92_spill] sm:$0xff] }
 0x283   :  { %10803 = vst [vmem:[#allocation160_spill] sm:$0xff] %v7204_v39  ;;  %v3010_v29 = vpop.f32.mrf.mxu1  ;;  %v4626_v32 = vadd.f32 %v4625_v10, %v4371_v11  ;;  %v4374_v16 = vmul.f32 %v10810_v61, %v10810_v61 }
 0x284   :  { %v2618_v24 = vpop.f32.mrf.mxu0  ;;  %v4109_v48 = vadd.f32 %v4108_v30, %v10806_v21  ;;  %v10812_v30 = vld [vmem:[#allocation94_spill] sm:$0xff] }
 0x285   :  { %v7219_v19 = vpop.f32.mrf.mxu1  ;;  %v4627_v40 = vadd.f32 %v4626_v32, %v4372_v4  ;;  %v4375_v21 = vmul.f32 %v10812_v30, %v10812_v30  ;;  %v4376_v32 = vmul.f32 %v10814_v62, %v10814_v62 }
 0x286   :  { %v7214_v57 = vpop.f32.mrf.mxu0  ;;  %10809 = vst [vmem:[#allocation163_spill] sm:$0xff] %v7219_v19  ;;  %v4110_v60 = vadd.f32 %v4109_v48, %v10808_v9  ;;  %v6586_v48 = vld [vmem:[#allocation3 + $0x774] ss:$8 sps:$4 sm:$0xff]  }
 0x287   :  { %10807 = vst [vmem:[#allocation162_spill] sm:$0xff] %v7214_v57  ;;  %v3015_v29 = vpop.f32.mrf.mxu1  ;;  %v4628_v10 = vadd.f32 %v4627_v40, %v4373_v7  ;;  %3211 = vmatprep.mubr.bf16.mxu1 %v6586_v48 }
 0x288   :  { %v2623_v24 = vpop.f32.mrf.mxu0  ;;  %v4111_v11 = vadd.f32 %v4110_v60, %v10810_v61  ;;  %v6584_v29 = vld [vmem:[#allocation3 + $0x770] ss:$8 sps:$4 sm:$0xff]  }
 0x289   :  { %v7229_v24 = vpop.f32.mrf.mxu1  ;;  %v4629_v19 = vadd.f32 %v4628_v10, %v4374_v16  ;;  %v10816_v60 = vld [vmem:[#allocation98_spill] sm:$0xff]  ;;  %3212 = vmatmul.mubr.bf16.gmra.mxu1 %v6584_v29  ;;  %v10821_v29 = vld [vmem:[#allocation104_spill] sm:$0xff] }
 0x28a   :  { %v7224_v49 = vpop.f32.mrf.mxu0  ;;  %10813 = vst [vmem:[#allocation165_spill] sm:$0xff] %v7229_v24  ;;  %v4112_v4 = vadd.f32 %v4111_v11, %v10812_v30  ;;  %v4377_v61 = vmul.f32 %v10816_v60, %v10816_v60  ;;  %v10818_v11 = vld [vmem:[#allocation100_spill] sm:$0xff] }
 0x28b   :  { %10811 = vst [vmem:[#allocation164_spill] sm:$0xff] %v7224_v49  ;;  %v3018_v27 = vpop.f32.mrf.mxu1  ;;  %v4630_v7 = vadd.f32 %v4629_v19, %v4375_v21  ;;  %v4378_v30 = vmul.f32 %v10818_v11, %v10818_v11 }
 0x28c   :  { %v2626_v45 = vpop.f32.mrf.mxu0  ;;  %v4113_v40 = vadd.f32 %v4112_v4, %v10814_v62  ;;  %v4379_v4 = vmul.f32 %v6933_v1, %v6933_v1 }
 0x28d   :  { %v7239_v24 = vpop.f32.mrf.mxu1  ;;  %v4631_v16 = vadd.f32 %v4630_v7, %v4376_v32  ;;  %v4380_v7 = vmul.f32 %v10821_v29, %v10821_v29 }
 0x28e   :  { %v7234_v9 = vpop.f32.mrf.mxu0  ;;  %10817 = vst [vmem:[#allocation167_spill] sm:$0xff] %v7239_v24  ;;  %v4114_v10 = vadd.f32 %v4113_v40, %v10816_v60  ;;  %v6589_v40 = vld [vmem:[#allocation3 + $0x784] ss:$8 sps:$4 sm:$0xff]  }
 0x28f   :  { %10815 = vst [vmem:[#allocation166_spill] sm:$0xff] %v7234_v9  ;;  %v3023_v27 = vpop.f32.mrf.mxu1  ;;  %v4632_v19 = vadd.f32 %v4631_v16, %v4377_v61  ;;  %3219 = vmatprep.mubr.bf16.mxu1 %v6589_v40 }
 0x290   :  { %v2631_v45 = vpop.f32.mrf.mxu0  ;;  %v4115_v21 = vadd.f32 %v4114_v10, %v10818_v11  ;;  %v6587_v27 = vld [vmem:[#allocation3 + $0x780] ss:$8 sps:$4 sm:$0xff]   ;;  %v10823_v10 = vld [vmem:[#allocation106_spill] sm:$0xff] }
 0x291   :  { %v7249_v45 = vpop.f32.mrf.mxu1  ;;  %v4633_v62 = vadd.f32 %v4632_v19, %v4378_v30  ;;  %v4381_v11 = vmul.f32 %v10823_v10, %v10823_v10  ;;  %3220 = vmatmul.mubr.bf16.gmra.mxu1 %v6587_v27  ;;  %v4384_v27 = vmul.f32 %v6964_v14, %v6964_v14 }
 0x292   :  { %v7244_v55 = vpop.f32.mrf.mxu0  ;;  %10820 = vst [vmem:[#allocation169_spill] sm:$0xff] %v7249_v45  ;;  %v4116_v32 = vadd.f32 %v4115_v21, %v6933_v1  ;;  %v10825_v21 = vld [vmem:[#allocation108_spill] sm:$0xff] }
 0x293   :  { %10819 = vst [vmem:[#allocation168_spill] sm:$0xff] %v7244_v55  ;;  %v3026_v24 = vpop.f32.mrf.mxu1  ;;  %v4634_v61 = vadd.f32 %v4633_v62, %v4379_v4  ;;  %v4382_v1 = vmul.f32 %v10825_v21, %v10825_v21 }
 0x294   :  { %v2634_v48 = vpop.f32.mrf.mxu0  ;;  %v4117_v16 = vadd.f32 %v4116_v32, %v10821_v29  ;;  %v10827_v32 = vld [vmem:[#allocation110_spill] sm:$0xff] }
 0x295   :  { %v7259_v45 = vpop.f32.mrf.mxu1  ;;  %v4635_v30 = vadd.f32 %v4634_v61, %v4380_v7  ;;  %v4383_v29 = vmul.f32 %v10827_v32, %v10827_v32  ;;  %v6592_v61 = vld [vmem:[#allocation3 + $0x794] ss:$8 sps:$4 sm:$0xff]  }
 0x296   :  { %v7254_v60 = vpop.f32.mrf.mxu0  ;;  %10824 = vst [vmem:[#allocation171_spill] sm:$0xff] %v7259_v45  ;;  %v4118_v19 = vadd.f32 %v4117_v16, %v10823_v10  ;;  %3227 = vmatprep.mubr.bf16.mxu1 %v6592_v61 }
 0x297   :  { %10822 = vst [vmem:[#allocation170_spill] sm:$0xff] %v7254_v60  ;;  %v3031_v24 = vpop.f32.mrf.mxu1  ;;  %v4636_v62 = vadd.f32 %v4635_v30, %v4381_v11 }
 0x298   :  { %v2639_v48 = vpop.f32.mrf.mxu0  ;;  %v4119_v4 = vadd.f32 %v4118_v19, %v10825_v21  ;;  %v6590_v24 = vld [vmem:[#allocation3 + $0x790] ss:$8 sps:$4 sm:$0xff]   ;;  %v4385_v19 = vmul.f32 %v6974_v31, %v6974_v31 }
 0x299   :  { %v7269_v48 = vpop.f32.mrf.mxu1  ;;  %v4637_v45 = vadd.f32 %v4636_v62, %v4382_v1  ;;  %3228 = vmatmul.mubr.bf16.gmra.mxu1 %v6590_v24  ;;  %v4388_v24 = vmul.f32 %v7004_v33, %v7004_v33 }
 0x29a   :  { %v7264_v46 = vpop.f32.mrf.mxu0  ;;  %v4120_v7 = vadd.f32 %v4119_v4, %v10827_v32  ;;  %v4386_v4 = vmul.f32 %v6984_v44, %v6984_v44 }
 0x29b   :  { %10826 = vst [vmem:[#allocation172_spill] sm:$0xff] %v7264_v46  ;;  %v3034_v10 = vpop.f32.mrf.mxu1  ;;  %v4638_v11 = vadd.f32 %v4637_v45, %v4383_v29 }
 0x29c   :  { %v2642_v40 = vpop.f32.mrf.mxu0  ;;  %v4121_v30 = vadd.f32 %v4120_v7, %v6964_v14  ;;  %v4387_v7 = vmul.f32 %v6994_v47, %v6994_v47 }
 0x29d   :  { %v7279_v21 = vpop.f32.mrf.mxu1  ;;  %v4639_v1 = vadd.f32 %v4638_v11, %v4384_v27  ;;  %v6595_v11 = vld [vmem:[#allocation3 + $0x7a4] ss:$8 sps:$4 sm:$0xff]  }
 0x29e   :  { %v7274_v16 = vpop.f32.mrf.mxu0  ;;  %v4122_v62 = vadd.f32 %v4121_v30, %v6974_v31  ;;  %3235 = vmatprep.mubr.bf16.mxu1 %v6595_v11 }
 0x29f   :  { %10828 = vst [vmem:[#allocation173_spill] sm:$0xff] %v7274_v16  ;;  %v3039_v10 = vpop.f32.mrf.mxu1  ;;  %v4640_v45 = vadd.f32 %v4639_v1, %v4385_v19 }
 0x2a0   :  { %v2647_v40 = vpop.f32.mrf.mxu0  ;;  %v4123_v29 = vadd.f32 %v4122_v62, %v6984_v44  ;;  %v6593_v10 = vld [vmem:[#allocation3 + $0x7a0] ss:$8 sps:$4 sm:$0xff]   ;;  %v4389_v62 = vmul.f32 %v7014_v63, %v7014_v63 }
 0x2a1   :  { %v7289_v40 = vpop.f32.mrf.mxu1  ;;  %v4641_v14 = vadd.f32 %v4640_v45, %v4386_v4  ;;  %3236 = vmatmul.mubr.bf16.gmra.mxu1 %v6593_v10  ;;  %v4392_v10 = vmul.f32 %v7044_v12, %v7044_v12 }
 0x2a2   :  { %v7284_v32 = vpop.f32.mrf.mxu0  ;;  %v4124_v27 = vadd.f32 %v4123_v29, %v6994_v47  ;;  %v4390_v29 = vmul.f32 %v7024_v26, %v7024_v26 }
 0x2a3   :  { %10829 = vst [vmem:[#allocation174_spill] sm:$0xff] %v7284_v32  ;;  %v3042_v31 = vpop.f32.mrf.mxu1  ;;  %v4642_v19 = vadd.f32 %v4641_v14, %v4387_v7 }
 0x2a4   :  { %v2650_v61 = vpop.f32.mrf.mxu0  ;;  %v4125_v1 = vadd.f32 %v4124_v27, %v7004_v33  ;;  %v4391_v27 = vmul.f32 %v7034_v15, %v7034_v15 }
 0x2a5   :  { %v7299_v44 = vpop.f32.mrf.mxu1  ;;  %v4643_v4 = vadd.f32 %v4642_v19, %v4388_v24  ;;  %v6598_v19 = vld [vmem:[#allocation3 + $0x7b4] ss:$8 sps:$4 sm:$0xff]  }
 0x2a6   :  { %v7294_v30 = vpop.f32.mrf.mxu0  ;;  %v4126_v45 = vadd.f32 %v4125_v1, %v7014_v63  ;;  %3243 = vmatprep.mubr.bf16.mxu1 %v6598_v19 }
 0x2a7   :  { %10830 = vst [vmem:[#allocation175_spill] sm:$0xff] %v7294_v30  ;;  %v3047_v31 = vpop.f32.mrf.mxu1  ;;  %v4644_v14 = vadd.f32 %v4643_v4, %v4389_v62 }
 0x2a8   :  { %v2655_v61 = vpop.f32.mrf.mxu0  ;;  %v4127_v7 = vadd.f32 %v4126_v45, %v7024_v26  ;;  %v6596_v31 = vld [vmem:[#allocation3 + $0x7b0] ss:$8 sps:$4 sm:$0xff]   ;;  %v4393_v45 = vmul.f32 %v7054_v35, %v7054_v35 }
 0x2a9   :  { %v7309_v61 = vpop.f32.mrf.mxu1  ;;  %v4645_v33 = vadd.f32 %v4644_v14, %v4390_v29  ;;  %3244 = vmatmul.mubr.bf16.gmra.mxu1 %v6596_v31  ;;  %v4396_v31 = vmul.f32 %v7084_v0, %v7084_v0 }
 0x2aa   :  { %v7304_v47 = vpop.f32.mrf.mxu0  ;;  %v4128_v24 = vadd.f32 %v4127_v7, %v7034_v15  ;;  %v4394_v7 = vmul.f32 %v7064_v51, %v7064_v51 }
 0x2ab   :  { %10831 = vst [vmem:[#allocation176_spill] sm:$0xff] %v7304_v47  ;;  %v3050_v63 = vpop.f32.mrf.mxu1  ;;  %v4646_v62 = vadd.f32 %v4645_v33, %v4391_v27 }
 0x2ac   :  { %v2658_v11 = vpop.f32.mrf.mxu0  ;;  %v4129_v4 = vadd.f32 %v4128_v24, %v7044_v12  ;;  %v4395_v24 = vmul.f32 %v7074_v56, %v7074_v56 }
 0x2ad   :  { %v7319_v26 = vpop.f32.mrf.mxu1  ;;  %v4647_v29 = vadd.f32 %v4646_v62, %v4392_v10  ;;  %v6601_v62 = vld [vmem:[#allocation3 + $0x7c4] ss:$8 sps:$4 sm:$0xff]  }
 0x2ae   :  { %v7314_v1 = vpop.f32.mrf.mxu0  ;;  %v4130_v14 = vadd.f32 %v4129_v4, %v7054_v35  ;;  %3251 = vmatprep.mubr.bf16.mxu1 %v6601_v62 }
 0x2af   :  { %10832 = vst [vmem:[#allocation177_spill] sm:$0xff] %v7314_v1  ;;  %v3055_v63 = vpop.f32.mrf.mxu1  ;;  %v4648_v33 = vadd.f32 %v4647_v29, %v4393_v45 }
 0x2b0   :  { %v2663_v11 = vpop.f32.mrf.mxu0  ;;  %v4131_v27 = vadd.f32 %v4130_v14, %v7064_v51  ;;  %v6599_v63 = vld [vmem:[#allocation3 + $0x7c0] ss:$8 sps:$4 sm:$0xff]   ;;  %v4397_v14 = vmul.f32 %v7094_v13, %v7094_v13 }
 0x2b1   :  { %v7329_v11 = vpop.f32.mrf.mxu1  ;;  %v4649_v12 = vadd.f32 %v4648_v33, %v4394_v7  ;;  %3252 = vmatmul.mubr.bf16.gmra.mxu1 %v6599_v63  ;;  %v4400_v63 = vmul.f32 %v7124_v59, %v7124_v59 }
 0x2b2   :  { %v7324_v15 = vpop.f32.mrf.mxu0  ;;  %v4132_v10 = vadd.f32 %v4131_v27, %v7074_v56  ;;  %v4398_v27 = vmul.f32 %v7104_v54, %v7104_v54 }
 0x2b3   :  { %10833 = vst [vmem:[#allocation178_spill] sm:$0xff] %v7324_v15  ;;  %v3058_v35 = vpop.f32.mrf.mxu1  ;;  %v4650_v45 = vadd.f32 %v4649_v12, %v4395_v24 }
 0x2b4   :  { %v2666_v19 = vpop.f32.mrf.mxu0  ;;  %v4133_v29 = vadd.f32 %v4132_v10, %v7084_v0  ;;  %v4399_v10 = vmul.f32 %v7114_v3, %v7114_v3 }
 0x2b5   :  { %v7339_v51 = vpop.f32.mrf.mxu1  ;;  %v4651_v7 = vadd.f32 %v4650_v45, %v4396_v31  ;;  %v6604_v45 = vld [vmem:[#allocation3 + $0x7d4] ss:$8 sps:$4 sm:$0xff]  }
 0x2b6   :  { %v7334_v4 = vpop.f32.mrf.mxu0  ;;  %v4134_v33 = vadd.f32 %v4133_v29, %v7094_v13  ;;  %3259 = vmatprep.mubr.bf16.mxu1 %v6604_v45 }
 0x2b7   :  { %10834 = vst [vmem:[#allocation179_spill] sm:$0xff] %v7334_v4  ;;  %v3063_v35 = vpop.f32.mrf.mxu1  ;;  %v4652_v12 = vadd.f32 %v4651_v7, %v4397_v14 }
 0x2b8   :  { %v2671_v19 = vpop.f32.mrf.mxu0  ;;  %v4135_v24 = vadd.f32 %v4134_v33, %v7104_v54  ;;  %v6602_v35 = vld [vmem:[#allocation3 + $0x7d0] ss:$8 sps:$4 sm:$0xff]   ;;  %v4401_v33 = vmul.f32 %v7134_v6, %v7134_v6 }
 0x2b9   :  { %v7349_v19 = vpop.f32.mrf.mxu1  ;;  %v4653_v0 = vadd.f32 %v4652_v12, %v4398_v27  ;;  %3260 = vmatmul.mubr.bf16.gmra.mxu1 %v6602_v35  ;;  %v4404_v35 = vmul.f32 %v7164_v52, %v7164_v52 }
 0x2ba   :  { %v7344_v56 = vpop.f32.mrf.mxu0  ;;  %v4136_v31 = vadd.f32 %v4135_v24, %v7114_v3  ;;  %v4402_v24 = vmul.f32 %v7144_v43, %v7144_v43 }
 0x2bb   :  { %10835 = vst [vmem:[#allocation180_spill] sm:$0xff] %v7344_v56  ;;  %v3066_v13 = vpop.f32.mrf.mxu1  ;;  %v4654_v14 = vadd.f32 %v4653_v0, %v4399_v10 }
 0x2bc   :  { %v2674_v62 = vpop.f32.mrf.mxu0  ;;  %v4137_v7 = vadd.f32 %v4136_v31, %v7124_v59  ;;  %v4403_v31 = vmul.f32 %v7154_v25, %v7154_v25 }
 0x2bd   :  { %v7359_v54 = vpop.f32.mrf.mxu1  ;;  %v4655_v27 = vadd.f32 %v4654_v14, %v4400_v63  ;;  %v6607_v14 = vld [vmem:[#allocation3 + $0x7e4] ss:$8 sps:$4 sm:$0xff]  }
 0x2be   :  { %v7354_v29 = vpop.f32.mrf.mxu0  ;;  %v4138_v12 = vadd.f32 %v4137_v7, %v7134_v6  ;;  %3267 = vmatprep.mubr.bf16.mxu1 %v6607_v14 }
 0x2bf   :  { %10836 = vst [vmem:[#allocation181_spill] sm:$0xff] %v7354_v29  ;;  %v3071_v13 = vpop.f32.mrf.mxu1  ;;  %v4656_v0 = vadd.f32 %v4655_v27, %v4401_v33 }
 0x2c0   :  { %v2679_v62 = vpop.f32.mrf.mxu0  ;;  %v4139_v10 = vadd.f32 %v4138_v12, %v7144_v43  ;;  %v6605_v13 = vld [vmem:[#allocation3 + $0x7e0] ss:$8 sps:$4 sm:$0xff]   ;;  %v4405_v12 = vmul.f32 %v7174_v28, %v7174_v28 }
 0x2c1   :  { %v7369_v62 = vpop.f32.mrf.mxu1  ;;  %v4657_v59 = vadd.f32 %v4656_v0, %v4402_v24  ;;  %3268 = vmatmul.mubr.bf16.gmra.mxu1 %v6605_v13  ;;  %v4408_v13 = vmul.f32 %v7204_v39, %v7204_v39 }
 0x2c2   :  { %v7364_v3 = vpop.f32.mrf.mxu0  ;;  %v4140_v63 = vadd.f32 %v4139_v10, %v7154_v25  ;;  %v4406_v10 = vmul.f32 %v7184_v53, %v7184_v53 }
 0x2c3   :  { %10837 = vst [vmem:[#allocation182_spill] sm:$0xff] %v7364_v3  ;;  %v3074_v6 = vpop.f32.mrf.mxu1  ;;  %v4658_v33 = vadd.f32 %v4657_v59, %v4403_v31 }
 0x2c4   :  { %v2682_v45 = vpop.f32.mrf.mxu0  ;;  %v4141_v27 = vadd.f32 %v4140_v63, %v7164_v52  ;;  %v4407_v63 = vmul.f32 %v7194_v22, %v7194_v22 }
 0x2c5   :  { %v7379_v43 = vpop.f32.mrf.mxu1  ;;  %v4659_v24 = vadd.f32 %v4658_v33, %v4404_v35  ;;  %v6610_v33 = vld [vmem:[#allocation3 + $0x7f4] ss:$8 sps:$4 sm:$0xff]  }
 0x2c6   :  { %v7374_v7 = vpop.f32.mrf.mxu0  ;;  %v4142_v0 = vadd.f32 %v4141_v27, %v7174_v28  ;;  %3275 = vmatprep.mubr.bf16.mxu1 %v6610_v33 }
 0x2c7   :  { %10838 = vst [vmem:[#allocation183_spill] sm:$0xff] %v7374_v7  ;;  %v3079_v6 = vpop.f32.mrf.mxu1  ;;  %v4660_v59 = vadd.f32 %v4659_v24, %v4405_v12 }
 0x2c8   :  { %v2687_v45 = vpop.f32.mrf.mxu0  ;;  %v4143_v31 = vadd.f32 %v4142_v0, %v7184_v53  ;;  %v6608_v6 = vld [vmem:[#allocation3 + $0x7f0] ss:$8 sps:$4 sm:$0xff]   ;;  %v4409_v0 = vmul.f32 %v7214_v57, %v7214_v57 }
 0x2c9   :  { %v7389_v45 = vpop.f32.mrf.mxu1  ;;  %v4661_v52 = vadd.f32 %v4660_v59, %v4406_v10  ;;  %3276 = vmatmul.mubr.bf16.gmra.mxu1 %v6608_v6  ;;  %v4412_v6 = vmul.f32 %v7244_v55, %v7244_v55 }
 0x2ca   :  { %v7384_v25 = vpop.f32.mrf.mxu0  ;;  %v4144_v35 = vadd.f32 %v4143_v31, %v7194_v22  ;;  %v4410_v31 = vmul.f32 %v7224_v49, %v7224_v49 }
 0x2cb   :  { %10839 = vst [vmem:[#allocation184_spill] sm:$0xff] %v7384_v25  ;;  %v3082_v28 = vpop.f32.mrf.mxu1  ;;  %v4662_v12 = vadd.f32 %v4661_v52, %v4407_v63 }
 0x2cc   :  { %v2690_v14 = vpop.f32.mrf.mxu0  ;;  %v4145_v24 = vadd.f32 %v4144_v35, %v7204_v39  ;;  %v4411_v35 = vmul.f32 %v7234_v9, %v7234_v9 }
 0x2cd   :  { %v7399_v53 = vpop.f32.mrf.mxu1  ;;  %v4663_v10 = vadd.f32 %v4662_v12, %v4408_v13 }
 0x2ce   :  { %v7394_v27 = vpop.f32.mrf.mxu0  ;;  %v4146_v59 = vadd.f32 %v4145_v24, %v7214_v57 }
 0x2cf   :  { %10840 = vst [vmem:[#allocation185_spill] sm:$0xff] %v7394_v27  ;;  %v3087_v28 = vpop.f32.mrf.mxu1  ;;  %v4664_v52 = vadd.f32 %v4663_v10, %v4409_v0  ;;  %v4413_v10 = vmul.f32 %v7254_v60, %v7254_v60 }
 0x2d0   :  { %v2695_v14 = vpop.f32.mrf.mxu0  ;;  %v4147_v63 = vadd.f32 %v4146_v59, %v7224_v49 }
 0x2d1   :  { %v7409_v14 = vpop.f32.mrf.mxu1  ;;  %v4665_v39 = vadd.f32 %v4664_v52, %v4410_v31  ;;  %v4414_v52 = vmul.f32 %v7264_v46, %v7264_v46 }
 0x2d2   :  { %v7404_v22 = vpop.f32.mrf.mxu0  ;;  %v4148_v13 = vadd.f32 %v4147_v63, %v7234_v9 }
 0x2d3   :  { %10841 = vst [vmem:[#allocation186_spill] sm:$0xff] %v7404_v22  ;;  %v3090_v24 = vpop.f32.mrf.mxu1  ;;  %v4666_v57 = vadd.f32 %v4665_v39, %v4411_v35  ;;  %v4415_v35 = vmul.f32 %v7274_v16, %v7274_v16 }
 0x2d4   :  { %v2698_v33 = vpop.f32.mrf.mxu0  ;;  %v4149_v0 = vadd.f32 %v4148_v13, %v7244_v55 }
 0x2d5   :  { %v7419_v28 = vpop.f32.mrf.mxu1  ;;  %v4667_v33 = vadd.f32 %v4666_v57, %v4412_v6  ;;  %v4416_v6 = vmul.f32 %v7284_v32, %v7284_v32 }
 0x2d6   :  { %v7414_v12 = vpop.f32.mrf.mxu0  ;;  %v4150_v31 = vadd.f32 %v4149_v0, %v7254_v60 }
 0x2d7   :  { %10842 = vst [vmem:[#allocation187_spill] sm:$0xff] %v7414_v12  ;;  %v3095_v9 = vpop.f32.mrf.mxu1  ;;  %v4668_v49 = vadd.f32 %v4667_v33, %v4413_v10  ;;  %v4417_v10 = vmul.f32 %v7294_v30, %v7294_v30 }
 0x2d8   :  { %v2703_v59 = vpop.f32.mrf.mxu0  ;;  %v4151_v39 = vadd.f32 %v4150_v31, %v7264_v46 }
 0x2d9   :  { %v7429_v24 = vpop.f32.mrf.mxu1  ;;  %v4669_v59 = vadd.f32 %v4668_v49, %v4414_v52  ;;  %v4418_v52 = vmul.f32 %v7304_v47, %v7304_v47 }
 0x2da   :  { %v7424_v63 = vpop.f32.mrf.mxu0  ;;  %v4152_v57 = vadd.f32 %v4151_v39, %v7274_v16 }
 0x2db   :  { %10843 = vst [vmem:[#allocation188_spill] sm:$0xff] %v7424_v63  ;;  %v3098_v60 = vpop.f32.mrf.mxu1  ;;  %v4670_v55 = vadd.f32 %v4669_v59, %v4415_v35  ;;  %v4419_v35 = vmul.f32 %v7314_v1, %v7314_v1 }
 0x2dc   :  { %v2706_v13 = vpop.f32.mrf.mxu0  ;;  %v4153_v9 = vadd.f32 %v4152_v57, %v7284_v32 }
 0x2dd   :  { %v7439_v31 = vpop.f32.mrf.mxu1  ;;  %v4671_v13 = vadd.f32 %v4670_v55, %v4416_v6  ;;  %v4420_v6 = vmul.f32 %v7324_v15, %v7324_v15 }
 0x2de   :  { %v7434_v0 = vpop.f32.mrf.mxu0  ;;  %v4154_v49 = vadd.f32 %v4153_v9, %v7294_v30 }
 0x2df   :  { %10844 = vst [vmem:[#allocation189_spill] sm:$0xff] %v7434_v0  ;;  %v3103_v16 = vpop.f32.mrf.mxu1  ;;  %v4672_v46 = vadd.f32 %v4671_v13, %v4417_v10  ;;  %v4421_v10 = vmul.f32 %v7334_v4, %v7334_v4 }
 0x2e0   :  { %v2711_v33 = vpop.f32.mrf.mxu0  ;;  %v4155_v60 = vadd.f32 %v4154_v49, %v7304_v47 }
 0x2e1   :  { %v7449_v57 = vpop.f32.mrf.mxu1  ;;  %v4673_v33 = vadd.f32 %v4672_v46, %v4418_v52  ;;  %v4422_v52 = vmul.f32 %v7344_v56, %v7344_v56 }
 0x2e2   :  { %v7444_v39 = vpop.f32.mrf.mxu0  ;;  %v4156_v55 = vadd.f32 %v4155_v60, %v7314_v1 }
 0x2e3   :  { %10845 = vst [vmem:[#allocation190_spill] sm:$0xff] %v7444_v39  ;;  %v3106_v30 = vpop.f32.mrf.mxu1  ;;  %v4674_v32 = vadd.f32 %v4673_v33, %v4419_v35  ;;  %v4423_v35 = vmul.f32 %v7354_v29, %v7354_v29 }
 0x2e4   :  { %v2714_v59 = vpop.f32.mrf.mxu0  ;;  %v4157_v16 = vadd.f32 %v4156_v55, %v7324_v15 }
 0x2e5   :  { %v7459_v49 = vpop.f32.mrf.mxu1  ;;  %v4675_v59 = vadd.f32 %v4674_v32, %v4420_v6  ;;  %v4424_v6 = vmul.f32 %v7364_v3, %v7364_v3 }
 0x2e6   :  { %v7454_v9 = vpop.f32.mrf.mxu0  ;;  %v4158_v46 = vadd.f32 %v4157_v16, %v7334_v4 }
 0x2e7   :  { %10846 = vst [vmem:[#allocation191_spill] sm:$0xff] %v7454_v9  ;;  %v3111_v1 = vpop.f32.mrf.mxu1  ;;  %v4676_v47 = vadd.f32 %v4675_v59, %v4421_v10  ;;  %v4425_v10 = vmul.f32 %v7374_v7, %v7374_v7 }
 0x2e8   :  { %v2719_v13 = vpop.f32.mrf.mxu0  ;;  %v4159_v30 = vadd.f32 %v4158_v46, %v7344_v56 }
 0x2e9   :  { %v7469_v55 = vpop.f32.mrf.mxu1  ;;  %v4677_v13 = vadd.f32 %v4676_v47, %v4422_v52  ;;  %v4426_v52 = vmul.f32 %v7384_v25, %v7384_v25 }
 0x2ea   :  { %v7464_v60 = vpop.f32.mrf.mxu0  ;;  %v4160_v32 = vadd.f32 %v4159_v30, %v7354_v29 }
 0x2eb   :  { %10847 = vst [vmem:[#allocation192_spill] sm:$0xff] %v7464_v60  ;;  %v3114_v4 = vpop.f32.mrf.mxu1  ;;  %v4678_v15 = vadd.f32 %v4677_v13, %v4423_v35  ;;  %v4427_v35 = vmul.f32 %v7394_v27, %v7394_v27 }
 0x2ec   :  { %v2722_v33 = vpop.f32.mrf.mxu0  ;;  %v4161_v1 = vadd.f32 %v4160_v32, %v7364_v3 }
 0x2ed   :  { %v7479_v46 = vpop.f32.mrf.mxu1  ;;  %v4679_v33 = vadd.f32 %v4678_v15, %v4424_v6  ;;  %v4428_v6 = vmul.f32 %v7404_v22, %v7404_v22 }
 0x2ee   :  { %v7474_v16 = vpop.f32.mrf.mxu0  ;;  %v4162_v47 = vadd.f32 %v4161_v1, %v7374_v7 }
 0x2ef   :  { %10848 = vst [vmem:[#allocation193_spill] sm:$0xff] %v7474_v16  ;;  %v3119_v29 = vpop.f32.mrf.mxu1  ;;  %v4680_v56 = vadd.f32 %v4679_v33, %v4425_v10  ;;  %v4429_v10 = vmul.f32 %v7414_v12, %v7414_v12 }
 0x2f0   :  { %v2727_v59 = vpop.f32.mrf.mxu0  ;;  %v4163_v4 = vadd.f32 %v4162_v47, %v7384_v25 }
 0x2f1   :  { %v7489_v32 = vpop.f32.mrf.mxu1  ;;  %v4681_v59 = vadd.f32 %v4680_v56, %v4426_v52  ;;  %v4430_v52 = vmul.f32 %v7424_v63, %v7424_v63 }
 0x2f2   :  { %v7484_v30 = vpop.f32.mrf.mxu0  ;;  %v4164_v15 = vadd.f32 %v4163_v4, %v7394_v27 }
 0x2f3   :  { %10849 = vst [vmem:[#allocation194_spill] sm:$0xff] %v7484_v30  ;;  %v3122_v7 = vpop.f32.mrf.mxu1  ;;  %v4682_v3 = vadd.f32 %v4681_v59, %v4427_v35  ;;  %v4431_v35 = vmul.f32 %v7434_v0, %v7434_v0 }
 0x2f4   :  { %v2730_v13 = vpop.f32.mrf.mxu0  ;;  %v4165_v29 = vadd.f32 %v4164_v15, %v7404_v22 }
 0x2f5   :  { %v7499_v47 = vpop.f32.mrf.mxu1  ;;  %v4683_v13 = vadd.f32 %v4682_v3, %v4428_v6  ;;  %v4432_v6 = vmul.f32 %v7444_v39, %v7444_v39 }
 0x2f6   :  { %v7494_v1 = vpop.f32.mrf.mxu0  ;;  %v4166_v56 = vadd.f32 %v4165_v29, %v7414_v12 }
 0x2f7   :  { %10850 = vst [vmem:[#allocation195_spill] sm:$0xff] %v7494_v1  ;;  %v3127_v27 = vpop.f32.mrf.mxu1  ;;  %v4684_v25 = vadd.f32 %v4683_v13, %v4429_v10  ;;  %v4433_v10 = vmul.f32 %v7454_v9, %v7454_v9 }
 0x2f8   :  { %v2735_v33 = vpop.f32.mrf.mxu0  ;;  %v4167_v7 = vadd.f32 %v4166_v56, %v7424_v63 }
 0x2f9   :  { %v7509_v15 = vpop.f32.mrf.mxu1  ;;  %v4685_v33 = vadd.f32 %v4684_v25, %v4430_v52  ;;  %v4434_v52 = vmul.f32 %v7464_v60, %v7464_v60 }
 0x2fa   :  { %v7504_v4 = vpop.f32.mrf.mxu0  ;;  %v4168_v3 = vadd.f32 %v4167_v7, %v7434_v0 }
 0x2fb   :  { %10851 = vst [vmem:[#allocation196_spill] sm:$0xff] %v7504_v4  ;;  %v3130_v12 = vpop.f32.mrf.mxu1  ;;  %v4686_v22 = vadd.f32 %v4685_v33, %v4431_v35  ;;  %v4435_v35 = vmul.f32 %v7474_v16, %v7474_v16 }
 0x2fc   :  { %v2738_v59 = vpop.f32.mrf.mxu0  ;;  %v4169_v27 = vadd.f32 %v4168_v3, %v7444_v39 }
 0x2fd   :  { %v7519_v56 = vpop.f32.mrf.mxu1  ;;  %v4687_v59 = vadd.f32 %v4686_v22, %v4432_v6  ;;  %v4436_v6 = vmul.f32 %v7484_v30, %v7484_v30 }
 0x2fe   :  { %v7514_v29 = vpop.f32.mrf.mxu0  ;;  %v4170_v25 = vadd.f32 %v4169_v27, %v7454_v9 }
 0x2ff   :  { %10852 = vst [vmem:[#allocation197_spill] sm:$0xff] %v7514_v29  ;;  %v3135_v0 = vpop.f32.mrf.mxu1  ;;  %v4688_v63 = vadd.f32 %v4687_v59, %v4433_v10  ;;  %v4437_v10 = vmul.f32 %v7494_v1, %v7494_v1 }
 0x300   :  { %v2743_v13 = vpop.f32.mrf.mxu0  ;;  %v4171_v12 = vadd.f32 %v4170_v25, %v7464_v60 }
 0x301   :  { %v7529_v3 = vpop.f32.mrf.mxu1  ;;  %v4689_v13 = vadd.f32 %v4688_v63, %v4434_v52  ;;  %v4438_v52 = vmul.f32 %v7504_v4, %v7504_v4 }
 0x302   :  { %v7524_v7 = vpop.f32.mrf.mxu0  ;;  %v4172_v22 = vadd.f32 %v4171_v12, %v7474_v16 }
 0x303   :  { %10853 = vst [vmem:[#allocation198_spill] sm:$0xff] %v7524_v7  ;;  %v3138_v9 = vpop.f32.mrf.mxu1  ;;  %v4690_v39 = vadd.f32 %v4689_v13, %v4435_v35  ;;  %v4439_v35 = vmul.f32 %v7514_v29, %v7514_v29 }
 0x304   :  { %v2746_v33 = vpop.f32.mrf.mxu0  ;;  %v4173_v0 = vadd.f32 %v4172_v22, %v7484_v30 }
 0x305   :  { %v7539_v25 = vpop.f32.mrf.mxu1  ;;  %v4691_v33 = vadd.f32 %v4690_v39, %v4436_v6  ;;  %v4440_v6 = vmul.f32 %v7524_v7, %v7524_v7 }
 0x306   :  { %v7534_v27 = vpop.f32.mrf.mxu0  ;;  %v4174_v63 = vadd.f32 %v4173_v0, %v7494_v1 }
 0x307   :  { %10854 = vst [vmem:[#allocation199_spill] sm:$0xff] %v7534_v27  ;;  %v3143_v16 = vpop.f32.mrf.mxu1  ;;  %v4692_v60 = vadd.f32 %v4691_v33, %v4437_v10  ;;  %v4441_v10 = vmul.f32 %v7534_v27, %v7534_v27 }
 0x308   :  { %v2751_v59 = vpop.f32.mrf.mxu0  ;;  %v4175_v9 = vadd.f32 %v4174_v63, %v7504_v4 }
 0x309   :  { %v7549_v22 = vpop.f32.mrf.mxu1  ;;  %v4693_v59 = vadd.f32 %v4692_v60, %v4438_v52 }
 0x30a   :  { %v7544_v12 = vpop.f32.mrf.mxu0  ;;  %10856 = vst [vmem:[#allocation201_spill] sm:$0xff] %v7549_v22  ;;  %v4176_v39 = vadd.f32 %v4175_v9, %v7514_v29 }
 0x30b   :  { %10855 = vst [vmem:[#allocation200_spill] sm:$0xff] %v7544_v12  ;;  %v3146_v1 = vpop.f32.mrf.mxu1  ;;  %v4694_v30 = vadd.f32 %v4693_v59, %v4439_v35  ;;  %v4442_v52 = vmul.f32 %v7544_v12, %v7544_v12 }
 0x30c   :  { %v2754_v13 = vpop.f32.mrf.mxu0  ;;  %v4177_v16 = vadd.f32 %v4176_v39, %v7524_v7 }
 0x30d   :  { %v7559_v63 = vpop.f32.mrf.mxu1  ;;  %v4695_v13 = vadd.f32 %v4694_v30, %v4440_v6 }
 0x30e   :  { %v7554_v0 = vpop.f32.mrf.mxu0  ;;  %10858 = vst [vmem:[#allocation203_spill] sm:$0xff] %v7559_v63  ;;  %v4178_v60 = vadd.f32 %v4177_v16, %v7534_v27 }
 0x30f   :  { %10857 = vst [vmem:[#allocation202_spill] sm:$0xff] %v7554_v0  ;;  %v3151_v29 = vpop.f32.mrf.mxu1  ;;  %v4696_v4 = vadd.f32 %v4695_v13, %v4441_v10  ;;  %v4443_v35 = vmul.f32 %v7554_v0, %v7554_v0 }
 0x310   :  { %v2759_v33 = vpop.f32.mrf.mxu0  ;;  %v4179_v1 = vadd.f32 %v4178_v60, %v7544_v12 }
 0x311   :  { %v7569_v39 = vpop.f32.mrf.mxu1  ;;  %v4697_v33 = vadd.f32 %v4696_v4, %v4442_v52 }
 0x312   :  { %v7564_v9 = vpop.f32.mrf.mxu0  ;;  %10860 = vst [vmem:[#allocation205_spill] sm:$0xff] %v7569_v39  ;;  %v4180_v30 = vadd.f32 %v4179_v1, %v7554_v0  ;;  %v10869_v39 = vld [vmem:[#allocation49_spill] sm:$0xff] }
 0x313   :  { %10859 = vst [vmem:[#allocation204_spill] sm:$0xff] %v7564_v9  ;;  %v4444_v6 = vmul.f32 %v7564_v9, %v7564_v9  ;;  %v3154_v27 = vpop.f32.mrf.mxu1  ;;  %v4698_v7 = vadd.f32 %v4697_v33, %v4443_v35 }
 0x314   :  { %v2762_v59 = vpop.f32.mrf.mxu0  ;;  %v4181_v29 = vadd.f32 %v4180_v30, %v7564_v9  ;;  %v10865_v30 = vld [vmem:[#allocation43_spill] sm:$0xff] }
 0x315   :  { %v7579_v60 = vpop.f32.mrf.mxu1  ;;  %v4699_v59 = vadd.f32 %v4698_v7, %v4444_v6 }
 0x316   :  { %v7574_v16 = vpop.f32.mrf.mxu0  ;;  %10862 = vst [vmem:[#allocation207_spill] sm:$0xff] %v7579_v60 }
 0x317   :  { %10861 = vst [vmem:[#allocation206_spill] sm:$0xff] %v7574_v16  ;;  %v4445_v10 = vmul.f32 %v7574_v16, %v7574_v16  ;;  %v4182_v4 = vadd.f32 %v4181_v29, %v7574_v16  ;;  %v3159_v1 = vpop.f32.mrf.mxu1  ;;  %v10866_v29 = vld [vmem:[#allocation45_spill] sm:$0xff] }
 0x318   :  { %v2767_v13 = vpop.f32.mrf.mxu0  ;;  %v4448_v16 = vmul.f32 %v10866_v29, %v10866_v29  ;;  %v10868_v1 = vld [vmem:[#allocation47_spill] sm:$0xff] }
 0x319   :  { %v4700_v0 = vadd.f32 %v4699_v59, %v4445_v10  ;;  %v7587_v33 = vpop.f32.mrf.mxu1  ;;  %v4447_v13 = vmul.f32 %v10865_v30, %v10865_v30 }
 0x31a   :  { %v7582_v52 = vpop.f32.mrf.mxu0  ;;  %10864 = vst [vmem:[#allocation209_spill] sm:$0xff] %v7587_v33 }
 0x31b   :  { %10863 = vst [vmem:[#allocation208_spill] sm:$0xff] %v7582_v52  ;;  %v4183_v12 = vadd.f32 %v4182_v4, %v7582_v52  ;;  %v4446_v27 = vmul.f32 %v7582_v52, %v7582_v52  ;;  %v3162_v6 = vpop.f32.mrf.mxu1 }
 0x31c   :  { %v2770_v35 = vpop.f32.mrf.mxu0 }
 0x31d   :  { %v4184_v9 = vadd.f32 %v4183_v12, %v10865_v30  ;;  %v4701_v7 = vadd.f32 %v4700_v0, %v4446_v27  ;;  %v7595_v4 = vpop.f32.mrf.mxu1  ;;  %v4449_v35 = vmul.f32 %v10868_v1, %v10868_v1  ;;  %v4450_v12 = vmul.f32 %v10869_v39, %v10869_v39  ;;  %v10871_v30 = vld [vmem:[#allocation51_spill] sm:$0xff] }
 0x31e   :  { %10867 = vst [vmem:[#allocation210_spill] sm:$0xff] %v7595_v4  ;;  %v10872_v4 = vld [vmem:[#allocation53_spill] sm:$0xff] }
 0x31f   :  { %v4185_v10 = vadd.f32 %v4184_v9, %v10866_v29  ;;  %v4702_v59 = vadd.f32 %v4701_v7, %v4447_v13  ;;  %v3167_v60 = vpop.f32.mrf.mxu1  ;;  %v4451_v9 = vmul.f32 %v10871_v30, %v10871_v30 }
 0x321   :  { %v4186_v52 = vadd.f32 %v4185_v10, %v10868_v1  ;;  %v4703_v33 = vadd.f32 %v4702_v59, %v4448_v16  ;;  %v7603_v6 = vpop.f32.mrf.mxu1  ;;  %v4452_v10 = vmul.f32 %v10872_v4, %v10872_v4  ;;  %v10874_v1 = vld [vmem:[#allocation55_spill] sm:$0xff] }
 0x322   :  { %10870 = vst [vmem:[#allocation211_spill] sm:$0xff] %v7603_v6  ;;  %v10875_v6 = vld [vmem:[#allocation57_spill] sm:$0xff] }
 0x323   :  { %v4187_v0 = vadd.f32 %v4186_v52, %v10869_v39  ;;  %v4704_v27 = vadd.f32 %v4703_v33, %v4449_v35  ;;  %v3170_v29 = vpop.f32.mrf.mxu1  ;;  %v4453_v52 = vmul.f32 %v10874_v1, %v10874_v1 }
 0x325   :  { %v4188_v13 = vadd.f32 %v4187_v0, %v10871_v30  ;;  %v4705_v7 = vadd.f32 %v4704_v27, %v4450_v12  ;;  %v7611_v59 = vpop.f32.mrf.mxu1  ;;  %v4454_v0 = vmul.f32 %v10875_v6, %v10875_v6  ;;  %v10877_v30 = vld [vmem:[#allocation59_spill] sm:$0xff] }
 0x326   :  { %10873 = vst [vmem:[#allocation212_spill] sm:$0xff] %v7611_v59  ;;  %v10878_v59 = vld [vmem:[#allocation61_spill] sm:$0xff] }
 0x327   :  { %v4189_v16 = vadd.f32 %v4188_v13, %v10872_v4  ;;  %v4706_v60 = vadd.f32 %v4705_v7, %v4451_v9  ;;  %v3175_v39 = vpop.f32.mrf.mxu1  ;;  %v4455_v9 = vmul.f32 %v10877_v30, %v10877_v30 }
 0x329   :  { %v4190_v33 = vadd.f32 %v4189_v16, %v10874_v1  ;;  %v4707_v35 = vadd.f32 %v4706_v60, %v4452_v10  ;;  %v7619_v27 = vpop.f32.mrf.mxu1  ;;  %v4456_v16 = vmul.f32 %v10878_v59, %v10878_v59  ;;  %v10880_v1 = vld [vmem:[#allocation63_spill] sm:$0xff] }
 0x32a   :  { %10876 = vst [vmem:[#allocation213_spill] sm:$0xff] %v7619_v27  ;;  %v10881_v27 = vld [vmem:[#allocation65_spill] sm:$0xff] }
 0x32b   :  { %v4191_v29 = vadd.f32 %v4190_v33, %v10875_v6  ;;  %v4708_v12 = vadd.f32 %v4707_v35, %v4453_v52  ;;  %v3178_v4 = vpop.f32.mrf.mxu1  ;;  %v4457_v52 = vmul.f32 %v10880_v1, %v10880_v1 }
 0x32d   :  { %v4192_v13 = vadd.f32 %v4191_v29, %v10877_v30  ;;  %v4709_v7 = vadd.f32 %v4708_v12, %v4454_v0  ;;  %v7627_v60 = vpop.f32.mrf.mxu1  ;;  %v4458_v29 = vmul.f32 %v10881_v27, %v10881_v27  ;;  %v10883_v30 = vld [vmem:[#allocation67_spill] sm:$0xff] }
 0x32e   :  { %10879 = vst [vmem:[#allocation214_spill] sm:$0xff] %v7627_v60  ;;  %v10884_v60 = vld [vmem:[#allocation69_spill] sm:$0xff] }
 0x32f   :  { %v4193_v39 = vadd.f32 %v4192_v13, %v10878_v59  ;;  %v4710_v10 = vadd.f32 %v4709_v7, %v4455_v9  ;;  %v3183_v6 = vpop.f32.mrf.mxu1  ;;  %v4459_v9 = vmul.f32 %v10883_v30, %v10883_v30 }
 0x331   :  { %v4194_v33 = vadd.f32 %v4193_v39, %v10880_v1  ;;  %v4711_v35 = vadd.f32 %v4710_v10, %v4456_v16  ;;  %v7635_v12 = vpop.f32.mrf.mxu1  ;;  %v4460_v39 = vmul.f32 %v10884_v60, %v10884_v60  ;;  %v10886_v1 = vld [vmem:[#allocation71_spill] sm:$0xff] }
 0x332   :  { %10882 = vst [vmem:[#allocation215_spill] sm:$0xff] %v7635_v12  ;;  %v10887_v12 = vld [vmem:[#allocation73_spill] sm:$0xff] }
 0x333   :  { %v4195_v4 = vadd.f32 %v4194_v33, %v10881_v27  ;;  %v4712_v0 = vadd.f32 %v4711_v35, %v4457_v52  ;;  %v3186_v59 = vpop.f32.mrf.mxu1  ;;  %v4461_v52 = vmul.f32 %v10886_v1, %v10886_v1 }
 0x335   :  { %v4196_v13 = vadd.f32 %v4195_v4, %v10883_v30  ;;  %v4713_v7 = vadd.f32 %v4712_v0, %v4458_v29  ;;  %v7643_v10 = vpop.f32.mrf.mxu1  ;;  %v4462_v4 = vmul.f32 %v10887_v12, %v10887_v12  ;;  %v10889_v30 = vld [vmem:[#allocation75_spill] sm:$0xff] }
 0x336   :  { %10885 = vst [vmem:[#allocation216_spill] sm:$0xff] %v7643_v10  ;;  %v10890_v10 = vld [vmem:[#allocation77_spill] sm:$0xff] }
 0x337   :  { %v4197_v6 = vadd.f32 %v4196_v13, %v10884_v60  ;;  %v4714_v16 = vadd.f32 %v4713_v7, %v4459_v9  ;;  %v3191_v27 = vpop.f32.mrf.mxu1  ;;  %v4463_v9 = vmul.f32 %v10889_v30, %v10889_v30 }
 0x339   :  { %v4198_v33 = vadd.f32 %v4197_v6, %v10886_v1  ;;  %v4715_v35 = vadd.f32 %v4714_v16, %v4460_v39  ;;  %v7651_v0 = vpop.f32.mrf.mxu1  ;;  %v4464_v6 = vmul.f32 %v10890_v10, %v10890_v10  ;;  %v10892_v1 = vld [vmem:[#allocation79_spill] sm:$0xff] }
 0x33a   :  { %10888 = vst [vmem:[#allocation217_spill] sm:$0xff] %v7651_v0  ;;  %v10893_v0 = vld [vmem:[#allocation81_spill] sm:$0xff] }
 0x33b   :  { %v4199_v59 = vadd.f32 %v4198_v33, %v10887_v12  ;;  %v4716_v29 = vadd.f32 %v4715_v35, %v4461_v52  ;;  %v3194_v60 = vpop.f32.mrf.mxu1  ;;  %v4465_v52 = vmul.f32 %v10892_v1, %v10892_v1 }
 0x33d   :  { %v4200_v13 = vadd.f32 %v4199_v59, %v10889_v30  ;;  %v4717_v7 = vadd.f32 %v4716_v29, %v4462_v4  ;;  %v7659_v16 = vpop.f32.mrf.mxu1  ;;  %v4466_v59 = vmul.f32 %v10893_v0, %v10893_v0  ;;  %v10895_v30 = vld [vmem:[#allocation83_spill] sm:$0xff] }
 0x33e   :  { %10891 = vst [vmem:[#allocation218_spill] sm:$0xff] %v7659_v16  ;;  %v10896_v16 = vld [vmem:[#allocation85_spill] sm:$0xff] }
 0x33f   :  { %v4201_v27 = vadd.f32 %v4200_v13, %v10890_v10  ;;  %v4718_v39 = vadd.f32 %v4717_v7, %v4463_v9  ;;  %v3199_v12 = vpop.f32.mrf.mxu1  ;;  %v4467_v9 = vmul.f32 %v10895_v30, %v10895_v30 }
 0x341   :  { %v4202_v33 = vadd.f32 %v4201_v27, %v10892_v1  ;;  %v4719_v35 = vadd.f32 %v4718_v39, %v4464_v6  ;;  %v7667_v29 = vpop.f32.mrf.mxu1  ;;  %v4468_v27 = vmul.f32 %v10896_v16, %v10896_v16  ;;  %v10898_v1 = vld [vmem:[#allocation87_spill] sm:$0xff] }
 0x342   :  { %10894 = vst [vmem:[#allocation219_spill] sm:$0xff] %v7667_v29  ;;  %v10899_v29 = vld [vmem:[#allocation89_spill] sm:$0xff] }
 0x343   :  { %v4203_v60 = vadd.f32 %v4202_v33, %v10893_v0  ;;  %v4720_v4 = vadd.f32 %v4719_v35, %v4465_v52  ;;  %v3202_v10 = vpop.f32.mrf.mxu1  ;;  %v4469_v52 = vmul.f32 %v10898_v1, %v10898_v1 }
 0x345   :  { %v4204_v13 = vadd.f32 %v4203_v60, %v10895_v30  ;;  %v4721_v7 = vadd.f32 %v4720_v4, %v4466_v59  ;;  %v7675_v39 = vpop.f32.mrf.mxu1  ;;  %v4470_v60 = vmul.f32 %v10899_v29, %v10899_v29  ;;  %v10901_v30 = vld [vmem:[#allocation91_spill] sm:$0xff] }
 0x346   :  { %10897 = vst [vmem:[#allocation220_spill] sm:$0xff] %v7675_v39  ;;  %v10902_v39 = vld [vmem:[#allocation93_spill] sm:$0xff] }
 0x347   :  { %v4205_v12 = vadd.f32 %v4204_v13, %v10896_v16  ;;  %v4722_v6 = vadd.f32 %v4721_v7, %v4467_v9  ;;  %v3207_v0 = vpop.f32.mrf.mxu1  ;;  %v4471_v9 = vmul.f32 %v10901_v30, %v10901_v30 }
 0x349   :  { %v4206_v33 = vadd.f32 %v4205_v12, %v10898_v1  ;;  %v4723_v35 = vadd.f32 %v4722_v6, %v4468_v27  ;;  %v7683_v4 = vpop.f32.mrf.mxu1  ;;  %v4472_v12 = vmul.f32 %v10902_v39, %v10902_v39  ;;  %v10904_v1 = vld [vmem:[#allocation95_spill] sm:$0xff] }
 0x34a   :  { %10900 = vst [vmem:[#allocation221_spill] sm:$0xff] %v7683_v4  ;;  %v10905_v4 = vld [vmem:[#allocation97_spill] sm:$0xff] }
 0x34b   :  { %v4207_v10 = vadd.f32 %v4206_v33, %v10899_v29  ;;  %v4724_v59 = vadd.f32 %v4723_v35, %v4469_v52  ;;  %v3210_v16 = vpop.f32.mrf.mxu1  ;;  %v4473_v52 = vmul.f32 %v10904_v1, %v10904_v1 }
 0x34d   :  { %v4208_v13 = vadd.f32 %v4207_v10, %v10901_v30  ;;  %v4725_v7 = vadd.f32 %v4724_v59, %v4470_v60  ;;  %v7691_v6 = vpop.f32.mrf.mxu1  ;;  %v4474_v10 = vmul.f32 %v10905_v4, %v10905_v4  ;;  %v10907_v30 = vld [vmem:[#allocation99_spill] sm:$0xff] }
 0x34e   :  { %10903 = vst [vmem:[#allocation222_spill] sm:$0xff] %v7691_v6  ;;  %v10908_v6 = vld [vmem:[#allocation101_spill] sm:$0xff] }
 0x34f   :  { %v4209_v0 = vadd.f32 %v4208_v13, %v10902_v39  ;;  %v4726_v27 = vadd.f32 %v4725_v7, %v4471_v9  ;;  %v3215_v29 = vpop.f32.mrf.mxu1  ;;  %v4475_v9 = vmul.f32 %v10907_v30, %v10907_v30 }
 0x351   :  { %v4210_v33 = vadd.f32 %v4209_v0, %v10904_v1  ;;  %v4727_v35 = vadd.f32 %v4726_v27, %v4472_v12  ;;  %v7699_v59 = vpop.f32.mrf.mxu1  ;;  %v4476_v0 = vmul.f32 %v10908_v6, %v10908_v6  ;;  %v10910_v1 = vld [vmem:[#allocation103_spill] sm:$0xff] }
 0x352   :  { %10906 = vst [vmem:[#allocation223_spill] sm:$0xff] %v7699_v59  ;;  %v10911_v59 = vld [vmem:[#allocation105_spill] sm:$0xff] }
 0x353   :  { %v4211_v16 = vadd.f32 %v4210_v33, %v10905_v4  ;;  %v4728_v60 = vadd.f32 %v4727_v35, %v4473_v52  ;;  %v3218_v39 = vpop.f32.mrf.mxu1  ;;  %v4477_v52 = vmul.f32 %v10910_v1, %v10910_v1 }
 0x355   :  { %v4212_v13 = vadd.f32 %v4211_v16, %v10907_v30  ;;  %v4729_v7 = vadd.f32 %v4728_v60, %v4474_v10  ;;  %v7707_v27 = vpop.f32.mrf.mxu1  ;;  %v4478_v16 = vmul.f32 %v10911_v59, %v10911_v59  ;;  %v10912_v30 = vld [vmem:[#allocation107_spill] sm:$0xff] }
 0x356   :  { %10909 = vst [vmem:[#allocation224_spill] sm:$0xff] %v7707_v27  ;;  %v10913_v27 = vld [vmem:[#allocation109_spill] sm:$0xff] }
 0x357   :  { %v4213_v29 = vadd.f32 %v4212_v13, %v10908_v6  ;;  %v4730_v12 = vadd.f32 %v4729_v7, %v4475_v9  ;;  %v3223_v4 = vpop.f32.mrf.mxu1  ;;  %v4479_v9 = vmul.f32 %v10912_v30, %v10912_v30 }
 0x359   :  { %v4214_v33 = vadd.f32 %v4213_v29, %v10910_v1  ;;  %v4731_v35 = vadd.f32 %v4730_v12, %v4476_v0  ;;  %v7715_v60 = vpop.f32.mrf.mxu1  ;;  %v4480_v29 = vmul.f32 %v10913_v27, %v10913_v27  ;;  %v10914_v1 = vld [vmem:[#allocation111_spill] sm:$0xff] }
 0x35b   :  { %v4215_v39 = vadd.f32 %v4214_v33, %v10911_v59  ;;  %v4732_v10 = vadd.f32 %v4731_v35, %v4477_v52  ;;  %v3226_v6 = vpop.f32.mrf.mxu1  ;;  %v4481_v52 = vmul.f32 %v10914_v1, %v10914_v1 }
 0x35d   :  { %v4216_v13 = vadd.f32 %v4215_v39, %v10912_v30  ;;  %v4733_v7 = vadd.f32 %v4732_v10, %v4478_v16  ;;  %v7723_v12 = vpop.f32.mrf.mxu1  ;;  %v4482_v39 = vmul.f32 %v6969_v37, %v6969_v37 }
 0x35f   :  { %v4217_v4 = vadd.f32 %v4216_v13, %v10913_v27  ;;  %v4734_v0 = vadd.f32 %v4733_v7, %v4479_v9  ;;  %v3231_v59 = vpop.f32.mrf.mxu1  ;;  %v4483_v9 = vmul.f32 %v6979_v5, %v6979_v5 }
 0x361   :  { %v4218_v33 = vadd.f32 %v4217_v4, %v10914_v1  ;;  %v4735_v35 = vadd.f32 %v4734_v0, %v4480_v29  ;;  %v7731_v10 = vpop.f32.mrf.mxu1  ;;  %v4484_v4 = vmul.f32 %v6989_v34, %v6989_v34  ;;  %v10936_v1 = vld [vmem:[#allocation165_spill] sm:$0xff] }
 0x363   :  { %v4219_v6 = vadd.f32 %v4218_v33, %v6969_v37  ;;  %v4736_v16 = vadd.f32 %v4735_v35, %v4481_v52  ;;  %v3234_v27 = vpop.f32.mrf.mxu1  ;;  %v4485_v52 = vmul.f32 %v6999_v41, %v6999_v41 }
 0x365   :  { %v4220_v13 = vadd.f32 %v4219_v6, %v6979_v5  ;;  %v4737_v7 = vadd.f32 %v4736_v16, %v4482_v39  ;;  %v7739_v0 = vpop.f32.mrf.mxu1  ;;  %v4486_v6 = vmul.f32 %v7009_v50, %v7009_v50  ;;  %v10934_v5 = vld [vmem:[#allocation161_spill] sm:$0xff] }
 0x367   :  { %v4221_v59 = vadd.f32 %v4220_v13, %v6989_v34  ;;  %v4738_v29 = vadd.f32 %v4737_v7, %v4483_v9  ;;  %v3239_v37 = vpop.f32.mrf.mxu1  ;;  %v4487_v9 = vmul.f32 %v7019_v20, %v7019_v20 }
 0x369   :  { %v4222_v33 = vadd.f32 %v4221_v59, %v6999_v41  ;;  %v4739_v35 = vadd.f32 %v4738_v29, %v4484_v4  ;;  %v7747_v16 = vpop.f32.mrf.mxu1  ;;  %v4488_v59 = vmul.f32 %v7029_v2, %v7029_v2  ;;  %v10931_v41 = vld [vmem:[#allocation157_spill] sm:$0xff] }
 0x36a   :  { %10915 = vst [vmem:[#allocation225_spill] sm:$0xff] %v7747_v16 }
 0x36b   :  { %v4223_v27 = vadd.f32 %v4222_v33, %v7009_v50  ;;  %v4740_v39 = vadd.f32 %v4739_v35, %v4485_v52  ;;  %v3242_v34 = vpop.f32.mrf.mxu1  ;;  %v4489_v52 = vmul.f32 %v7039_v23, %v7039_v23 }
 0x36d   :  { %v4224_v13 = vadd.f32 %v4223_v27, %v7019_v20  ;;  %v4741_v7 = vadd.f32 %v4740_v39, %v4486_v6  ;;  %v7755_v29 = vpop.f32.mrf.mxu1  ;;  %v4490_v27 = vmul.f32 %v7049_v18, %v7049_v18  ;;  %v10928_v20 = vld [vmem:[#allocation153_spill] sm:$0xff] }
 0x36e   :  { %10916 = vst [vmem:[#allocation226_spill] sm:$0xff] %v7755_v29 }
 0x36f   :  { %v4225_v37 = vadd.f32 %v4224_v13, %v7029_v2  ;;  %v4742_v4 = vadd.f32 %v4741_v7, %v4487_v9  ;;  %v3247_v50 = vpop.f32.mrf.mxu1  ;;  %v4491_v9 = vmul.f32 %v7059_v42, %v7059_v42 }
 0x371   :  { %v4226_v33 = vadd.f32 %v4225_v37, %v7039_v23  ;;  %v4743_v35 = vadd.f32 %v4742_v4, %v4488_v59  ;;  %v7763_v39 = vpop.f32.mrf.mxu1  ;;  %v4492_v37 = vmul.f32 %v7069_v38, %v7069_v38  ;;  %v10925_v23 = vld [vmem:[#allocation149_spill] sm:$0xff] }
 0x372   :  { %10917 = vst [vmem:[#allocation227_spill] sm:$0xff] %v7763_v39 }
 0x373   :  { %v4227_v34 = vadd.f32 %v4226_v33, %v7049_v18  ;;  %v4744_v6 = vadd.f32 %v4743_v35, %v4489_v52  ;;  %v3250_v2 = vpop.f32.mrf.mxu1  ;;  %v4493_v52 = vmul.f32 %v7079_v58, %v7079_v58 }
 0x375   :  { %v4228_v13 = vadd.f32 %v4227_v34, %v7059_v42  ;;  %v4745_v7 = vadd.f32 %v4744_v6, %v4490_v27  ;;  %v7771_v4 = vpop.f32.mrf.mxu1  ;;  %v4494_v34 = vmul.f32 %v7089_v36, %v7089_v36  ;;  %v10922_v42 = vld [vmem:[#allocation145_spill] sm:$0xff] }
 0x376   :  { %10918 = vst [vmem:[#allocation228_spill] sm:$0xff] %v7771_v4 }
 0x377   :  { %v4229_v50 = vadd.f32 %v4228_v13, %v7069_v38  ;;  %v4746_v59 = vadd.f32 %v4745_v7, %v4491_v9  ;;  %v3255_v18 = vpop.f32.mrf.mxu1  ;;  %v4495_v9 = vmul.f32 %v7099_v8, %v7099_v8 }
 0x379   :  { %v4230_v33 = vadd.f32 %v4229_v50, %v7079_v58  ;;  %v4747_v35 = vadd.f32 %v4746_v59, %v4492_v37  ;;  %v7779_v6 = vpop.f32.mrf.mxu1  ;;  %v4496_v50 = vmul.f32 %v7109_v17, %v7109_v17  ;;  %v10921_v58 = vld [vmem:[#allocation143_spill] sm:$0xff] }
 0x37a   :  { %10919 = vst [vmem:[#allocation229_spill] sm:$0xff] %v7779_v6 }
 0x37b   :  { %v4231_v2 = vadd.f32 %v4230_v33, %v7089_v36  ;;  %v4748_v27 = vadd.f32 %v4747_v35, %v4493_v52  ;;  %v3258_v38 = vpop.f32.mrf.mxu1  ;;  %v4497_v52 = vmul.f32 %v10921_v58, %v10921_v58 }
 0x37d   :  { %v4232_v13 = vadd.f32 %v4231_v2, %v7099_v8  ;;  %v4749_v7 = vadd.f32 %v4748_v27, %v4494_v34  ;;  %v7787_v59 = vpop.f32.mrf.mxu1  ;;  %v4498_v2 = vmul.f32 %v10922_v42, %v10922_v42 }
 0x37e   :  { %10920 = vst [vmem:[#allocation230_spill] sm:$0xff] %v7787_v59 }
 0x37f   :  { %v4750_v37 = vadd.f32 %v4749_v7, %v4495_v9  ;;  %v4233_v18 = vadd.f32 %v4232_v13, %v7109_v17  ;;  %v3263_v36 = vpop.f32.mrf.mxu1  ;;  %v10924_v9 = vld [vmem:[#allocation147_spill] sm:$0xff] }
 0x380   :  { %v4499_v13 = vmul.f32 %v10924_v9, %v10924_v9 }
 0x381   :  { %v4234_v33 = vadd.f32 %v4233_v18, %v10921_v58  ;;  %v4751_v35 = vadd.f32 %v4750_v37, %v4496_v50  ;;  %v7795_v27 = vpop.f32.mrf.mxu1  ;;  %v4500_v18 = vmul.f32 %v10925_v23, %v10925_v23  ;;  %v10927_v58 = vld [vmem:[#allocation151_spill] sm:$0xff] }
 0x382   :  { %10923 = vst [vmem:[#allocation231_spill] sm:$0xff] %v7795_v27 }
 0x383   :  { %v4235_v38 = vadd.f32 %v4234_v33, %v10922_v42  ;;  %v4752_v34 = vadd.f32 %v4751_v35, %v4497_v52  ;;  %v3266_v8 = vpop.f32.mrf.mxu1  ;;  %v4501_v52 = vmul.f32 %v10927_v58, %v10927_v58 }
 0x385   :  { %v4236_v7 = vadd.f32 %v4235_v38, %v10924_v9  ;;  %v4753_v17 = vadd.f32 %v4752_v34, %v4498_v2  ;;  %v7803_v37 = vpop.f32.mrf.mxu1  ;;  %v4502_v38 = vmul.f32 %v10928_v20, %v10928_v20  ;;  %v10930_v9 = vld [vmem:[#allocation155_spill] sm:$0xff] }
 0x386   :  { %10926 = vst [vmem:[#allocation232_spill] sm:$0xff] %v7803_v37 }
 0x387   :  { %v4237_v36 = vadd.f32 %v4236_v7, %v10925_v23  ;;  %v4754_v50 = vadd.f32 %v4753_v17, %v4499_v13  ;;  %v3271_v42 = vpop.f32.mrf.mxu1  ;;  %v4503_v17 = vmul.f32 %v10930_v9, %v10930_v9 }
 0x389   :  { %v4238_v33 = vadd.f32 %v4237_v36, %v10927_v58  ;;  %v4755_v35 = vadd.f32 %v4754_v50, %v4500_v18  ;;  %v7811_v34 = vpop.f32.mrf.mxu1  ;;  %v4504_v36 = vmul.f32 %v10931_v41, %v10931_v41  ;;  %v10933_v58 = vld [vmem:[#allocation159_spill] sm:$0xff] }
 0x38a   :  { %10929 = vst [vmem:[#allocation233_spill] sm:$0xff] %v7811_v34 }
 0x38b   :  { %v4239_v8 = vadd.f32 %v4238_v33, %v10928_v20  ;;  %v4756_v2 = vadd.f32 %v4755_v35, %v4501_v52  ;;  %v3274_v23 = vpop.f32.mrf.mxu1  ;;  %v4505_v52 = vmul.f32 %v10933_v58, %v10933_v58 }
 0x38d   :  { %v4240_v13 = vadd.f32 %v4239_v8, %v10930_v9  ;;  %v4757_v7 = vadd.f32 %v4756_v2, %v4502_v38  ;;  %v7819_v50 = vpop.f32.mrf.mxu1  ;;  %v4506_v8 = vmul.f32 %v10934_v5, %v10934_v5  ;;  %v10935_v9 = vld [vmem:[#allocation163_spill] sm:$0xff] }
 0x38e   :  { %10932 = vst [vmem:[#allocation234_spill] sm:$0xff] %v7819_v50 }
 0x38f   :  { %v4241_v42 = vadd.f32 %v4240_v13, %v10931_v41  ;;  %v4758_v18 = vadd.f32 %v4757_v7, %v4503_v17  ;;  %v3279_v20 = vpop.f32.mrf.mxu1  ;;  %v4507_v17 = vmul.f32 %v10935_v9, %v10935_v9 }
 0x391   :  { %v4242_v33 = vadd.f32 %v4241_v42, %v10933_v58  ;;  %v4759_v35 = vadd.f32 %v4758_v18, %v4504_v36  ;;  %v7827_v2 = vpop.f32.mrf.mxu1  ;;  %v4508_v42 = vmul.f32 %v10936_v1, %v10936_v1  ;;  %v10937_v18 = vld [vmem:[#allocation167_spill] sm:$0xff] }
 0x392   :  { %v4509_v58 = vmul.f32 %v10937_v18, %v10937_v18 }
 0x393   :  { %v4243_v23 = vadd.f32 %v4242_v33, %v10934_v5  ;;  %v4760_v38 = vadd.f32 %v4759_v35, %v4505_v52  ;;  %v3282_v41 = vpop.f32.mrf.mxu1  ;;  %v10938_v35 = vld [vmem:[#allocation169_spill] sm:$0xff] }
 0x394   :  { %v4510_v5 = vmul.f32 %v10938_v35, %v10938_v35 }
 0x395   :  { %v4244_v13 = vadd.f32 %v4243_v23, %v10935_v9  ;;  %v4761_v7 = vadd.f32 %v4760_v38, %v4506_v8  ;;  %v10939_v8 = vld [vmem:[#allocation171_spill] sm:$0xff] }
 0x396   :  { %v4511_v41 = vmul.f32 %v10939_v8, %v10939_v8 }
 0x397   :  { %v4245_v20 = vadd.f32 %v4244_v13, %v10936_v1  ;;  %v4762_v36 = vadd.f32 %v4761_v7, %v4507_v17  ;;  %v4512_v13 = vmul.f32 %v7269_v48, %v7269_v48 }
 0x399   :  { %v4246_v52 = vadd.f32 %v4245_v20, %v10937_v18  ;;  %v4763_v33 = vadd.f32 %v4762_v36, %v4508_v42  ;;  %v4513_v36 = vmul.f32 %v7279_v21, %v7279_v21 }
 0x39b   :  { %v4247_v30 = vadd.f32 %v4246_v52, %v10938_v35  ;;  %v4764_v23 = vadd.f32 %v4763_v33, %v4509_v58  ;;  %v4514_v33 = vmul.f32 %v7289_v40, %v7289_v40 }
 0x39d   :  { %v4248_v38 = vadd.f32 %v4247_v30, %v10939_v8  ;;  %v4765_v9 = vadd.f32 %v4764_v23, %v4510_v5  ;;  %v4515_v23 = vmul.f32 %v7299_v44, %v7299_v44 }
 0x39f   :  { %v4249_v17 = vadd.f32 %v4248_v38, %v7269_v48  ;;  %v4766_v7 = vadd.f32 %v4765_v9, %v4511_v41  ;;  %v4516_v41 = vmul.f32 %v7309_v61, %v7309_v61 }
 0x3a1   :  { %v4767_v20 = vadd.f32 %v4766_v7, %v4512_v13  ;;  %v4250_v42 = vadd.f32 %v4249_v17, %v7279_v21  ;;  %v4517_v7 = vmul.f32 %v7319_v26, %v7319_v26 }
 0x3a3   :  { %v4768_v52 = vadd.f32 %v4767_v20, %v4513_v36  ;;  %v4251_v58 = vadd.f32 %v4250_v42, %v7289_v40  ;;  %v4518_v36 = vmul.f32 %v7329_v11, %v7329_v11 }
 0x3a5   :  { %v4769_v30 = vadd.f32 %v4768_v52, %v4514_v33  ;;  %v4252_v5 = vadd.f32 %v4251_v58, %v7299_v44  ;;  %v4519_v33 = vmul.f32 %v7339_v51, %v7339_v51 }
 0x3a7   :  { %v4770_v38 = vadd.f32 %v4769_v30, %v4515_v23  ;;  %v4253_v9 = vadd.f32 %v4252_v5, %v7309_v61  ;;  %v4520_v23 = vmul.f32 %v7349_v19, %v7349_v19 }
 0x3a9   :  { %v4771_v17 = vadd.f32 %v4770_v38, %v4516_v41  ;;  %v4254_v13 = vadd.f32 %v4253_v9, %v7319_v26  ;;  %v4521_v41 = vmul.f32 %v7359_v54, %v7359_v54 }
 0x3ab   :  { %v4772_v20 = vadd.f32 %v4771_v17, %v4517_v7  ;;  %v4255_v42 = vadd.f32 %v4254_v13, %v7329_v11  ;;  %v4522_v7 = vmul.f32 %v7369_v62, %v7369_v62 }
 0x3ad   :  { %v4773_v52 = vadd.f32 %v4772_v20, %v4518_v36  ;;  %v4256_v58 = vadd.f32 %v4255_v42, %v7339_v51  ;;  %v4523_v36 = vmul.f32 %v7379_v43, %v7379_v43 }
 0x3af   :  { %v4774_v30 = vadd.f32 %v4773_v52, %v4519_v33  ;;  %v4257_v5 = vadd.f32 %v4256_v58, %v7349_v19  ;;  %v4524_v33 = vmul.f32 %v7389_v45, %v7389_v45 }
 0x3b1   :  { %v4775_v38 = vadd.f32 %v4774_v30, %v4520_v23  ;;  %v4258_v9 = vadd.f32 %v4257_v5, %v7359_v54  ;;  %v4525_v23 = vmul.f32 %v7399_v53, %v7399_v53 }
 0x3b3   :  { %v4776_v17 = vadd.f32 %v4775_v38, %v4521_v41  ;;  %v4259_v13 = vadd.f32 %v4258_v9, %v7369_v62  ;;  %v4526_v41 = vmul.f32 %v7409_v14, %v7409_v14 }
 0x3b5   :  { %v4777_v20 = vadd.f32 %v4776_v17, %v4522_v7  ;;  %v4260_v42 = vadd.f32 %v4259_v13, %v7379_v43  ;;  %v4527_v7 = vmul.f32 %v7419_v28, %v7419_v28 }
 0x3b7   :  { %v4778_v52 = vadd.f32 %v4777_v20, %v4523_v36  ;;  %v4261_v58 = vadd.f32 %v4260_v42, %v7389_v45  ;;  %v4528_v36 = vmul.f32 %v7429_v24, %v7429_v24 }
 0x3b9   :  { %v4779_v30 = vadd.f32 %v4778_v52, %v4524_v33  ;;  %v4262_v5 = vadd.f32 %v4261_v58, %v7399_v53  ;;  %v4529_v33 = vmul.f32 %v7439_v31, %v7439_v31 }
 0x3bb   :  { %v4780_v38 = vadd.f32 %v4779_v30, %v4525_v23  ;;  %v4263_v9 = vadd.f32 %v4262_v5, %v7409_v14  ;;  %v4530_v23 = vmul.f32 %v7449_v57, %v7449_v57 }
 0x3bd   :  { %v4781_v17 = vadd.f32 %v4780_v38, %v4526_v41  ;;  %v4264_v13 = vadd.f32 %v4263_v9, %v7419_v28  ;;  %v4531_v41 = vmul.f32 %v7459_v49, %v7459_v49 }
 0x3bf   :  { %v4782_v20 = vadd.f32 %v4781_v17, %v4527_v7  ;;  %v4265_v42 = vadd.f32 %v4264_v13, %v7429_v24  ;;  %v4532_v7 = vmul.f32 %v7469_v55, %v7469_v55 }
 0x3c1   :  { %v4783_v52 = vadd.f32 %v4782_v20, %v4528_v36  ;;  %v4266_v58 = vadd.f32 %v4265_v42, %v7439_v31  ;;  %v4533_v36 = vmul.f32 %v7479_v46, %v7479_v46 }
 0x3c3   :  { %v4784_v30 = vadd.f32 %v4783_v52, %v4529_v33  ;;  %v4267_v5 = vadd.f32 %v4266_v58, %v7449_v57  ;;  %v4534_v33 = vmul.f32 %v7489_v32, %v7489_v32 }
 0x3c5   :  { %v4785_v38 = vadd.f32 %v4784_v30, %v4530_v23  ;;  %v4268_v9 = vadd.f32 %v4267_v5, %v7459_v49  ;;  %v4535_v23 = vmul.f32 %v7499_v47, %v7499_v47 }
 0x3c7   :  { %v4786_v17 = vadd.f32 %v4785_v38, %v4531_v41  ;;  %v4269_v13 = vadd.f32 %v4268_v9, %v7469_v55  ;;  %v4536_v41 = vmul.f32 %v7509_v15, %v7509_v15 }
 0x3c9   :  { %v4787_v20 = vadd.f32 %v4786_v17, %v4532_v7  ;;  %v4270_v42 = vadd.f32 %v4269_v13, %v7479_v46  ;;  %v4537_v7 = vmul.f32 %v7519_v56, %v7519_v56 }
 0x3cb   :  { %v4788_v52 = vadd.f32 %v4787_v20, %v4533_v36  ;;  %v4271_v58 = vadd.f32 %v4270_v42, %v7489_v32  ;;  %v4538_v36 = vmul.f32 %v7529_v3, %v7529_v3 }
 0x3cd   :  { %v4789_v30 = vadd.f32 %v4788_v52, %v4534_v33  ;;  %v4272_v5 = vadd.f32 %v4271_v58, %v7499_v47  ;;  %v4539_v33 = vmul.f32 %v7539_v25, %v7539_v25 }
 0x3cf   :  { %v4790_v38 = vadd.f32 %v4789_v30, %v4535_v23  ;;  %v4273_v9 = vadd.f32 %v4272_v5, %v7509_v15  ;;  %v4540_v23 = vmul.f32 %v7549_v22, %v7549_v22 }
 0x3d1   :  { %v4791_v17 = vadd.f32 %v4790_v38, %v4536_v41  ;;  %v4274_v13 = vadd.f32 %v4273_v9, %v7519_v56  ;;  %v4541_v41 = vmul.f32 %v7559_v63, %v7559_v63 }
 0x3d3   :  { %v4792_v20 = vadd.f32 %v4791_v17, %v4537_v7  ;;  %v4275_v42 = vadd.f32 %v4274_v13, %v7529_v3  ;;  %v10940_v13 = vld [vmem:[#allocation205_spill] sm:$0xff] }
 0x3d5   :  { %v4793_v52 = vadd.f32 %v4792_v20, %v4538_v36  ;;  %v4276_v58 = vadd.f32 %v4275_v42, %v7539_v25  ;;  %v4542_v20 = vmul.f32 %v10940_v13, %v10940_v13  ;;  %v10941_v36 = vld [vmem:[#allocation207_spill] sm:$0xff] }
 0x3d7   :  { %v4794_v30 = vadd.f32 %v4793_v52, %v4539_v33  ;;  %v4277_v5 = vadd.f32 %v4276_v58, %v7549_v22  ;;  %v4543_v58 = vmul.f32 %v10941_v36, %v10941_v36  ;;  %v10942_v22 = vld [vmem:[#allocation209_spill] sm:$0xff] }
 0x3d9   :  { %v4795_v38 = vadd.f32 %v4794_v30, %v4540_v23  ;;  %v4278_v9 = vadd.f32 %v4277_v5, %v7559_v63  ;;  %v4544_v5 = vmul.f32 %v10942_v22, %v10942_v22  ;;  %v10943_v63 = vld [vmem:[#allocation210_spill] sm:$0xff] }
 0x3db   :  { %v4796_v17 = vadd.f32 %v4795_v38, %v4541_v41  ;;  %v4279_v7 = vadd.f32 %v4278_v9, %v10940_v13  ;;  %v4545_v9 = vmul.f32 %v10943_v63, %v10943_v63  ;;  %v10944_v13 = vld [vmem:[#allocation211_spill] sm:$0xff] }
 0x3dd   :  { %v4797_v42 = vadd.f32 %v4796_v17, %v4542_v20  ;;  %v4280_v52 = vadd.f32 %v4279_v7, %v10941_v36  ;;  %v4546_v7 = vmul.f32 %v10944_v13, %v10944_v13  ;;  %v10945_v36 = vld [vmem:[#allocation212_spill] sm:$0xff] }
 0x3df   :  { %v4798_v33 = vadd.f32 %v4797_v42, %v4543_v58  ;;  %v4281_v30 = vadd.f32 %v4280_v52, %v10942_v22  ;;  %v4547_v52 = vmul.f32 %v10945_v36, %v10945_v36  ;;  %v10946_v22 = vld [vmem:[#allocation213_spill] sm:$0xff] }
 0x3e1   :  { %v4799_v23 = vadd.f32 %v4798_v33, %v4544_v5  ;;  %v4282_v38 = vadd.f32 %v4281_v30, %v10943_v63  ;;  %v4548_v30 = vmul.f32 %v10946_v22, %v10946_v22  ;;  %v10947_v63 = vld [vmem:[#allocation214_spill] sm:$0xff] }
 0x3e3   :  { %v4800_v41 = vadd.f32 %v4799_v23, %v4545_v9  ;;  %v4283_v17 = vadd.f32 %v4282_v38, %v10944_v13  ;;  %v4549_v38 = vmul.f32 %v10947_v63, %v10947_v63  ;;  %v10948_v13 = vld [vmem:[#allocation215_spill] sm:$0xff] }
 0x3e5   :  { %v4801_v20 = vadd.f32 %v4800_v41, %v4546_v7  ;;  %v4284_v42 = vadd.f32 %v4283_v17, %v10945_v36  ;;  %v4550_v17 = vmul.f32 %v10948_v13, %v10948_v13  ;;  %v10949_v36 = vld [vmem:[#allocation216_spill] sm:$0xff] }
 0x3e7   :  { %v4802_v58 = vadd.f32 %v4801_v20, %v4547_v52  ;;  %v4285_v33 = vadd.f32 %v4284_v42, %v10946_v22  ;;  %v4551_v42 = vmul.f32 %v10949_v36, %v10949_v36  ;;  %v10950_v22 = vld [vmem:[#allocation217_spill] sm:$0xff] }
 0x3e9   :  { %v4803_v5 = vadd.f32 %v4802_v58, %v4548_v30  ;;  %v4286_v23 = vadd.f32 %v4285_v33, %v10947_v63  ;;  %v4552_v33 = vmul.f32 %v10950_v22, %v10950_v22  ;;  %v10951_v63 = vld [vmem:[#allocation218_spill] sm:$0xff] }
 0x3eb   :  { %v4804_v9 = vadd.f32 %v4803_v5, %v4549_v38  ;;  %v4287_v41 = vadd.f32 %v4286_v23, %v10948_v13  ;;  %v4553_v23 = vmul.f32 %v10951_v63, %v10951_v63  ;;  %v10952_v13 = vld [vmem:[#allocation219_spill] sm:$0xff] }
 0x3ed   :  { %v4805_v7 = vadd.f32 %v4804_v9, %v4550_v17  ;;  %v4288_v20 = vadd.f32 %v4287_v41, %v10949_v36  ;;  %v4554_v41 = vmul.f32 %v10952_v13, %v10952_v13  ;;  %v10953_v36 = vld [vmem:[#allocation220_spill] sm:$0xff] }
 0x3ef   :  { %v4806_v52 = vadd.f32 %v4805_v7, %v4551_v42  ;;  %v4289_v58 = vadd.f32 %v4288_v20, %v10950_v22  ;;  %v4555_v20 = vmul.f32 %v10953_v36, %v10953_v36  ;;  %v10954_v22 = vld [vmem:[#allocation221_spill] sm:$0xff] }
 0x3f1   :  { %v4807_v30 = vadd.f32 %v4806_v52, %v4552_v33  ;;  %v4290_v5 = vadd.f32 %v4289_v58, %v10951_v63  ;;  %v4556_v58 = vmul.f32 %v10954_v22, %v10954_v22  ;;  %v10955_v63 = vld [vmem:[#allocation222_spill] sm:$0xff] }
 0x3f3   :  { %v4808_v38 = vadd.f32 %v4807_v30, %v4553_v23  ;;  %v4291_v9 = vadd.f32 %v4290_v5, %v10952_v13  ;;  %v4557_v5 = vmul.f32 %v10955_v63, %v10955_v63  ;;  %v10956_v13 = vld [vmem:[#allocation223_spill] sm:$0xff] }
 0x3f5   :  { %v4809_v17 = vadd.f32 %v4808_v38, %v4554_v41  ;;  %v4292_v7 = vadd.f32 %v4291_v9, %v10953_v36  ;;  %v4558_v9 = vmul.f32 %v10956_v13, %v10956_v13  ;;  %v10957_v36 = vld [vmem:[#allocation224_spill] sm:$0xff] }
 0x3f7   :  { %v4810_v42 = vadd.f32 %v4809_v17, %v4555_v20  ;;  %v4293_v52 = vadd.f32 %v4292_v7, %v10954_v22  ;;  %v4559_v7 = vmul.f32 %v10957_v36, %v10957_v36 }
 0x3f9   :  { %v4811_v33 = vadd.f32 %v4810_v42, %v4556_v58  ;;  %v4294_v30 = vadd.f32 %v4293_v52, %v10955_v63  ;;  %v4560_v52 = vmul.f32 %v7715_v60, %v7715_v60 }
 0x3fb   :  { %v4812_v23 = vadd.f32 %v4811_v33, %v4557_v5  ;;  %v4295_v38 = vadd.f32 %v4294_v30, %v10956_v13  ;;  %v4561_v30 = vmul.f32 %v7723_v12, %v7723_v12 }
 0x3fd   :  { %v4813_v41 = vadd.f32 %v4812_v23, %v4558_v9  ;;  %v4296_v17 = vadd.f32 %v4295_v38, %v10957_v36  ;;  %v4562_v38 = vmul.f32 %v7731_v10, %v7731_v10 }
 0x3ff   :  { %v4814_v20 = vadd.f32 %v4813_v41, %v4559_v7  ;;  %v4297_v42 = vadd.f32 %v4296_v17, %v7715_v60  ;;  %v4563_v17 = vmul.f32 %v7739_v0, %v7739_v0 }
 0x401   :  { %v4815_v58 = vadd.f32 %v4814_v20, %v4560_v52  ;;  %v4298_v33 = vadd.f32 %v4297_v42, %v7723_v12  ;;  %v4564_v42 = vmul.f32 %v7747_v16, %v7747_v16 }
 0x403   :  { %v4816_v5 = vadd.f32 %v4815_v58, %v4561_v30  ;;  %v4299_v23 = vadd.f32 %v4298_v33, %v7731_v10  ;;  %v4565_v33 = vmul.f32 %v7755_v29, %v7755_v29 }
 0x405   :  { %v4817_v9 = vadd.f32 %v4816_v5, %v4562_v38  ;;  %v4300_v41 = vadd.f32 %v4299_v23, %v7739_v0  ;;  %v4566_v23 = vmul.f32 %v7763_v39, %v7763_v39 }
 0x407   :  { %v4818_v7 = vadd.f32 %v4817_v9, %v4563_v17  ;;  %v4301_v20 = vadd.f32 %v4300_v41, %v7747_v16  ;;  %v4567_v41 = vmul.f32 %v7771_v4, %v7771_v4  ;;  %v4846_v16 = vlaneseq }
 0x409   :  { %v4819_v52 = vadd.f32 %v4818_v7, %v4564_v42  ;;  %v4302_v58 = vadd.f32 %v4301_v20, %v7755_v29  ;;  %v4568_v20 = vmul.f32 %v7779_v6, %v7779_v6 }
 0x40b   :  { %v4820_v30 = vadd.f32 %v4819_v52, %v4565_v33  ;;  %v4303_v5 = vadd.f32 %v4302_v58, %v7763_v39  ;;  %v4569_v58 = vmul.f32 %v7787_v59, %v7787_v59 }
 0x40d   :  { %v4821_v38 = vadd.f32 %v4820_v30, %v4566_v23  ;;  %v4304_v9 = vadd.f32 %v4303_v5, %v7771_v4  ;;  %v4570_v5 = vmul.f32 %v7795_v27, %v7795_v27 }
 0x40f   :  { %v4822_v17 = vadd.f32 %v4821_v38, %v4567_v41  ;;  %v4305_v7 = vadd.f32 %v4304_v9, %v7779_v6  ;;  %v4571_v9 = vmul.f32 %v7803_v37, %v7803_v37 }
 0x411   :  { %v4823_v42 = vadd.f32 %v4822_v17, %v4568_v20  ;;  %v4306_v52 = vadd.f32 %v4305_v7, %v7787_v59  ;;  %v4572_v7 = vmul.f32 %v7811_v34, %v7811_v34 }
 0x413   :  { %v4824_v33 = vadd.f32 %v4823_v42, %v4569_v58  ;;  %v4307_v30 = vadd.f32 %v4306_v52, %v7795_v27  ;;  %v4573_v52 = vmul.f32 %v7819_v50, %v7819_v50 }
 0x415   :  { %v4825_v23 = vadd.f32 %v4824_v33, %v4570_v5  ;;  %v4308_v38 = vadd.f32 %v4307_v30, %v7803_v37  ;;  %v4574_v30 = vmul.f32 %v7827_v2, %v7827_v2 }
 0x417   :  { %v4826_v41 = vadd.f32 %v4825_v23, %v4571_v9  ;;  %v4309_v17 = vadd.f32 %v4308_v38, %v7811_v34 }
 0x419   :  { %v4827_v20 = vadd.f32 %v4826_v41, %v4572_v7  ;;  %v4310_v42 = vadd.f32 %v4309_v17, %v7819_v50 }
 0x41b   :  { %v4828_v58 = vadd.f32 %v4827_v20, %v4573_v52  ;;  %v4311_v33 = vadd.f32 %v4310_v42, %v7827_v2 }
 0x41d   :  { %v4312_v5 = vrot.slane %v4311_v33, 4  ;;  %v4829_v37 = vadd.f32 %v4828_v58, %v4574_v30  ;;  %v4847_v58 = vshrl.u32 %v4846_v16, 7 }
 0x41f   :  { %v4313_v23 = vadd.f32 %v4312_v5, %v4311_v33  ;;  %v4830_v9 = vrot.slane %v4829_v37, 4  ;;  %v4848_v33 = vsub.s32 0, %v4847_v58 }
 0x421   :  { %v4314_v38 = vrot.slane %v4313_v23, 2  ;;  %v4831_v27 = vadd.f32 %v4830_v9, %v4829_v37  ;;  %v4055_v37 = vld [vmem:[%s10349_s2] sm:$0x1]  ;;  %v10960_v9 = vld [vmem:[#allocation14_spill] sm:$0xff]  ;;  %s6686_s2 = smov [#allocation8]  }
 0x423   :  { %v4315_v59 = vadd.f32 %v4314_v38, %v4313_v23  ;;  %v4832_v34 = vrot.slane %v4831_v27, 2 }
 0x425   :  { %v4316_v41 = vrot.slane %v4315_v59, 1  ;;  %v4833_v7 = vadd.f32 %v4832_v34, %v4831_v27 }
 0x427   :  { %v4317_v17 = vadd.f32 %v4316_v41, %v4315_v59  ;;  %v4834_v6 = vrot.slane %v4833_v7, 1  ;;  %v4056_v59 = vld [vmem:[%s10350_s3] sm:$0x1]  ;;  %v10961_v41 = vld [vmem:[#allocation15_spill] sm:$0xff]  ;;  %s5886_s3 = sshll.u32 %s6686_s2, 4  ;;  %s5887_s3 = int_to_ptr.vmem [resolvable:$true] %s5886_s3 }
 0x428   :  { %s6653_s5 = scalar_lea.vmem %s5887_s3, 32768  ;;  %p6658_p11 = scmp.lt.s32.totalorder %s5887_s3, %s5887_s3 }
 0x429   :  { %v4318_v4 = vmul.f32 0.00048828125, %v4317_v17  ;;  %v4835_v50 = vadd.f32 %v4834_v6, %v4833_v7  ;;  %v10962_v7 = vld [vmem:[#allocation16_spill] sm:$0xff]  ;;  %p6654_p10 = scmp.ne.s32.totalorder %s5887_s3, %s6653_s5  ;;  %p6659_p12 = scmp.lt.s32.totalorder %s6653_s5, %s6653_s5 }
 0x42b   :  { %v4836_v20 = vmul.f32 0.00048828125, %v4835_v50  ;;  %v4837_v52 = vmul.f32 %v4318_v4, %v4318_v4  ;;  %v10959_v50 = vld [vmem:[#allocation13_spill] sm:$0xff]  ;;  %p6660_p13 = por %p6659_p12, %p6658_p11 }
 0x42d   :  { %v4838_v42 = vsub.f32 %v4836_v20, %v4837_v52  ;;  %p6661_p0 = pnand %p6660_p13, %p6654_p10 }
 0x42f   :  { %v4839_v39 = vmax.f32 %v4838_v42, 0.0  ;;  %v10964_v42 = vld [vmem:[#allocation18_spill] sm:$0xff] }
 0x431   :  { %v4840_v29 = vadd.f32 1e-05, %v4839_v39  ;;  %v10958_v39 = vld [vmem:[#allocation12_spill] sm:$0xff] }
 0x433   :  { %6611 = vrsqrt.f32 %v4840_v29 }
 0x440   :  { %v6612_v30 = vpop.eup %6611 }
 0x441   :  { %v4842_v5 = vmul.f32 %v6612_v30, %v4055_v37  ;;  %v10965_v37 = vld [vmem:[#allocation19_spill] sm:$0xff] }
 0x443   :  { %v4843_v6 = vmul.f32 %v4842_v5, %v4318_v4  ;;  %v8039_v27 = vrot.slane %v4842_v5, %v4848_v33  ;;  %v10966_v5 = vld [vmem:[#allocation20_spill] sm:$0xff] }
 0x445   :  { %v4844_v34 = vsub.f32 %v4056_v59, %v4843_v6  ;;  %v5106_v29 = vmul.f32 %v8039_v27, %v7827_v2  ;;  %v8045_v16 = vmul.f32 %v8039_v27, %v10958_v39  ;;  %v8049_v23 = vmul.f32 %v8039_v27, %v10959_v50  ;;  %v10963_v2 = vld [vmem:[#allocation17_spill] sm:$0xff]  ;;  %v10969_v50 = vld [vmem:[#allocation22_spill] sm:$0xff] }
 0x446   :  { %v8053_v38 = vmul.f32 %v8039_v27, %v10960_v9  ;;  %v8057_v4 = vmul.f32 %v8039_v27, %v10961_v41  ;;  %v8061_v17 = vmul.f32 %v8039_v27, %v10962_v7  ;;  %v8065_v20 = vmul.f32 %v8039_v27, %v10963_v2  ;;  %v10967_v6 = vld [vmem:[#allocation21_spill] sm:$0xff]  ;;  %v10973_v41 = vld [vmem:[#allocation24_spill] sm:$0xff] }
 0x447   :  { %v8067_v52 = vrot.slane %v4844_v34, %v4848_v33  ;;  %v8071_v58 = vmul.f32 %v8039_v27, %v10964_v42  ;;  %v8075_v30 = vmul.f32 %v8039_v27, %v10965_v37  ;;  %v8079_v59 = vmul.f32 %v8039_v27, %v10966_v5  ;;  %v10971_v34 = vld [vmem:[#allocation23_spill] sm:$0xff]  ;;  %v10975_v42 = vld [vmem:[#allocation25_spill] sm:$0xff]  ;;  %v10977_v5 = vld [vmem:[#allocation26_spill] sm:$0xff] }
 0x448   :  { %v8083_v39 = vmul.f32 %v8039_v27, %v10967_v6  ;;  %v8087_v33 = vmul.f32 %v8039_v27, %v10969_v50  ;;  %v8091_v9 = vmul.f32 %v8039_v27, %v10971_v34  ;;  %v8095_v7 = vmul.f32 %v8039_v27, %v10973_v41  ;;  %v10979_v50 = vld [vmem:[#allocation27_spill] sm:$0xff]  ;;  %v10981_v34 = vld [vmem:[#allocation28_spill] sm:$0xff]  ;;  %v10983_v41 = vld [vmem:[#allocation29_spill] sm:$0xff] }
 0x449   :  { %v5368_v2 = vadd.f32 %v8067_v52, %v5106_v29  ;;  %v8100_v37 = vmul.f32 %v8039_v27, %v10975_v42  ;;  %v8104_v6 = vmul.f32 %v8039_v27, %v10977_v5  ;;  %v10985_v29 = vld [vmem:[#allocation30_spill] sm:$0xff] }
 0x44a   :  { %10968 = vst [vmem:[#allocation165_spill] sm:$0xff] %v8083_v39  ;;  %10970 = vst [vmem:[#allocation167_spill] sm:$0xff] %v8087_v33  ;;  %v8108_v33 = vmul.f32 %v8039_v27, %v10979_v50  ;;  %v8120_v42 = vmul.f32 %v8039_v27, %v10985_v29  ;;  %v10988_v39 = vld [vmem:[#allocation32_spill] sm:$0xff] }
 0x44b   :  { %10972 = vst [vmem:[#allocation169_spill] sm:$0xff] %v8091_v9  ;;  %10974 = vst [vmem:[#allocation171_spill] sm:$0xff] %v8095_v7  ;;  %v8112_v9 = vmul.f32 %v8039_v27, %v10981_v34  ;;  %v8116_v7 = vmul.f32 %v8039_v27, %v10983_v41  ;;  %v8128_v50 = vmul.f32 %v8039_v27, %v10988_v39 }
 0x44c   :  { %10976 = vst [vmem:[#allocation221_spill] sm:$0xff] %v8100_v37  ;;  %10978 = vst [vmem:[#allocation222_spill] sm:$0xff] %v8104_v6  ;;  %v10987_v37 = vld [vmem:[#allocation31_spill] sm:$0xff]  ;;  %v5624_v6 = vmax.f32 %v5368_v2, 0.0  ;;  %v10998_v2 = vld [vmem:[#allocation37_spill] sm:$0xff] }
 0x44d   :  { %10980 = vst [vmem:[#allocation223_spill] sm:$0xff] %v8108_v33  ;;  %10982 = vst [vmem:[#allocation224_spill] sm:$0xff] %v8112_v9  ;;  %v8124_v5 = vmul.f32 %v8039_v27, %v10987_v37  ;;  %v10990_v33 = vld [vmem:[#allocation33_spill] sm:$0xff]  ;;  %v10992_v9 = vld [vmem:[#allocation34_spill] sm:$0xff]  ;;  %v8148_v39 = vmul.f32 %v8039_v27, %v10998_v2 }
 0x44e   :  { %10984 = vst [vmem:[#allocation12_spill] sm:$0xff] %v8116_v7  ;;  %10986 = vst [vmem:[#allocation13_spill] sm:$0xff] %v8120_v42  ;;  %v8132_v34 = vmul.f32 %v8039_v27, %v10990_v33  ;;  %v8136_v41 = vmul.f32 %v8039_v27, %v10992_v9  ;;  %v10994_v7 = vld [vmem:[#allocation35_spill] sm:$0xff]  ;;  %v10996_v42 = vld [vmem:[#allocation36_spill] sm:$0xff] }
 0x44f   :  { %10989 = vst [vmem:[#allocation14_spill] sm:$0xff] %v8128_v50  ;;  %v8140_v29 = vmul.f32 %v8039_v27, %v10994_v7  ;;  %v8144_v37 = vmul.f32 %v8039_v27, %v10996_v42  ;;  %10999 = vst [vmem:[#allocation19_spill] sm:$0xff] %v8148_v39  ;;  %v11000_v50 = vld [vmem:[#allocation38_spill] sm:$0xff]  ;;  %v11009_v39 = vld [vmem:[#allocation44_spill] sm:$0xff] }
 0x450   :  { %10991 = vst [vmem:[#allocation15_spill] sm:$0xff] %v8132_v34  ;;  %10993 = vst [vmem:[#allocation16_spill] sm:$0xff] %v8136_v41  ;;  %v8152_v33 = vmul.f32 %v8039_v27, %v11000_v50  ;;  %v11001_v34 = vld [vmem:[#allocation39_spill] sm:$0xff]  ;;  %v11003_v41 = vld [vmem:[#allocation40_spill] sm:$0xff]  ;;  %v8172_v50 = vmul.f32 %v8039_v27, %v11009_v39 }
 0x451   :  { %10995 = vst [vmem:[#allocation17_spill] sm:$0xff] %v8140_v29  ;;  %10997 = vst [vmem:[#allocation18_spill] sm:$0xff] %v8144_v37  ;;  %v8156_v9 = vmul.f32 %v8039_v27, %v11001_v34  ;;  %v8160_v7 = vmul.f32 %v8039_v27, %v11003_v41  ;;  %v11005_v29 = vld [vmem:[#allocation41_spill] sm:$0xff]  ;;  %v11007_v37 = vld [vmem:[#allocation42_spill] sm:$0xff] }
 0x452   :  { %5880 = vst [vmem:[#allocation8 + $0x7f8] sm:$0xff] %v5624_v6  ;;  %v8164_v42 = vmul.f32 %v8039_v27, %v11005_v29  ;;  %v8168_v2 = vmul.f32 %v8039_v27, %v11007_v37  ;;  %11010 = vst [vmem:[#allocation24_spill] sm:$0xff] %v8172_v50  ;;  %v11011_v6 = vld [vmem:[#allocation46_spill] sm:$0xff]  ;;  %v11021_v50 = vld [vmem:[#allocation56_spill] sm:$0xff] }
 0x453   :  { %11002 = vst [vmem:[#allocation20_spill] sm:$0xff] %v8156_v9  ;;  %11004 = vst [vmem:[#allocation21_spill] sm:$0xff] %v8160_v7  ;;  %v8176_v34 = vmul.f32 %v8039_v27, %v11011_v6  ;;  %v11013_v9 = vld [vmem:[#allocation48_spill] sm:$0xff]  ;;  %v11015_v7 = vld [vmem:[#allocation50_spill] sm:$0xff]  ;;  %v8196_v6 = vmul.f32 %v8039_v27, %v11021_v50 }
 0x454   :  { %11006 = vst [vmem:[#allocation22_spill] sm:$0xff] %v8164_v42  ;;  %11008 = vst [vmem:[#allocation23_spill] sm:$0xff] %v8168_v2  ;;  %v8180_v41 = vmul.f32 %v8039_v27, %v11013_v9  ;;  %v8184_v29 = vmul.f32 %v8039_v27, %v11015_v7  ;;  %v11017_v42 = vld [vmem:[#allocation52_spill] sm:$0xff]  ;;  %v11019_v2 = vld [vmem:[#allocation54_spill] sm:$0xff] }
 0x455   :  { %11012 = vst [vmem:[#allocation25_spill] sm:$0xff] %v8176_v34  ;;  %v8188_v37 = vmul.f32 %v8039_v27, %v11017_v42  ;;  %v8192_v39 = vmul.f32 %v8039_v27, %v11019_v2  ;;  %11022 = vst [vmem:[#allocation30_spill] sm:$0xff] %v8196_v6  ;;  %v11023_v34 = vld [vmem:[#allocation58_spill] sm:$0xff]  ;;  %v11033_v6 = vld [vmem:[#allocation68_spill] sm:$0xff] }
 0x456   :  { %11014 = vst [vmem:[#allocation26_spill] sm:$0xff] %v8180_v41  ;;  %11016 = vst [vmem:[#allocation27_spill] sm:$0xff] %v8184_v29  ;;  %v8200_v9 = vmul.f32 %v8039_v27, %v11023_v34  ;;  %v11025_v41 = vld [vmem:[#allocation60_spill] sm:$0xff]  ;;  %v11027_v29 = vld [vmem:[#allocation62_spill] sm:$0xff]  ;;  %v8220_v34 = vmul.f32 %v8039_v27, %v11033_v6 }
 0x457   :  { %11018 = vst [vmem:[#allocation28_spill] sm:$0xff] %v8188_v37  ;;  %11020 = vst [vmem:[#allocation29_spill] sm:$0xff] %v8192_v39  ;;  %v8204_v7 = vmul.f32 %v8039_v27, %v11025_v41  ;;  %v8208_v42 = vmul.f32 %v8039_v27, %v11027_v29  ;;  %v11029_v37 = vld [vmem:[#allocation64_spill] sm:$0xff]  ;;  %v11031_v39 = vld [vmem:[#allocation66_spill] sm:$0xff] }
 0x458   :  { %11024 = vst [vmem:[#allocation31_spill] sm:$0xff] %v8200_v9  ;;  %v8212_v2 = vmul.f32 %v8039_v27, %v11029_v37  ;;  %v8216_v50 = vmul.f32 %v8039_v27, %v11031_v39  ;;  %11034 = vst [vmem:[#allocation36_spill] sm:$0xff] %v8220_v34  ;;  %v11035_v9 = vld [vmem:[#allocation70_spill] sm:$0xff]  ;;  %v11045_v34 = vld [vmem:[#allocation80_spill] sm:$0xff] }
 0x459   :  { %11026 = vst [vmem:[#allocation32_spill] sm:$0xff] %v8204_v7  ;;  %11028 = vst [vmem:[#allocation33_spill] sm:$0xff] %v8208_v42  ;;  %v8224_v41 = vmul.f32 %v8039_v27, %v11035_v9  ;;  %v11037_v7 = vld [vmem:[#allocation72_spill] sm:$0xff]  ;;  %v11039_v42 = vld [vmem:[#allocation74_spill] sm:$0xff]  ;;  %v8244_v9 = vmul.f32 %v8039_v27, %v11045_v34 }
 0x45a   :  { %11030 = vst [vmem:[#allocation34_spill] sm:$0xff] %v8212_v2  ;;  %11032 = vst [vmem:[#allocation35_spill] sm:$0xff] %v8216_v50  ;;  %v8228_v29 = vmul.f32 %v8039_v27, %v11037_v7  ;;  %v8232_v37 = vmul.f32 %v8039_v27, %v11039_v42  ;;  %v11041_v2 = vld [vmem:[#allocation76_spill] sm:$0xff]  ;;  %v11043_v50 = vld [vmem:[#allocation78_spill] sm:$0xff] }
 0x45b   :  { %11036 = vst [vmem:[#allocation37_spill] sm:$0xff] %v8224_v41  ;;  %v8236_v39 = vmul.f32 %v8039_v27, %v11041_v2  ;;  %v8240_v6 = vmul.f32 %v8039_v27, %v11043_v50  ;;  %11046 = vst [vmem:[#allocation42_spill] sm:$0xff] %v8244_v9  ;;  %v11047_v41 = vld [vmem:[#allocation82_spill] sm:$0xff]  ;;  %v11057_v9 = vld [vmem:[#allocation92_spill] sm:$0xff] }
 0x45c   :  { %11038 = vst [vmem:[#allocation38_spill] sm:$0xff] %v8228_v29  ;;  %11040 = vst [vmem:[#allocation39_spill] sm:$0xff] %v8232_v37  ;;  %v8248_v7 = vmul.f32 %v8039_v27, %v11047_v41  ;;  %v11049_v29 = vld [vmem:[#allocation84_spill] sm:$0xff]  ;;  %v11051_v37 = vld [vmem:[#allocation86_spill] sm:$0xff]  ;;  %v8268_v41 = vmul.f32 %v8039_v27, %v11057_v9 }
 0x45d   :  { %11042 = vst [vmem:[#allocation40_spill] sm:$0xff] %v8236_v39  ;;  %11044 = vst [vmem:[#allocation41_spill] sm:$0xff] %v8240_v6  ;;  %v8252_v42 = vmul.f32 %v8039_v27, %v11049_v29  ;;  %v8256_v2 = vmul.f32 %v8039_v27, %v11051_v37  ;;  %v11053_v39 = vld [vmem:[#allocation88_spill] sm:$0xff]  ;;  %v11055_v6 = vld [vmem:[#allocation90_spill] sm:$0xff] }
 0x45e   :  { %11048 = vst [vmem:[#allocation44_spill] sm:$0xff] %v8248_v7  ;;  %v8260_v50 = vmul.f32 %v8039_v27, %v11053_v39  ;;  %v8264_v34 = vmul.f32 %v8039_v27, %v11055_v6  ;;  %11058 = vst [vmem:[#allocation54_spill] sm:$0xff] %v8268_v41  ;;  %v11059_v7 = vld [vmem:[#allocation94_spill] sm:$0xff]  ;;  %v11069_v41 = vld [vmem:[#allocation104_spill] sm:$0xff] }
 0x45f   :  { %11050 = vst [vmem:[#allocation46_spill] sm:$0xff] %v8252_v42  ;;  %11052 = vst [vmem:[#allocation48_spill] sm:$0xff] %v8256_v2  ;;  %v8272_v29 = vmul.f32 %v8039_v27, %v11059_v7  ;;  %v11061_v42 = vld [vmem:[#allocation96_spill] sm:$0xff]  ;;  %v11063_v2 = vld [vmem:[#allocation98_spill] sm:$0xff]  ;;  %v8292_v7 = vmul.f32 %v8039_v27, %v11069_v41 }
 0x460   :  { %11054 = vst [vmem:[#allocation50_spill] sm:$0xff] %v8260_v50  ;;  %11056 = vst [vmem:[#allocation52_spill] sm:$0xff] %v8264_v34  ;;  %v8276_v37 = vmul.f32 %v8039_v27, %v11061_v42  ;;  %v8280_v39 = vmul.f32 %v8039_v27, %v11063_v2  ;;  %v11065_v50 = vld [vmem:[#allocation100_spill] sm:$0xff]  ;;  %v11067_v34 = vld [vmem:[#allocation102_spill] sm:$0xff] }
 0x461   :  { %11060 = vst [vmem:[#allocation56_spill] sm:$0xff] %v8272_v29  ;;  %v8284_v6 = vmul.f32 %v8039_v27, %v11065_v50  ;;  %v8288_v9 = vmul.f32 %v8039_v27, %v11067_v34  ;;  %11070 = vst [vmem:[#allocation66_spill] sm:$0xff] %v8292_v7  ;;  %v11071_v29 = vld [vmem:[#allocation106_spill] sm:$0xff]  ;;  %v11081_v7 = vld [vmem:[#allocation116_spill] sm:$0xff] }
 0x462   :  { %11062 = vst [vmem:[#allocation58_spill] sm:$0xff] %v8276_v37  ;;  %11064 = vst [vmem:[#allocation60_spill] sm:$0xff] %v8280_v39  ;;  %v8296_v42 = vmul.f32 %v8039_v27, %v11071_v29  ;;  %v11073_v37 = vld [vmem:[#allocation108_spill] sm:$0xff]  ;;  %v11075_v39 = vld [vmem:[#allocation110_spill] sm:$0xff]  ;;  %v8316_v29 = vmul.f32 %v8039_v27, %v11081_v7 }
 0x463   :  { %11066 = vst [vmem:[#allocation62_spill] sm:$0xff] %v8284_v6  ;;  %11068 = vst [vmem:[#allocation64_spill] sm:$0xff] %v8288_v9  ;;  %v8300_v2 = vmul.f32 %v8039_v27, %v11073_v37  ;;  %v8304_v50 = vmul.f32 %v8039_v27, %v11075_v39  ;;  %v11077_v6 = vld [vmem:[#allocation112_spill] sm:$0xff]  ;;  %v11079_v9 = vld [vmem:[#allocation114_spill] sm:$0xff] }
 0x464   :  { %11072 = vst [vmem:[#allocation68_spill] sm:$0xff] %v8296_v42  ;;  %v8308_v34 = vmul.f32 %v8039_v27, %v11077_v6  ;;  %v8312_v41 = vmul.f32 %v8039_v27, %v11079_v9  ;;  %11082 = vst [vmem:[#allocation78_spill] sm:$0xff] %v8316_v29  ;;  %v11083_v42 = vld [vmem:[#allocation118_spill] sm:$0xff]  ;;  %v11093_v29 = vld [vmem:[#allocation128_spill] sm:$0xff] }
 0x465   :  { %11074 = vst [vmem:[#allocation70_spill] sm:$0xff] %v8300_v2  ;;  %11076 = vst [vmem:[#allocation72_spill] sm:$0xff] %v8304_v50  ;;  %v8320_v37 = vmul.f32 %v8039_v27, %v11083_v42  ;;  %v11085_v2 = vld [vmem:[#allocation120_spill] sm:$0xff]  ;;  %v11087_v50 = vld [vmem:[#allocation122_spill] sm:$0xff]  ;;  %v8340_v42 = vmul.f32 %v8039_v27, %v11093_v29 }
 0x466   :  { %11078 = vst [vmem:[#allocation74_spill] sm:$0xff] %v8308_v34  ;;  %11080 = vst [vmem:[#allocation76_spill] sm:$0xff] %v8312_v41  ;;  %v8324_v39 = vmul.f32 %v8039_v27, %v11085_v2  ;;  %v8328_v6 = vmul.f32 %v8039_v27, %v11087_v50  ;;  %v11089_v34 = vld [vmem:[#allocation124_spill] sm:$0xff]  ;;  %v11091_v41 = vld [vmem:[#allocation126_spill] sm:$0xff] }
 0x467   :  { %11084 = vst [vmem:[#allocation80_spill] sm:$0xff] %v8320_v37  ;;  %v8332_v9 = vmul.f32 %v8039_v27, %v11089_v34  ;;  %v8336_v7 = vmul.f32 %v8039_v27, %v11091_v41  ;;  %11094 = vst [vmem:[#allocation90_spill] sm:$0xff] %v8340_v42  ;;  %v11095_v37 = vld [vmem:[#allocation130_spill] sm:$0xff]  ;;  %v11105_v42 = vld [vmem:[#allocation140_spill] sm:$0xff] }
 0x468   :  { %11086 = vst [vmem:[#allocation82_spill] sm:$0xff] %v8324_v39  ;;  %11088 = vst [vmem:[#allocation84_spill] sm:$0xff] %v8328_v6  ;;  %v8344_v2 = vmul.f32 %v8039_v27, %v11095_v37  ;;  %v11097_v39 = vld [vmem:[#allocation132_spill] sm:$0xff]  ;;  %v11099_v6 = vld [vmem:[#allocation134_spill] sm:$0xff]  ;;  %v8364_v37 = vmul.f32 %v8039_v27, %v11105_v42 }
 0x469   :  { %11090 = vst [vmem:[#allocation86_spill] sm:$0xff] %v8332_v9  ;;  %11092 = vst [vmem:[#allocation88_spill] sm:$0xff] %v8336_v7  ;;  %v8348_v50 = vmul.f32 %v8039_v27, %v11097_v39  ;;  %v8352_v34 = vmul.f32 %v8039_v27, %v11099_v6  ;;  %v11101_v9 = vld [vmem:[#allocation136_spill] sm:$0xff]  ;;  %v11103_v7 = vld [vmem:[#allocation138_spill] sm:$0xff] }
 0x46a   :  { %11096 = vst [vmem:[#allocation92_spill] sm:$0xff] %v8344_v2  ;;  %v8356_v41 = vmul.f32 %v8039_v27, %v11101_v9  ;;  %v8360_v29 = vmul.f32 %v8039_v27, %v11103_v7  ;;  %11106 = vst [vmem:[#allocation102_spill] sm:$0xff] %v8364_v37  ;;  %v11107_v2 = vld [vmem:[#allocation142_spill] sm:$0xff]  ;;  %v11117_v37 = vld [vmem:[#allocation152_spill] sm:$0xff] }
 0x46b   :  { %11098 = vst [vmem:[#allocation94_spill] sm:$0xff] %v8348_v50  ;;  %11100 = vst [vmem:[#allocation96_spill] sm:$0xff] %v8352_v34  ;;  %v8368_v39 = vmul.f32 %v8039_v27, %v11107_v2  ;;  %v11109_v50 = vld [vmem:[#allocation144_spill] sm:$0xff]  ;;  %v11111_v34 = vld [vmem:[#allocation146_spill] sm:$0xff]  ;;  %v8388_v2 = vmul.f32 %v8039_v27, %v11117_v37 }
 0x46c   :  { %11102 = vst [vmem:[#allocation98_spill] sm:$0xff] %v8356_v41  ;;  %11104 = vst [vmem:[#allocation100_spill] sm:$0xff] %v8360_v29  ;;  %v8372_v6 = vmul.f32 %v8039_v27, %v11109_v50  ;;  %v8376_v9 = vmul.f32 %v8039_v27, %v11111_v34  ;;  %v11113_v41 = vld [vmem:[#allocation148_spill] sm:$0xff]  ;;  %v11115_v29 = vld [vmem:[#allocation150_spill] sm:$0xff] }
 0x46d   :  { %11108 = vst [vmem:[#allocation104_spill] sm:$0xff] %v8368_v39  ;;  %v8380_v7 = vmul.f32 %v8039_v27, %v11113_v41  ;;  %v8384_v42 = vmul.f32 %v8039_v27, %v11115_v29  ;;  %11118 = vst [vmem:[#allocation114_spill] sm:$0xff] %v8388_v2  ;;  %v11119_v39 = vld [vmem:[#allocation154_spill] sm:$0xff]  ;;  %v11129_v2 = vld [vmem:[#allocation164_spill] sm:$0xff] }
 0x46e   :  { %11110 = vst [vmem:[#allocation106_spill] sm:$0xff] %v8372_v6  ;;  %11112 = vst [vmem:[#allocation108_spill] sm:$0xff] %v8376_v9  ;;  %v8392_v50 = vmul.f32 %v8039_v27, %v11119_v39  ;;  %v11121_v6 = vld [vmem:[#allocation156_spill] sm:$0xff]  ;;  %v11123_v9 = vld [vmem:[#allocation158_spill] sm:$0xff]  ;;  %v8412_v39 = vmul.f32 %v8039_v27, %v11129_v2 }
 0x46f   :  { %11114 = vst [vmem:[#allocation110_spill] sm:$0xff] %v8380_v7  ;;  %11116 = vst [vmem:[#allocation112_spill] sm:$0xff] %v8384_v42  ;;  %v8396_v34 = vmul.f32 %v8039_v27, %v11121_v6  ;;  %v8400_v41 = vmul.f32 %v8039_v27, %v11123_v9  ;;  %v11125_v7 = vld [vmem:[#allocation160_spill] sm:$0xff]  ;;  %v11127_v42 = vld [vmem:[#allocation162_spill] sm:$0xff] }
 0x470   :  { %11120 = vst [vmem:[#allocation116_spill] sm:$0xff] %v8392_v50  ;;  %v8404_v29 = vmul.f32 %v8039_v27, %v11125_v7  ;;  %v8408_v37 = vmul.f32 %v8039_v27, %v11127_v42  ;;  %11130 = vst [vmem:[#allocation126_spill] sm:$0xff] %v8412_v39  ;;  %v11131_v50 = vld [vmem:[#allocation166_spill] sm:$0xff] }
 0x471   :  { %11122 = vst [vmem:[#allocation118_spill] sm:$0xff] %v8396_v34  ;;  %11124 = vst [vmem:[#allocation120_spill] sm:$0xff] %v8400_v41  ;;  %v8416_v6 = vmul.f32 %v8039_v27, %v11131_v50  ;;  %v11133_v34 = vld [vmem:[#allocation168_spill] sm:$0xff]  ;;  %v11135_v41 = vld [vmem:[#allocation170_spill] sm:$0xff] }
 0x472   :  { %11126 = vst [vmem:[#allocation122_spill] sm:$0xff] %v8404_v29  ;;  %11128 = vst [vmem:[#allocation124_spill] sm:$0xff] %v8408_v37  ;;  %v8420_v9 = vmul.f32 %v8039_v27, %v11133_v34  ;;  %v8424_v7 = vmul.f32 %v8039_v27, %v11135_v41  ;;  %v11137_v29 = vld [vmem:[#allocation172_spill] sm:$0xff]  ;;  %v11139_v37 = vld [vmem:[#allocation173_spill] sm:$0xff] }
 0x473   :  { %11132 = vst [vmem:[#allocation128_spill] sm:$0xff] %v8416_v6  ;;  %v8428_v42 = vmul.f32 %v8039_v27, %v11137_v29  ;;  %v8432_v2 = vmul.f32 %v8039_v27, %v11139_v37  ;;  %v11141_v39 = vld [vmem:[#allocation174_spill] sm:$0xff]  ;;  %v11143_v6 = vld [vmem:[#allocation175_spill] sm:$0xff] }
 0x474   :  { %11134 = vst [vmem:[#allocation130_spill] sm:$0xff] %v8420_v9  ;;  %11136 = vst [vmem:[#allocation132_spill] sm:$0xff] %v8424_v7  ;;  %v8436_v50 = vmul.f32 %v8039_v27, %v11141_v39  ;;  %v8440_v34 = vmul.f32 %v8039_v27, %v11143_v6  ;;  %v11145_v9 = vld [vmem:[#allocation176_spill] sm:$0xff]  ;;  %v11147_v7 = vld [vmem:[#allocation177_spill] sm:$0xff] }
 0x475   :  { %11138 = vst [vmem:[#allocation134_spill] sm:$0xff] %v8428_v42  ;;  %11140 = vst [vmem:[#allocation136_spill] sm:$0xff] %v8432_v2  ;;  %v8444_v41 = vmul.f32 %v8039_v27, %v11145_v9  ;;  %v8448_v29 = vmul.f32 %v8039_v27, %v11147_v7  ;;  %v11149_v42 = vld [vmem:[#allocation178_spill] sm:$0xff]  ;;  %v11151_v2 = vld [vmem:[#allocation179_spill] sm:$0xff] }
 0x476   :  { %11142 = vst [vmem:[#allocation138_spill] sm:$0xff] %v8436_v50  ;;  %11144 = vst [vmem:[#allocation140_spill] sm:$0xff] %v8440_v34  ;;  %v8452_v37 = vmul.f32 %v8039_v27, %v11149_v42  ;;  %v8456_v39 = vmul.f32 %v8039_v27, %v11151_v2  ;;  %v11153_v50 = vld [vmem:[#allocation180_spill] sm:$0xff]  ;;  %v11155_v34 = vld [vmem:[#allocation181_spill] sm:$0xff] }
 0x477   :  { %11146 = vst [vmem:[#allocation142_spill] sm:$0xff] %v8444_v41  ;;  %11148 = vst [vmem:[#allocation144_spill] sm:$0xff] %v8448_v29  ;;  %v8460_v6 = vmul.f32 %v8039_v27, %v11153_v50  ;;  %v8464_v9 = vmul.f32 %v8039_v27, %v11155_v34  ;;  %v11157_v41 = vld [vmem:[#allocation182_spill] sm:$0xff]  ;;  %v11159_v29 = vld [vmem:[#allocation183_spill] sm:$0xff] }
 0x478   :  { %11150 = vst [vmem:[#allocation146_spill] sm:$0xff] %v8452_v37  ;;  %11152 = vst [vmem:[#allocation148_spill] sm:$0xff] %v8456_v39  ;;  %v8468_v7 = vmul.f32 %v8039_v27, %v11157_v41  ;;  %v8472_v42 = vmul.f32 %v8039_v27, %v11159_v29  ;;  %v11161_v37 = vld [vmem:[#allocation184_spill] sm:$0xff]  ;;  %v11163_v39 = vld [vmem:[#allocation185_spill] sm:$0xff] }
 0x479   :  { %11154 = vst [vmem:[#allocation150_spill] sm:$0xff] %v8460_v6  ;;  %11156 = vst [vmem:[#allocation152_spill] sm:$0xff] %v8464_v9  ;;  %v8476_v2 = vmul.f32 %v8039_v27, %v11161_v37  ;;  %v8480_v50 = vmul.f32 %v8039_v27, %v11163_v39  ;;  %v11165_v6 = vld [vmem:[#allocation186_spill] sm:$0xff]  ;;  %v11167_v9 = vld [vmem:[#allocation187_spill] sm:$0xff] }
 0x47a   :  { %11158 = vst [vmem:[#allocation154_spill] sm:$0xff] %v8468_v7  ;;  %11160 = vst [vmem:[#allocation156_spill] sm:$0xff] %v8472_v42  ;;  %v8484_v34 = vmul.f32 %v8039_v27, %v11165_v6  ;;  %v8488_v41 = vmul.f32 %v8039_v27, %v11167_v9  ;;  %v11169_v7 = vld [vmem:[#allocation188_spill] sm:$0xff]  ;;  %v11171_v42 = vld [vmem:[#allocation189_spill] sm:$0xff] }
 0x47b   :  { %11162 = vst [vmem:[#allocation158_spill] sm:$0xff] %v8476_v2  ;;  %11164 = vst [vmem:[#allocation160_spill] sm:$0xff] %v8480_v50  ;;  %v8492_v29 = vmul.f32 %v8039_v27, %v11169_v7  ;;  %v8496_v37 = vmul.f32 %v8039_v27, %v11171_v42  ;;  %v11173_v2 = vld [vmem:[#allocation190_spill] sm:$0xff]  ;;  %v11175_v50 = vld [vmem:[#allocation191_spill] sm:$0xff] }
 0x47c   :  { %11166 = vst [vmem:[#allocation162_spill] sm:$0xff] %v8484_v34  ;;  %11168 = vst [vmem:[#allocation164_spill] sm:$0xff] %v8488_v41  ;;  %v8500_v39 = vmul.f32 %v8039_v27, %v11173_v2  ;;  %v8504_v6 = vmul.f32 %v8039_v27, %v11175_v50  ;;  %v11177_v34 = vld [vmem:[#allocation192_spill] sm:$0xff]  ;;  %v11179_v41 = vld [vmem:[#allocation193_spill] sm:$0xff] }
 0x47d   :  { %11170 = vst [vmem:[#allocation166_spill] sm:$0xff] %v8492_v29  ;;  %11172 = vst [vmem:[#allocation168_spill] sm:$0xff] %v8496_v37  ;;  %v8508_v9 = vmul.f32 %v8039_v27, %v11177_v34  ;;  %v8512_v7 = vmul.f32 %v8039_v27, %v11179_v41  ;;  %v11181_v29 = vld [vmem:[#allocation194_spill] sm:$0xff]  ;;  %v11183_v37 = vld [vmem:[#allocation195_spill] sm:$0xff] }
 0x47e   :  { %11174 = vst [vmem:[#allocation170_spill] sm:$0xff] %v8500_v39  ;;  %11176 = vst [vmem:[#allocation172_spill] sm:$0xff] %v8504_v6  ;;  %v8516_v42 = vmul.f32 %v8039_v27, %v11181_v29  ;;  %v8520_v2 = vmul.f32 %v8039_v27, %v11183_v37  ;;  %v11185_v39 = vld [vmem:[#allocation196_spill] sm:$0xff]  ;;  %v11187_v6 = vld [vmem:[#allocation197_spill] sm:$0xff] }
 0x47f   :  { %11178 = vst [vmem:[#allocation173_spill] sm:$0xff] %v8508_v9  ;;  %11180 = vst [vmem:[#allocation174_spill] sm:$0xff] %v8512_v7  ;;  %v8524_v50 = vmul.f32 %v8039_v27, %v11185_v39  ;;  %v8528_v34 = vmul.f32 %v8039_v27, %v11187_v6  ;;  %v11189_v9 = vld [vmem:[#allocation198_spill] sm:$0xff]  ;;  %v11191_v7 = vld [vmem:[#allocation199_spill] sm:$0xff] }
 0x480   :  { %11182 = vst [vmem:[#allocation175_spill] sm:$0xff] %v8516_v42  ;;  %11184 = vst [vmem:[#allocation176_spill] sm:$0xff] %v8520_v2  ;;  %v8532_v41 = vmul.f32 %v8039_v27, %v11189_v9  ;;  %v8536_v29 = vmul.f32 %v8039_v27, %v11191_v7  ;;  %v11193_v42 = vld [vmem:[#allocation200_spill] sm:$0xff]  ;;  %v11195_v2 = vld [vmem:[#allocation202_spill] sm:$0xff] }
 0x481   :  { %11186 = vst [vmem:[#allocation177_spill] sm:$0xff] %v8524_v50  ;;  %11188 = vst [vmem:[#allocation178_spill] sm:$0xff] %v8528_v34  ;;  %v8540_v37 = vmul.f32 %v8039_v27, %v11193_v42  ;;  %v8544_v39 = vmul.f32 %v8039_v27, %v11195_v2  ;;  %v11197_v50 = vld [vmem:[#allocation204_spill] sm:$0xff]  ;;  %v11199_v34 = vld [vmem:[#allocation206_spill] sm:$0xff] }
 0x482   :  { %11190 = vst [vmem:[#allocation179_spill] sm:$0xff] %v8532_v41  ;;  %11192 = vst [vmem:[#allocation180_spill] sm:$0xff] %v8536_v29  ;;  %v8548_v6 = vmul.f32 %v8039_v27, %v11197_v50  ;;  %v8552_v9 = vmul.f32 %v8039_v27, %v11199_v34  ;;  %v11201_v41 = vld [vmem:[#allocation208_spill] sm:$0xff]  ;;  %v11203_v29 = vld [vmem:[#allocation43_spill] sm:$0xff] }
 0x483   :  { %11194 = vst [vmem:[#allocation181_spill] sm:$0xff] %v8540_v37  ;;  %11196 = vst [vmem:[#allocation182_spill] sm:$0xff] %v8544_v39  ;;  %v8556_v7 = vmul.f32 %v8039_v27, %v11201_v41  ;;  %v8560_v42 = vmul.f32 %v8039_v27, %v11203_v29  ;;  %v11205_v37 = vld [vmem:[#allocation45_spill] sm:$0xff]  ;;  %v11207_v39 = vld [vmem:[#allocation47_spill] sm:$0xff] }
 0x484   :  { %11198 = vst [vmem:[#allocation183_spill] sm:$0xff] %v8548_v6  ;;  %11200 = vst [vmem:[#allocation184_spill] sm:$0xff] %v8552_v9  ;;  %v8564_v2 = vmul.f32 %v8039_v27, %v11205_v37  ;;  %v8568_v50 = vmul.f32 %v8039_v27, %v11207_v39  ;;  %v11209_v6 = vld [vmem:[#allocation49_spill] sm:$0xff]  ;;  %v11211_v9 = vld [vmem:[#allocation51_spill] sm:$0xff] }
 0x485   :  { %11202 = vst [vmem:[#allocation185_spill] sm:$0xff] %v8556_v7  ;;  %11204 = vst [vmem:[#allocation186_spill] sm:$0xff] %v8560_v42  ;;  %v8572_v34 = vmul.f32 %v8039_v27, %v11209_v6  ;;  %v8576_v41 = vmul.f32 %v8039_v27, %v11211_v9  ;;  %v11213_v7 = vld [vmem:[#allocation53_spill] sm:$0xff]  ;;  %v11215_v42 = vld [vmem:[#allocation55_spill] sm:$0xff] }
 0x486   :  { %11206 = vst [vmem:[#allocation187_spill] sm:$0xff] %v8564_v2  ;;  %11208 = vst [vmem:[#allocation188_spill] sm:$0xff] %v8568_v50  ;;  %v8580_v29 = vmul.f32 %v8039_v27, %v11213_v7  ;;  %v8584_v37 = vmul.f32 %v8039_v27, %v11215_v42  ;;  %v11217_v2 = vld [vmem:[#allocation57_spill] sm:$0xff]  ;;  %v11219_v50 = vld [vmem:[#allocation59_spill] sm:$0xff] }
 0x487   :  { %11210 = vst [vmem:[#allocation189_spill] sm:$0xff] %v8572_v34  ;;  %11212 = vst [vmem:[#allocation190_spill] sm:$0xff] %v8576_v41  ;;  %v8588_v39 = vmul.f32 %v8039_v27, %v11217_v2  ;;  %v8592_v6 = vmul.f32 %v8039_v27, %v11219_v50  ;;  %v11221_v34 = vld [vmem:[#allocation61_spill] sm:$0xff]  ;;  %v11223_v41 = vld [vmem:[#allocation63_spill] sm:$0xff] }
 0x488   :  { %11214 = vst [vmem:[#allocation191_spill] sm:$0xff] %v8580_v29  ;;  %11216 = vst [vmem:[#allocation192_spill] sm:$0xff] %v8584_v37  ;;  %v8596_v9 = vmul.f32 %v8039_v27, %v11221_v34  ;;  %v8600_v7 = vmul.f32 %v8039_v27, %v11223_v41  ;;  %v11225_v29 = vld [vmem:[#allocation65_spill] sm:$0xff]  ;;  %v11227_v37 = vld [vmem:[#allocation67_spill] sm:$0xff] }
 0x489   :  { %11218 = vst [vmem:[#allocation193_spill] sm:$0xff] %v8588_v39  ;;  %11220 = vst [vmem:[#allocation194_spill] sm:$0xff] %v8592_v6  ;;  %v8604_v42 = vmul.f32 %v8039_v27, %v11225_v29  ;;  %v8608_v2 = vmul.f32 %v8039_v27, %v11227_v37  ;;  %v11229_v39 = vld [vmem:[#allocation69_spill] sm:$0xff]  ;;  %v11231_v6 = vld [vmem:[#allocation71_spill] sm:$0xff] }
 0x48a   :  { %11222 = vst [vmem:[#allocation195_spill] sm:$0xff] %v8596_v9  ;;  %11224 = vst [vmem:[#allocation196_spill] sm:$0xff] %v8600_v7  ;;  %v8612_v50 = vmul.f32 %v8039_v27, %v11229_v39  ;;  %v8616_v34 = vmul.f32 %v8039_v27, %v11231_v6  ;;  %v11233_v9 = vld [vmem:[#allocation73_spill] sm:$0xff]  ;;  %v11235_v7 = vld [vmem:[#allocation75_spill] sm:$0xff] }
 0x48b   :  { %11226 = vst [vmem:[#allocation197_spill] sm:$0xff] %v8604_v42  ;;  %11228 = vst [vmem:[#allocation198_spill] sm:$0xff] %v8608_v2  ;;  %v8620_v41 = vmul.f32 %v8039_v27, %v11233_v9  ;;  %v8624_v29 = vmul.f32 %v8039_v27, %v11235_v7  ;;  %v11237_v42 = vld [vmem:[#allocation77_spill] sm:$0xff]  ;;  %v11239_v2 = vld [vmem:[#allocation79_spill] sm:$0xff] }
 0x48c   :  { %11230 = vst [vmem:[#allocation199_spill] sm:$0xff] %v8612_v50  ;;  %11232 = vst [vmem:[#allocation200_spill] sm:$0xff] %v8616_v34  ;;  %v8628_v37 = vmul.f32 %v8039_v27, %v11237_v42  ;;  %v8632_v39 = vmul.f32 %v8039_v27, %v11239_v2  ;;  %v11241_v50 = vld [vmem:[#allocation81_spill] sm:$0xff]  ;;  %v11243_v34 = vld [vmem:[#allocation83_spill] sm:$0xff] }
 0x48d   :  { %11234 = vst [vmem:[#allocation202_spill] sm:$0xff] %v8620_v41  ;;  %11236 = vst [vmem:[#allocation204_spill] sm:$0xff] %v8624_v29  ;;  %v8636_v6 = vmul.f32 %v8039_v27, %v11241_v50  ;;  %v8640_v9 = vmul.f32 %v8039_v27, %v11243_v34  ;;  %v11245_v41 = vld [vmem:[#allocation85_spill] sm:$0xff]  ;;  %v11247_v29 = vld [vmem:[#allocation87_spill] sm:$0xff] }
 0x48e   :  { %11238 = vst [vmem:[#allocation206_spill] sm:$0xff] %v8628_v37  ;;  %11240 = vst [vmem:[#allocation208_spill] sm:$0xff] %v8632_v39  ;;  %v8644_v7 = vmul.f32 %v8039_v27, %v11245_v41  ;;  %v8648_v42 = vmul.f32 %v8039_v27, %v11247_v29  ;;  %v11249_v37 = vld [vmem:[#allocation89_spill] sm:$0xff]  ;;  %v11251_v39 = vld [vmem:[#allocation91_spill] sm:$0xff] }
 0x48f   :  { %11242 = vst [vmem:[#allocation43_spill] sm:$0xff] %v8636_v6  ;;  %11244 = vst [vmem:[#allocation45_spill] sm:$0xff] %v8640_v9  ;;  %v8652_v2 = vmul.f32 %v8039_v27, %v11249_v37  ;;  %v8656_v50 = vmul.f32 %v8039_v27, %v11251_v39  ;;  %v11253_v6 = vld [vmem:[#allocation93_spill] sm:$0xff]  ;;  %v11255_v9 = vld [vmem:[#allocation95_spill] sm:$0xff] }
 0x490   :  { %11246 = vst [vmem:[#allocation47_spill] sm:$0xff] %v8644_v7  ;;  %11248 = vst [vmem:[#allocation49_spill] sm:$0xff] %v8648_v42  ;;  %v8660_v34 = vmul.f32 %v8039_v27, %v11253_v6  ;;  %v8664_v41 = vmul.f32 %v8039_v27, %v11255_v9  ;;  %v11257_v7 = vld [vmem:[#allocation97_spill] sm:$0xff]  ;;  %v11259_v42 = vld [vmem:[#allocation99_spill] sm:$0xff] }
 0x491   :  { %11250 = vst [vmem:[#allocation51_spill] sm:$0xff] %v8652_v2  ;;  %11252 = vst [vmem:[#allocation53_spill] sm:$0xff] %v8656_v50  ;;  %v8668_v29 = vmul.f32 %v8039_v27, %v11257_v7  ;;  %v8672_v37 = vmul.f32 %v8039_v27, %v11259_v42  ;;  %v11261_v2 = vld [vmem:[#allocation101_spill] sm:$0xff]  ;;  %v11263_v50 = vld [vmem:[#allocation103_spill] sm:$0xff] }
 0x492   :  { %11254 = vst [vmem:[#allocation55_spill] sm:$0xff] %v8660_v34  ;;  %11256 = vst [vmem:[#allocation57_spill] sm:$0xff] %v8664_v41  ;;  %v8676_v39 = vmul.f32 %v8039_v27, %v11261_v2  ;;  %v8680_v6 = vmul.f32 %v8039_v27, %v11263_v50  ;;  %v11265_v34 = vld [vmem:[#allocation105_spill] sm:$0xff]  ;;  %v11267_v41 = vld [vmem:[#allocation107_spill] sm:$0xff] }
 0x493   :  { %11258 = vst [vmem:[#allocation59_spill] sm:$0xff] %v8668_v29  ;;  %11260 = vst [vmem:[#allocation61_spill] sm:$0xff] %v8672_v37  ;;  %v8684_v9 = vmul.f32 %v8039_v27, %v11265_v34  ;;  %v8688_v7 = vmul.f32 %v8039_v27, %v11267_v41  ;;  %v11269_v29 = vld [vmem:[#allocation109_spill] sm:$0xff]  ;;  %v11271_v37 = vld [vmem:[#allocation111_spill] sm:$0xff] }
 0x494   :  { %11262 = vst [vmem:[#allocation63_spill] sm:$0xff] %v8676_v39  ;;  %11264 = vst [vmem:[#allocation65_spill] sm:$0xff] %v8680_v6  ;;  %v8692_v42 = vmul.f32 %v8039_v27, %v11269_v29  ;;  %v8696_v2 = vmul.f32 %v8039_v27, %v11271_v37  ;;  %v11273_v39 = vld [vmem:[#allocation113_spill] sm:$0xff]  ;;  %v11275_v6 = vld [vmem:[#allocation115_spill] sm:$0xff] }
 0x495   :  { %11266 = vst [vmem:[#allocation67_spill] sm:$0xff] %v8684_v9  ;;  %11268 = vst [vmem:[#allocation69_spill] sm:$0xff] %v8688_v7  ;;  %v8700_v50 = vmul.f32 %v8039_v27, %v11273_v39  ;;  %v8704_v34 = vmul.f32 %v8039_v27, %v11275_v6  ;;  %v11277_v9 = vld [vmem:[#allocation117_spill] sm:$0xff]  ;;  %v11279_v7 = vld [vmem:[#allocation119_spill] sm:$0xff] }
 0x496   :  { %11270 = vst [vmem:[#allocation71_spill] sm:$0xff] %v8692_v42  ;;  %11272 = vst [vmem:[#allocation73_spill] sm:$0xff] %v8696_v2  ;;  %v8708_v41 = vmul.f32 %v8039_v27, %v11277_v9  ;;  %v8712_v29 = vmul.f32 %v8039_v27, %v11279_v7  ;;  %v11281_v42 = vld [vmem:[#allocation121_spill] sm:$0xff]  ;;  %v11283_v2 = vld [vmem:[#allocation123_spill] sm:$0xff] }
 0x497   :  { %11274 = vst [vmem:[#allocation75_spill] sm:$0xff] %v8700_v50  ;;  %11276 = vst [vmem:[#allocation77_spill] sm:$0xff] %v8704_v34  ;;  %v8716_v37 = vmul.f32 %v8039_v27, %v11281_v42  ;;  %v8720_v39 = vmul.f32 %v8039_v27, %v11283_v2  ;;  %v11285_v50 = vld [vmem:[#allocation125_spill] sm:$0xff]  ;;  %v11287_v34 = vld [vmem:[#allocation127_spill] sm:$0xff] }
 0x498   :  { %11278 = vst [vmem:[#allocation79_spill] sm:$0xff] %v8708_v41  ;;  %11280 = vst [vmem:[#allocation81_spill] sm:$0xff] %v8712_v29  ;;  %v8724_v6 = vmul.f32 %v8039_v27, %v11285_v50  ;;  %v8728_v9 = vmul.f32 %v8039_v27, %v11287_v34  ;;  %v11289_v41 = vld [vmem:[#allocation129_spill] sm:$0xff]  ;;  %v11291_v29 = vld [vmem:[#allocation131_spill] sm:$0xff] }
 0x499   :  { %11282 = vst [vmem:[#allocation83_spill] sm:$0xff] %v8716_v37  ;;  %11284 = vst [vmem:[#allocation85_spill] sm:$0xff] %v8720_v39  ;;  %v8732_v7 = vmul.f32 %v8039_v27, %v11289_v41  ;;  %v8736_v42 = vmul.f32 %v8039_v27, %v11291_v29  ;;  %v11293_v37 = vld [vmem:[#allocation133_spill] sm:$0xff]  ;;  %v11295_v39 = vld [vmem:[#allocation135_spill] sm:$0xff] }
 0x49a   :  { %11286 = vst [vmem:[#allocation87_spill] sm:$0xff] %v8724_v6  ;;  %11288 = vst [vmem:[#allocation89_spill] sm:$0xff] %v8728_v9  ;;  %v8740_v2 = vmul.f32 %v8039_v27, %v11293_v37  ;;  %v8744_v50 = vmul.f32 %v8039_v27, %v11295_v39  ;;  %v11297_v6 = vld [vmem:[#allocation137_spill] sm:$0xff]  ;;  %v11299_v9 = vld [vmem:[#allocation139_spill] sm:$0xff] }
 0x49b   :  { %11290 = vst [vmem:[#allocation91_spill] sm:$0xff] %v8732_v7  ;;  %11292 = vst [vmem:[#allocation93_spill] sm:$0xff] %v8736_v42  ;;  %v8748_v34 = vmul.f32 %v8039_v27, %v11297_v6  ;;  %v8752_v41 = vmul.f32 %v8039_v27, %v11299_v9  ;;  %v11301_v7 = vld [vmem:[#allocation141_spill] sm:$0xff]  ;;  %v11303_v42 = vld [vmem:[#allocation143_spill] sm:$0xff] }
 0x49c   :  { %11294 = vst [vmem:[#allocation95_spill] sm:$0xff] %v8740_v2  ;;  %11296 = vst [vmem:[#allocation97_spill] sm:$0xff] %v8744_v50  ;;  %v8756_v29 = vmul.f32 %v8039_v27, %v11301_v7  ;;  %v8760_v37 = vmul.f32 %v8039_v27, %v11303_v42  ;;  %v11305_v2 = vld [vmem:[#allocation145_spill] sm:$0xff]  ;;  %v11307_v50 = vld [vmem:[#allocation147_spill] sm:$0xff] }
 0x49d   :  { %11298 = vst [vmem:[#allocation99_spill] sm:$0xff] %v8748_v34  ;;  %11300 = vst [vmem:[#allocation101_spill] sm:$0xff] %v8752_v41  ;;  %v8764_v39 = vmul.f32 %v8039_v27, %v11305_v2  ;;  %v8768_v6 = vmul.f32 %v8039_v27, %v11307_v50  ;;  %v11309_v34 = vld [vmem:[#allocation149_spill] sm:$0xff]  ;;  %v11311_v41 = vld [vmem:[#allocation151_spill] sm:$0xff] }
 0x49e   :  { %11302 = vst [vmem:[#allocation103_spill] sm:$0xff] %v8756_v29  ;;  %11304 = vst [vmem:[#allocation105_spill] sm:$0xff] %v8760_v37  ;;  %v8772_v9 = vmul.f32 %v8039_v27, %v11309_v34  ;;  %v8776_v7 = vmul.f32 %v8039_v27, %v11311_v41  ;;  %v11313_v29 = vld [vmem:[#allocation153_spill] sm:$0xff]  ;;  %v11314_v37 = vld [vmem:[#allocation155_spill] sm:$0xff] }
 0x49f   :  { %11306 = vst [vmem:[#allocation107_spill] sm:$0xff] %v8764_v39  ;;  %11308 = vst [vmem:[#allocation109_spill] sm:$0xff] %v8768_v6  ;;  %v8780_v42 = vmul.f32 %v8039_v27, %v11313_v29  ;;  %v8784_v2 = vmul.f32 %v8039_v27, %v11314_v37  ;;  %v11315_v39 = vld [vmem:[#allocation157_spill] sm:$0xff]  ;;  %v11316_v6 = vld [vmem:[#allocation159_spill] sm:$0xff]  ;;  %v8804_v37 = vmul.f32 %v8039_v27, %v10936_v1 }
 0x4a0   :  { %11310 = vst [vmem:[#allocation111_spill] sm:$0xff] %v8772_v9  ;;  %11312 = vst [vmem:[#allocation113_spill] sm:$0xff] %v8776_v7  ;;  %v8788_v50 = vmul.f32 %v8039_v27, %v11315_v39  ;;  %v8792_v34 = vmul.f32 %v8039_v27, %v11316_v6  ;;  %v11317_v9 = vld [vmem:[#allocation161_spill] sm:$0xff]  ;;  %v11318_v7 = vld [vmem:[#allocation163_spill] sm:$0xff]  ;;  %v8808_v39 = vmul.f32 %v8039_v27, %v10937_v18 }
 0x4a1   :  { %v8796_v41 = vmul.f32 %v8039_v27, %v11317_v9  ;;  %v8800_v29 = vmul.f32 %v8039_v27, %v11318_v7  ;;  %v8812_v6 = vmul.f32 %v8039_v27, %v10938_v35  ;;  %v8816_v9 = vmul.f32 %v8039_v27, %v10939_v8 }
 0x4a2   :  { %v8820_v7 = vmul.f32 %v8039_v27, %v7269_v48  ;;  %v8824_v1 = vmul.f32 %v8039_v27, %v7279_v21  ;;  %v8828_v18 = vmul.f32 %v8039_v27, %v7289_v40  ;;  %v8832_v35 = vmul.f32 %v8039_v27, %v7299_v44 }
 0x4a3   :  { %v8836_v8 = vmul.f32 %v8039_v27, %v7309_v61  ;;  %v8840_v48 = vmul.f32 %v8039_v27, %v7319_v26  ;;  %v8844_v21 = vmul.f32 %v8039_v27, %v7329_v11  ;;  %v8848_v40 = vmul.f32 %v8039_v27, %v7339_v51 }
 0x4a4   :  { %v8852_v44 = vmul.f32 %v8039_v27, %v7349_v19  ;;  %v8856_v61 = vmul.f32 %v8039_v27, %v7359_v54  ;;  %v8860_v26 = vmul.f32 %v8039_v27, %v7369_v62  ;;  %v8864_v11 = vmul.f32 %v8039_v27, %v7379_v43 }
 0x4a5   :  { %v8868_v51 = vmul.f32 %v8039_v27, %v7389_v45  ;;  %v8872_v19 = vmul.f32 %v8039_v27, %v7399_v53  ;;  %v8876_v54 = vmul.f32 %v8039_v27, %v7409_v14  ;;  %v8880_v62 = vmul.f32 %v8039_v27, %v7419_v28 }
 0x4a6   :  { %v8884_v43 = vmul.f32 %v8039_v27, %v7429_v24  ;;  %v8888_v45 = vmul.f32 %v8039_v27, %v7439_v31  ;;  %v8892_v53 = vmul.f32 %v8039_v27, %v7449_v57  ;;  %v8896_v14 = vmul.f32 %v8039_v27, %v7459_v49 }
 0x4a7   :  { %v8900_v28 = vmul.f32 %v8039_v27, %v7469_v55  ;;  %v8904_v24 = vmul.f32 %v8039_v27, %v7479_v46  ;;  %v8908_v31 = vmul.f32 %v8039_v27, %v7489_v32  ;;  %v8912_v57 = vmul.f32 %v8039_v27, %v7499_v47 }
 0x4a8   :  { %v8916_v49 = vmul.f32 %v8039_v27, %v7509_v15  ;;  %v8920_v55 = vmul.f32 %v8039_v27, %v7519_v56  ;;  %v8924_v46 = vmul.f32 %v8039_v27, %v7529_v3  ;;  %v8928_v32 = vmul.f32 %v8039_v27, %v7539_v25 }
 0x4a9   :  { %11319 = vst [vmem:[#allocation115_spill] sm:$0xff] %v8908_v31  ;;  %11320 = vst [vmem:[#allocation117_spill] sm:$0xff] %v8912_v57  ;;  %v11325_v31 = vld [vmem:[#allocation201_spill] sm:$0xff]  ;;  %v11327_v57 = vld [vmem:[#allocation203_spill] sm:$0xff] }
 0x4aa   :  { %11321 = vst [vmem:[#allocation119_spill] sm:$0xff] %v8916_v49  ;;  %11322 = vst [vmem:[#allocation121_spill] sm:$0xff] %v8920_v55  ;;  %v8932_v47 = vmul.f32 %v8039_v27, %v11325_v31  ;;  %v8936_v15 = vmul.f32 %v8039_v27, %v11327_v57  ;;  %v11329_v49 = vld [vmem:[#allocation205_spill] sm:$0xff]  ;;  %v11331_v55 = vld [vmem:[#allocation207_spill] sm:$0xff] }
 0x4ab   :  { %11323 = vst [vmem:[#allocation123_spill] sm:$0xff] %v8924_v46  ;;  %11324 = vst [vmem:[#allocation125_spill] sm:$0xff] %v8928_v32  ;;  %v8940_v56 = vmul.f32 %v8039_v27, %v11329_v49  ;;  %v8944_v3 = vmul.f32 %v8039_v27, %v11331_v55  ;;  %v11333_v46 = vld [vmem:[#allocation209_spill] sm:$0xff]  ;;  %v11335_v32 = vld [vmem:[#allocation210_spill] sm:$0xff] }
 0x4ac   :  { %11326 = vst [vmem:[#allocation127_spill] sm:$0xff] %v8932_v47  ;;  %11328 = vst [vmem:[#allocation129_spill] sm:$0xff] %v8936_v15  ;;  %v8948_v25 = vmul.f32 %v8039_v27, %v11333_v46  ;;  %v8952_v31 = vmul.f32 %v8039_v27, %v11335_v32  ;;  %v11337_v47 = vld [vmem:[#allocation211_spill] sm:$0xff]  ;;  %v11339_v15 = vld [vmem:[#allocation212_spill] sm:$0xff] }
 0x4ad   :  { %11330 = vst [vmem:[#allocation131_spill] sm:$0xff] %v8940_v56  ;;  %11332 = vst [vmem:[#allocation133_spill] sm:$0xff] %v8944_v3  ;;  %v8956_v57 = vmul.f32 %v8039_v27, %v11337_v47  ;;  %v8960_v49 = vmul.f32 %v8039_v27, %v11339_v15  ;;  %v11341_v56 = vld [vmem:[#allocation213_spill] sm:$0xff]  ;;  %v11343_v3 = vld [vmem:[#allocation214_spill] sm:$0xff] }
 0x4ae   :  { %11334 = vst [vmem:[#allocation135_spill] sm:$0xff] %v8948_v25  ;;  %11336 = vst [vmem:[#allocation137_spill] sm:$0xff] %v8952_v31  ;;  %v8964_v55 = vmul.f32 %v8039_v27, %v11341_v56  ;;  %v8968_v46 = vmul.f32 %v8039_v27, %v11343_v3  ;;  %v11345_v25 = vld [vmem:[#allocation215_spill] sm:$0xff]  ;;  %v11346_v31 = vld [vmem:[#allocation216_spill] sm:$0xff] }
 0x4af   :  { %11338 = vst [vmem:[#allocation139_spill] sm:$0xff] %v8956_v57  ;;  %11340 = vst [vmem:[#allocation141_spill] sm:$0xff] %v8960_v49  ;;  %v8972_v32 = vmul.f32 %v8039_v27, %v11345_v25  ;;  %v8976_v47 = vmul.f32 %v8039_v27, %v11346_v31  ;;  %v11347_v57 = vld [vmem:[#allocation217_spill] sm:$0xff]  ;;  %v11348_v49 = vld [vmem:[#allocation218_spill] sm:$0xff]  ;;  %v8996_v31 = vmul.f32 %v8039_v27, %v10954_v22 }
 0x4b0   :  { %11342 = vst [vmem:[#allocation143_spill] sm:$0xff] %v8964_v55  ;;  %11344 = vst [vmem:[#allocation145_spill] sm:$0xff] %v8968_v46  ;;  %v8980_v15 = vmul.f32 %v8039_v27, %v11347_v57  ;;  %v8984_v56 = vmul.f32 %v8039_v27, %v11348_v49  ;;  %v11349_v55 = vld [vmem:[#allocation219_spill] sm:$0xff]  ;;  %v11350_v46 = vld [vmem:[#allocation220_spill] sm:$0xff]  ;;  %v9000_v57 = vmul.f32 %v8039_v27, %v10955_v63 }
 0x4b1   :  { %v8988_v3 = vmul.f32 %v8039_v27, %v11349_v55  ;;  %v8992_v25 = vmul.f32 %v8039_v27, %v11350_v46  ;;  %v9004_v49 = vmul.f32 %v8039_v27, %v10956_v13  ;;  %v9008_v55 = vmul.f32 %v8039_v27, %v10957_v36 }
 0x4b2   :  { %v9012_v46 = vmul.f32 %v8039_v27, %v7715_v60  ;;  %v9016_v22 = vmul.f32 %v8039_v27, %v7723_v12  ;;  %v9020_v63 = vmul.f32 %v8039_v27, %v7731_v10  ;;  %v9024_v13 = vmul.f32 %v8039_v27, %v7739_v0 }
 0x4b3   :  { %11351 = vst [vmem:[#allocation147_spill] sm:$0xff] %v9004_v49  ;;  %11352 = vst [vmem:[#allocation149_spill] sm:$0xff] %v9008_v55  ;;  %v11357_v49 = vld [vmem:[#allocation225_spill] sm:$0xff]  ;;  %v11359_v55 = vld [vmem:[#allocation226_spill] sm:$0xff] }
 0x4b4   :  { %11353 = vst [vmem:[#allocation151_spill] sm:$0xff] %v9012_v46  ;;  %11354 = vst [vmem:[#allocation153_spill] sm:$0xff] %v9016_v22  ;;  %v9028_v36 = vmul.f32 %v8039_v27, %v11357_v49  ;;  %v9032_v60 = vmul.f32 %v8039_v27, %v11359_v55  ;;  %v11361_v46 = vld [vmem:[#allocation227_spill] sm:$0xff]  ;;  %v11363_v22 = vld [vmem:[#allocation228_spill] sm:$0xff] }
 0x4b5   :  { %11355 = vst [vmem:[#allocation155_spill] sm:$0xff] %v9020_v63  ;;  %11356 = vst [vmem:[#allocation157_spill] sm:$0xff] %v9024_v13  ;;  %v9036_v12 = vmul.f32 %v8039_v27, %v11361_v46  ;;  %v9040_v10 = vmul.f32 %v8039_v27, %v11363_v22  ;;  %v11365_v63 = vld [vmem:[#allocation229_spill] sm:$0xff]  ;;  %v11366_v13 = vld [vmem:[#allocation230_spill] sm:$0xff] }
 0x4b6   :  { %11358 = vst [vmem:[#allocation159_spill] sm:$0xff] %v9028_v36  ;;  %11360 = vst [vmem:[#allocation161_spill] sm:$0xff] %v9032_v60  ;;  %v9044_v0 = vmul.f32 %v8039_v27, %v11365_v63  ;;  %v9048_v49 = vmul.f32 %v8039_v27, %v11366_v13  ;;  %v11367_v36 = vld [vmem:[#allocation231_spill] sm:$0xff]  ;;  %v11368_v60 = vld [vmem:[#allocation232_spill] sm:$0xff]  ;;  %v9068_v13 = vadd.f32 %v8067_v52, %v8045_v16 }
 0x4b7   :  { %11362 = vst [vmem:[#allocation163_spill] sm:$0xff] %v9036_v12  ;;  %11364 = vst [vmem:[#allocation201_spill] sm:$0xff] %v9040_v10  ;;  %v9052_v55 = vmul.f32 %v8039_v27, %v11367_v36  ;;  %v9056_v46 = vmul.f32 %v8039_v27, %v11368_v60  ;;  %v11369_v12 = vld [vmem:[#allocation233_spill] sm:$0xff]  ;;  %v11370_v10 = vld [vmem:[#allocation234_spill] sm:$0xff]  ;;  %v9072_v36 = vadd.f32 %v8067_v52, %v8049_v23 }
 0x4b8   :  { %v9060_v22 = vmul.f32 %v8039_v27, %v11369_v12  ;;  %v9064_v63 = vmul.f32 %v8039_v27, %v11370_v10  ;;  %v9076_v60 = vadd.f32 %v8067_v52, %v8053_v38  ;;  %v9080_v12 = vadd.f32 %v8067_v52, %v8057_v4  ;;  %v11376_v10 = vld [vmem:[#allocation165_spill] sm:$0xff] }
 0x4b9   :  { %v9084_v27 = vadd.f32 %v8067_v52, %v8061_v17  ;;  %v9088_v16 = vadd.f32 %v8067_v52, %v8065_v20  ;;  %v9092_v23 = vadd.f32 %v8067_v52, %v8071_v58  ;;  %v9096_v38 = vadd.f32 %v8067_v52, %v8075_v30 }
 0x4ba   :  { %v9100_v4 = vadd.f32 %v8067_v52, %v8079_v59  ;;  %v9104_v17 = vadd.f32 %v8067_v52, %v11376_v10 }
 0x4bb   :  { %11371 = vst [vmem:[#allocation203_spill] sm:$0xff] %v9084_v27  ;;  %11372 = vst [vmem:[#allocation205_spill] sm:$0xff] %v9088_v16  ;;  %v11378_v27 = vld [vmem:[#allocation167_spill] sm:$0xff]  ;;  %v11380_v16 = vld [vmem:[#allocation169_spill] sm:$0xff] }
 0x4bc   :  { %11373 = vst [vmem:[#allocation207_spill] sm:$0xff] %v9092_v23  ;;  %11374 = vst [vmem:[#allocation209_spill] sm:$0xff] %v9096_v38  ;;  %v9108_v20 = vadd.f32 %v8067_v52, %v11378_v27  ;;  %v9112_v58 = vadd.f32 %v8067_v52, %v11380_v16  ;;  %v11382_v23 = vld [vmem:[#allocation171_spill] sm:$0xff]  ;;  %v11384_v38 = vld [vmem:[#allocation221_spill] sm:$0xff] }
 0x4bd   :  { %11375 = vst [vmem:[#allocation210_spill] sm:$0xff] %v9100_v4  ;;  %11377 = vst [vmem:[#allocation211_spill] sm:$0xff] %v9104_v17  ;;  %v9116_v30 = vadd.f32 %v8067_v52, %v11382_v23  ;;  %v9120_v59 = vadd.f32 %v8067_v52, %v11384_v38  ;;  %v11385_v4 = vld [vmem:[#allocation222_spill] sm:$0xff]  ;;  %v11387_v17 = vld [vmem:[#allocation223_spill] sm:$0xff] }
 0x4be   :  { %11379 = vst [vmem:[#allocation212_spill] sm:$0xff] %v9108_v20  ;;  %11381 = vst [vmem:[#allocation213_spill] sm:$0xff] %v9112_v58  ;;  %v9124_v10 = vadd.f32 %v8067_v52, %v11385_v4  ;;  %v9128_v27 = vadd.f32 %v8067_v52, %v11387_v17  ;;  %v11389_v20 = vld [vmem:[#allocation224_spill] sm:$0xff]  ;;  %v9144_v4 = vadd.f32 %v8067_v52, %v8124_v5 }
 0x4bf   :  { %11383 = vst [vmem:[#allocation214_spill] sm:$0xff] %v9116_v30  ;;  %v9132_v16 = vadd.f32 %v8067_v52, %v11389_v20  ;;  %v11391_v58 = vld [vmem:[#allocation12_spill] sm:$0xff]  ;;  %v11393_v30 = vld [vmem:[#allocation13_spill] sm:$0xff] }
 0x4c0   :  { %11386 = vst [vmem:[#allocation215_spill] sm:$0xff] %v9124_v10  ;;  %11388 = vst [vmem:[#allocation216_spill] sm:$0xff] %v9128_v27  ;;  %v9136_v23 = vadd.f32 %v8067_v52, %v11391_v58  ;;  %v9140_v38 = vadd.f32 %v8067_v52, %v11393_v30  ;;  %v11396_v10 = vld [vmem:[#allocation14_spill] sm:$0xff]  ;;  %v11397_v27 = vld [vmem:[#allocation15_spill] sm:$0xff] }
 0x4c1   :  { %11390 = vst [vmem:[#allocation217_spill] sm:$0xff] %v9132_v16  ;;  %11395 = vst [vmem:[#allocation220_spill] sm:$0xff] %v9144_v4  ;;  %v9148_v17 = vadd.f32 %v8067_v52, %v11396_v10  ;;  %v9152_v20 = vadd.f32 %v8067_v52, %v11397_v27  ;;  %v11399_v16 = vld [vmem:[#allocation16_spill] sm:$0xff]  ;;  %v11405_v4 = vld [vmem:[#allocation19_spill] sm:$0xff]  ;;  %v9172_v27 = vadd.f32 %v8067_v52, %v8152_v33 }
 0x4c2   :  { %11392 = vst [vmem:[#allocation218_spill] sm:$0xff] %v9136_v23  ;;  %11394 = vst [vmem:[#allocation219_spill] sm:$0xff] %v9140_v38  ;;  %v9156_v58 = vadd.f32 %v8067_v52, %v11399_v16  ;;  %v11401_v23 = vld [vmem:[#allocation17_spill] sm:$0xff]  ;;  %v11403_v38 = vld [vmem:[#allocation18_spill] sm:$0xff]  ;;  %v9168_v10 = vadd.f32 %v8067_v52, %v11405_v4 }
 0x4c3   :  { %11398 = vst [vmem:[#allocation225_spill] sm:$0xff] %v9152_v20  ;;  %v9160_v30 = vadd.f32 %v8067_v52, %v11401_v23  ;;  %v9164_v5 = vadd.f32 %v8067_v52, %v11403_v38  ;;  %11407 = vst [vmem:[#allocation230_spill] sm:$0xff] %v9172_v27  ;;  %v11408_v20 = vld [vmem:[#allocation20_spill] sm:$0xff]  ;;  %v11418_v27 = vld [vmem:[#allocation25_spill] sm:$0xff] }
 0x4c4   :  { %11400 = vst [vmem:[#allocation226_spill] sm:$0xff] %v9156_v58  ;;  %11406 = vst [vmem:[#allocation229_spill] sm:$0xff] %v9168_v10  ;;  %v9176_v16 = vadd.f32 %v8067_v52, %v11408_v20  ;;  %v11410_v58 = vld [vmem:[#allocation21_spill] sm:$0xff]  ;;  %v11416_v10 = vld [vmem:[#allocation24_spill] sm:$0xff]  ;;  %v9196_v20 = vadd.f32 %v8067_v52, %v11418_v27 }
 0x4c5   :  { %11402 = vst [vmem:[#allocation227_spill] sm:$0xff] %v9160_v30  ;;  %11404 = vst [vmem:[#allocation228_spill] sm:$0xff] %v9164_v5  ;;  %v9180_v23 = vadd.f32 %v8067_v52, %v11410_v58  ;;  %v11412_v30 = vld [vmem:[#allocation22_spill] sm:$0xff]  ;;  %v11414_v5 = vld [vmem:[#allocation23_spill] sm:$0xff]  ;;  %v9192_v33 = vadd.f32 %v8067_v52, %v11416_v10 }
 0x4c6   :  { %11409 = vst [vmem:[#allocation231_spill] sm:$0xff] %v9176_v16  ;;  %v9184_v38 = vadd.f32 %v8067_v52, %v11412_v30  ;;  %v9188_v4 = vadd.f32 %v8067_v52, %v11414_v5  ;;  %11419 = vst [vmem:[#allocation167_spill] sm:$0xff] %v9196_v20  ;;  %v11420_v16 = vld [vmem:[#allocation26_spill] sm:$0xff]  ;;  %v11430_v20 = vld [vmem:[#allocation31_spill] sm:$0xff] }
 0x4c7   :  { %11411 = vst [vmem:[#allocation232_spill] sm:$0xff] %v9180_v23  ;;  %11417 = vst [vmem:[#allocation165_spill] sm:$0xff] %v9192_v33  ;;  %v9200_v58 = vadd.f32 %v8067_v52, %v11420_v16  ;;  %v11422_v23 = vld [vmem:[#allocation27_spill] sm:$0xff]  ;;  %v11428_v33 = vld [vmem:[#allocation30_spill] sm:$0xff]  ;;  %v9220_v16 = vadd.f32 %v8067_v52, %v11430_v20 }
 0x4c8   :  { %11413 = vst [vmem:[#allocation233_spill] sm:$0xff] %v9184_v38  ;;  %11415 = vst [vmem:[#allocation234_spill] sm:$0xff] %v9188_v4  ;;  %v9204_v30 = vadd.f32 %v8067_v52, %v11422_v23  ;;  %v11424_v38 = vld [vmem:[#allocation28_spill] sm:$0xff]  ;;  %v11426_v4 = vld [vmem:[#allocation29_spill] sm:$0xff]  ;;  %v9216_v27 = vadd.f32 %v8067_v52, %v11428_v33 }
 0x4c9   :  { %11421 = vst [vmem:[#allocation169_spill] sm:$0xff] %v9200_v58  ;;  %v9208_v5 = vadd.f32 %v8067_v52, %v11424_v38  ;;  %v9212_v10 = vadd.f32 %v8067_v52, %v11426_v4  ;;  %11431 = vst [vmem:[#allocation224_spill] sm:$0xff] %v9220_v16  ;;  %v11432_v58 = vld [vmem:[#allocation32_spill] sm:$0xff]  ;;  %v11442_v16 = vld [vmem:[#allocation37_spill] sm:$0xff] }
 0x4ca   :  { %11423 = vst [vmem:[#allocation171_spill] sm:$0xff] %v9204_v30  ;;  %11429 = vst [vmem:[#allocation223_spill] sm:$0xff] %v9216_v27  ;;  %v9224_v23 = vadd.f32 %v8067_v52, %v11432_v58  ;;  %v11434_v30 = vld [vmem:[#allocation33_spill] sm:$0xff]  ;;  %v11440_v27 = vld [vmem:[#allocation36_spill] sm:$0xff]  ;;  %v9244_v58 = vadd.f32 %v8067_v52, %v11442_v16 }
 0x4cb   :  { %11425 = vst [vmem:[#allocation221_spill] sm:$0xff] %v9208_v5  ;;  %11427 = vst [vmem:[#allocation222_spill] sm:$0xff] %v9212_v10  ;;  %v9228_v38 = vadd.f32 %v8067_v52, %v11434_v30  ;;  %v11436_v5 = vld [vmem:[#allocation34_spill] sm:$0xff]  ;;  %v11438_v10 = vld [vmem:[#allocation35_spill] sm:$0xff]  ;;  %v9240_v20 = vadd.f32 %v8067_v52, %v11440_v27 }
 0x4cc   :  { %11433 = vst [vmem:[#allocation12_spill] sm:$0xff] %v9224_v23  ;;  %v9232_v4 = vadd.f32 %v8067_v52, %v11436_v5  ;;  %v9236_v33 = vadd.f32 %v8067_v52, %v11438_v10  ;;  %11443 = vst [vmem:[#allocation17_spill] sm:$0xff] %v9244_v58  ;;  %v11444_v23 = vld [vmem:[#allocation38_spill] sm:$0xff]  ;;  %v11454_v58 = vld [vmem:[#allocation44_spill] sm:$0xff] }
 0x4cd   :  { %11435 = vst [vmem:[#allocation13_spill] sm:$0xff] %v9228_v38  ;;  %11441 = vst [vmem:[#allocation16_spill] sm:$0xff] %v9240_v20  ;;  %v9248_v30 = vadd.f32 %v8067_v52, %v11444_v23  ;;  %v11446_v38 = vld [vmem:[#allocation39_spill] sm:$0xff]  ;;  %v11452_v20 = vld [vmem:[#allocation42_spill] sm:$0xff]  ;;  %v9268_v23 = vadd.f32 %v8067_v52, %v11454_v58 }
 0x4ce   :  { %11437 = vst [vmem:[#allocation14_spill] sm:$0xff] %v9232_v4  ;;  %11439 = vst [vmem:[#allocation15_spill] sm:$0xff] %v9236_v33  ;;  %v9252_v5 = vadd.f32 %v8067_v52, %v11446_v38  ;;  %v11448_v4 = vld [vmem:[#allocation40_spill] sm:$0xff]  ;;  %v11450_v33 = vld [vmem:[#allocation41_spill] sm:$0xff]  ;;  %v9264_v16 = vadd.f32 %v8067_v52, %v11452_v20 }
 0x4cf   :  { %11445 = vst [vmem:[#allocation18_spill] sm:$0xff] %v9248_v30  ;;  %v9256_v10 = vadd.f32 %v8067_v52, %v11448_v4  ;;  %v9260_v27 = vadd.f32 %v8067_v52, %v11450_v33  ;;  %11455 = vst [vmem:[#allocation23_spill] sm:$0xff] %v9268_v23  ;;  %v11456_v30 = vld [vmem:[#allocation46_spill] sm:$0xff]  ;;  %v11466_v23 = vld [vmem:[#allocation56_spill] sm:$0xff] }
 0x4d0   :  { %11447 = vst [vmem:[#allocation19_spill] sm:$0xff] %v9252_v5  ;;  %11453 = vst [vmem:[#allocation22_spill] sm:$0xff] %v9264_v16  ;;  %v9272_v38 = vadd.f32 %v8067_v52, %v11456_v30  ;;  %v11458_v5 = vld [vmem:[#allocation48_spill] sm:$0xff]  ;;  %v11464_v16 = vld [vmem:[#allocation54_spill] sm:$0xff]  ;;  %v9292_v30 = vadd.f32 %v8067_v52, %v11466_v23 }
 0x4d1   :  { %11449 = vst [vmem:[#allocation20_spill] sm:$0xff] %v9256_v10  ;;  %11451 = vst [vmem:[#allocation21_spill] sm:$0xff] %v9260_v27  ;;  %v9276_v4 = vadd.f32 %v8067_v52, %v11458_v5  ;;  %v11460_v10 = vld [vmem:[#allocation50_spill] sm:$0xff]  ;;  %v11462_v27 = vld [vmem:[#allocation52_spill] sm:$0xff]  ;;  %v9288_v58 = vadd.f32 %v8067_v52, %v11464_v16 }
 0x4d2   :  { %11457 = vst [vmem:[#allocation24_spill] sm:$0xff] %v9272_v38  ;;  %v9280_v33 = vadd.f32 %v8067_v52, %v11460_v10  ;;  %v9284_v20 = vadd.f32 %v8067_v52, %v11462_v27  ;;  %11467 = vst [vmem:[#allocation29_spill] sm:$0xff] %v9292_v30  ;;  %v11468_v38 = vld [vmem:[#allocation58_spill] sm:$0xff]  ;;  %v11478_v30 = vld [vmem:[#allocation68_spill] sm:$0xff] }
 0x4d3   :  { %11459 = vst [vmem:[#allocation25_spill] sm:$0xff] %v9276_v4  ;;  %11465 = vst [vmem:[#allocation28_spill] sm:$0xff] %v9288_v58  ;;  %v9296_v5 = vadd.f32 %v8067_v52, %v11468_v38  ;;  %v11470_v4 = vld [vmem:[#allocation60_spill] sm:$0xff]  ;;  %v11476_v58 = vld [vmem:[#allocation66_spill] sm:$0xff]  ;;  %v9316_v38 = vadd.f32 %v8067_v52, %v11478_v30 }
 0x4d4   :  { %11461 = vst [vmem:[#allocation26_spill] sm:$0xff] %v9280_v33  ;;  %11463 = vst [vmem:[#allocation27_spill] sm:$0xff] %v9284_v20  ;;  %v9300_v10 = vadd.f32 %v8067_v52, %v11470_v4  ;;  %v11472_v33 = vld [vmem:[#allocation62_spill] sm:$0xff]  ;;  %v11474_v20 = vld [vmem:[#allocation64_spill] sm:$0xff]  ;;  %v9312_v23 = vadd.f32 %v8067_v52, %v11476_v58 }
 0x4d5   :  { %11469 = vst [vmem:[#allocation30_spill] sm:$0xff] %v9296_v5  ;;  %v9304_v27 = vadd.f32 %v8067_v52, %v11472_v33  ;;  %v9308_v16 = vadd.f32 %v8067_v52, %v11474_v20  ;;  %11479 = vst [vmem:[#allocation35_spill] sm:$0xff] %v9316_v38  ;;  %v11480_v5 = vld [vmem:[#allocation70_spill] sm:$0xff]  ;;  %v11490_v38 = vld [vmem:[#allocation80_spill] sm:$0xff] }
 0x4d6   :  { %11471 = vst [vmem:[#allocation31_spill] sm:$0xff] %v9300_v10  ;;  %11477 = vst [vmem:[#allocation34_spill] sm:$0xff] %v9312_v23  ;;  %v9320_v4 = vadd.f32 %v8067_v52, %v11480_v5  ;;  %v11482_v10 = vld [vmem:[#allocation72_spill] sm:$0xff]  ;;  %v11488_v23 = vld [vmem:[#allocation78_spill] sm:$0xff]  ;;  %v9340_v5 = vadd.f32 %v8067_v52, %v11490_v38 }
 0x4d7   :  { %11473 = vst [vmem:[#allocation32_spill] sm:$0xff] %v9304_v27  ;;  %11475 = vst [vmem:[#allocation33_spill] sm:$0xff] %v9308_v16  ;;  %v9324_v33 = vadd.f32 %v8067_v52, %v11482_v10  ;;  %v11484_v27 = vld [vmem:[#allocation74_spill] sm:$0xff]  ;;  %v11486_v16 = vld [vmem:[#allocation76_spill] sm:$0xff]  ;;  %v9336_v30 = vadd.f32 %v8067_v52, %v11488_v23 }
 0x4d8   :  { %11481 = vst [vmem:[#allocation36_spill] sm:$0xff] %v9320_v4  ;;  %v9328_v20 = vadd.f32 %v8067_v52, %v11484_v27  ;;  %v9332_v58 = vadd.f32 %v8067_v52, %v11486_v16  ;;  %11491 = vst [vmem:[#allocation41_spill] sm:$0xff] %v9340_v5  ;;  %v11492_v4 = vld [vmem:[#allocation82_spill] sm:$0xff]  ;;  %v11502_v5 = vld [vmem:[#allocation92_spill] sm:$0xff] }
 0x4d9   :  { %11483 = vst [vmem:[#allocation37_spill] sm:$0xff] %v9324_v33  ;;  %11489 = vst [vmem:[#allocation40_spill] sm:$0xff] %v9336_v30  ;;  %v9344_v10 = vadd.f32 %v8067_v52, %v11492_v4  ;;  %v11494_v33 = vld [vmem:[#allocation84_spill] sm:$0xff]  ;;  %v11500_v30 = vld [vmem:[#allocation90_spill] sm:$0xff]  ;;  %v9364_v4 = vadd.f32 %v8067_v52, %v11502_v5 }
 0x4da   :  { %11485 = vst [vmem:[#allocation38_spill] sm:$0xff] %v9328_v20  ;;  %11487 = vst [vmem:[#allocation39_spill] sm:$0xff] %v9332_v58  ;;  %v9348_v27 = vadd.f32 %v8067_v52, %v11494_v33  ;;  %v11496_v20 = vld [vmem:[#allocation86_spill] sm:$0xff]  ;;  %v11498_v58 = vld [vmem:[#allocation88_spill] sm:$0xff]  ;;  %v9360_v38 = vadd.f32 %v8067_v52, %v11500_v30 }
 0x4db   :  { %11493 = vst [vmem:[#allocation42_spill] sm:$0xff] %v9344_v10  ;;  %v9352_v16 = vadd.f32 %v8067_v52, %v11496_v20  ;;  %v9356_v23 = vadd.f32 %v8067_v52, %v11498_v58  ;;  %11503 = vst [vmem:[#allocation52_spill] sm:$0xff] %v9364_v4  ;;  %v11504_v10 = vld [vmem:[#allocation94_spill] sm:$0xff]  ;;  %v11514_v4 = vld [vmem:[#allocation104_spill] sm:$0xff] }
 0x4dc   :  { %11495 = vst [vmem:[#allocation44_spill] sm:$0xff] %v9348_v27  ;;  %11501 = vst [vmem:[#allocation50_spill] sm:$0xff] %v9360_v38  ;;  %v9368_v33 = vadd.f32 %v8067_v52, %v11504_v10  ;;  %v11506_v27 = vld [vmem:[#allocation96_spill] sm:$0xff]  ;;  %v11512_v38 = vld [vmem:[#allocation102_spill] sm:$0xff]  ;;  %v9388_v10 = vadd.f32 %v8067_v52, %v11514_v4 }
 0x4dd   :  { %11497 = vst [vmem:[#allocation46_spill] sm:$0xff] %v9352_v16  ;;  %11499 = vst [vmem:[#allocation48_spill] sm:$0xff] %v9356_v23  ;;  %v9372_v20 = vadd.f32 %v8067_v52, %v11506_v27  ;;  %v11508_v16 = vld [vmem:[#allocation98_spill] sm:$0xff]  ;;  %v11510_v23 = vld [vmem:[#allocation100_spill] sm:$0xff]  ;;  %v9384_v5 = vadd.f32 %v8067_v52, %v11512_v38 }
 0x4de   :  { %11505 = vst [vmem:[#allocation54_spill] sm:$0xff] %v9368_v33  ;;  %v9376_v58 = vadd.f32 %v8067_v52, %v11508_v16  ;;  %v9380_v30 = vadd.f32 %v8067_v52, %v11510_v23  ;;  %11515 = vst [vmem:[#allocation64_spill] sm:$0xff] %v9388_v10  ;;  %v11516_v33 = vld [vmem:[#allocation106_spill] sm:$0xff]  ;;  %v11526_v10 = vld [vmem:[#allocation116_spill] sm:$0xff] }
 0x4df   :  { %11507 = vst [vmem:[#allocation56_spill] sm:$0xff] %v9372_v20  ;;  %11513 = vst [vmem:[#allocation62_spill] sm:$0xff] %v9384_v5  ;;  %v9392_v27 = vadd.f32 %v8067_v52, %v11516_v33  ;;  %v11518_v20 = vld [vmem:[#allocation108_spill] sm:$0xff]  ;;  %v11524_v5 = vld [vmem:[#allocation114_spill] sm:$0xff]  ;;  %v9412_v33 = vadd.f32 %v8067_v52, %v11526_v10 }
 0x4e0   :  { %11509 = vst [vmem:[#allocation58_spill] sm:$0xff] %v9376_v58  ;;  %11511 = vst [vmem:[#allocation60_spill] sm:$0xff] %v9380_v30  ;;  %v9396_v16 = vadd.f32 %v8067_v52, %v11518_v20  ;;  %v11520_v58 = vld [vmem:[#allocation110_spill] sm:$0xff]  ;;  %v11522_v30 = vld [vmem:[#allocation112_spill] sm:$0xff]  ;;  %v9408_v4 = vadd.f32 %v8067_v52, %v11524_v5 }
 0x4e1   :  { %11517 = vst [vmem:[#allocation66_spill] sm:$0xff] %v9392_v27  ;;  %v9400_v23 = vadd.f32 %v8067_v52, %v11520_v58  ;;  %v9404_v38 = vadd.f32 %v8067_v52, %v11522_v30  ;;  %11527 = vst [vmem:[#allocation76_spill] sm:$0xff] %v9412_v33  ;;  %v11528_v27 = vld [vmem:[#allocation118_spill] sm:$0xff]  ;;  %v11538_v33 = vld [vmem:[#allocation128_spill] sm:$0xff] }
 0x4e2   :  { %11519 = vst [vmem:[#allocation68_spill] sm:$0xff] %v9396_v16  ;;  %11525 = vst [vmem:[#allocation74_spill] sm:$0xff] %v9408_v4  ;;  %v9416_v20 = vadd.f32 %v8067_v52, %v11528_v27  ;;  %v11530_v16 = vld [vmem:[#allocation120_spill] sm:$0xff]  ;;  %v11536_v4 = vld [vmem:[#allocation126_spill] sm:$0xff]  ;;  %v9436_v27 = vadd.f32 %v8067_v52, %v11538_v33 }
 0x4e3   :  { %11521 = vst [vmem:[#allocation70_spill] sm:$0xff] %v9400_v23  ;;  %11523 = vst [vmem:[#allocation72_spill] sm:$0xff] %v9404_v38  ;;  %v9420_v58 = vadd.f32 %v8067_v52, %v11530_v16  ;;  %v11532_v23 = vld [vmem:[#allocation122_spill] sm:$0xff]  ;;  %v11534_v38 = vld [vmem:[#allocation124_spill] sm:$0xff]  ;;  %v9432_v10 = vadd.f32 %v8067_v52, %v11536_v4 }
 0x4e4   :  { %11529 = vst [vmem:[#allocation78_spill] sm:$0xff] %v9416_v20  ;;  %v9424_v30 = vadd.f32 %v8067_v52, %v11532_v23  ;;  %v9428_v5 = vadd.f32 %v8067_v52, %v11534_v38  ;;  %11539 = vst [vmem:[#allocation88_spill] sm:$0xff] %v9436_v27  ;;  %v11540_v20 = vld [vmem:[#allocation130_spill] sm:$0xff]  ;;  %v11550_v27 = vld [vmem:[#allocation140_spill] sm:$0xff] }
 0x4e5   :  { %11531 = vst [vmem:[#allocation80_spill] sm:$0xff] %v9420_v58  ;;  %11537 = vst [vmem:[#allocation86_spill] sm:$0xff] %v9432_v10  ;;  %v9440_v16 = vadd.f32 %v8067_v52, %v11540_v20  ;;  %v11542_v58 = vld [vmem:[#allocation132_spill] sm:$0xff]  ;;  %v11548_v10 = vld [vmem:[#allocation138_spill] sm:$0xff]  ;;  %v9460_v20 = vadd.f32 %v8067_v52, %v11550_v27 }
 0x4e6   :  { %11533 = vst [vmem:[#allocation82_spill] sm:$0xff] %v9424_v30  ;;  %11535 = vst [vmem:[#allocation84_spill] sm:$0xff] %v9428_v5  ;;  %v9444_v23 = vadd.f32 %v8067_v52, %v11542_v58  ;;  %v11544_v30 = vld [vmem:[#allocation134_spill] sm:$0xff]  ;;  %v11546_v5 = vld [vmem:[#allocation136_spill] sm:$0xff]  ;;  %v9456_v33 = vadd.f32 %v8067_v52, %v11548_v10 }
 0x4e7   :  { %11541 = vst [vmem:[#allocation90_spill] sm:$0xff] %v9440_v16  ;;  %v9448_v38 = vadd.f32 %v8067_v52, %v11544_v30  ;;  %v9452_v4 = vadd.f32 %v8067_v52, %v11546_v5  ;;  %11551 = vst [vmem:[#allocation100_spill] sm:$0xff] %v9460_v20  ;;  %v11552_v16 = vld [vmem:[#allocation142_spill] sm:$0xff]  ;;  %v11562_v20 = vld [vmem:[#allocation152_spill] sm:$0xff] }
 0x4e8   :  { %11543 = vst [vmem:[#allocation92_spill] sm:$0xff] %v9444_v23  ;;  %11549 = vst [vmem:[#allocation98_spill] sm:$0xff] %v9456_v33  ;;  %v9464_v58 = vadd.f32 %v8067_v52, %v11552_v16  ;;  %v11554_v23 = vld [vmem:[#allocation144_spill] sm:$0xff]  ;;  %v11560_v33 = vld [vmem:[#allocation150_spill] sm:$0xff]  ;;  %v9484_v16 = vadd.f32 %v8067_v52, %v11562_v20 }
 0x4e9   :  { %11545 = vst [vmem:[#allocation94_spill] sm:$0xff] %v9448_v38  ;;  %11547 = vst [vmem:[#allocation96_spill] sm:$0xff] %v9452_v4  ;;  %v9468_v30 = vadd.f32 %v8067_v52, %v11554_v23  ;;  %v11556_v38 = vld [vmem:[#allocation146_spill] sm:$0xff]  ;;  %v11558_v4 = vld [vmem:[#allocation148_spill] sm:$0xff]  ;;  %v9480_v27 = vadd.f32 %v8067_v52, %v11560_v33 }
 0x4ea   :  { %11553 = vst [vmem:[#allocation102_spill] sm:$0xff] %v9464_v58  ;;  %v9472_v5 = vadd.f32 %v8067_v52, %v11556_v38  ;;  %v9476_v10 = vadd.f32 %v8067_v52, %v11558_v4  ;;  %11563 = vst [vmem:[#allocation112_spill] sm:$0xff] %v9484_v16  ;;  %v11564_v58 = vld [vmem:[#allocation154_spill] sm:$0xff]  ;;  %v11574_v16 = vld [vmem:[#allocation164_spill] sm:$0xff] }
 0x4eb   :  { %11555 = vst [vmem:[#allocation104_spill] sm:$0xff] %v9468_v30  ;;  %11561 = vst [vmem:[#allocation110_spill] sm:$0xff] %v9480_v27  ;;  %v9488_v23 = vadd.f32 %v8067_v52, %v11564_v58  ;;  %v11566_v30 = vld [vmem:[#allocation156_spill] sm:$0xff]  ;;  %v11572_v27 = vld [vmem:[#allocation162_spill] sm:$0xff]  ;;  %v9508_v58 = vadd.f32 %v8067_v52, %v11574_v16 }
 0x4ec   :  { %11557 = vst [vmem:[#allocation106_spill] sm:$0xff] %v9472_v5  ;;  %11559 = vst [vmem:[#allocation108_spill] sm:$0xff] %v9476_v10  ;;  %v9492_v38 = vadd.f32 %v8067_v52, %v11566_v30  ;;  %v11568_v5 = vld [vmem:[#allocation158_spill] sm:$0xff]  ;;  %v11570_v10 = vld [vmem:[#allocation160_spill] sm:$0xff]  ;;  %v9504_v20 = vadd.f32 %v8067_v52, %v11572_v27 }
 0x4ed   :  { %11565 = vst [vmem:[#allocation114_spill] sm:$0xff] %v9488_v23  ;;  %v9496_v4 = vadd.f32 %v8067_v52, %v11568_v5  ;;  %v9500_v33 = vadd.f32 %v8067_v52, %v11570_v10  ;;  %11575 = vst [vmem:[#allocation124_spill] sm:$0xff] %v9508_v58  ;;  %v11576_v23 = vld [vmem:[#allocation166_spill] sm:$0xff] }
 0x4ee   :  { %11567 = vst [vmem:[#allocation116_spill] sm:$0xff] %v9492_v38  ;;  %11573 = vst [vmem:[#allocation122_spill] sm:$0xff] %v9504_v20  ;;  %v9512_v30 = vadd.f32 %v8067_v52, %v11576_v23  ;;  %v11578_v38 = vld [vmem:[#allocation168_spill] sm:$0xff]  ;;  %v11584_v20 = vld [vmem:[#allocation173_spill] sm:$0xff] }
 0x4ef   :  { %11569 = vst [vmem:[#allocation118_spill] sm:$0xff] %v9496_v4  ;;  %11571 = vst [vmem:[#allocation120_spill] sm:$0xff] %v9500_v33  ;;  %v9516_v5 = vadd.f32 %v8067_v52, %v11578_v38  ;;  %v11580_v4 = vld [vmem:[#allocation170_spill] sm:$0xff]  ;;  %v11582_v33 = vld [vmem:[#allocation172_spill] sm:$0xff]  ;;  %v9528_v16 = vadd.f32 %v8067_v52, %v11584_v20 }
 0x4f0   :  { %11577 = vst [vmem:[#allocation126_spill] sm:$0xff] %v9512_v30  ;;  %v9520_v10 = vadd.f32 %v8067_v52, %v11580_v4  ;;  %v9524_v27 = vadd.f32 %v8067_v52, %v11582_v33  ;;  %v11586_v58 = vld [vmem:[#allocation174_spill] sm:$0xff]  ;;  %v11588_v30 = vld [vmem:[#allocation175_spill] sm:$0xff] }
 0x4f1   :  { %11579 = vst [vmem:[#allocation128_spill] sm:$0xff] %v9516_v5  ;;  %11585 = vst [vmem:[#allocation134_spill] sm:$0xff] %v9528_v16  ;;  %v9532_v23 = vadd.f32 %v8067_v52, %v11586_v58  ;;  %v9536_v38 = vadd.f32 %v8067_v52, %v11588_v30  ;;  %v11590_v5 = vld [vmem:[#allocation176_spill] sm:$0xff]  ;;  %v11596_v16 = vld [vmem:[#allocation179_spill] sm:$0xff] }
 0x4f2   :  { %11581 = vst [vmem:[#allocation130_spill] sm:$0xff] %v9520_v10  ;;  %11583 = vst [vmem:[#allocation132_spill] sm:$0xff] %v9524_v27  ;;  %v9540_v4 = vadd.f32 %v8067_v52, %v11590_v5  ;;  %v11592_v10 = vld [vmem:[#allocation177_spill] sm:$0xff]  ;;  %v11594_v27 = vld [vmem:[#allocation178_spill] sm:$0xff]  ;;  %v9552_v58 = vadd.f32 %v8067_v52, %v11596_v16 }
 0x4f3   :  { %11587 = vst [vmem:[#allocation136_spill] sm:$0xff] %v9532_v23  ;;  %11589 = vst [vmem:[#allocation138_spill] sm:$0xff] %v9536_v38  ;;  %v9544_v33 = vadd.f32 %v8067_v52, %v11592_v10  ;;  %v9548_v20 = vadd.f32 %v8067_v52, %v11594_v27  ;;  %v11598_v23 = vld [vmem:[#allocation180_spill] sm:$0xff]  ;;  %v11600_v38 = vld [vmem:[#allocation181_spill] sm:$0xff] }
 0x4f4   :  { %11591 = vst [vmem:[#allocation140_spill] sm:$0xff] %v9540_v4  ;;  %11597 = vst [vmem:[#allocation146_spill] sm:$0xff] %v9552_v58  ;;  %v9556_v30 = vadd.f32 %v8067_v52, %v11598_v23  ;;  %v9560_v5 = vadd.f32 %v8067_v52, %v11600_v38  ;;  %v11602_v4 = vld [vmem:[#allocation182_spill] sm:$0xff]  ;;  %v11608_v58 = vld [vmem:[#allocation185_spill] sm:$0xff] }
 0x4f5   :  { %11593 = vst [vmem:[#allocation142_spill] sm:$0xff] %v9544_v33  ;;  %11595 = vst [vmem:[#allocation144_spill] sm:$0xff] %v9548_v20  ;;  %v9564_v10 = vadd.f32 %v8067_v52, %v11602_v4  ;;  %v11604_v33 = vld [vmem:[#allocation183_spill] sm:$0xff]  ;;  %v11606_v20 = vld [vmem:[#allocation184_spill] sm:$0xff]  ;;  %v9576_v23 = vadd.f32 %v8067_v52, %v11608_v58 }
 0x4f6   :  { %11599 = vst [vmem:[#allocation148_spill] sm:$0xff] %v9556_v30  ;;  %11601 = vst [vmem:[#allocation150_spill] sm:$0xff] %v9560_v5  ;;  %v9568_v27 = vadd.f32 %v8067_v52, %v11604_v33  ;;  %v9572_v16 = vadd.f32 %v8067_v52, %v11606_v20  ;;  %v11610_v30 = vld [vmem:[#allocation186_spill] sm:$0xff]  ;;  %v11612_v5 = vld [vmem:[#allocation187_spill] sm:$0xff] }
 0x4f7   :  { %11603 = vst [vmem:[#allocation152_spill] sm:$0xff] %v9564_v10  ;;  %11609 = vst [vmem:[#allocation158_spill] sm:$0xff] %v9576_v23  ;;  %v9580_v38 = vadd.f32 %v8067_v52, %v11610_v30  ;;  %v9584_v4 = vadd.f32 %v8067_v52, %v11612_v5  ;;  %v11614_v10 = vld [vmem:[#allocation188_spill] sm:$0xff]  ;;  %v11620_v23 = vld [vmem:[#allocation191_spill] sm:$0xff] }
 0x4f8   :  { %11605 = vst [vmem:[#allocation154_spill] sm:$0xff] %v9568_v27  ;;  %11607 = vst [vmem:[#allocation156_spill] sm:$0xff] %v9572_v16  ;;  %v9588_v33 = vadd.f32 %v8067_v52, %v11614_v10  ;;  %v11616_v27 = vld [vmem:[#allocation189_spill] sm:$0xff]  ;;  %v11618_v16 = vld [vmem:[#allocation190_spill] sm:$0xff]  ;;  %v9600_v30 = vadd.f32 %v8067_v52, %v11620_v23 }
 0x4f9   :  { %11611 = vst [vmem:[#allocation160_spill] sm:$0xff] %v9580_v38  ;;  %11613 = vst [vmem:[#allocation162_spill] sm:$0xff] %v9584_v4  ;;  %v9592_v20 = vadd.f32 %v8067_v52, %v11616_v27  ;;  %v9596_v58 = vadd.f32 %v8067_v52, %v11618_v16  ;;  %v11622_v38 = vld [vmem:[#allocation192_spill] sm:$0xff]  ;;  %v11624_v4 = vld [vmem:[#allocation193_spill] sm:$0xff] }
 0x4fa   :  { %11615 = vst [vmem:[#allocation164_spill] sm:$0xff] %v9588_v33  ;;  %11621 = vst [vmem:[#allocation170_spill] sm:$0xff] %v9600_v30  ;;  %v9604_v5 = vadd.f32 %v8067_v52, %v11622_v38  ;;  %v9608_v10 = vadd.f32 %v8067_v52, %v11624_v4  ;;  %v11626_v33 = vld [vmem:[#allocation194_spill] sm:$0xff]  ;;  %v11632_v30 = vld [vmem:[#allocation197_spill] sm:$0xff] }
 0x4fb   :  { %11617 = vst [vmem:[#allocation166_spill] sm:$0xff] %v9592_v20  ;;  %11619 = vst [vmem:[#allocation168_spill] sm:$0xff] %v9596_v58  ;;  %v9612_v27 = vadd.f32 %v8067_v52, %v11626_v33  ;;  %v11628_v20 = vld [vmem:[#allocation195_spill] sm:$0xff]  ;;  %v11630_v58 = vld [vmem:[#allocation196_spill] sm:$0xff]  ;;  %v9624_v38 = vadd.f32 %v8067_v52, %v11632_v30 }
 0x4fc   :  { %11623 = vst [vmem:[#allocation172_spill] sm:$0xff] %v9604_v5  ;;  %11625 = vst [vmem:[#allocation173_spill] sm:$0xff] %v9608_v10  ;;  %v9616_v16 = vadd.f32 %v8067_v52, %v11628_v20  ;;  %v9620_v23 = vadd.f32 %v8067_v52, %v11630_v58  ;;  %v11634_v5 = vld [vmem:[#allocation198_spill] sm:$0xff]  ;;  %v11636_v10 = vld [vmem:[#allocation199_spill] sm:$0xff] }
 0x4fd   :  { %11627 = vst [vmem:[#allocation174_spill] sm:$0xff] %v9612_v27  ;;  %11633 = vst [vmem:[#allocation177_spill] sm:$0xff] %v9624_v38  ;;  %v9628_v4 = vadd.f32 %v8067_v52, %v11634_v5  ;;  %v9632_v33 = vadd.f32 %v8067_v52, %v11636_v10  ;;  %v11638_v27 = vld [vmem:[#allocation200_spill] sm:$0xff]  ;;  %v11644_v38 = vld [vmem:[#allocation206_spill] sm:$0xff] }
 0x4fe   :  { %11629 = vst [vmem:[#allocation175_spill] sm:$0xff] %v9616_v16  ;;  %11631 = vst [vmem:[#allocation176_spill] sm:$0xff] %v9620_v23  ;;  %v9636_v20 = vadd.f32 %v8067_v52, %v11638_v27  ;;  %v11640_v16 = vld [vmem:[#allocation202_spill] sm:$0xff]  ;;  %v11642_v23 = vld [vmem:[#allocation204_spill] sm:$0xff]  ;;  %v9648_v5 = vadd.f32 %v8067_v52, %v11644_v38 }
 0x4ff   :  { %11635 = vst [vmem:[#allocation178_spill] sm:$0xff] %v9628_v4  ;;  %11637 = vst [vmem:[#allocation179_spill] sm:$0xff] %v9632_v33  ;;  %v9640_v58 = vadd.f32 %v8067_v52, %v11640_v16  ;;  %v9644_v30 = vadd.f32 %v8067_v52, %v11642_v23  ;;  %v11646_v4 = vld [vmem:[#allocation208_spill] sm:$0xff]  ;;  %v11648_v33 = vld [vmem:[#allocation43_spill] sm:$0xff] }
 0x500   :  { %11639 = vst [vmem:[#allocation180_spill] sm:$0xff] %v9636_v20  ;;  %11645 = vst [vmem:[#allocation183_spill] sm:$0xff] %v9648_v5  ;;  %v9652_v10 = vadd.f32 %v8067_v52, %v11646_v4  ;;  %v9656_v27 = vadd.f32 %v8067_v52, %v11648_v33  ;;  %v11650_v20 = vld [vmem:[#allocation45_spill] sm:$0xff]  ;;  %v11656_v5 = vld [vmem:[#allocation51_spill] sm:$0xff] }
 0x501   :  { %11641 = vst [vmem:[#allocation181_spill] sm:$0xff] %v9640_v58  ;;  %11643 = vst [vmem:[#allocation182_spill] sm:$0xff] %v9644_v30  ;;  %v9660_v16 = vadd.f32 %v8067_v52, %v11650_v20  ;;  %v11652_v58 = vld [vmem:[#allocation47_spill] sm:$0xff]  ;;  %v11654_v30 = vld [vmem:[#allocation49_spill] sm:$0xff]  ;;  %v9672_v4 = vadd.f32 %v8067_v52, %v11656_v5 }
 0x502   :  { %11647 = vst [vmem:[#allocation184_spill] sm:$0xff] %v9652_v10  ;;  %11649 = vst [vmem:[#allocation185_spill] sm:$0xff] %v9656_v27  ;;  %v9664_v23 = vadd.f32 %v8067_v52, %v11652_v58  ;;  %v9668_v38 = vadd.f32 %v8067_v52, %v11654_v30  ;;  %v11658_v10 = vld [vmem:[#allocation53_spill] sm:$0xff]  ;;  %v11660_v27 = vld [vmem:[#allocation55_spill] sm:$0xff] }
 0x503   :  { %11651 = vst [vmem:[#allocation186_spill] sm:$0xff] %v9660_v16  ;;  %11657 = vst [vmem:[#allocation189_spill] sm:$0xff] %v9672_v4  ;;  %v9676_v33 = vadd.f32 %v8067_v52, %v11658_v10  ;;  %v9680_v20 = vadd.f32 %v8067_v52, %v11660_v27  ;;  %v11662_v16 = vld [vmem:[#allocation57_spill] sm:$0xff]  ;;  %v11668_v4 = vld [vmem:[#allocation63_spill] sm:$0xff] }
 0x504   :  { %11653 = vst [vmem:[#allocation187_spill] sm:$0xff] %v9664_v23  ;;  %11655 = vst [vmem:[#allocation188_spill] sm:$0xff] %v9668_v38  ;;  %v9684_v58 = vadd.f32 %v8067_v52, %v11662_v16  ;;  %v11664_v23 = vld [vmem:[#allocation59_spill] sm:$0xff]  ;;  %v11666_v38 = vld [vmem:[#allocation61_spill] sm:$0xff]  ;;  %v9696_v10 = vadd.f32 %v8067_v52, %v11668_v4 }
 0x505   :  { %11659 = vst [vmem:[#allocation190_spill] sm:$0xff] %v9676_v33  ;;  %11661 = vst [vmem:[#allocation191_spill] sm:$0xff] %v9680_v20  ;;  %v9688_v30 = vadd.f32 %v8067_v52, %v11664_v23  ;;  %v9692_v5 = vadd.f32 %v8067_v52, %v11666_v38  ;;  %v11670_v33 = vld [vmem:[#allocation65_spill] sm:$0xff]  ;;  %v11672_v20 = vld [vmem:[#allocation67_spill] sm:$0xff] }
 0x506   :  { %11663 = vst [vmem:[#allocation192_spill] sm:$0xff] %v9684_v58  ;;  %11669 = vst [vmem:[#allocation195_spill] sm:$0xff] %v9696_v10  ;;  %v9700_v27 = vadd.f32 %v8067_v52, %v11670_v33  ;;  %v9704_v16 = vadd.f32 %v8067_v52, %v11672_v20  ;;  %v11674_v58 = vld [vmem:[#allocation69_spill] sm:$0xff]  ;;  %v11680_v10 = vld [vmem:[#allocation75_spill] sm:$0xff] }
 0x507   :  { %11665 = vst [vmem:[#allocation193_spill] sm:$0xff] %v9688_v30  ;;  %11667 = vst [vmem:[#allocation194_spill] sm:$0xff] %v9692_v5  ;;  %v9708_v23 = vadd.f32 %v8067_v52, %v11674_v58  ;;  %v11676_v30 = vld [vmem:[#allocation71_spill] sm:$0xff]  ;;  %v11678_v5 = vld [vmem:[#allocation73_spill] sm:$0xff]  ;;  %v9720_v33 = vadd.f32 %v8067_v52, %v11680_v10 }
 0x508   :  { %11671 = vst [vmem:[#allocation196_spill] sm:$0xff] %v9700_v27  ;;  %11673 = vst [vmem:[#allocation197_spill] sm:$0xff] %v9704_v16  ;;  %v9712_v38 = vadd.f32 %v8067_v52, %v11676_v30  ;;  %v9716_v4 = vadd.f32 %v8067_v52, %v11678_v5  ;;  %v11682_v27 = vld [vmem:[#allocation77_spill] sm:$0xff]  ;;  %v11684_v16 = vld [vmem:[#allocation79_spill] sm:$0xff] }
 0x509   :  { %11675 = vst [vmem:[#allocation198_spill] sm:$0xff] %v9708_v23  ;;  %11681 = vst [vmem:[#allocation202_spill] sm:$0xff] %v9720_v33  ;;  %v9724_v20 = vadd.f32 %v8067_v52, %v11682_v27  ;;  %v9728_v58 = vadd.f32 %v8067_v52, %v11684_v16  ;;  %v11686_v23 = vld [vmem:[#allocation81_spill] sm:$0xff]  ;;  %v11692_v33 = vld [vmem:[#allocation87_spill] sm:$0xff] }
 0x50a   :  { %11677 = vst [vmem:[#allocation199_spill] sm:$0xff] %v9712_v38  ;;  %11679 = vst [vmem:[#allocation200_spill] sm:$0xff] %v9716_v4  ;;  %v9732_v30 = vadd.f32 %v8067_v52, %v11686_v23  ;;  %v11688_v38 = vld [vmem:[#allocation83_spill] sm:$0xff]  ;;  %v11690_v4 = vld [vmem:[#allocation85_spill] sm:$0xff]  ;;  %v9744_v27 = vadd.f32 %v8067_v52, %v11692_v33 }
 0x50b   :  { %11683 = vst [vmem:[#allocation204_spill] sm:$0xff] %v9724_v20  ;;  %11685 = vst [vmem:[#allocation206_spill] sm:$0xff] %v9728_v58  ;;  %v9736_v5 = vadd.f32 %v8067_v52, %v11688_v38  ;;  %v9740_v10 = vadd.f32 %v8067_v52, %v11690_v4  ;;  %v11694_v20 = vld [vmem:[#allocation89_spill] sm:$0xff]  ;;  %v11696_v58 = vld [vmem:[#allocation91_spill] sm:$0xff] }
 0x50c   :  { %11687 = vst [vmem:[#allocation208_spill] sm:$0xff] %v9732_v30  ;;  %11693 = vst [vmem:[#allocation47_spill] sm:$0xff] %v9744_v27  ;;  %v9748_v16 = vadd.f32 %v8067_v52, %v11694_v20  ;;  %v9752_v23 = vadd.f32 %v8067_v52, %v11696_v58  ;;  %v11698_v30 = vld [vmem:[#allocation93_spill] sm:$0xff]  ;;  %v11704_v27 = vld [vmem:[#allocation99_spill] sm:$0xff] }
 0x50d   :  { %11689 = vst [vmem:[#allocation43_spill] sm:$0xff] %v9736_v5  ;;  %11691 = vst [vmem:[#allocation45_spill] sm:$0xff] %v9740_v10  ;;  %v9756_v38 = vadd.f32 %v8067_v52, %v11698_v30  ;;  %v11700_v5 = vld [vmem:[#allocation95_spill] sm:$0xff]  ;;  %v11702_v10 = vld [vmem:[#allocation97_spill] sm:$0xff]  ;;  %v9768_v20 = vadd.f32 %v8067_v52, %v11704_v27 }
 0x50e   :  { %11695 = vst [vmem:[#allocation49_spill] sm:$0xff] %v9748_v16  ;;  %11697 = vst [vmem:[#allocation51_spill] sm:$0xff] %v9752_v23  ;;  %v9760_v4 = vadd.f32 %v8067_v52, %v11700_v5  ;;  %v9764_v33 = vadd.f32 %v8067_v52, %v11702_v10  ;;  %v11706_v16 = vld [vmem:[#allocation101_spill] sm:$0xff]  ;;  %v11708_v23 = vld [vmem:[#allocation103_spill] sm:$0xff] }
 0x50f   :  { %11699 = vst [vmem:[#allocation53_spill] sm:$0xff] %v9756_v38  ;;  %11705 = vst [vmem:[#allocation59_spill] sm:$0xff] %v9768_v20  ;;  %v9772_v58 = vadd.f32 %v8067_v52, %v11706_v16  ;;  %v9776_v30 = vadd.f32 %v8067_v52, %v11708_v23  ;;  %v11709_v38 = vld [vmem:[#allocation105_spill] sm:$0xff]  ;;  %v11712_v20 = vld [vmem:[#allocation111_spill] sm:$0xff] }
 0x510   :  { %11701 = vst [vmem:[#allocation55_spill] sm:$0xff] %v9760_v4  ;;  %11703 = vst [vmem:[#allocation57_spill] sm:$0xff] %v9764_v33  ;;  %v9780_v5 = vadd.f32 %v8067_v52, %v11709_v38  ;;  %v11710_v4 = vld [vmem:[#allocation107_spill] sm:$0xff]  ;;  %v11711_v33 = vld [vmem:[#allocation109_spill] sm:$0xff]  ;;  %v9792_v16 = vadd.f32 %v8067_v52, %v11712_v20  ;;  %v9800_v38 = vadd.f32 %v8067_v52, %v8780_v42 }
 0x511   :  { %11707 = vst [vmem:[#allocation61_spill] sm:$0xff] %v9772_v58  ;;  %v9784_v10 = vadd.f32 %v8067_v52, %v11710_v4  ;;  %v9788_v27 = vadd.f32 %v8067_v52, %v11711_v33  ;;  %v11713_v58 = vld [vmem:[#allocation113_spill] sm:$0xff]  ;;  %v9804_v4 = vadd.f32 %v8067_v52, %v8784_v2  ;;  %v9808_v33 = vadd.f32 %v8067_v52, %v8788_v50 }
 0x512   :  { %v9796_v23 = vadd.f32 %v8067_v52, %v11713_v58  ;;  %v9812_v20 = vadd.f32 %v8067_v52, %v8792_v34  ;;  %v9816_v58 = vadd.f32 %v8067_v52, %v8796_v41  ;;  %v9820_v42 = vadd.f32 %v8067_v52, %v8800_v29 }
 0x513   :  { %v9824_v2 = vadd.f32 %v8067_v52, %v8804_v37  ;;  %v9828_v50 = vadd.f32 %v8067_v52, %v8808_v39  ;;  %v9832_v34 = vadd.f32 %v8067_v52, %v8812_v6  ;;  %v9836_v41 = vadd.f32 %v8067_v52, %v8816_v9 }
 0x514   :  { %v9840_v29 = vadd.f32 %v8067_v52, %v8820_v7  ;;  %v9844_v37 = vadd.f32 %v8067_v52, %v8824_v1  ;;  %v9848_v39 = vadd.f32 %v8067_v52, %v8828_v18  ;;  %v9852_v6 = vadd.f32 %v8067_v52, %v8832_v35 }
 0x515   :  { %v9856_v9 = vadd.f32 %v8067_v52, %v8836_v8  ;;  %v9860_v7 = vadd.f32 %v8067_v52, %v8840_v48  ;;  %v9864_v1 = vadd.f32 %v8067_v52, %v8844_v21  ;;  %v9868_v18 = vadd.f32 %v8067_v52, %v8848_v40 }
 0x516   :  { %v9872_v35 = vadd.f32 %v8067_v52, %v8852_v44  ;;  %v9876_v8 = vadd.f32 %v8067_v52, %v8856_v61  ;;  %v9880_v48 = vadd.f32 %v8067_v52, %v8860_v26  ;;  %v9884_v21 = vadd.f32 %v8067_v52, %v8864_v11 }
 0x517   :  { %v9888_v40 = vadd.f32 %v8067_v52, %v8868_v51  ;;  %v9892_v44 = vadd.f32 %v8067_v52, %v8872_v19  ;;  %v9896_v61 = vadd.f32 %v8067_v52, %v8876_v54  ;;  %v9900_v26 = vadd.f32 %v8067_v52, %v8880_v62 }
 0x518   :  { %v9904_v11 = vadd.f32 %v8067_v52, %v8884_v43  ;;  %v9908_v51 = vadd.f32 %v8067_v52, %v8888_v45  ;;  %v9912_v19 = vadd.f32 %v8067_v52, %v8892_v53  ;;  %v9916_v54 = vadd.f32 %v8067_v52, %v8896_v14 }
 0x519   :  { %v9920_v62 = vadd.f32 %v8067_v52, %v8900_v28  ;;  %v9924_v43 = vadd.f32 %v8067_v52, %v8904_v24 }
 0x51a   :  { %11714 = vst [vmem:[#allocation63_spill] sm:$0xff] %v9904_v11  ;;  %11715 = vst [vmem:[#allocation65_spill] sm:$0xff] %v9908_v51  ;;  %v11720_v11 = vld [vmem:[#allocation115_spill] sm:$0xff]  ;;  %v11722_v51 = vld [vmem:[#allocation117_spill] sm:$0xff] }
 0x51b   :  { %11716 = vst [vmem:[#allocation67_spill] sm:$0xff] %v9912_v19  ;;  %11717 = vst [vmem:[#allocation69_spill] sm:$0xff] %v9916_v54  ;;  %v9928_v45 = vadd.f32 %v8067_v52, %v11720_v11  ;;  %v9932_v53 = vadd.f32 %v8067_v52, %v11722_v51  ;;  %v11724_v19 = vld [vmem:[#allocation119_spill] sm:$0xff]  ;;  %v11726_v54 = vld [vmem:[#allocation121_spill] sm:$0xff] }
 0x51c   :  { %11718 = vst [vmem:[#allocation71_spill] sm:$0xff] %v9920_v62  ;;  %11719 = vst [vmem:[#allocation73_spill] sm:$0xff] %v9924_v43  ;;  %v9936_v14 = vadd.f32 %v8067_v52, %v11724_v19  ;;  %v9940_v28 = vadd.f32 %v8067_v52, %v11726_v54  ;;  %v11728_v62 = vld [vmem:[#allocation123_spill] sm:$0xff]  ;;  %v11730_v43 = vld [vmem:[#allocation125_spill] sm:$0xff] }
 0x51d   :  { %11721 = vst [vmem:[#allocation75_spill] sm:$0xff] %v9928_v45  ;;  %11723 = vst [vmem:[#allocation77_spill] sm:$0xff] %v9932_v53  ;;  %v9944_v24 = vadd.f32 %v8067_v52, %v11728_v62  ;;  %v9948_v11 = vadd.f32 %v8067_v52, %v11730_v43  ;;  %v11732_v45 = vld [vmem:[#allocation127_spill] sm:$0xff]  ;;  %v11734_v53 = vld [vmem:[#allocation129_spill] sm:$0xff] }
 0x51e   :  { %11725 = vst [vmem:[#allocation79_spill] sm:$0xff] %v9936_v14  ;;  %11727 = vst [vmem:[#allocation81_spill] sm:$0xff] %v9940_v28  ;;  %v9952_v51 = vadd.f32 %v8067_v52, %v11732_v45  ;;  %v9956_v19 = vadd.f32 %v8067_v52, %v11734_v53  ;;  %v11736_v14 = vld [vmem:[#allocation131_spill] sm:$0xff]  ;;  %v11738_v28 = vld [vmem:[#allocation133_spill] sm:$0xff] }
 0x51f   :  { %11729 = vst [vmem:[#allocation83_spill] sm:$0xff] %v9944_v24  ;;  %11731 = vst [vmem:[#allocation85_spill] sm:$0xff] %v9948_v11  ;;  %v9960_v54 = vadd.f32 %v8067_v52, %v11736_v14  ;;  %v9964_v62 = vadd.f32 %v8067_v52, %v11738_v28  ;;  %v11740_v24 = vld [vmem:[#allocation135_spill] sm:$0xff]  ;;  %v11741_v11 = vld [vmem:[#allocation137_spill] sm:$0xff] }
 0x520   :  { %11733 = vst [vmem:[#allocation87_spill] sm:$0xff] %v9952_v51  ;;  %11735 = vst [vmem:[#allocation89_spill] sm:$0xff] %v9956_v19  ;;  %v9968_v43 = vadd.f32 %v8067_v52, %v11740_v24  ;;  %v9972_v45 = vadd.f32 %v8067_v52, %v11741_v11  ;;  %v11742_v51 = vld [vmem:[#allocation139_spill] sm:$0xff]  ;;  %v11743_v19 = vld [vmem:[#allocation141_spill] sm:$0xff]  ;;  %v9992_v11 = vadd.f32 %v8067_v52, %v8972_v32 }
 0x521   :  { %11737 = vst [vmem:[#allocation91_spill] sm:$0xff] %v9960_v54  ;;  %11739 = vst [vmem:[#allocation93_spill] sm:$0xff] %v9964_v62  ;;  %v9976_v53 = vadd.f32 %v8067_v52, %v11742_v51  ;;  %v9980_v14 = vadd.f32 %v8067_v52, %v11743_v19  ;;  %v11744_v54 = vld [vmem:[#allocation143_spill] sm:$0xff]  ;;  %v11745_v62 = vld [vmem:[#allocation145_spill] sm:$0xff]  ;;  %v9996_v51 = vadd.f32 %v8067_v52, %v8976_v47 }
 0x522   :  { %v9984_v28 = vadd.f32 %v8067_v52, %v11744_v54  ;;  %v9988_v24 = vadd.f32 %v8067_v52, %v11745_v62  ;;  %v10000_v19 = vadd.f32 %v8067_v52, %v8980_v15  ;;  %v10004_v54 = vadd.f32 %v8067_v52, %v8984_v56 }
 0x523   :  { %11746 = vst [vmem:[#allocation95_spill] sm:$0xff] %v9996_v51  ;;  %v10008_v62 = vadd.f32 %v8067_v52, %v8988_v3  ;;  %v10012_v32 = vadd.f32 %v8067_v52, %v8992_v25  ;;  %v10016_v47 = vadd.f32 %v8067_v52, %v8996_v31  ;;  %v10020_v15 = vadd.f32 %v8067_v52, %v9000_v57 }
 0x524   :  { %11747 = vst [vmem:[#allocation97_spill] sm:$0xff] %v10000_v19  ;;  %11748 = vst [vmem:[#allocation99_spill] sm:$0xff] %v10004_v54  ;;  %v11753_v19 = vld [vmem:[#allocation147_spill] sm:$0xff]  ;;  %v11755_v54 = vld [vmem:[#allocation149_spill] sm:$0xff] }
 0x525   :  { %11749 = vst [vmem:[#allocation101_spill] sm:$0xff] %v10008_v62  ;;  %11750 = vst [vmem:[#allocation103_spill] sm:$0xff] %v10012_v32  ;;  %v10024_v56 = vadd.f32 %v8067_v52, %v11753_v19  ;;  %v10028_v3 = vadd.f32 %v8067_v52, %v11755_v54  ;;  %v11757_v62 = vld [vmem:[#allocation151_spill] sm:$0xff]  ;;  %v11759_v32 = vld [vmem:[#allocation153_spill] sm:$0xff] }
 0x526   :  { %11751 = vst [vmem:[#allocation105_spill] sm:$0xff] %v10016_v47  ;;  %11752 = vst [vmem:[#allocation107_spill] sm:$0xff] %v10020_v15  ;;  %v10032_v25 = vadd.f32 %v8067_v52, %v11757_v62  ;;  %v10036_v31 = vadd.f32 %v8067_v52, %v11759_v32  ;;  %v11761_v47 = vld [vmem:[#allocation155_spill] sm:$0xff]  ;;  %v11763_v15 = vld [vmem:[#allocation157_spill] sm:$0xff] }
 0x527   :  { %11754 = vst [vmem:[#allocation109_spill] sm:$0xff] %v10024_v56  ;;  %11756 = vst [vmem:[#allocation111_spill] sm:$0xff] %v10028_v3  ;;  %v10040_v57 = vadd.f32 %v8067_v52, %v11761_v47  ;;  %v10044_v19 = vadd.f32 %v8067_v52, %v11763_v15  ;;  %v11765_v56 = vld [vmem:[#allocation159_spill] sm:$0xff]  ;;  %v11767_v3 = vld [vmem:[#allocation161_spill] sm:$0xff]  ;;  %v10064_v15 = vadd.f32 %v8067_v52, %v9044_v0 }
 0x528   :  { %11758 = vst [vmem:[#allocation113_spill] sm:$0xff] %v10032_v25  ;;  %11760 = vst [vmem:[#allocation115_spill] sm:$0xff] %v10036_v31  ;;  %v10048_v54 = vadd.f32 %v8067_v52, %v11765_v56  ;;  %v10052_v62 = vadd.f32 %v8067_v52, %v11767_v3  ;;  %v11769_v25 = vld [vmem:[#allocation163_spill] sm:$0xff]  ;;  %v11771_v31 = vld [vmem:[#allocation201_spill] sm:$0xff]  ;;  %v10068_v56 = vadd.f32 %v8067_v52, %v9048_v49  ;;  %v5370_v49 = vmax.f32 %v9072_v36, 0.0 }
 0x529   :  { %11762 = vst [vmem:[#allocation117_spill] sm:$0xff] %v10040_v57  ;;  %11764 = vst [vmem:[#allocation119_spill] sm:$0xff] %v10044_v19  ;;  %v10056_v32 = vadd.f32 %v8067_v52, %v11769_v25  ;;  %v10060_v47 = vadd.f32 %v8067_v52, %v11771_v31  ;;  %v10072_v3 = vadd.f32 %v8067_v52, %v9052_v55  ;;  %v5372_v55 = vmax.f32 %v9080_v12, 0.0  ;;  %v11786_v36 = vld [vmem:[#allocation213_spill] sm:$0xff] }
 0x52a   :  { %11766 = vst [vmem:[#allocation121_spill] sm:$0xff] %v10048_v54  ;;  %11768 = vst [vmem:[#allocation123_spill] sm:$0xff] %v10052_v62  ;;  %v10076_v25 = vadd.f32 %v8067_v52, %v9056_v46  ;;  %v10080_v31 = vadd.f32 %v8067_v52, %v9060_v22  ;;  %v10084_v0 = vadd.f32 %v8067_v52, %v9064_v63  ;;  %v11780_v46 = vld [vmem:[#allocation205_spill] sm:$0xff]  ;;  %v11783_v54 = vld [vmem:[#allocation210_spill] sm:$0xff]  ;;  %v5380_v57 = vmax.f32 %v11786_v36, 0.0 }
 0x52b   :  { %11770 = vst [vmem:[#allocation125_spill] sm:$0xff] %v10056_v32  ;;  %11772 = vst [vmem:[#allocation127_spill] sm:$0xff] %v10060_v47  ;;  %v11781_v32 = vld [vmem:[#allocation207_spill] sm:$0xff]  ;;  %v11782_v22 = vld [vmem:[#allocation209_spill] sm:$0xff]  ;;  %v5377_v19 = vmax.f32 %v11783_v54, 0.0  ;;  %v5382_v12 = vmax.f32 %v9120_v59, 0.0 }
 0x52c   :  { %11773 = vst [vmem:[#allocation129_spill] sm:$0xff] %v10064_v15  ;;  %11774 = vst [vmem:[#allocation131_spill] sm:$0xff] %v10068_v56  ;;  %v5369_v15 = vmax.f32 %v9068_v13, 0.0  ;;  %v5371_v56 = vmax.f32 %v9076_v60, 0.0  ;;  %v5375_v62 = vmax.f32 %v11781_v32, 0.0  ;;  %v11784_v52 = vld [vmem:[#allocation211_spill] sm:$0xff] }
 0x52d   :  { %11775 = vst [vmem:[#allocation133_spill] sm:$0xff] %v10072_v3  ;;  %11776 = vst [vmem:[#allocation135_spill] sm:$0xff] %v10076_v25  ;;  %v11779_v3 = vld [vmem:[#allocation203_spill] sm:$0xff]  ;;  %v5374_v25 = vmax.f32 %v11780_v46, 0.0  ;;  %v5378_v63 = vmax.f32 %v11784_v52, 0.0  ;;  %v11785_v13 = vld [vmem:[#allocation212_spill] sm:$0xff] }
 0x52e   :  { %11777 = vst [vmem:[#allocation137_spill] sm:$0xff] %v10080_v31  ;;  %11778 = vst [vmem:[#allocation139_spill] sm:$0xff] %v10084_v0  ;;  %v5373_v47 = vmax.f32 %v11779_v3, 0.0  ;;  %v5376_v31 = vmax.f32 %v11782_v22, 0.0  ;;  %v5379_v0 = vmax.f32 %v11785_v13, 0.0  ;;  %v11787_v60 = vld [vmem:[#allocation214_spill] sm:$0xff] }
 0x52f   :  { %5625 = vst [vmem:[#allocation8] sm:$0xff] %v5369_v15  ;;  %v5381_v51 = vmax.f32 %v11787_v60, 0.0  ;;  %5626 = vst [vmem:[#allocation8 + $0x8] sm:$0xff] %v5370_v49  ;;  %v11788_v32 = vld [vmem:[#allocation215_spill] sm:$0xff]  ;;  %v11789_v46 = vld [vmem:[#allocation216_spill] sm:$0xff] }
 0x530   :  { %5627 = vst [vmem:[#allocation8 + $0x10] sm:$0xff] %v5371_v56  ;;  %5628 = vst [vmem:[#allocation8 + $0x18] sm:$0xff] %v5372_v55  ;;  %v5383_v3 = vmax.f32 %v11788_v32, 0.0  ;;  %v5384_v22 = vmax.f32 %v11789_v46, 0.0  ;;  %v11790_v54 = vld [vmem:[#allocation217_spill] sm:$0xff]  ;;  %v11791_v52 = vld [vmem:[#allocation218_spill] sm:$0xff] }
 0x531   :  { %5629 = vst [vmem:[#allocation8 + $0x20] sm:$0xff] %v5373_v47  ;;  %v5385_v15 = vmax.f32 %v11790_v54, 0.0  ;;  %5630 = vst [vmem:[#allocation8 + $0x28] sm:$0xff] %v5374_v25  ;;  %v5386_v13 = vmax.f32 %v11791_v52, 0.0  ;;  %v11792_v36 = vld [vmem:[#allocation219_spill] sm:$0xff]  ;;  %v11793_v49 = vld [vmem:[#allocation220_spill] sm:$0xff] }
 0x532   :  { %5631 = vst [vmem:[#allocation8 + $0x30] sm:$0xff] %v5375_v62  ;;  %5632 = vst [vmem:[#allocation8 + $0x38] sm:$0xff] %v5376_v31  ;;  %v5387_v60 = vmax.f32 %v11792_v36, 0.0  ;;  %v5388_v56 = vmax.f32 %v11793_v49, 0.0  ;;  %v5389_v47 = vmax.f32 %v9148_v17, 0.0  ;;  %v11794_v59 = vld [vmem:[#allocation225_spill] sm:$0xff] }
 0x533   :  { %5633 = vst [vmem:[#allocation8 + $0x40] sm:$0xff] %v5377_v19  ;;  %5634 = vst [vmem:[#allocation8 + $0x48] sm:$0xff] %v5378_v63  ;;  %v5390_v55 = vmax.f32 %v11794_v59, 0.0  ;;  %v11795_v32 = vld [vmem:[#allocation226_spill] sm:$0xff]  ;;  %v11796_v25 = vld [vmem:[#allocation227_spill] sm:$0xff] }
 0x534   :  { %5635 = vst [vmem:[#allocation8 + $0x50] sm:$0xff] %v5379_v0  ;;  %5636 = vst [vmem:[#allocation8 + $0x58] sm:$0xff] %v5380_v57  ;;  %v5391_v46 = vmax.f32 %v11795_v32, 0.0  ;;  %v5392_v62 = vmax.f32 %v11796_v25, 0.0  ;;  %v11797_v31 = vld [vmem:[#allocation228_spill] sm:$0xff]  ;;  %v11798_v54 = vld [vmem:[#allocation229_spill] sm:$0xff] }
 0x535   :  { %5637 = vst [vmem:[#allocation8 + $0x60] sm:$0xff] %v5381_v51  ;;  %v5393_v19 = vmax.f32 %v11797_v31, 0.0  ;;  %5638 = vst [vmem:[#allocation8 + $0x68] sm:$0xff] %v5382_v12  ;;  %v5394_v52 = vmax.f32 %v11798_v54, 0.0  ;;  %v11799_v36 = vld [vmem:[#allocation230_spill] sm:$0xff]  ;;  %v11800_v63 = vld [vmem:[#allocation231_spill] sm:$0xff] }
 0x536   :  { %5639 = vst [vmem:[#allocation8 + $0x70] sm:$0xff] %v5383_v3  ;;  %5640 = vst [vmem:[#allocation8 + $0x78] sm:$0xff] %v5384_v22  ;;  %v5395_v17 = vmax.f32 %v11799_v36, 0.0  ;;  %v5396_v0 = vmax.f32 %v11800_v63, 0.0  ;;  %v11801_v57 = vld [vmem:[#allocation232_spill] sm:$0xff]  ;;  %v11802_v49 = vld [vmem:[#allocation233_spill] sm:$0xff] }
 0x537   :  { %5641 = vst [vmem:[#allocation8 + $0x80] sm:$0xff] %v5385_v15  ;;  %v5397_v51 = vmax.f32 %v11801_v57, 0.0  ;;  %5642 = vst [vmem:[#allocation8 + $0x88] sm:$0xff] %v5386_v13  ;;  %v5398_v59 = vmax.f32 %v11802_v49, 0.0  ;;  %v11803_v32 = vld [vmem:[#allocation234_spill] sm:$0xff]  ;;  %v11804_v12 = vld [vmem:[#allocation165_spill] sm:$0xff] }
 0x538   :  { %5643 = vst [vmem:[#allocation8 + $0x90] sm:$0xff] %v5387_v60  ;;  %5644 = vst [vmem:[#allocation8 + $0x98] sm:$0xff] %v5388_v56  ;;  %v5399_v25 = vmax.f32 %v11803_v32, 0.0  ;;  %v5400_v3 = vmax.f32 %v11804_v12, 0.0  ;;  %v11805_v22 = vld [vmem:[#allocation167_spill] sm:$0xff]  ;;  %v11806_v31 = vld [vmem:[#allocation169_spill] sm:$0xff] }
 0x539   :  { %5645 = vst [vmem:[#allocation8 + $0xa0] sm:$0xff] %v5389_v47  ;;  %v5401_v15 = vmax.f32 %v11805_v22, 0.0  ;;  %5646 = vst [vmem:[#allocation8 + $0xa8] sm:$0xff] %v5390_v55  ;;  %v5402_v54 = vmax.f32 %v11806_v31, 0.0  ;;  %v11807_v36 = vld [vmem:[#allocation171_spill] sm:$0xff]  ;;  %v11808_v13 = vld [vmem:[#allocation221_spill] sm:$0xff] }
 0x53a   :  { %5647 = vst [vmem:[#allocation8 + $0xb0] sm:$0xff] %v5391_v46  ;;  %5648 = vst [vmem:[#allocation8 + $0xb8] sm:$0xff] %v5392_v62  ;;  %v5403_v63 = vmax.f32 %v11807_v36, 0.0  ;;  %v5404_v60 = vmax.f32 %v11808_v13, 0.0  ;;  %v11809_v56 = vld [vmem:[#allocation222_spill] sm:$0xff]  ;;  %v11810_v57 = vld [vmem:[#allocation223_spill] sm:$0xff] }
 0x53b   :  { %5649 = vst [vmem:[#allocation8 + $0xc0] sm:$0xff] %v5393_v19  ;;  %v5405_v47 = vmax.f32 %v11809_v56, 0.0  ;;  %5650 = vst [vmem:[#allocation8 + $0xc8] sm:$0xff] %v5394_v52  ;;  %v5406_v49 = vmax.f32 %v11810_v57, 0.0  ;;  %v11811_v32 = vld [vmem:[#allocation224_spill] sm:$0xff]  ;;  %v11813_v62 = vld [vmem:[#allocation13_spill] sm:$0xff] }
 0x53c   :  { %5651 = vst [vmem:[#allocation8 + $0xd0] sm:$0xff] %v5395_v17  ;;  %5652 = vst [vmem:[#allocation8 + $0xd8] sm:$0xff] %v5396_v0  ;;  %v5407_v12 = vmax.f32 %v11811_v32, 0.0  ;;  %v11812_v55 = vld [vmem:[#allocation12_spill] sm:$0xff]  ;;  %v5409_v19 = vmax.f32 %v11813_v62, 0.0  ;;  %v11814_v22 = vld [vmem:[#allocation14_spill] sm:$0xff] }
 0x53d   :  { %5653 = vst [vmem:[#allocation8 + $0xe0] sm:$0xff] %v5397_v51  ;;  %v5408_v46 = vmax.f32 %v11812_v55, 0.0  ;;  %5654 = vst [vmem:[#allocation8 + $0xe8] sm:$0xff] %v5398_v59  ;;  %v5410_v31 = vmax.f32 %v11814_v22, 0.0  ;;  %v11815_v36 = vld [vmem:[#allocation15_spill] sm:$0xff]  ;;  %v11816_v52 = vld [vmem:[#allocation16_spill] sm:$0xff] }
 0x53e   :  { %5655 = vst [vmem:[#allocation8 + $0xf0] sm:$0xff] %v5399_v25  ;;  %5656 = vst [vmem:[#allocation8 + $0xf8] sm:$0xff] %v5400_v3  ;;  %v5411_v13 = vmax.f32 %v11815_v36, 0.0  ;;  %v5412_v17 = vmax.f32 %v11816_v52, 0.0  ;;  %v11817_v0 = vld [vmem:[#allocation17_spill] sm:$0xff]  ;;  %v11818_v56 = vld [vmem:[#allocation18_spill] sm:$0xff] }
 0x53f   :  { %5657 = vst [vmem:[#allocation8 + $0x100] sm:$0xff] %v5401_v15  ;;  %v5413_v51 = vmax.f32 %v11817_v0, 0.0  ;;  %5658 = vst [vmem:[#allocation8 + $0x108] sm:$0xff] %v5402_v54  ;;  %v5414_v57 = vmax.f32 %v11818_v56, 0.0  ;;  %v11819_v32 = vld [vmem:[#allocation19_spill] sm:$0xff]  ;;  %v11820_v59 = vld [vmem:[#allocation20_spill] sm:$0xff] }
 0x540   :  { %5659 = vst [vmem:[#allocation8 + $0x110] sm:$0xff] %v5403_v63  ;;  %5660 = vst [vmem:[#allocation8 + $0x118] sm:$0xff] %v5404_v60  ;;  %v5415_v55 = vmax.f32 %v11819_v32, 0.0  ;;  %v5416_v25 = vmax.f32 %v11820_v59, 0.0  ;;  %v11821_v3 = vld [vmem:[#allocation21_spill] sm:$0xff]  ;;  %v11822_v62 = vld [vmem:[#allocation22_spill] sm:$0xff] }
 0x541   :  { %5661 = vst [vmem:[#allocation8 + $0x120] sm:$0xff] %v5405_v47  ;;  %v5417_v15 = vmax.f32 %v11821_v3, 0.0  ;;  %5662 = vst [vmem:[#allocation8 + $0x128] sm:$0xff] %v5406_v49  ;;  %v5418_v22 = vmax.f32 %v11822_v62, 0.0  ;;  %v11823_v36 = vld [vmem:[#allocation23_spill] sm:$0xff]  ;;  %v11824_v54 = vld [vmem:[#allocation24_spill] sm:$0xff] }
 0x542   :  { %5663 = vst [vmem:[#allocation8 + $0x130] sm:$0xff] %v5407_v12  ;;  %5664 = vst [vmem:[#allocation8 + $0x138] sm:$0xff] %v5408_v46  ;;  %v5419_v52 = vmax.f32 %v11823_v36, 0.0  ;;  %v5420_v63 = vmax.f32 %v11824_v54, 0.0  ;;  %v11825_v60 = vld [vmem:[#allocation25_spill] sm:$0xff]  ;;  %v11826_v0 = vld [vmem:[#allocation26_spill] sm:$0xff] }
 0x543   :  { %5665 = vst [vmem:[#allocation8 + $0x140] sm:$0xff] %v5409_v19  ;;  %v5421_v47 = vmax.f32 %v11825_v60, 0.0  ;;  %5666 = vst [vmem:[#allocation8 + $0x148] sm:$0xff] %v5410_v31  ;;  %v5422_v56 = vmax.f32 %v11826_v0, 0.0  ;;  %v11827_v32 = vld [vmem:[#allocation27_spill] sm:$0xff]  ;;  %v11828_v49 = vld [vmem:[#allocation28_spill] sm:$0xff] }
 0x544   :  { %5667 = vst [vmem:[#allocation8 + $0x150] sm:$0xff] %v5411_v13  ;;  %5668 = vst [vmem:[#allocation8 + $0x158] sm:$0xff] %v5412_v17  ;;  %v5423_v59 = vmax.f32 %v11827_v32, 0.0  ;;  %v5424_v12 = vmax.f32 %v11828_v49, 0.0  ;;  %v11829_v46 = vld [vmem:[#allocation29_spill] sm:$0xff]  ;;  %v11830_v3 = vld [vmem:[#allocation30_spill] sm:$0xff] }
 0x545   :  { %5669 = vst [vmem:[#allocation8 + $0x160] sm:$0xff] %v5413_v51  ;;  %v5425_v19 = vmax.f32 %v11829_v46, 0.0  ;;  %5670 = vst [vmem:[#allocation8 + $0x168] sm:$0xff] %v5414_v57  ;;  %v5426_v62 = vmax.f32 %v11830_v3, 0.0  ;;  %v11831_v36 = vld [vmem:[#allocation31_spill] sm:$0xff]  ;;  %v11832_v31 = vld [vmem:[#allocation32_spill] sm:$0xff] }
 0x546   :  { %5671 = vst [vmem:[#allocation8 + $0x170] sm:$0xff] %v5415_v55  ;;  %5672 = vst [vmem:[#allocation8 + $0x178] sm:$0xff] %v5416_v25  ;;  %v5427_v54 = vmax.f32 %v11831_v36, 0.0  ;;  %v5428_v13 = vmax.f32 %v11832_v31, 0.0  ;;  %v11833_v17 = vld [vmem:[#allocation33_spill] sm:$0xff]  ;;  %v11834_v60 = vld [vmem:[#allocation34_spill] sm:$0xff] }
 0x547   :  { %5673 = vst [vmem:[#allocation8 + $0x180] sm:$0xff] %v5417_v15  ;;  %v5429_v51 = vmax.f32 %v11833_v17, 0.0  ;;  %5674 = vst [vmem:[#allocation8 + $0x188] sm:$0xff] %v5418_v22  ;;  %v5430_v0 = vmax.f32 %v11834_v60, 0.0  ;;  %v11835_v32 = vld [vmem:[#allocation35_spill] sm:$0xff]  ;;  %v11836_v57 = vld [vmem:[#allocation36_spill] sm:$0xff] }
 0x548   :  { %5675 = vst [vmem:[#allocation8 + $0x190] sm:$0xff] %v5419_v52  ;;  %5676 = vst [vmem:[#allocation8 + $0x198] sm:$0xff] %v5420_v63  ;;  %v5431_v49 = vmax.f32 %v11835_v32, 0.0  ;;  %v5432_v55 = vmax.f32 %v11836_v57, 0.0  ;;  %v11837_v25 = vld [vmem:[#allocation37_spill] sm:$0xff]  ;;  %v11838_v46 = vld [vmem:[#allocation38_spill] sm:$0xff] }
 0x549   :  { %5677 = vst [vmem:[#allocation8 + $0x1a0] sm:$0xff] %v5421_v47  ;;  %v5433_v15 = vmax.f32 %v11837_v25, 0.0  ;;  %5678 = vst [vmem:[#allocation8 + $0x1a8] sm:$0xff] %v5422_v56  ;;  %v5434_v3 = vmax.f32 %v11838_v46, 0.0  ;;  %v11839_v36 = vld [vmem:[#allocation39_spill] sm:$0xff]  ;;  %v11840_v22 = vld [vmem:[#allocation40_spill] sm:$0xff] }
 0x54a   :  { %5679 = vst [vmem:[#allocation8 + $0x1b0] sm:$0xff] %v5423_v59  ;;  %5680 = vst [vmem:[#allocation8 + $0x1b8] sm:$0xff] %v5424_v12  ;;  %v5435_v31 = vmax.f32 %v11839_v36, 0.0  ;;  %v5436_v52 = vmax.f32 %v11840_v22, 0.0  ;;  %v11841_v63 = vld [vmem:[#allocation41_spill] sm:$0xff]  ;;  %v11842_v17 = vld [vmem:[#allocation42_spill] sm:$0xff] }
 0x54b   :  { %5681 = vst [vmem:[#allocation8 + $0x1c0] sm:$0xff] %v5425_v19  ;;  %v5437_v47 = vmax.f32 %v11841_v63, 0.0  ;;  %5682 = vst [vmem:[#allocation8 + $0x1c8] sm:$0xff] %v5426_v62  ;;  %v5438_v60 = vmax.f32 %v11842_v17, 0.0  ;;  %v11843_v32 = vld [vmem:[#allocation44_spill] sm:$0xff]  ;;  %v11844_v56 = vld [vmem:[#allocation46_spill] sm:$0xff] }
 0x54c   :  { %5683 = vst [vmem:[#allocation8 + $0x1d0] sm:$0xff] %v5427_v54  ;;  %5684 = vst [vmem:[#allocation8 + $0x1d8] sm:$0xff] %v5428_v13  ;;  %v5439_v57 = vmax.f32 %v11843_v32, 0.0  ;;  %v5440_v59 = vmax.f32 %v11844_v56, 0.0  ;;  %v11845_v12 = vld [vmem:[#allocation48_spill] sm:$0xff]  ;;  %v11846_v25 = vld [vmem:[#allocation50_spill] sm:$0xff] }
 0x54d   :  { %5685 = vst [vmem:[#allocation8 + $0x1e0] sm:$0xff] %v5429_v51  ;;  %v5441_v19 = vmax.f32 %v11845_v12, 0.0  ;;  %5686 = vst [vmem:[#allocation8 + $0x1e8] sm:$0xff] %v5430_v0  ;;  %v5442_v46 = vmax.f32 %v11846_v25, 0.0  ;;  %v11847_v36 = vld [vmem:[#allocation52_spill] sm:$0xff]  ;;  %v11848_v62 = vld [vmem:[#allocation54_spill] sm:$0xff] }
 0x54e   :  { %5687 = vst [vmem:[#allocation8 + $0x1f0] sm:$0xff] %v5431_v49  ;;  %5688 = vst [vmem:[#allocation8 + $0x1f8] sm:$0xff] %v5432_v55  ;;  %v5443_v22 = vmax.f32 %v11847_v36, 0.0  ;;  %v5444_v54 = vmax.f32 %v11848_v62, 0.0  ;;  %v11849_v13 = vld [vmem:[#allocation56_spill] sm:$0xff]  ;;  %v11850_v63 = vld [vmem:[#allocation58_spill] sm:$0xff] }
 0x54f   :  { %5689 = vst [vmem:[#allocation8 + $0x200] sm:$0xff] %v5433_v15  ;;  %v5445_v51 = vmax.f32 %v11849_v13, 0.0  ;;  %5690 = vst [vmem:[#allocation8 + $0x208] sm:$0xff] %v5434_v3  ;;  %v5446_v17 = vmax.f32 %v11850_v63, 0.0  ;;  %v11851_v32 = vld [vmem:[#allocation60_spill] sm:$0xff]  ;;  %v11852_v0 = vld [vmem:[#allocation62_spill] sm:$0xff] }
 0x550   :  { %5691 = vst [vmem:[#allocation8 + $0x210] sm:$0xff] %v5435_v31  ;;  %5692 = vst [vmem:[#allocation8 + $0x218] sm:$0xff] %v5436_v52  ;;  %v5447_v56 = vmax.f32 %v11851_v32, 0.0  ;;  %v5448_v49 = vmax.f32 %v11852_v0, 0.0  ;;  %v11853_v55 = vld [vmem:[#allocation64_spill] sm:$0xff]  ;;  %v11854_v12 = vld [vmem:[#allocation66_spill] sm:$0xff] }
 0x551   :  { %5693 = vst [vmem:[#allocation8 + $0x220] sm:$0xff] %v5437_v47  ;;  %v5449_v15 = vmax.f32 %v11853_v55, 0.0  ;;  %5694 = vst [vmem:[#allocation8 + $0x228] sm:$0xff] %v5438_v60  ;;  %v5450_v25 = vmax.f32 %v11854_v12, 0.0  ;;  %v11855_v36 = vld [vmem:[#allocation68_spill] sm:$0xff]  ;;  %v11856_v3 = vld [vmem:[#allocation70_spill] sm:$0xff] }
 0x552   :  { %5695 = vst [vmem:[#allocation8 + $0x230] sm:$0xff] %v5439_v57  ;;  %5696 = vst [vmem:[#allocation8 + $0x238] sm:$0xff] %v5440_v59  ;;  %v5451_v62 = vmax.f32 %v11855_v36, 0.0  ;;  %v5452_v31 = vmax.f32 %v11856_v3, 0.0  ;;  %v11857_v52 = vld [vmem:[#allocation72_spill] sm:$0xff]  ;;  %v11858_v13 = vld [vmem:[#allocation74_spill] sm:$0xff] }
 0x553   :  { %5697 = vst [vmem:[#allocation8 + $0x240] sm:$0xff] %v5441_v19  ;;  %v5453_v47 = vmax.f32 %v11857_v52, 0.0  ;;  %5698 = vst [vmem:[#allocation8 + $0x248] sm:$0xff] %v5442_v46  ;;  %v5454_v63 = vmax.f32 %v11858_v13, 0.0  ;;  %v11859_v32 = vld [vmem:[#allocation76_spill] sm:$0xff]  ;;  %v11860_v60 = vld [vmem:[#allocation78_spill] sm:$0xff] }
 0x554   :  { %5699 = vst [vmem:[#allocation8 + $0x250] sm:$0xff] %v5443_v22  ;;  %5700 = vst [vmem:[#allocation8 + $0x258] sm:$0xff] %v5444_v54  ;;  %v5455_v0 = vmax.f32 %v11859_v32, 0.0  ;;  %v5456_v57 = vmax.f32 %v11860_v60, 0.0  ;;  %v11861_v59 = vld [vmem:[#allocation80_spill] sm:$0xff]  ;;  %v11862_v55 = vld [vmem:[#allocation82_spill] sm:$0xff] }
 0x555   :  { %5701 = vst [vmem:[#allocation8 + $0x260] sm:$0xff] %v5445_v51  ;;  %v5457_v19 = vmax.f32 %v11861_v59, 0.0  ;;  %5702 = vst [vmem:[#allocation8 + $0x268] sm:$0xff] %v5446_v17  ;;  %v5458_v12 = vmax.f32 %v11862_v55, 0.0  ;;  %v11863_v36 = vld [vmem:[#allocation84_spill] sm:$0xff]  ;;  %v11864_v46 = vld [vmem:[#allocation86_spill] sm:$0xff] }
 0x556   :  { %5703 = vst [vmem:[#allocation8 + $0x270] sm:$0xff] %v5447_v56  ;;  %5704 = vst [vmem:[#allocation8 + $0x278] sm:$0xff] %v5448_v49  ;;  %v5459_v3 = vmax.f32 %v11863_v36, 0.0  ;;  %v5460_v22 = vmax.f32 %v11864_v46, 0.0  ;;  %v11865_v54 = vld [vmem:[#allocation88_spill] sm:$0xff]  ;;  %v11866_v52 = vld [vmem:[#allocation90_spill] sm:$0xff] }
 0x557   :  { %5705 = vst [vmem:[#allocation8 + $0x280] sm:$0xff] %v5449_v15  ;;  %v5461_v51 = vmax.f32 %v11865_v54, 0.0  ;;  %5706 = vst [vmem:[#allocation8 + $0x288] sm:$0xff] %v5450_v25  ;;  %v5462_v13 = vmax.f32 %v11866_v52, 0.0  ;;  %v11867_v32 = vld [vmem:[#allocation92_spill] sm:$0xff]  ;;  %v11868_v17 = vld [vmem:[#allocation94_spill] sm:$0xff] }
 0x558   :  { %5707 = vst [vmem:[#allocation8 + $0x290] sm:$0xff] %v5451_v62  ;;  %5708 = vst [vmem:[#allocation8 + $0x298] sm:$0xff] %v5452_v31  ;;  %v5463_v60 = vmax.f32 %v11867_v32, 0.0  ;;  %v5464_v56 = vmax.f32 %v11868_v17, 0.0  ;;  %v11869_v49 = vld [vmem:[#allocation96_spill] sm:$0xff]  ;;  %v11870_v59 = vld [vmem:[#allocation98_spill] sm:$0xff] }
 0x559   :  { %5709 = vst [vmem:[#allocation8 + $0x2a0] sm:$0xff] %v5453_v47  ;;  %v5465_v15 = vmax.f32 %v11869_v49, 0.0  ;;  %5710 = vst [vmem:[#allocation8 + $0x2a8] sm:$0xff] %v5454_v63  ;;  %v5466_v55 = vmax.f32 %v11870_v59, 0.0  ;;  %v11871_v36 = vld [vmem:[#allocation100_spill] sm:$0xff]  ;;  %v11872_v25 = vld [vmem:[#allocation102_spill] sm:$0xff] }
 0x55a   :  { %5711 = vst [vmem:[#allocation8 + $0x2b0] sm:$0xff] %v5455_v0  ;;  %5712 = vst [vmem:[#allocation8 + $0x2b8] sm:$0xff] %v5456_v57  ;;  %v5467_v46 = vmax.f32 %v11871_v36, 0.0  ;;  %v5468_v62 = vmax.f32 %v11872_v25, 0.0  ;;  %v11873_v31 = vld [vmem:[#allocation104_spill] sm:$0xff]  ;;  %v11874_v54 = vld [vmem:[#allocation106_spill] sm:$0xff] }
 0x55b   :  { %5713 = vst [vmem:[#allocation8 + $0x2c0] sm:$0xff] %v5457_v19  ;;  %v5469_v47 = vmax.f32 %v11873_v31, 0.0  ;;  %5714 = vst [vmem:[#allocation8 + $0x2c8] sm:$0xff] %v5458_v12  ;;  %v5470_v52 = vmax.f32 %v11874_v54, 0.0  ;;  %v11875_v32 = vld [vmem:[#allocation108_spill] sm:$0xff]  ;;  %v11876_v63 = vld [vmem:[#allocation110_spill] sm:$0xff] }
 0x55c   :  { %5715 = vst [vmem:[#allocation8 + $0x2d0] sm:$0xff] %v5459_v3  ;;  %5716 = vst [vmem:[#allocation8 + $0x2d8] sm:$0xff] %v5460_v22  ;;  %v5471_v17 = vmax.f32 %v11875_v32, 0.0  ;;  %v5472_v0 = vmax.f32 %v11876_v63, 0.0  ;;  %v11877_v57 = vld [vmem:[#allocation112_spill] sm:$0xff]  ;;  %v11878_v49 = vld [vmem:[#allocation114_spill] sm:$0xff] }
 0x55d   :  { %5717 = vst [vmem:[#allocation8 + $0x2e0] sm:$0xff] %v5461_v51  ;;  %v5473_v19 = vmax.f32 %v11877_v57, 0.0  ;;  %5718 = vst [vmem:[#allocation8 + $0x2e8] sm:$0xff] %v5462_v13  ;;  %v5474_v59 = vmax.f32 %v11878_v49, 0.0  ;;  %v11879_v36 = vld [vmem:[#allocation116_spill] sm:$0xff]  ;;  %v11880_v12 = vld [vmem:[#allocation118_spill] sm:$0xff] }
 0x55e   :  { %5719 = vst [vmem:[#allocation8 + $0x2f0] sm:$0xff] %v5463_v60  ;;  %5720 = vst [vmem:[#allocation8 + $0x2f8] sm:$0xff] %v5464_v56  ;;  %v5475_v25 = vmax.f32 %v11879_v36, 0.0  ;;  %v5476_v3 = vmax.f32 %v11880_v12, 0.0  ;;  %v11881_v22 = vld [vmem:[#allocation120_spill] sm:$0xff]  ;;  %v11882_v31 = vld [vmem:[#allocation122_spill] sm:$0xff] }
 0x55f   :  { %5721 = vst [vmem:[#allocation8 + $0x300] sm:$0xff] %v5465_v15  ;;  %v5477_v51 = vmax.f32 %v11881_v22, 0.0  ;;  %5722 = vst [vmem:[#allocation8 + $0x308] sm:$0xff] %v5466_v55  ;;  %v5478_v54 = vmax.f32 %v11882_v31, 0.0  ;;  %v11883_v32 = vld [vmem:[#allocation124_spill] sm:$0xff]  ;;  %v11884_v13 = vld [vmem:[#allocation126_spill] sm:$0xff] }
 0x560   :  { %5723 = vst [vmem:[#allocation8 + $0x310] sm:$0xff] %v5467_v46  ;;  %5724 = vst [vmem:[#allocation8 + $0x318] sm:$0xff] %v5468_v62  ;;  %v5479_v63 = vmax.f32 %v11883_v32, 0.0  ;;  %v5480_v60 = vmax.f32 %v11884_v13, 0.0  ;;  %v11885_v56 = vld [vmem:[#allocation128_spill] sm:$0xff]  ;;  %v11886_v57 = vld [vmem:[#allocation130_spill] sm:$0xff] }
 0x561   :  { %5725 = vst [vmem:[#allocation8 + $0x320] sm:$0xff] %v5469_v47  ;;  %v5481_v15 = vmax.f32 %v11885_v56, 0.0  ;;  %5726 = vst [vmem:[#allocation8 + $0x328] sm:$0xff] %v5470_v52  ;;  %v5482_v49 = vmax.f32 %v11886_v57, 0.0  ;;  %v11887_v36 = vld [vmem:[#allocation132_spill] sm:$0xff]  ;;  %v11888_v55 = vld [vmem:[#allocation134_spill] sm:$0xff] }
 0x562   :  { %5727 = vst [vmem:[#allocation8 + $0x330] sm:$0xff] %v5471_v17  ;;  %5728 = vst [vmem:[#allocation8 + $0x338] sm:$0xff] %v5472_v0  ;;  %v5483_v12 = vmax.f32 %v11887_v36, 0.0  ;;  %v5484_v46 = vmax.f32 %v11888_v55, 0.0  ;;  %v11889_v62 = vld [vmem:[#allocation136_spill] sm:$0xff]  ;;  %v11890_v22 = vld [vmem:[#allocation138_spill] sm:$0xff] }
 0x563   :  { %5729 = vst [vmem:[#allocation8 + $0x340] sm:$0xff] %v5473_v19  ;;  %v5485_v47 = vmax.f32 %v11889_v62, 0.0  ;;  %5730 = vst [vmem:[#allocation8 + $0x348] sm:$0xff] %v5474_v59  ;;  %v5486_v31 = vmax.f32 %v11890_v22, 0.0  ;;  %v11891_v32 = vld [vmem:[#allocation140_spill] sm:$0xff]  ;;  %v11892_v52 = vld [vmem:[#allocation142_spill] sm:$0xff] }
 0x564   :  { %5731 = vst [vmem:[#allocation8 + $0x350] sm:$0xff] %v5475_v25  ;;  %5732 = vst [vmem:[#allocation8 + $0x358] sm:$0xff] %v5476_v3  ;;  %v5487_v13 = vmax.f32 %v11891_v32, 0.0  ;;  %v5488_v17 = vmax.f32 %v11892_v52, 0.0  ;;  %v11893_v0 = vld [vmem:[#allocation144_spill] sm:$0xff]  ;;  %v11894_v56 = vld [vmem:[#allocation146_spill] sm:$0xff] }
 0x565   :  { %5733 = vst [vmem:[#allocation8 + $0x360] sm:$0xff] %v5477_v51  ;;  %v5489_v19 = vmax.f32 %v11893_v0, 0.0  ;;  %5734 = vst [vmem:[#allocation8 + $0x368] sm:$0xff] %v5478_v54  ;;  %v5490_v57 = vmax.f32 %v11894_v56, 0.0  ;;  %v11895_v36 = vld [vmem:[#allocation148_spill] sm:$0xff]  ;;  %v11896_v59 = vld [vmem:[#allocation150_spill] sm:$0xff] }
 0x566   :  { %5735 = vst [vmem:[#allocation8 + $0x370] sm:$0xff] %v5479_v63  ;;  %5736 = vst [vmem:[#allocation8 + $0x378] sm:$0xff] %v5480_v60  ;;  %v5491_v55 = vmax.f32 %v11895_v36, 0.0  ;;  %v5492_v25 = vmax.f32 %v11896_v59, 0.0  ;;  %v11897_v3 = vld [vmem:[#allocation152_spill] sm:$0xff]  ;;  %v11898_v62 = vld [vmem:[#allocation154_spill] sm:$0xff] }
 0x567   :  { %5737 = vst [vmem:[#allocation8 + $0x380] sm:$0xff] %v5481_v15  ;;  %v5493_v51 = vmax.f32 %v11897_v3, 0.0  ;;  %5738 = vst [vmem:[#allocation8 + $0x388] sm:$0xff] %v5482_v49  ;;  %v5494_v22 = vmax.f32 %v11898_v62, 0.0  ;;  %v11899_v32 = vld [vmem:[#allocation156_spill] sm:$0xff]  ;;  %v11900_v54 = vld [vmem:[#allocation158_spill] sm:$0xff] }
 0x568   :  { %5739 = vst [vmem:[#allocation8 + $0x390] sm:$0xff] %v5483_v12  ;;  %5740 = vst [vmem:[#allocation8 + $0x398] sm:$0xff] %v5484_v46  ;;  %v5495_v52 = vmax.f32 %v11899_v32, 0.0  ;;  %v5496_v63 = vmax.f32 %v11900_v54, 0.0  ;;  %v11901_v60 = vld [vmem:[#allocation160_spill] sm:$0xff]  ;;  %v11902_v0 = vld [vmem:[#allocation162_spill] sm:$0xff] }
 0x569   :  { %5741 = vst [vmem:[#allocation8 + $0x3a0] sm:$0xff] %v5485_v47  ;;  %v5497_v15 = vmax.f32 %v11901_v60, 0.0  ;;  %5742 = vst [vmem:[#allocation8 + $0x3a8] sm:$0xff] %v5486_v31  ;;  %v5498_v56 = vmax.f32 %v11902_v0, 0.0  ;;  %v11903_v36 = vld [vmem:[#allocation164_spill] sm:$0xff]  ;;  %v11904_v49 = vld [vmem:[#allocation166_spill] sm:$0xff] }
 0x56a   :  { %5743 = vst [vmem:[#allocation8 + $0x3b0] sm:$0xff] %v5487_v13  ;;  %5744 = vst [vmem:[#allocation8 + $0x3b8] sm:$0xff] %v5488_v17  ;;  %v5499_v59 = vmax.f32 %v11903_v36, 0.0  ;;  %v5500_v12 = vmax.f32 %v11904_v49, 0.0  ;;  %v11905_v46 = vld [vmem:[#allocation168_spill] sm:$0xff]  ;;  %v11906_v3 = vld [vmem:[#allocation170_spill] sm:$0xff] }
 0x56b   :  { %5745 = vst [vmem:[#allocation8 + $0x3c0] sm:$0xff] %v5489_v19  ;;  %v5501_v47 = vmax.f32 %v11905_v46, 0.0  ;;  %5746 = vst [vmem:[#allocation8 + $0x3c8] sm:$0xff] %v5490_v57  ;;  %v5502_v62 = vmax.f32 %v11906_v3, 0.0  ;;  %v11907_v32 = vld [vmem:[#allocation172_spill] sm:$0xff]  ;;  %v11908_v31 = vld [vmem:[#allocation173_spill] sm:$0xff] }
 0x56c   :  { %5747 = vst [vmem:[#allocation8 + $0x3d0] sm:$0xff] %v5491_v55  ;;  %5748 = vst [vmem:[#allocation8 + $0x3d8] sm:$0xff] %v5492_v25  ;;  %v5503_v54 = vmax.f32 %v11907_v32, 0.0  ;;  %v5504_v13 = vmax.f32 %v11908_v31, 0.0  ;;  %v11909_v17 = vld [vmem:[#allocation174_spill] sm:$0xff]  ;;  %v11910_v60 = vld [vmem:[#allocation175_spill] sm:$0xff] }
 0x56d   :  { %5749 = vst [vmem:[#allocation8 + $0x3e0] sm:$0xff] %v5493_v51  ;;  %v5505_v19 = vmax.f32 %v11909_v17, 0.0  ;;  %5750 = vst [vmem:[#allocation8 + $0x3e8] sm:$0xff] %v5494_v22  ;;  %v5506_v0 = vmax.f32 %v11910_v60, 0.0  ;;  %v11911_v36 = vld [vmem:[#allocation176_spill] sm:$0xff]  ;;  %v11912_v57 = vld [vmem:[#allocation177_spill] sm:$0xff] }
 0x56e   :  { %5751 = vst [vmem:[#allocation8 + $0x3f0] sm:$0xff] %v5495_v52  ;;  %5752 = vst [vmem:[#allocation8 + $0x3f8] sm:$0xff] %v5496_v63  ;;  %v5507_v49 = vmax.f32 %v11911_v36, 0.0  ;;  %v5508_v55 = vmax.f32 %v11912_v57, 0.0  ;;  %v11913_v25 = vld [vmem:[#allocation178_spill] sm:$0xff]  ;;  %v11914_v46 = vld [vmem:[#allocation179_spill] sm:$0xff] }
 0x56f   :  { %5753 = vst [vmem:[#allocation8 + $0x400] sm:$0xff] %v5497_v15  ;;  %v5509_v51 = vmax.f32 %v11913_v25, 0.0  ;;  %5754 = vst [vmem:[#allocation8 + $0x408] sm:$0xff] %v5498_v56  ;;  %v5510_v3 = vmax.f32 %v11914_v46, 0.0  ;;  %v11915_v32 = vld [vmem:[#allocation180_spill] sm:$0xff]  ;;  %v11916_v22 = vld [vmem:[#allocation181_spill] sm:$0xff] }
 0x570   :  { %5755 = vst [vmem:[#allocation8 + $0x410] sm:$0xff] %v5499_v59  ;;  %5756 = vst [vmem:[#allocation8 + $0x418] sm:$0xff] %v5500_v12  ;;  %v5511_v31 = vmax.f32 %v11915_v32, 0.0  ;;  %v5512_v52 = vmax.f32 %v11916_v22, 0.0  ;;  %v11917_v63 = vld [vmem:[#allocation182_spill] sm:$0xff]  ;;  %v11918_v17 = vld [vmem:[#allocation183_spill] sm:$0xff] }
 0x571   :  { %5757 = vst [vmem:[#allocation8 + $0x420] sm:$0xff] %v5501_v47  ;;  %v5513_v15 = vmax.f32 %v11917_v63, 0.0  ;;  %5758 = vst [vmem:[#allocation8 + $0x428] sm:$0xff] %v5502_v62  ;;  %v5514_v60 = vmax.f32 %v11918_v17, 0.0  ;;  %v11919_v36 = vld [vmem:[#allocation184_spill] sm:$0xff]  ;;  %v11920_v56 = vld [vmem:[#allocation185_spill] sm:$0xff] }
 0x572   :  { %5759 = vst [vmem:[#allocation8 + $0x430] sm:$0xff] %v5503_v54  ;;  %5760 = vst [vmem:[#allocation8 + $0x438] sm:$0xff] %v5504_v13  ;;  %v5515_v57 = vmax.f32 %v11919_v36, 0.0  ;;  %v5516_v59 = vmax.f32 %v11920_v56, 0.0  ;;  %v11921_v12 = vld [vmem:[#allocation186_spill] sm:$0xff]  ;;  %v11922_v25 = vld [vmem:[#allocation187_spill] sm:$0xff] }
 0x573   :  { %5761 = vst [vmem:[#allocation8 + $0x440] sm:$0xff] %v5505_v19  ;;  %v5517_v47 = vmax.f32 %v11921_v12, 0.0  ;;  %5762 = vst [vmem:[#allocation8 + $0x448] sm:$0xff] %v5506_v0  ;;  %v5518_v46 = vmax.f32 %v11922_v25, 0.0  ;;  %v11923_v32 = vld [vmem:[#allocation188_spill] sm:$0xff]  ;;  %v11924_v62 = vld [vmem:[#allocation189_spill] sm:$0xff] }
 0x574   :  { %5763 = vst [vmem:[#allocation8 + $0x450] sm:$0xff] %v5507_v49  ;;  %5764 = vst [vmem:[#allocation8 + $0x458] sm:$0xff] %v5508_v55  ;;  %v5519_v22 = vmax.f32 %v11923_v32, 0.0  ;;  %v5520_v54 = vmax.f32 %v11924_v62, 0.0  ;;  %v11925_v13 = vld [vmem:[#allocation190_spill] sm:$0xff]  ;;  %v11926_v63 = vld [vmem:[#allocation191_spill] sm:$0xff] }
 0x575   :  { %5765 = vst [vmem:[#allocation8 + $0x460] sm:$0xff] %v5509_v51  ;;  %v5521_v19 = vmax.f32 %v11925_v13, 0.0  ;;  %5766 = vst [vmem:[#allocation8 + $0x468] sm:$0xff] %v5510_v3  ;;  %v5522_v17 = vmax.f32 %v11926_v63, 0.0  ;;  %v11927_v36 = vld [vmem:[#allocation192_spill] sm:$0xff]  ;;  %v11928_v0 = vld [vmem:[#allocation193_spill] sm:$0xff] }
 0x576   :  { %5767 = vst [vmem:[#allocation8 + $0x470] sm:$0xff] %v5511_v31  ;;  %5768 = vst [vmem:[#allocation8 + $0x478] sm:$0xff] %v5512_v52  ;;  %v5523_v56 = vmax.f32 %v11927_v36, 0.0  ;;  %v5524_v49 = vmax.f32 %v11928_v0, 0.0  ;;  %v11929_v55 = vld [vmem:[#allocation194_spill] sm:$0xff]  ;;  %v11930_v12 = vld [vmem:[#allocation195_spill] sm:$0xff] }
 0x577   :  { %5769 = vst [vmem:[#allocation8 + $0x480] sm:$0xff] %v5513_v15  ;;  %v5525_v51 = vmax.f32 %v11929_v55, 0.0  ;;  %5770 = vst [vmem:[#allocation8 + $0x488] sm:$0xff] %v5514_v60  ;;  %v5526_v25 = vmax.f32 %v11930_v12, 0.0  ;;  %v11931_v32 = vld [vmem:[#allocation196_spill] sm:$0xff]  ;;  %v11932_v3 = vld [vmem:[#allocation197_spill] sm:$0xff] }
 0x578   :  { %5771 = vst [vmem:[#allocation8 + $0x490] sm:$0xff] %v5515_v57  ;;  %5772 = vst [vmem:[#allocation8 + $0x498] sm:$0xff] %v5516_v59  ;;  %v5527_v62 = vmax.f32 %v11931_v32, 0.0  ;;  %v5528_v31 = vmax.f32 %v11932_v3, 0.0  ;;  %v11933_v52 = vld [vmem:[#allocation198_spill] sm:$0xff]  ;;  %v11934_v13 = vld [vmem:[#allocation199_spill] sm:$0xff] }
 0x579   :  { %5773 = vst [vmem:[#allocation8 + $0x4a0] sm:$0xff] %v5517_v47  ;;  %v5529_v15 = vmax.f32 %v11933_v52, 0.0  ;;  %5774 = vst [vmem:[#allocation8 + $0x4a8] sm:$0xff] %v5518_v46  ;;  %v5530_v63 = vmax.f32 %v11934_v13, 0.0  ;;  %v11935_v36 = vld [vmem:[#allocation200_spill] sm:$0xff]  ;;  %v11936_v60 = vld [vmem:[#allocation202_spill] sm:$0xff] }
 0x57a   :  { %5775 = vst [vmem:[#allocation8 + $0x4b0] sm:$0xff] %v5519_v22  ;;  %5776 = vst [vmem:[#allocation8 + $0x4b8] sm:$0xff] %v5520_v54  ;;  %v5531_v0 = vmax.f32 %v11935_v36, 0.0  ;;  %v5532_v57 = vmax.f32 %v11936_v60, 0.0  ;;  %v11937_v59 = vld [vmem:[#allocation204_spill] sm:$0xff]  ;;  %v11938_v55 = vld [vmem:[#allocation206_spill] sm:$0xff] }
 0x57b   :  { %5777 = vst [vmem:[#allocation8 + $0x4c0] sm:$0xff] %v5521_v19  ;;  %v5533_v47 = vmax.f32 %v11937_v59, 0.0  ;;  %5778 = vst [vmem:[#allocation8 + $0x4c8] sm:$0xff] %v5522_v17  ;;  %v5534_v12 = vmax.f32 %v11938_v55, 0.0  ;;  %v11939_v32 = vld [vmem:[#allocation208_spill] sm:$0xff]  ;;  %v11940_v46 = vld [vmem:[#allocation43_spill] sm:$0xff] }
 0x57c   :  { %5779 = vst [vmem:[#allocation8 + $0x4d0] sm:$0xff] %v5523_v56  ;;  %5780 = vst [vmem:[#allocation8 + $0x4d8] sm:$0xff] %v5524_v49  ;;  %v5535_v3 = vmax.f32 %v11939_v32, 0.0  ;;  %v5536_v22 = vmax.f32 %v11940_v46, 0.0  ;;  %v11941_v54 = vld [vmem:[#allocation45_spill] sm:$0xff]  ;;  %v11942_v52 = vld [vmem:[#allocation47_spill] sm:$0xff] }
 0x57d   :  { %5781 = vst [vmem:[#allocation8 + $0x4e0] sm:$0xff] %v5525_v51  ;;  %v5537_v19 = vmax.f32 %v11941_v54, 0.0  ;;  %5782 = vst [vmem:[#allocation8 + $0x4e8] sm:$0xff] %v5526_v25  ;;  %v5538_v13 = vmax.f32 %v11942_v52, 0.0  ;;  %v11943_v36 = vld [vmem:[#allocation49_spill] sm:$0xff]  ;;  %v11944_v17 = vld [vmem:[#allocation51_spill] sm:$0xff] }
 0x57e   :  { %5783 = vst [vmem:[#allocation8 + $0x4f0] sm:$0xff] %v5527_v62  ;;  %5784 = vst [vmem:[#allocation8 + $0x4f8] sm:$0xff] %v5528_v31  ;;  %v5539_v60 = vmax.f32 %v11943_v36, 0.0  ;;  %v5540_v56 = vmax.f32 %v11944_v17, 0.0  ;;  %v11945_v49 = vld [vmem:[#allocation53_spill] sm:$0xff]  ;;  %v11946_v59 = vld [vmem:[#allocation55_spill] sm:$0xff] }
 0x57f   :  { %5785 = vst [vmem:[#allocation8 + $0x500] sm:$0xff] %v5529_v15  ;;  %v5541_v51 = vmax.f32 %v11945_v49, 0.0  ;;  %5786 = vst [vmem:[#allocation8 + $0x508] sm:$0xff] %v5530_v63  ;;  %v5542_v55 = vmax.f32 %v11946_v59, 0.0  ;;  %v11947_v32 = vld [vmem:[#allocation57_spill] sm:$0xff]  ;;  %v11948_v25 = vld [vmem:[#allocation59_spill] sm:$0xff] }
 0x580   :  { %5787 = vst [vmem:[#allocation8 + $0x510] sm:$0xff] %v5531_v0  ;;  %5788 = vst [vmem:[#allocation8 + $0x518] sm:$0xff] %v5532_v57  ;;  %v5543_v46 = vmax.f32 %v11947_v32, 0.0  ;;  %v5544_v62 = vmax.f32 %v11948_v25, 0.0  ;;  %v11949_v31 = vld [vmem:[#allocation61_spill] sm:$0xff]  ;;  %v5546_v54 = vmax.f32 %v9776_v30, 0.0 }
 0x581   :  { %5789 = vst [vmem:[#allocation8 + $0x520] sm:$0xff] %v5533_v47  ;;  %v5545_v15 = vmax.f32 %v11949_v31, 0.0  ;;  %5790 = vst [vmem:[#allocation8 + $0x528] sm:$0xff] %v5534_v12  ;;  %v5547_v52 = vmax.f32 %v9780_v5, 0.0  ;;  %v5548_v63 = vmax.f32 %v9784_v10, 0.0  ;;  %v5549_v0 = vmax.f32 %v9788_v27, 0.0 }
 0x582   :  { %5791 = vst [vmem:[#allocation8 + $0x530] sm:$0xff] %v5535_v3  ;;  %5792 = vst [vmem:[#allocation8 + $0x538] sm:$0xff] %v5536_v22  ;;  %v5550_v57 = vmax.f32 %v9792_v16, 0.0  ;;  %v5551_v47 = vmax.f32 %v9796_v23, 0.0  ;;  %v5552_v12 = vmax.f32 %v9800_v38, 0.0  ;;  %v5553_v3 = vmax.f32 %v9804_v4, 0.0 }
 0x583   :  { %5793 = vst [vmem:[#allocation8 + $0x540] sm:$0xff] %v5537_v19  ;;  %5794 = vst [vmem:[#allocation8 + $0x548] sm:$0xff] %v5538_v13  ;;  %v5554_v30 = vmax.f32 %v9808_v33, 0.0  ;;  %v5555_v5 = vmax.f32 %v9812_v20, 0.0  ;;  %v5556_v10 = vmax.f32 %v9816_v58, 0.0  ;;  %v5557_v27 = vmax.f32 %v9820_v42, 0.0 }
 0x584   :  { %5795 = vst [vmem:[#allocation8 + $0x550] sm:$0xff] %v5539_v60  ;;  %5796 = vst [vmem:[#allocation8 + $0x558] sm:$0xff] %v5540_v56  ;;  %v5558_v16 = vmax.f32 %v9824_v2, 0.0  ;;  %v5559_v23 = vmax.f32 %v9828_v50, 0.0  ;;  %v5560_v38 = vmax.f32 %v9832_v34, 0.0  ;;  %v5561_v4 = vmax.f32 %v9836_v41, 0.0 }
 0x585   :  { %5797 = vst [vmem:[#allocation8 + $0x560] sm:$0xff] %v5541_v51  ;;  %5798 = vst [vmem:[#allocation8 + $0x568] sm:$0xff] %v5542_v55  ;;  %v5562_v33 = vmax.f32 %v9840_v29, 0.0  ;;  %v5563_v20 = vmax.f32 %v9844_v37, 0.0  ;;  %v5564_v58 = vmax.f32 %v9848_v39, 0.0  ;;  %v5565_v42 = vmax.f32 %v9852_v6, 0.0 }
 0x586   :  { %5799 = vst [vmem:[#allocation8 + $0x570] sm:$0xff] %v5543_v46  ;;  %5800 = vst [vmem:[#allocation8 + $0x578] sm:$0xff] %v5544_v62  ;;  %v5566_v2 = vmax.f32 %v9856_v9, 0.0  ;;  %v5567_v50 = vmax.f32 %v9860_v7, 0.0  ;;  %v5568_v34 = vmax.f32 %v9864_v1, 0.0  ;;  %v5569_v41 = vmax.f32 %v9868_v18, 0.0 }
 0x587   :  { %5801 = vst [vmem:[#allocation8 + $0x580] sm:$0xff] %v5545_v15  ;;  %5802 = vst [vmem:[#allocation8 + $0x588] sm:$0xff] %v5546_v54  ;;  %v5570_v29 = vmax.f32 %v9872_v35, 0.0  ;;  %v5571_v37 = vmax.f32 %v9876_v8, 0.0  ;;  %v5572_v39 = vmax.f32 %v9880_v48, 0.0  ;;  %v5573_v6 = vmax.f32 %v9884_v21, 0.0 }
 0x588   :  { %5803 = vst [vmem:[#allocation8 + $0x590] sm:$0xff] %v5547_v52  ;;  %5804 = vst [vmem:[#allocation8 + $0x598] sm:$0xff] %v5548_v63  ;;  %v5574_v9 = vmax.f32 %v9888_v40, 0.0  ;;  %v5575_v7 = vmax.f32 %v9892_v44, 0.0  ;;  %v5576_v1 = vmax.f32 %v9896_v61, 0.0  ;;  %v5577_v18 = vmax.f32 %v9900_v26, 0.0 }
 0x589   :  { %5805 = vst [vmem:[#allocation8 + $0x5a0] sm:$0xff] %v5549_v0  ;;  %5806 = vst [vmem:[#allocation8 + $0x5a8] sm:$0xff] %v5550_v57  ;;  %v11950_v35 = vld [vmem:[#allocation63_spill] sm:$0xff]  ;;  %v11951_v48 = vld [vmem:[#allocation65_spill] sm:$0xff] }
 0x58a   :  { %5807 = vst [vmem:[#allocation8 + $0x5b0] sm:$0xff] %v5551_v47  ;;  %5808 = vst [vmem:[#allocation8 + $0x5b8] sm:$0xff] %v5552_v12  ;;  %v5578_v8 = vmax.f32 %v11950_v35, 0.0  ;;  %v5579_v21 = vmax.f32 %v11951_v48, 0.0  ;;  %v11952_v22 = vld [vmem:[#allocation67_spill] sm:$0xff]  ;;  %v11953_v13 = vld [vmem:[#allocation69_spill] sm:$0xff] }
 0x58b   :  { %5809 = vst [vmem:[#allocation8 + $0x5c0] sm:$0xff] %v5553_v3  ;;  %5810 = vst [vmem:[#allocation8 + $0x5c8] sm:$0xff] %v5554_v30  ;;  %v5580_v19 = vmax.f32 %v11952_v22, 0.0  ;;  %v5581_v36 = vmax.f32 %v11953_v13, 0.0  ;;  %v11954_v40 = vld [vmem:[#allocation71_spill] sm:$0xff]  ;;  %v11955_v61 = vld [vmem:[#allocation73_spill] sm:$0xff] }
 0x58c   :  { %5811 = vst [vmem:[#allocation8 + $0x5d0] sm:$0xff] %v5555_v5  ;;  %5812 = vst [vmem:[#allocation8 + $0x5d8] sm:$0xff] %v5556_v10  ;;  %v5582_v44 = vmax.f32 %v11954_v40, 0.0  ;;  %v5583_v26 = vmax.f32 %v11955_v61, 0.0  ;;  %v11956_v60 = vld [vmem:[#allocation75_spill] sm:$0xff]  ;;  %v11957_v56 = vld [vmem:[#allocation77_spill] sm:$0xff] }
 0x58d   :  { %5813 = vst [vmem:[#allocation8 + $0x5e0] sm:$0xff] %v5557_v27  ;;  %5814 = vst [vmem:[#allocation8 + $0x5e8] sm:$0xff] %v5558_v16  ;;  %v5584_v17 = vmax.f32 %v11956_v60, 0.0  ;;  %v5585_v49 = vmax.f32 %v11957_v56, 0.0  ;;  %v11958_v51 = vld [vmem:[#allocation79_spill] sm:$0xff]  ;;  %v11959_v55 = vld [vmem:[#allocation81_spill] sm:$0xff] }
 0x58e   :  { %5815 = vst [vmem:[#allocation8 + $0x5f0] sm:$0xff] %v5559_v23  ;;  %5816 = vst [vmem:[#allocation8 + $0x5f8] sm:$0xff] %v5560_v38  ;;  %v5586_v59 = vmax.f32 %v11958_v51, 0.0  ;;  %v5587_v32 = vmax.f32 %v11959_v55, 0.0  ;;  %v11960_v46 = vld [vmem:[#allocation83_spill] sm:$0xff]  ;;  %v11961_v62 = vld [vmem:[#allocation85_spill] sm:$0xff] }
 0x58f   :  { %5817 = vst [vmem:[#allocation8 + $0x600] sm:$0xff] %v5561_v4  ;;  %5818 = vst [vmem:[#allocation8 + $0x608] sm:$0xff] %v5562_v33  ;;  %v5588_v25 = vmax.f32 %v11960_v46, 0.0  ;;  %v5589_v31 = vmax.f32 %v11961_v62, 0.0  ;;  %v11962_v15 = vld [vmem:[#allocation87_spill] sm:$0xff]  ;;  %v11963_v52 = vld [vmem:[#allocation89_spill] sm:$0xff] }
 0x590   :  { %5819 = vst [vmem:[#allocation8 + $0x610] sm:$0xff] %v5563_v20  ;;  %5820 = vst [vmem:[#allocation8 + $0x618] sm:$0xff] %v5564_v58  ;;  %v5590_v54 = vmax.f32 %v11962_v15, 0.0  ;;  %v5591_v63 = vmax.f32 %v11963_v52, 0.0  ;;  %v11964_v0 = vld [vmem:[#allocation91_spill] sm:$0xff]  ;;  %v11965_v47 = vld [vmem:[#allocation93_spill] sm:$0xff] }
 0x591   :  { %5821 = vst [vmem:[#allocation8 + $0x620] sm:$0xff] %v5565_v42  ;;  %5822 = vst [vmem:[#allocation8 + $0x628] sm:$0xff] %v5566_v2  ;;  %v5592_v57 = vmax.f32 %v11964_v0, 0.0  ;;  %v5593_v12 = vmax.f32 %v11965_v47, 0.0  ;;  %v5594_v3 = vmax.f32 %v9968_v43, 0.0  ;;  %v5595_v30 = vmax.f32 %v9972_v45, 0.0 }
 0x592   :  { %5823 = vst [vmem:[#allocation8 + $0x630] sm:$0xff] %v5567_v50  ;;  %5824 = vst [vmem:[#allocation8 + $0x638] sm:$0xff] %v5568_v34  ;;  %v5596_v5 = vmax.f32 %v9976_v53, 0.0  ;;  %v5597_v10 = vmax.f32 %v9980_v14, 0.0  ;;  %v5598_v27 = vmax.f32 %v9984_v28, 0.0  ;;  %v5599_v16 = vmax.f32 %v9988_v24, 0.0 }
 0x593   :  { %5825 = vst [vmem:[#allocation8 + $0x640] sm:$0xff] %v5569_v41  ;;  %5826 = vst [vmem:[#allocation8 + $0x648] sm:$0xff] %v5570_v29  ;;  %v5600_v23 = vmax.f32 %v9992_v11, 0.0  ;;  %v11966_v38 = vld [vmem:[#allocation95_spill] sm:$0xff]  ;;  %v11967_v43 = vld [vmem:[#allocation97_spill] sm:$0xff] }
 0x594   :  { %5827 = vst [vmem:[#allocation8 + $0x650] sm:$0xff] %v5571_v37  ;;  %5828 = vst [vmem:[#allocation8 + $0x658] sm:$0xff] %v5572_v39  ;;  %v5601_v4 = vmax.f32 %v11966_v38, 0.0  ;;  %v5602_v45 = vmax.f32 %v11967_v43, 0.0  ;;  %v11968_v53 = vld [vmem:[#allocation99_spill] sm:$0xff]  ;;  %v11969_v33 = vld [vmem:[#allocation101_spill] sm:$0xff] }
 0x595   :  { %5829 = vst [vmem:[#allocation8 + $0x660] sm:$0xff] %v5573_v6  ;;  %5830 = vst [vmem:[#allocation8 + $0x668] sm:$0xff] %v5574_v9  ;;  %v5603_v14 = vmax.f32 %v11968_v53, 0.0  ;;  %v5604_v20 = vmax.f32 %v11969_v33, 0.0  ;;  %v11970_v58 = vld [vmem:[#allocation103_spill] sm:$0xff]  ;;  %v11971_v28 = vld [vmem:[#allocation105_spill] sm:$0xff] }
 0x596   :  { %5831 = vst [vmem:[#allocation8 + $0x670] sm:$0xff] %v5575_v7  ;;  %5832 = vst [vmem:[#allocation8 + $0x678] sm:$0xff] %v5576_v1  ;;  %v5605_v42 = vmax.f32 %v11970_v58, 0.0  ;;  %v5606_v24 = vmax.f32 %v11971_v28, 0.0  ;;  %v11972_v11 = vld [vmem:[#allocation107_spill] sm:$0xff]  ;;  %v11973_v50 = vld [vmem:[#allocation109_spill] sm:$0xff] }
 0x597   :  { %5833 = vst [vmem:[#allocation8 + $0x680] sm:$0xff] %v5577_v18  ;;  %5834 = vst [vmem:[#allocation8 + $0x688] sm:$0xff] %v5578_v8  ;;  %v5607_v2 = vmax.f32 %v11972_v11, 0.0  ;;  %v5608_v34 = vmax.f32 %v11973_v50, 0.0  ;;  %v11974_v41 = vld [vmem:[#allocation111_spill] sm:$0xff]  ;;  %v11975_v37 = vld [vmem:[#allocation113_spill] sm:$0xff] }
 0x598   :  { %5835 = vst [vmem:[#allocation8 + $0x690] sm:$0xff] %v5579_v21  ;;  %5836 = vst [vmem:[#allocation8 + $0x698] sm:$0xff] %v5580_v19  ;;  %v5609_v29 = vmax.f32 %v11974_v41, 0.0  ;;  %v5610_v39 = vmax.f32 %v11975_v37, 0.0  ;;  %v11976_v6 = vld [vmem:[#allocation115_spill] sm:$0xff]  ;;  %v11977_v7 = vld [vmem:[#allocation117_spill] sm:$0xff] }
 0x599   :  { %5837 = vst [vmem:[#allocation8 + $0x6a0] sm:$0xff] %v5581_v36  ;;  %5838 = vst [vmem:[#allocation8 + $0x6a8] sm:$0xff] %v5582_v44  ;;  %v5611_v9 = vmax.f32 %v11976_v6, 0.0  ;;  %v5612_v1 = vmax.f32 %v11977_v7, 0.0  ;;  %v11978_v18 = vld [vmem:[#allocation119_spill] sm:$0xff]  ;;  %v11979_v8 = vld [vmem:[#allocation121_spill] sm:$0xff] }
 0x59a   :  { %5839 = vst [vmem:[#allocation8 + $0x6b0] sm:$0xff] %v5583_v26  ;;  %5840 = vst [vmem:[#allocation8 + $0x6b8] sm:$0xff] %v5584_v17  ;;  %v5613_v35 = vmax.f32 %v11978_v18, 0.0  ;;  %v5614_v48 = vmax.f32 %v11979_v8, 0.0  ;;  %v11980_v21 = vld [vmem:[#allocation123_spill] sm:$0xff]  ;;  %v11981_v19 = vld [vmem:[#allocation125_spill] sm:$0xff] }
 0x59b   :  { %5841 = vst [vmem:[#allocation8 + $0x6c0] sm:$0xff] %v5585_v49  ;;  %5842 = vst [vmem:[#allocation8 + $0x6c8] sm:$0xff] %v5586_v59  ;;  %v5615_v22 = vmax.f32 %v11980_v21, 0.0  ;;  %v5616_v13 = vmax.f32 %v11981_v19, 0.0  ;;  %v11982_v36 = vld [vmem:[#allocation127_spill] sm:$0xff]  ;;  %v11983_v44 = vld [vmem:[#allocation129_spill] sm:$0xff] }
 0x59c   :  { %5843 = vst [vmem:[#allocation8 + $0x6d0] sm:$0xff] %v5587_v32  ;;  %5844 = vst [vmem:[#allocation8 + $0x6d8] sm:$0xff] %v5588_v25  ;;  %v5617_v40 = vmax.f32 %v11982_v36, 0.0  ;;  %v5618_v61 = vmax.f32 %v11983_v44, 0.0  ;;  %v11984_v26 = vld [vmem:[#allocation131_spill] sm:$0xff]  ;;  %v11985_v17 = vld [vmem:[#allocation133_spill] sm:$0xff] }
 0x59d   :  { %5845 = vst [vmem:[#allocation8 + $0x6e0] sm:$0xff] %v5589_v31  ;;  %5846 = vst [vmem:[#allocation8 + $0x6e8] sm:$0xff] %v5590_v54  ;;  %v5619_v60 = vmax.f32 %v11984_v26, 0.0  ;;  %v5620_v56 = vmax.f32 %v11985_v17, 0.0  ;;  %v11986_v49 = vld [vmem:[#allocation135_spill] sm:$0xff]  ;;  %v11987_v59 = vld [vmem:[#allocation137_spill] sm:$0xff] }
 0x59e   :  { %5847 = vst [vmem:[#allocation8 + $0x6f0] sm:$0xff] %v5591_v63  ;;  %5848 = vst [vmem:[#allocation8 + $0x6f8] sm:$0xff] %v5592_v57  ;;  %v5621_v51 = vmax.f32 %v11986_v49, 0.0  ;;  %v5622_v55 = vmax.f32 %v11987_v59, 0.0  ;;  %v11988_v32 = vld [vmem:[#allocation139_spill] sm:$0xff] }
 0x59f   :  { %5849 = vst [vmem:[#allocation8 + $0x700] sm:$0xff] %v5593_v12  ;;  %5850 = vst [vmem:[#allocation8 + $0x708] sm:$0xff] %v5594_v3  ;;  %v5623_v46 = vmax.f32 %v11988_v32, 0.0 }
 0x5a0   :  { %5851 = vst [vmem:[#allocation8 + $0x710] sm:$0xff] %v5595_v30  ;;  %5852 = vst [vmem:[#allocation8 + $0x718] sm:$0xff] %v5596_v5 }
 0x5a1   :  { %5853 = vst [vmem:[#allocation8 + $0x720] sm:$0xff] %v5597_v10  ;;  %5854 = vst [vmem:[#allocation8 + $0x728] sm:$0xff] %v5598_v27 }
 0x5a2   :  { %5855 = vst [vmem:[#allocation8 + $0x730] sm:$0xff] %v5599_v16  ;;  %5856 = vst [vmem:[#allocation8 + $0x738] sm:$0xff] %v5600_v23 }
 0x5a3   :  { %5857 = vst [vmem:[#allocation8 + $0x740] sm:$0xff] %v5601_v4  ;;  %5858 = vst [vmem:[#allocation8 + $0x748] sm:$0xff] %v5602_v45 }
 0x5a4   :  { %5859 = vst [vmem:[#allocation8 + $0x750] sm:$0xff] %v5603_v14  ;;  %5860 = vst [vmem:[#allocation8 + $0x758] sm:$0xff] %v5604_v20 }
 0x5a5   :  { %5861 = vst [vmem:[#allocation8 + $0x760] sm:$0xff] %v5605_v42  ;;  %5862 = vst [vmem:[#allocation8 + $0x768] sm:$0xff] %v5606_v24 }
 0x5a6   :  { %5863 = vst [vmem:[#allocation8 + $0x770] sm:$0xff] %v5607_v2  ;;  %5864 = vst [vmem:[#allocation8 + $0x778] sm:$0xff] %v5608_v34 }
 0x5a7   :  { %5865 = vst [vmem:[#allocation8 + $0x780] sm:$0xff] %v5609_v29  ;;  %5866 = vst [vmem:[#allocation8 + $0x788] sm:$0xff] %v5610_v39 }
 0x5a8   :  { %5867 = vst [vmem:[#allocation8 + $0x790] sm:$0xff] %v5611_v9  ;;  %5868 = vst [vmem:[#allocation8 + $0x798] sm:$0xff] %v5612_v1 }
 0x5a9   :  { %5869 = vst [vmem:[#allocation8 + $0x7a0] sm:$0xff] %v5613_v35  ;;  %5870 = vst [vmem:[#allocation8 + $0x7a8] sm:$0xff] %v5614_v48 }
 0x5aa   :  { %5871 = vst [vmem:[#allocation8 + $0x7b0] sm:$0xff] %v5615_v22  ;;  %5872 = vst [vmem:[#allocation8 + $0x7b8] sm:$0xff] %v5616_v13 }
 0x5ab   :  { %5873 = vst [vmem:[#allocation8 + $0x7c0] sm:$0xff] %v5617_v40  ;;  %5874 = vst [vmem:[#allocation8 + $0x7c8] sm:$0xff] %v5618_v61 }
 0x5ac   :  { %5875 = vst [vmem:[#allocation8 + $0x7d0] sm:$0xff] %v5619_v60  ;;  %5876 = vst [vmem:[#allocation8 + $0x7d8] sm:$0xff] %v5620_v56 }
 0x5ad   :  { %5877 = vst [vmem:[#allocation8 + $0x7e0] sm:$0xff] %v5621_v51  ;;  %5878 = vst [vmem:[#allocation8 + $0x7e8] sm:$0xff] %v5622_v55 }
 0x5ae   :  { %5879 = vst [vmem:[#allocation8 + $0x7f0] sm:$0xff] %v5623_v46 }
 0x5af   :  { %6664 = shalt.err (!%p6661_p0)
}
 0x5b0   :  { %5892 = dma.vmem_to_hbm [thread:$0]  %s5887_s3, 32768, %s10351_s4, [#allocation5], %s6680_s18, %s6680_s18, %s6681_s19  }
 0x5b1   :  { %6677 = dma.done.wait [#allocation5], 32768  }
 0x5b2   :  { %6678 = vsyncadd [#allocation5], 4294934528 }
 0x5b3   :  { %5896 = vsyncpa [#allocation4], 1 }
 0x5b4   :  { %5897 = vsyncpa [#allocation7], 1 }
 0x5b5   :  { %5898 = vsyncpa [#allocation5], 1 }

</bundles_post_ra>
